<compile_context>
chip_gen: v7x
topology: tpu7x:2x2x1
jax: 0.10.0
libtpu: 0.0.40
codegen_flags: <defaults>
</compile_context>

<pallas_src>
import functools
import math

import jax
import jax.numpy as jnp
from jax.experimental import pallas as pl
from jax.experimental.pallas import tpu as pltpu

# ------------------------- scaled-down configuration -------------------------
IMG_SIZE = 32
IN_CHANS = 3
EMBED_DIM = 32      # vit_conv_small real value: 384
DEPTH = 2           # real: 12
NUM_HEADS = 4       # real: 12
HEAD_DIM = EMBED_DIM // NUM_HEADS
MLP_RATIO = 4
PROJECTOR_DIM = 32
FEATURE_DIM = 16
NUM_CLASSES = 10
BATCH = 2

LN_EPS = 1e-6
BN_EPS = 1e-5


# --------------------------- in-kernel math helpers ---------------------------
def _layernorm(x, g, b, eps):
    mean = jnp.mean(x, axis=-1, keepdims=True)
    var = jnp.mean(jnp.square(x - mean), axis=-1, keepdims=True)
    return (x - mean) * jax.lax.rsqrt(var + eps) * g + b


def _bn_per_view(y, g, b, rows_per_view, eps, relu):
    """Training-mode BatchNorm (biased batch variance, PyTorch default forward)
    with statistics computed separately for the first / second half of the rows
    (the two augmented views), so fusing the views is numerically identical to
    two independent PyTorch calls."""
    row_id = jax.lax.broadcasted_iota(jnp.int32, y.shape, 0)
    in_v0 = row_id < rows_per_view
    n = float(rows_per_view)
    mean0 = jnp.sum(jnp.where(in_v0, y, 0.0), axis=0, keepdims=True) / n
    mean1 = jnp.sum(jnp.where(in_v0, 0.0, y), axis=0, keepdims=True) / n
    d = y - jnp.where(in_v0, mean0, mean1)
    var0 = jnp.sum(jnp.where(in_v0, d * d, 0.0), axis=0, keepdims=True) / n
    var1 = jnp.sum(jnp.where(in_v0, 0.0, d * d), axis=0, keepdims=True) / n
    out = d * jax.lax.rsqrt(jnp.where(in_v0, var0, var1) + eps) * g + b
    if relu:
        out = jnp.maximum(out, 0.0)
    return out


def _erf(x):
    # Abramowitz & Stegun 7.1.26 polynomial, |abs err| <= 1.5e-7 (~f32 eps).
    p = 0.3275911
    a1, a2, a3, a4, a5 = (0.254829592, -0.284496736, 1.421413741,
                          -1.453152027, 1.061405429)
    ax = jnp.abs(x)
    t = 1.0 / (1.0 + p * ax)
    poly = ((((a5 * t + a4) * t + a3) * t + a2) * t + a1) * t
    y = 1.0 - poly * jnp.exp(-ax * ax)
    return jnp.where(x >= 0.0, y, -y)


def _gelu(x):
    # TODO(synk): PyTorch nn.GELU uses exact erf; lax.erf lowering inside Mosaic
    # is not relied upon, so an in-kernel erf polynomial (|err|<=1.5e-7) is used.
    return 0.5 * x * (1.0 + _erf(x * (1.0 / math.sqrt(2.0))))


# ------------------------- fused ConvStem layer kernels ------------------------
def _stem_kernel(p_ref, w_ref, g_ref, b_ref, o_ref, *, rows_per_view, eps):
    y = jnp.dot(p_ref[...], w_ref[...], preferred_element_type=jnp.float32)
    y = _bn_per_view(y, g_ref[...], b_ref[...], rows_per_view, eps, relu=True)
    o_ref[...] = y.astype(o_ref.dtype)


def _stem_final_kernel(p_ref, w_ref, g_ref, b_ref, pw_ref, pb_ref, o_ref, *,
                       rows_per_view, eps):
    y = jnp.dot(p_ref[...], w_ref[...], preferred_element_type=jnp.float32)
    y = _bn_per_view(y, g_ref[...], b_ref[...], rows_per_view, eps, relu=True)
    y = jnp.dot(y, pw_ref[...], preferred_element_type=jnp.float32) + pb_ref[...]
    o_ref[...] = y.astype(o_ref.dtype)


def pallas_stem_layer(patches, wmat, gamma, beta, rows_per_view):
    rows = patches.shape[0]
    cout = wmat.shape[1]
    return pl.pallas_call(
        functools.partial(_stem_kernel, rows_per_view=rows_per_view, eps=BN_EPS),
        out_shape=jax.ShapeDtypeStruct((rows, cout), jnp.float32),
    )(patches, wmat, gamma.reshape(1, cout), beta.reshape(1, cout))


def pallas_stem_final(patches, wmat, gamma, beta, proj_w, proj_b, rows_per_view):
    rows = patches.shape[0]
    cout = wmat.shape[1]
    d = proj_w.shape[1]
    return pl.pallas_call(
        functools.partial(_stem_final_kernel, rows_per_view=rows_per_view,
                          eps=BN_EPS),
        out_shape=jax.ShapeDtypeStruct((rows, d), jnp.float32),
    )(patches, wmat, gamma.reshape(1, cout), beta.reshape(1, cout),
      proj_w, proj_b.reshape(1, d))


def _im2col_3x3_s2(x):
    """x: NHWC (B, H, W, C). 3x3 conv, stride 2, padding 1 -> (B*Ho*Wo, 9*C)."""
    b, h, w, c = x.shape
    ho, wo = h // 2, w // 2
    xp = jnp.pad(x, ((0, 0), (1, 1), (1, 1), (0, 0)))
    cols = []
    for kh in range(3):
        for kw in range(3):
            cols.append(xp[:, kh:kh + 2 * ho:2, kw:kw + 2 * wo:2, :])  # (B,Ho,Wo,C)
    patches = jnp.stack(cols, axis=3)                                  # (B,Ho,Wo,9,C)
    return patches.reshape(b * ho * wo, 9 * c), ho, wo


# ------------------------ fused transformer block kernel -----------------------
def _block_kernel(x_ref, ln1g_ref, ln1b_ref, qkvw_ref, qkvb_ref, pw_ref, pb_ref,
                  ln2g_ref, ln2b_ref, fc1w_ref, fc1b_ref, fc2w_ref, fc2b_ref,
                  o_ref, *, num_heads, head_dim, scale, eps):
    x = x_ref[...]                                                # (T, D)
    t, d = x.shape

    # ------------- attention: LN1 -> QKV -> per-head SDPA -> out-proj ----------
    h = _layernorm(x, ln1g_ref[...], ln1b_ref[...], eps)
    qkv = (jnp.dot(h, qkvw_ref[...], preferred_element_type=jnp.float32)
           + qkvb_ref[...])                                       # (T, 3D)
    q = qkv[:, 0 * d:1 * d]
    k = qkv[:, 1 * d:2 * d]
    v = qkv[:, 2 * d:3 * d]
    pw = pw_ref[...]                                              # (D, D)
    attn = jnp.zeros((t, d), jnp.float32)
    for hh in range(num_heads):                                   # static unroll
        lo, hi = hh * head_dim, (hh + 1) * head_dim
        qh, kh, vh = q[:, lo:hi], k[:, lo:hi], v[:, lo:hi]
        s = jax.lax.dot_general(qh, kh, (((1,), (1,)), ((), ())),
                                preferred_element_type=jnp.float32) * scale
        s = s - jnp.max(s, axis=-1, keepdims=True)
        p = jnp.exp(s)
        p = p * pl.reciprocal(jnp.sum(p, axis=-1, keepdims=True), approx=True)
        oh = jnp.dot(p, vh, preferred_element_type=jnp.float32)   # (T, Dh)
        # concat-free out-proj: sum_h oh @ pw[h*Dh:(h+1)*Dh, :] == concat(oh) @ pw
        attn = attn + jnp.dot(oh, pw[lo:hi, :],
                              preferred_element_type=jnp.float32)
    x = x + attn + pb_ref[...]

    # --------------------------- MLP: LN2 -> fc1 -> GELU -> fc2 ----------------
    h = _layernorm(x, ln2g_ref[...], ln2b_ref[...], eps)
    h = jnp.dot(h, fc1w_ref[...], preferred_element_type=jnp.float32) + fc1b_ref[...]
    h = _gelu(h)
    x = x + jnp.dot(h, fc2w_ref[...], preferred_element_type=jnp.float32) + fc2b_ref[...]

    o_ref[...] = x.astype(o_ref.dtype)


def _param_spec(a):
    return pl.BlockSpec(a.shape, lambda i: (0,) * a.ndim)


def pallas_transformer_block(x, blk):
    b, t, d = x.shape
    hidden = blk["fc1_w"].shape[1]
    params = [
        blk["ln1_g"].reshape(1, d), blk["ln1_b"].reshape(1, d),
        blk["qkv_w"], blk["qkv_b"].reshape(1, 3 * d),
        blk["proj_w"], blk["proj_b"].reshape(1, d),
        blk["ln2_g"].reshape(1, d), blk["ln2_b"].reshape(1, d),
        blk["fc1_w"], blk["fc1_b"].reshape(1, hidden),
        blk["fc2_w"], blk["fc2_b"].reshape(1, d),
    ]
    tok_spec = pl.BlockSpec((None, t, d), lambda i: (i, 0, 0))
    return pl.pallas_call(
        functools.partial(_block_kernel, num_heads=NUM_HEADS, head_dim=HEAD_DIM,
                          scale=HEAD_DIM ** -0.5, eps=LN_EPS),
        grid=(b,),
        in_specs=[tok_spec] + [_param_spec(p) for p in params],
        out_specs=tok_spec,
        out_shape=jax.ShapeDtypeStruct((b, t, d), jnp.float32),
        compiler_params=pltpu.CompilerParams(dimension_semantics=("parallel",)),
    )(x, *params)


# ------------------ fused head: final LN + both projectors ---------------------
def _head_kernel(f_ref, ng_ref, nb_ref,
                 i1w, i1b, ig1, ibt1, i2w, i2b, ig2, ibt2, i3w, i3b,
                 c1w, c1b, cg1, cbt1, c2w, c2b, cg2, cbt2, c3w, c3b,
                 z_ref, c_ref, *, rows_per_view, ln_eps, bn_eps):
    f = _layernorm(f_ref[...], ng_ref[...], nb_ref[...], ln_eps)   # final ViT LN

    # instance projector: Linear -> BN+ReLU -> Linear -> BN+ReLU -> Linear
    h = jnp.dot(f, i1w[...], preferred_element_type=jnp.float32) + i1b[...]
    h = _bn_per_view(h, ig1[...], ibt1[...], rows_per_view, bn_eps, relu=True)
    h = jnp.dot(h, i2w[...], preferred_element_type=jnp.float32) + i2b[...]
    h = _bn_per_view(h, ig2[...], ibt2[...], rows_per_view, bn_eps, relu=True)
    z_ref[...] = (jnp.dot(h, i3w[...], preferred_element_type=jnp.float32)
                  + i3b[...]).astype(z_ref.dtype)

    # cluster projector: ... -> Linear -> Softmax(dim=1)
    h = jnp.dot(f, c1w[...], preferred_element_type=jnp.float32) + c1b[...]
    h = _bn_per_view(h, cg1[...], cbt1[...], rows_per_view, bn_eps, relu=True)
    h = jnp.dot(h, c2w[...], preferred_element_type=jnp.float32) + c2b[...]
    h = _bn_per_view(h, cg2[...], cbt2[...], rows_per_view, bn_eps, relu=True)
    logits = jnp.dot(h, c3w[...], preferred_element_type=jnp.float32) + c3b[...]
    logits = logits - jnp.max(logits, axis=-1, keepdims=True)
    e = jnp.exp(logits)
    c_ref[...] = (e / jnp.sum(e, axis=-1, keepdims=True)).astype(c_ref.dtype)


def pallas_head(vit_p, inst_p, clus_p, f, rows_per_view):
    twob, d = f.shape

    def proj_args(p):
        return [p["l1_w"], p["l1_b"].reshape(1, -1),
                p["bn1_g"].reshape(1, -1), p["bn1_b"].reshape(1, -1),
                p["l2_w"], p["l2_b"].reshape(1, -1),
                p["bn2_g"].reshape(1, -1), p["bn2_b"].reshape(1, -1),
                p["l3_w"], p["l3_b"].reshape(1, -1)]

    args = ([f, vit_p["norm_g"].reshape(1, d), vit_p["norm_b"].reshape(1, d)]
            + proj_args(inst_p) + proj_args(clus_p))
    feat = inst_p["l3_w"].shape[1]
    ncls = clus_p["l3_w"].shape[1]
    return pl.pallas_call(
        functools.partial(_head_kernel, rows_per_view=rows_per_view,
                          ln_eps=LN_EPS, bn_eps=BN_EPS),
        out_shape=(jax.ShapeDtypeStruct((twob, feat), jnp.float32),
                   jax.ShapeDtypeStruct((twob, ncls), jnp.float32)),
    )(*args)


# ------------------------------- ViT backbone ----------------------------------
def vit_forward_backbone(p, x_nchw):
    """x_nchw: (2B, C, H, W), both views concatenated along batch.
    Returns cls-token features BEFORE the final LayerNorm (fused into head)."""
    x = x_nchw.transpose(0, 2, 3, 1)                               # NHWC
    twob = x.shape[0]
    tok = None
    for i in range(4):
        patches, ho, wo = _im2col_3x3_s2(x)
        w = p[f"stem{i}_w"]                                        # (Cout,Cin,3,3)
        wmat = w.transpose(2, 3, 1, 0).reshape(-1, w.shape[0])     # (9*Cin, Cout)
        rows_per_view = patches.shape[0] // 2
        if i < 3:
            y = pallas_stem_layer(patches, wmat, p[f"stem{i}_g"], p[f"stem{i}_b"],
                                  rows_per_view)
            x = y.reshape(twob, ho, wo, -1)
        else:  # last conv fused with BN+ReLU and the 1x1 projection conv
            y = pallas_stem_final(patches, wmat, p[f"stem{i}_g"], p[f"stem{i}_b"],
                                  p["stem_proj_w"], p["stem_proj_b"], rows_per_view)
            tok = y.reshape(twob, ho * wo, EMBED_DIM)              # (2B, N, D)

    b2, n, d = tok.shape
    cls = jnp.broadcast_to(p["cls_token"], (b2, 1, d))
    x = jnp.concatenate([cls, tok], axis=1) + p["pos_embed"]       # (2B, T, D)
    for blk in p["blocks"]:
        x = pallas_transformer_block(x, blk)
    return x[:, 0]                                                 # (2B, D)


def vitic_forward(params, x_i, x_j):
    b = x_i.shape[0]
    x = jnp.concatenate([x_i, x_j], axis=0)                        # batch both views
    f = vit_forward_backbone(params["vit"], x)                     # (2B, D)
    z, c = pallas_head(params["vit"], params["inst"], params["clus"], f,
                       rows_per_view=b)
    return z[:b], z[b:], c[:b], c[b:]


# ------------------------------ parameter init ---------------------------------
def _init_linear(key, fan_in, fan_out):
    kw, kb = jax.random.split(key)
    bound = 1.0 / math.sqrt(fan_in)
    w = jax.random.uniform(kw, (fan_in, fan_out), jnp.float32, -bound, bound)
    b = jax.random.uniform(kb, (fan_out,), jnp.float32, -bound, bound)
    return w, b


def _init_conv(key, cout, cin, k):
    bound = 1.0 / math.sqrt(cin * k * k)
    return jax.random.uniform(key, (cout, cin, k, k), jnp.float32, -bound, bound)


def _sincos_pos_embed(h, w, dim, temperature=10000.0):
    gw = jnp.arange(w, dtype=jnp.float32)
    gh = jnp.arange(h, dtype=jnp.float32)
    gw, gh = jnp.meshgrid(gw, gh, indexing="ij")
    pos_dim = dim // 4
    omega = jnp.arange(pos_dim, dtype=jnp.float32) / pos_dim
    omega = 1.0 / (temperature ** omega)
    out_w = gw.reshape(-1)[:, None] * omega[None, :]
    out_h = gh.reshape(-1)[:, None] * omega[None, :]
    pe = jnp.concatenate([jnp.sin(out_w), jnp.cos(out_w),
                          jnp.sin(out_h), jnp.cos(out_h)], axis=1)[None]
    return jnp.concatenate([jnp.zeros((1, 1, dim), jnp.float32), pe], axis=1)


def _init_projector(keys, out_dim):
    p = {}
    p["l1_w"], p["l1_b"] = _init_linear(next(keys), EMBED_DIM, PROJECTOR_DIM)
    p["bn1_g"] = jnp.ones((PROJECTOR_DIM,), jnp.float32)
    p["bn1_b"] = jnp.zeros((PROJECTOR_DIM,), jnp.float32)
    p["l2_w"], p["l2_b"] = _init_linear(next(keys), PROJECTOR_DIM, PROJECTOR_DIM)
    p["bn2_g"] = jnp.ones((PROJECTOR_DIM,), jnp.float32)
    p["bn2_b"] = jnp.zeros((PROJECTOR_DIM,), jnp.float32)
    p["l3_w"], p["l3_b"] = _init_linear(next(keys), PROJECTOR_DIM, out_dim)
    return p


def init_params(key):
    keys = iter(jax.random.split(key, 256))
    vit = {}
    cin, cout = IN_CHANS, EMBED_DIM // 8
    for i in range(4):
        vit[f"stem{i}_w"] = _init_conv(next(keys), cout, cin, 3)
        vit[f"stem{i}_g"] = jnp.ones((cout,), jnp.float32)
        vit[f"stem{i}_b"] = jnp.zeros((cout,), jnp.float32)
        cin, cout = cout, cout * 2
    vit["stem_proj_w"], vit["stem_proj_b"] = _init_linear(next(keys), cin, EMBED_DIM)
    grid = IMG_SIZE // 16
    vit["cls_token"] = 1e-6 * jax.random.normal(next(keys), (1, 1, EMBED_DIM), jnp.float32)
    vit["pos_embed"] = _sincos_pos_embed(grid, grid, EMBED_DIM)    # fixed sin-cos
    blocks = []
    hidden = EMBED_DIM * MLP_RATIO
    for _ in range(DEPTH):
        blk = {
            "ln1_g": jnp.ones((EMBED_DIM,), jnp.float32),
            "ln1_b": jnp.zeros((EMBED_DIM,), jnp.float32),
            "ln2_g": jnp.ones((EMBED_DIM,), jnp.float32),
            "ln2_b": jnp.zeros((EMBED_DIM,), jnp.float32),
        }
        blk["qkv_w"], blk["qkv_b"] = _init_linear(next(keys), EMBED_DIM, 3 * EMBED_DIM)
        blk["proj_w"], blk["proj_b"] = _init_linear(next(keys), EMBED_DIM, EMBED_DIM)
        blk["fc1_w"], blk["fc1_b"] = _init_linear(next(keys), EMBED_DIM, hidden)
        blk["fc2_w"], blk["fc2_b"] = _init_linear(next(keys), hidden, EMBED_DIM)
        blocks.append(blk)
    vit["blocks"] = blocks
    vit["norm_g"] = jnp.ones((EMBED_DIM,), jnp.float32)
    vit["norm_b"] = jnp.zeros((EMBED_DIM,), jnp.float32)
    return {
        "vit": vit,
        "inst": _init_projector(keys, FEATURE_DIM),
        "clus": _init_projector(keys, NUM_CLASSES),
    }


# ----------------------------------- main ---------------------------------------
if __name__ == "__main__":
    key = jax.random.PRNGKey(0)
    kp, ki, kj = jax.random.split(key, 3)
    params = init_params(kp)
    x_i = jax.random.normal(ki, (BATCH, IN_CHANS, IMG_SIZE, IMG_SIZE), jnp.float32)
    x_j = jax.random.normal(kj, (BATCH, IN_CHANS, IMG_SIZE, IMG_SIZE), jnp.float32)

    fwd = jax.jit(vitic_forward)
    z_i, z_j, c_i, c_j = fwd(params, x_i, x_j)
    jax.block_until_ready((z_i, z_j, c_i, c_j))

    assert z_i.shape == (BATCH, FEATURE_DIM) and z_j.shape == (BATCH, FEATURE_DIM)
    assert c_i.shape == (BATCH, NUM_CLASSES) and c_j.shape == (BATCH, NUM_CLASSES)
    # cluster head ends in Softmax(dim=1): rows must sum to 1
    assert bool(jnp.all(jnp.abs(jnp.sum(c_i, axis=1) - 1.0) < 1e-4))
    assert bool(jnp.all(jnp.abs(jnp.sum(c_j, axis=1) - 1.0) < 1e-4))
    print("KERNEL_OK")
</pallas_src>

<mosaic_0001>
module attributes {stable_mosaic.version = 11 : i64} {
  func.func @_stem_kernel(%arg0: memref<1024x27xf32, #tpu.memory_space<vmem>>, %arg1: memref<27x4xf32, #tpu.memory_space<vmem>>, %arg2: memref<1x4xf32, #tpu.memory_space<vmem>>, %arg3: memref<1x4xf32, #tpu.memory_space<vmem>>, %arg4: memref<1024x4xf32, #tpu.memory_space<vmem>>) attributes {dimension_semantics = [], scalar_prefetch = 0 : i64, scratch_operands = 0 : i64, tpu.core_type = #tpu.core_type<tc>} {
    %c0 = arith.constant 0 : index
    %c0_0 = arith.constant 0 : index
    %0 = vector.load %arg0[%c0, %c0_0] : memref<1024x27xf32, #tpu.memory_space<vmem>>, vector<1024x27xf32>
    %c0_1 = arith.constant 0 : index
    %c0_2 = arith.constant 0 : index
    %1 = vector.load %arg1[%c0_1, %c0_2] : memref<27x4xf32, #tpu.memory_space<vmem>>, vector<27x4xf32>
    %cst = arith.constant dense<0.000000e+00> : vector<1024x4xf32>
    %2 = tpu.matmul %0, %1, %cst {dimension_numbers = #tpu.dot_dimension_numbers<[1], [0], [0], [1], [0, 0, 1, 1], [], []>} : vector<1024x27xf32>, vector<27x4xf32>, vector<1024x4xf32> -> vector<1024x4xf32>
    %c0_3 = arith.constant 0 : index
    %c0_4 = arith.constant 0 : index
    %3 = vector.load %arg2[%c0_3, %c0_4] : memref<1x4xf32, #tpu.memory_space<vmem>>, vector<1x4xf32>
    %c0_5 = arith.constant 0 : index
    %c0_6 = arith.constant 0 : index
    %4 = vector.load %arg3[%c0_5, %c0_6] : memref<1x4xf32, #tpu.memory_space<vmem>>, vector<1x4xf32>
    %5 = tpu.iota {dimensions = array<i32: 0>} : vector<1024x4xi32>
    %c512_i32 = arith.constant 512 : i32
    %6 = vector.broadcast %c512_i32 : i32 to vector<1024x4xi32>
    %7 = arith.cmpi slt, %5, %6 : vector<1024x4xi32>
    %cst_7 = arith.constant 0.000000e+00 : f32
    %8 = vector.broadcast %cst_7 : f32 to vector<1024x4xf32>
    %9 = arith.select %7, %2, %8 : vector<1024x4xi1>, vector<1024x4xf32>
    %cst_8 = arith.constant dense<0.000000e+00> : vector<4xf32>
    %10 = vector.multi_reduction <add>, %9, %cst_8 [0] : vector<1024x4xf32> to vector<4xf32>
    %11 = vector.shape_cast %10 : vector<4xf32> to vector<1x4xf32>
    %cst_9 = arith.constant 5.120000e+02 : f32
    %12 = vector.broadcast %cst_9 : f32 to vector<1x4xf32>
    %13 = arith.divf %11, %12 : vector<1x4xf32>
    %cst_10 = arith.constant 0.000000e+00 : f32
    %14 = vector.broadcast %cst_10 : f32 to vector<1024x4xf32>
    %15 = arith.select %7, %14, %2 : vector<1024x4xi1>, vector<1024x4xf32>
    %cst_11 = arith.constant dense<0.000000e+00> : vector<4xf32>
    %16 = vector.multi_reduction <add>, %15, %cst_11 [0] : vector<1024x4xf32> to vector<4xf32>
    %17 = vector.shape_cast %16 : vector<4xf32> to vector<1x4xf32>
    %cst_12 = arith.constant 5.120000e+02 : f32
    %18 = vector.broadcast %cst_12 : f32 to vector<1x4xf32>
    %19 = arith.divf %17, %18 : vector<1x4xf32>
    %20 = vector.shape_cast %13 : vector<1x4xf32> to vector<1x4xf32>
    %21 = vector.broadcast %20 : vector<1x4xf32> to vector<1024x4xf32>
    %22 = vector.shape_cast %19 : vector<1x4xf32> to vector<1x4xf32>
    %23 = vector.broadcast %22 : vector<1x4xf32> to vector<1024x4xf32>
    %24 = arith.select %7, %21, %23 : vector<1024x4xi1>, vector<1024x4xf32>
    %25 = arith.subf %2, %24 : vector<1024x4xf32>
    %26 = arith.mulf %25, %25 : vector<1024x4xf32>
    %cst_13 = arith.constant 0.000000e+00 : f32
    %27 = vector.broadcast %cst_13 : f32 to vector<1024x4xf32>
    %28 = arith.select %7, %26, %27 : vector<1024x4xi1>, vector<1024x4xf32>
    %cst_14 = arith.constant dense<0.000000e+00> : vector<4xf32>
    %29 = vector.multi_reduction <add>, %28, %cst_14 [0] : vector<1024x4xf32> to vector<4xf32>
    %30 = vector.shape_cast %29 : vector<4xf32> to vector<1x4xf32>
    %cst_15 = arith.constant 5.120000e+02 : f32
    %31 = vector.broadcast %cst_15 : f32 to vector<1x4xf32>
    %32 = arith.divf %30, %31 : vector<1x4xf32>
    %33 = arith.mulf %25, %25 : vector<1024x4xf32>
    %cst_16 = arith.constant 0.000000e+00 : f32
    %34 = vector.broadcast %cst_16 : f32 to vector<1024x4xf32>
    %35 = arith.select %7, %34, %33 : vector<1024x4xi1>, vector<1024x4xf32>
    %cst_17 = arith.constant dense<0.000000e+00> : vector<4xf32>
    %36 = vector.multi_reduction <add>, %35, %cst_17 [0] : vector<1024x4xf32> to vector<4xf32>
    %37 = vector.shape_cast %36 : vector<4xf32> to vector<1x4xf32>
    %cst_18 = arith.constant 5.120000e+02 : f32
    %38 = vector.broadcast %cst_18 : f32 to vector<1x4xf32>
    %39 = arith.divf %37, %38 : vector<1x4xf32>
    %40 = vector.shape_cast %32 : vector<1x4xf32> to vector<1x4xf32>
    %41 = vector.broadcast %40 : vector<1x4xf32> to vector<1024x4xf32>
    %42 = vector.shape_cast %39 : vector<1x4xf32> to vector<1x4xf32>
    %43 = vector.broadcast %42 : vector<1x4xf32> to vector<1024x4xf32>
    %44 = arith.select %7, %41, %43 : vector<1024x4xi1>, vector<1024x4xf32>
    %cst_19 = arith.constant 9.99999974E-6 : f32
    %45 = vector.broadcast %cst_19 : f32 to vector<1024x4xf32>
    %46 = arith.addf %44, %45 : vector<1024x4xf32>
    %47 = math.rsqrt %46 : vector<1024x4xf32>
    %48 = arith.mulf %25, %47 : vector<1024x4xf32>
    %49 = vector.broadcast %3 : vector<1x4xf32> to vector<1024x4xf32>
    %50 = arith.mulf %48, %49 : vector<1024x4xf32>
    %51 = vector.broadcast %4 : vector<1x4xf32> to vector<1024x4xf32>
    %52 = arith.addf %50, %51 : vector<1024x4xf32>
    %cst_20 = arith.constant 0.000000e+00 : f32
    %53 = vector.broadcast %cst_20 : f32 to vector<1024x4xf32>
    %54 = arith.maximumf %52, %53 : vector<1024x4xf32>
    %c0_21 = arith.constant 0 : index
    %c0_22 = arith.constant 0 : index
    %55 = vector.load %arg4[%c0_21, %c0_22] : memref<1024x4xf32, #tpu.memory_space<vmem>>, vector<1024x4xf32>
    tpu.vector_store %arg4[%c0_21, %c0_22], %54 {strides = array<i32>} : memref<1024x4xf32, #tpu.memory_space<vmem>>, vector<1024x4xf32>,
    return
  }
}

module attributes {stable_mosaic.version = 11 : i64} {
  func.func @_stem_kernel(%arg0: memref<256x36xf32, #tpu.memory_space<vmem>>, %arg1: memref<36x8xf32, #tpu.memory_space<vmem>>, %arg2: memref<1x8xf32, #tpu.memory_space<vmem>>, %arg3: memref<1x8xf32, #tpu.memory_space<vmem>>, %arg4: memref<256x8xf32, #tpu.memory_space<vmem>>) attributes {dimension_semantics = [], scalar_prefetch = 0 : i64, scratch_operands = 0 : i64, tpu.core_type = #tpu.core_type<tc>} {
    %c0 = arith.constant 0 : index
    %c0_0 = arith.constant 0 : index
    %0 = vector.load %arg0[%c0, %c0_0] : memref<256x36xf32, #tpu.memory_space<vmem>>, vector<256x36xf32>
    %c0_1 = arith.constant 0 : index
    %c0_2 = arith.constant 0 : index
    %1 = vector.load %arg1[%c0_1, %c0_2] : memref<36x8xf32, #tpu.memory_space<vmem>>, vector<36x8xf32>
    %cst = arith.constant dense<0.000000e+00> : vector<256x8xf32>
    %2 = tpu.matmul %0, %1, %cst {dimension_numbers = #tpu.dot_dimension_numbers<[1], [0], [0], [1], [0, 0, 1, 1], [], []>} : vector<256x36xf32>, vector<36x8xf32>, vector<256x8xf32> -> vector<256x8xf32>
    %c0_3 = arith.constant 0 : index
    %c0_4 = arith.constant 0 : index
    %3 = vector.load %arg2[%c0_3, %c0_4] : memref<1x8xf32, #tpu.memory_space<vmem>>, vector<1x8xf32>
    %c0_5 = arith.constant 0 : index
    %c0_6 = arith.constant 0 : index
    %4 = vector.load %arg3[%c0_5, %c0_6] : memref<1x8xf32, #tpu.memory_space<vmem>>, vector<1x8xf32>
    %5 = tpu.iota {dimensions = array<i32: 0>} : vector<256x8xi32>
    %c128_i32 = arith.constant 128 : i32
    %6 = vector.broadcast %c128_i32 : i32 to vector<256x8xi32>
    %7 = arith.cmpi slt, %5, %6 : vector<256x8xi32>
    %cst_7 = arith.constant 0.000000e+00 : f32
    %8 = vector.broadcast %cst_7 : f32 to vector<256x8xf32>
    %9 = arith.select %7, %2, %8 : vector<256x8xi1>, vector<256x8xf32>
    %cst_8 = arith.constant dense<0.000000e+00> : vector<8xf32>
    %10 = vector.multi_reduction <add>, %9, %cst_8 [0] : vector<256x8xf32> to vector<8xf32>
    %11 = vector.shape_cast %10 : vector<8xf32> to vector<1x8xf32>
    %cst_9 = arith.constant 1.280000e+02 : f32
    %12 = vector.broadcast %cst_9 : f32 to vector<1x8xf32>
    %13 = arith.divf %11, %12 : vector<1x8xf32>
    %cst_10 = arith.constant 0.000000e+00 : f32
    %14 = vector.broadcast %cst_10 : f32 to vector<256x8xf32>
    %15 = arith.select %7, %14, %2 : vector<256x8xi1>, vector<256x8xf32>
    %cst_11 = arith.constant dense<0.000000e+00> : vector<8xf32>
    %16 = vector.multi_reduction <add>, %15, %cst_11 [0] : vector<256x8xf32> to vector<8xf32>
    %17 = vector.shape_cast %16 : vector<8xf32> to vector<1x8xf32>
    %cst_12 = arith.constant 1.280000e+02 : f32
    %18 = vector.broadcast %cst_12 : f32 to vector<1x8xf32>
    %19 = arith.divf %17, %18 : vector<1x8xf32>
    %20 = vector.shape_cast %13 : vector<1x8xf32> to vector<1x8xf32>
    %21 = vector.broadcast %20 : vector<1x8xf32> to vector<256x8xf32>
    %22 = vector.shape_cast %19 : vector<1x8xf32> to vector<1x8xf32>
    %23 = vector.broadcast %22 : vector<1x8xf32> to vector<256x8xf32>
    %24 = arith.select %7, %21, %23 : vector<256x8xi1>, vector<256x8xf32>
    %25 = arith.subf %2, %24 : vector<256x8xf32>
    %26 = arith.mulf %25, %25 : vector<256x8xf32>
    %cst_13 = arith.constant 0.000000e+00 : f32
    %27 = vector.broadcast %cst_13 : f32 to vector<256x8xf32>
    %28 = arith.select %7, %26, %27 : vector<256x8xi1>, vector<256x8xf32>
    %cst_14 = arith.constant dense<0.000000e+00> : vector<8xf32>
    %29 = vector.multi_reduction <add>, %28, %cst_14 [0] : vector<256x8xf32> to vector<8xf32>
    %30 = vector.shape_cast %29 : vector<8xf32> to vector<1x8xf32>
    %cst_15 = arith.constant 1.280000e+02 : f32
    %31 = vector.broadcast %cst_15 : f32 to vector<1x8xf32>
    %32 = arith.divf %30, %31 : vector<1x8xf32>
    %33 = arith.mulf %25, %25 : vector<256x8xf32>
    %cst_16 = arith.constant 0.000000e+00 : f32
    %34 = vector.broadcast %cst_16 : f32 to vector<256x8xf32>
    %35 = arith.select %7, %34, %33 : vector<256x8xi1>, vector<256x8xf32>
    %cst_17 = arith.constant dense<0.000000e+00> : vector<8xf32>
    %36 = vector.multi_reduction <add>, %35, %cst_17 [0] : vector<256x8xf32> to vector<8xf32>
    %37 = vector.shape_cast %36 : vector<8xf32> to vector<1x8xf32>
    %cst_18 = arith.constant 1.280000e+02 : f32
    %38 = vector.broadcast %cst_18 : f32 to vector<1x8xf32>
    %39 = arith.divf %37, %38 : vector<1x8xf32>
    %40 = vector.shape_cast %32 : vector<1x8xf32> to vector<1x8xf32>
    %41 = vector.broadcast %40 : vector<1x8xf32> to vector<256x8xf32>
    %42 = vector.shape_cast %39 : vector<1x8xf32> to vector<1x8xf32>
    %43 = vector.broadcast %42 : vector<1x8xf32> to vector<256x8xf32>
    %44 = arith.select %7, %41, %43 : vector<256x8xi1>, vector<256x8xf32>
    %cst_19 = arith.constant 9.99999974E-6 : f32
    %45 = vector.broadcast %cst_19 : f32 to vector<256x8xf32>
    %46 = arith.addf %44, %45 : vector<256x8xf32>
    %47 = math.rsqrt %46 : vector<256x8xf32>
    %48 = arith.mulf %25, %47 : vector<256x8xf32>
    %49 = vector.broadcast %3 : vector<1x8xf32> to vector<256x8xf32>
    %50 = arith.mulf %48, %49 : vector<256x8xf32>
    %51 = vector.broadcast %4 : vector<1x8xf32> to vector<256x8xf32>
    %52 = arith.addf %50, %51 : vector<256x8xf32>
    %cst_20 = arith.constant 0.000000e+00 : f32
    %53 = vector.broadcast %cst_20 : f32 to vector<256x8xf32>
    %54 = arith.maximumf %52, %53 : vector<256x8xf32>
    %c0_21 = arith.constant 0 : index
    %c0_22 = arith.constant 0 : index
    %55 = vector.load %arg4[%c0_21, %c0_22] : memref<256x8xf32, #tpu.memory_space<vmem>>, vector<256x8xf32>
    tpu.vector_store %arg4[%c0_21, %c0_22], %54 {strides = array<i32>} : memref<256x8xf32, #tpu.memory_space<vmem>>, vector<256x8xf32>,
    return
  }
}

module attributes {stable_mosaic.version = 11 : i64} {
  func.func @_stem_kernel(%arg0: memref<64x72xf32, #tpu.memory_space<vmem>>, %arg1: memref<72x16xf32, #tpu.memory_space<vmem>>, %arg2: memref<1x16xf32, #tpu.memory_space<vmem>>, %arg3: memref<1x16xf32, #tpu.memory_space<vmem>>, %arg4: memref<64x16xf32, #tpu.memory_space<vmem>>) attributes {dimension_semantics = [], scalar_prefetch = 0 : i64, scratch_operands = 0 : i64, tpu.core_type = #tpu.core_type<tc>} {
    %c0 = arith.constant 0 : index
    %c0_0 = arith.constant 0 : index
    %0 = vector.load %arg0[%c0, %c0_0] : memref<64x72xf32, #tpu.memory_space<vmem>>, vector<64x72xf32>
    %c0_1 = arith.constant 0 : index
    %c0_2 = arith.constant 0 : index
    %1 = vector.load %arg1[%c0_1, %c0_2] : memref<72x16xf32, #tpu.memory_space<vmem>>, vector<72x16xf32>
    %cst = arith.constant dense<0.000000e+00> : vector<64x16xf32>
    %2 = tpu.matmul %0, %1, %cst {dimension_numbers = #tpu.dot_dimension_numbers<[1], [0], [0], [1], [0, 0, 1, 1], [], []>} : vector<64x72xf32>, vector<72x16xf32>, vector<64x16xf32> -> vector<64x16xf32>
    %c0_3 = arith.constant 0 : index
    %c0_4 = arith.constant 0 : index
    %3 = vector.load %arg2[%c0_3, %c0_4] : memref<1x16xf32, #tpu.memory_space<vmem>>, vector<1x16xf32>
    %c0_5 = arith.constant 0 : index
    %c0_6 = arith.constant 0 : index
    %4 = vector.load %arg3[%c0_5, %c0_6] : memref<1x16xf32, #tpu.memory_space<vmem>>, vector<1x16xf32>
    %5 = tpu.iota {dimensions = array<i32: 0>} : vector<64x16xi32>
    %c32_i32 = arith.constant 32 : i32
    %6 = vector.broadcast %c32_i32 : i32 to vector<64x16xi32>
    %7 = arith.cmpi slt, %5, %6 : vector<64x16xi32>
    %cst_7 = arith.constant 0.000000e+00 : f32
    %8 = vector.broadcast %cst_7 : f32 to vector<64x16xf32>
    %9 = arith.select %7, %2, %8 : vector<64x16xi1>, vector<64x16xf32>
    %cst_8 = arith.constant dense<0.000000e+00> : vector<16xf32>
    %10 = vector.multi_reduction <add>, %9, %cst_8 [0] : vector<64x16xf32> to vector<16xf32>
    %11 = vector.shape_cast %10 : vector<16xf32> to vector<1x16xf32>
    %cst_9 = arith.constant 3.200000e+01 : f32
    %12 = vector.broadcast %cst_9 : f32 to vector<1x16xf32>
    %13 = arith.divf %11, %12 : vector<1x16xf32>
    %cst_10 = arith.constant 0.000000e+00 : f32
    %14 = vector.broadcast %cst_10 : f32 to vector<64x16xf32>
    %15 = arith.select %7, %14, %2 : vector<64x16xi1>, vector<64x16xf32>
    %cst_11 = arith.constant dense<0.000000e+00> : vector<16xf32>
    %16 = vector.multi_reduction <add>, %15, %cst_11 [0] : vector<64x16xf32> to vector<16xf32>
    %17 = vector.shape_cast %16 : vector<16xf32> to vector<1x16xf32>
    %cst_12 = arith.constant 3.200000e+01 : f32
    %18 = vector.broadcast %cst_12 : f32 to vector<1x16xf32>
    %19 = arith.divf %17, %18 : vector<1x16xf32>
    %20 = vector.shape_cast %13 : vector<1x16xf32> to vector<1x16xf32>
    %21 = vector.broadcast %20 : vector<1x16xf32> to vector<64x16xf32>
    %22 = vector.shape_cast %19 : vector<1x16xf32> to vector<1x16xf32>
    %23 = vector.broadcast %22 : vector<1x16xf32> to vector<64x16xf32>
    %24 = arith.select %7, %21, %23 : vector<64x16xi1>, vector<64x16xf32>
    %25 = arith.subf %2, %24 : vector<64x16xf32>
    %26 = arith.mulf %25, %25 : vector<64x16xf32>
    %cst_13 = arith.constant 0.000000e+00 : f32
    %27 = vector.broadcast %cst_13 : f32 to vector<64x16xf32>
    %28 = arith.select %7, %26, %27 : vector<64x16xi1>, vector<64x16xf32>
    %cst_14 = arith.constant dense<0.000000e+00> : vector<16xf32>
    %29 = vector.multi_reduction <add>, %28, %cst_14 [0] : vector<64x16xf32> to vector<16xf32>
    %30 = vector.shape_cast %29 : vector<16xf32> to vector<1x16xf32>
    %cst_15 = arith.constant 3.200000e+01 : f32
    %31 = vector.broadcast %cst_15 : f32 to vector<1x16xf32>
    %32 = arith.divf %30, %31 : vector<1x16xf32>
    %33 = arith.mulf %25, %25 : vector<64x16xf32>
    %cst_16 = arith.constant 0.000000e+00 : f32
    %34 = vector.broadcast %cst_16 : f32 to vector<64x16xf32>
    %35 = arith.select %7, %34, %33 : vector<64x16xi1>, vector<64x16xf32>
    %cst_17 = arith.constant dense<0.000000e+00> : vector<16xf32>
    %36 = vector.multi_reduction <add>, %35, %cst_17 [0] : vector<64x16xf32> to vector<16xf32>
    %37 = vector.shape_cast %36 : vector<16xf32> to vector<1x16xf32>
    %cst_18 = arith.constant 3.200000e+01 : f32
    %38 = vector.broadcast %cst_18 : f32 to vector<1x16xf32>
    %39 = arith.divf %37, %38 : vector<1x16xf32>
    %40 = vector.shape_cast %32 : vector<1x16xf32> to vector<1x16xf32>
    %41 = vector.broadcast %40 : vector<1x16xf32> to vector<64x16xf32>
    %42 = vector.shape_cast %39 : vector<1x16xf32> to vector<1x16xf32>
    %43 = vector.broadcast %42 : vector<1x16xf32> to vector<64x16xf32>
    %44 = arith.select %7, %41, %43 : vector<64x16xi1>, vector<64x16xf32>
    %cst_19 = arith.constant 9.99999974E-6 : f32
    %45 = vector.broadcast %cst_19 : f32 to vector<64x16xf32>
    %46 = arith.addf %44, %45 : vector<64x16xf32>
    %47 = math.rsqrt %46 : vector<64x16xf32>
    %48 = arith.mulf %25, %47 : vector<64x16xf32>
    %49 = vector.broadcast %3 : vector<1x16xf32> to vector<64x16xf32>
    %50 = arith.mulf %48, %49 : vector<64x16xf32>
    %51 = vector.broadcast %4 : vector<1x16xf32> to vector<64x16xf32>
    %52 = arith.addf %50, %51 : vector<64x16xf32>
    %cst_20 = arith.constant 0.000000e+00 : f32
    %53 = vector.broadcast %cst_20 : f32 to vector<64x16xf32>
    %54 = arith.maximumf %52, %53 : vector<64x16xf32>
    %c0_21 = arith.constant 0 : index
    %c0_22 = arith.constant 0 : index
    %55 = vector.load %arg4[%c0_21, %c0_22] : memref<64x16xf32, #tpu.memory_space<vmem>>, vector<64x16xf32>
    tpu.vector_store %arg4[%c0_21, %c0_22], %54 {strides = array<i32>} : memref<64x16xf32, #tpu.memory_space<vmem>>, vector<64x16xf32>,
    return
  }
}

module attributes {stable_mosaic.version = 11 : i64} {
  func.func @_stem_final_kernel(%arg0: memref<16x144xf32, #tpu.memory_space<vmem>>, %arg1: memref<144x32xf32, #tpu.memory_space<vmem>>, %arg2: memref<1x32xf32, #tpu.memory_space<vmem>>, %arg3: memref<1x32xf32, #tpu.memory_space<vmem>>, %arg4: memref<32x32xf32, #tpu.memory_space<vmem>>, %arg5: memref<1x32xf32, #tpu.memory_space<vmem>>, %arg6: memref<16x32xf32, #tpu.memory_space<vmem>>) attributes {dimension_semantics = [], scalar_prefetch = 0 : i64, scratch_operands = 0 : i64, tpu.core_type = #tpu.core_type<tc>} {
    %c0 = arith.constant 0 : index
    %c0_0 = arith.constant 0 : index
    %0 = vector.load %arg0[%c0, %c0_0] : memref<16x144xf32, #tpu.memory_space<vmem>>, vector<16x144xf32>
    %c0_1 = arith.constant 0 : index
    %c0_2 = arith.constant 0 : index
    %1 = vector.load %arg1[%c0_1, %c0_2] : memref<144x32xf32, #tpu.memory_space<vmem>>, vector<144x32xf32>
    %cst = arith.constant dense<0.000000e+00> : vector<16x32xf32>
    %2 = tpu.matmul %0, %1, %cst {dimension_numbers = #tpu.dot_dimension_numbers<[1], [0], [0], [1], [0, 0, 1, 1], [], []>} : vector<16x144xf32>, vector<144x32xf32>, vector<16x32xf32> -> vector<16x32xf32>
    %c0_3 = arith.constant 0 : index
    %c0_4 = arith.constant 0 : index
    %3 = vector.load %arg2[%c0_3, %c0_4] : memref<1x32xf32, #tpu.memory_space<vmem>>, vector<1x32xf32>
    %c0_5 = arith.constant 0 : index
    %c0_6 = arith.constant 0 : index
    %4 = vector.load %arg3[%c0_5, %c0_6] : memref<1x32xf32, #tpu.memory_space<vmem>>, vector<1x32xf32>
    %5 = tpu.iota {dimensions = array<i32: 0>} : vector<16x32xi32>
    %c8_i32 = arith.constant 8 : i32
    %6 = vector.broadcast %c8_i32 : i32 to vector<16x32xi32>
    %7 = arith.cmpi slt, %5, %6 : vector<16x32xi32>
    %cst_7 = arith.constant 0.000000e+00 : f32
    %8 = vector.broadcast %cst_7 : f32 to vector<16x32xf32>
    %9 = arith.select %7, %2, %8 : vector<16x32xi1>, vector<16x32xf32>
    %cst_8 = arith.constant dense<0.000000e+00> : vector<32xf32>
    %10 = vector.multi_reduction <add>, %9, %cst_8 [0] : vector<16x32xf32> to vector<32xf32>
    %11 = vector.shape_cast %10 : vector<32xf32> to vector<1x32xf32>
    %cst_9 = arith.constant 8.000000e+00 : f32
    %12 = vector.broadcast %cst_9 : f32 to vector<1x32xf32>
    %13 = arith.divf %11, %12 : vector<1x32xf32>
    %cst_10 = arith.constant 0.000000e+00 : f32
    %14 = vector.broadcast %cst_10 : f32 to vector<16x32xf32>
    %15 = arith.select %7, %14, %2 : vector<16x32xi1>, vector<16x32xf32>
    %cst_11 = arith.constant dense<0.000000e+00> : vector<32xf32>
    %16 = vector.multi_reduction <add>, %15, %cst_11 [0] : vector<16x32xf32> to vector<32xf32>
    %17 = vector.shape_cast %16 : vector<32xf32> to vector<1x32xf32>
    %cst_12 = arith.constant 8.000000e+00 : f32
    %18 = vector.broadcast %cst_12 : f32 to vector<1x32xf32>
    %19 = arith.divf %17, %18 : vector<1x32xf32>
    %20 = vector.shape_cast %13 : vector<1x32xf32> to vector<1x32xf32>
    %21 = vector.broadcast %20 : vector<1x32xf32> to vector<16x32xf32>
    %22 = vector.shape_cast %19 : vector<1x32xf32> to vector<1x32xf32>
    %23 = vector.broadcast %22 : vector<1x32xf32> to vector<16x32xf32>
    %24 = arith.select %7, %21, %23 : vector<16x32xi1>, vector<16x32xf32>
    %25 = arith.subf %2, %24 : vector<16x32xf32>
    %26 = arith.mulf %25, %25 : vector<16x32xf32>
    %cst_13 = arith.constant 0.000000e+00 : f32
    %27 = vector.broadcast %cst_13 : f32 to vector<16x32xf32>
    %28 = arith.select %7, %26, %27 : vector<16x32xi1>, vector<16x32xf32>
    %cst_14 = arith.constant dense<0.000000e+00> : vector<32xf32>
    %29 = vector.multi_reduction <add>, %28, %cst_14 [0] : vector<16x32xf32> to vector<32xf32>
    %30 = vector.shape_cast %29 : vector<32xf32> to vector<1x32xf32>
    %cst_15 = arith.constant 8.000000e+00 : f32
    %31 = vector.broadcast %cst_15 : f32 to vector<1x32xf32>
    %32 = arith.divf %30, %31 : vector<1x32xf32>
    %33 = arith.mulf %25, %25 : vector<16x32xf32>
    %cst_16 = arith.constant 0.000000e+00 : f32
    %34 = vector.broadcast %cst_16 : f32 to vector<16x32xf32>
    %35 = arith.select %7, %34, %33 : vector<16x32xi1>, vector<16x32xf32>
    %cst_17 = arith.constant dense<0.000000e+00> : vector<32xf32>
    %36 = vector.multi_reduction <add>, %35, %cst_17 [0] : vector<16x32xf32> to vector<32xf32>
    %37 = vector.shape_cast %36 : vector<32xf32> to vector<1x32xf32>
    %cst_18 = arith.constant 8.000000e+00 : f32
    %38 = vector.broadcast %cst_18 : f32 to vector<1x32xf32>
    %39 = arith.divf %37, %38 : vector<1x32xf32>
    %40 = vector.shape_cast %32 : vector<1x32xf32> to vector<1x32xf32>
    %41 = vector.broadcast %40 : vector<1x32xf32> to vector<16x32xf32>
    %42 = vector.shape_cast %39 : vector<1x32xf32> to vector<1x32xf32>
    %43 = vector.broadcast %42 : vector<1x32xf32> to vector<16x32xf32>
    %44 = arith.select %7, %41, %43 : vector<16x32xi1>, vector<16x32xf32>
    %cst_19 = arith.constant 9.99999974E-6 : f32
    %45 = vector.broadcast %cst_19 : f32 to vector<16x32xf32>
    %46 = arith.addf %44, %45 : vector<16x32xf32>
    %47 = math.rsqrt %46 : vector<16x32xf32>
    %48 = arith.mulf %25, %47 : vector<16x32xf32>
    %49 = vector.broadcast %3 : vector<1x32xf32> to vector<16x32xf32>
    %50 = arith.mulf %48, %49 : vector<16x32xf32>
    %51 = vector.broadcast %4 : vector<1x32xf32> to vector<16x32xf32>
    %52 = arith.addf %50, %51 : vector<16x32xf32>
    %cst_20 = arith.constant 0.000000e+00 : f32
    %53 = vector.broadcast %cst_20 : f32 to vector<16x32xf32>
    %54 = arith.maximumf %52, %53 : vector<16x32xf32>
    %c0_21 = arith.constant 0 : index
    %c0_22 = arith.constant 0 : index
    %55 = vector.load %arg4[%c0_21, %c0_22] : memref<32x32xf32, #tpu.memory_space<vmem>>, vector<32x32xf32>
    %cst_23 = arith.constant dense<0.000000e+00> : vector<16x32xf32>
    %56 = tpu.matmul %54, %55, %cst_23 {dimension_numbers = #tpu.dot_dimension_numbers<[1], [0], [0], [1], [0, 0, 1, 1], [], []>} : vector<16x32xf32>, vector<32x32xf32>, vector<16x32xf32> -> vector<16x32xf32>
    %c0_24 = arith.constant 0 : index
    %c0_25 = arith.constant 0 : index
    %57 = vector.load %arg5[%c0_24, %c0_25] : memref<1x32xf32, #tpu.memory_space<vmem>>, vector<1x32xf32>
    %58 = vector.broadcast %57 : vector<1x32xf32> to vector<16x32xf32>
    %59 = arith.addf %56, %58 : vector<16x32xf32>
    %c0_26 = arith.constant 0 : index
    %c0_27 = arith.constant 0 : index
    %60 = vector.load %arg6[%c0_26, %c0_27] : memref<16x32xf32, #tpu.memory_space<vmem>>, vector<16x32xf32>
    tpu.vector_store %arg6[%c0_26, %c0_27], %59 {strides = array<i32>} : memref<16x32xf32, #tpu.memory_space<vmem>>, vector<16x32xf32>,
    return
  }
}

module attributes {stable_mosaic.version = 11 : i64} {
  func.func @_head_kernel(%arg0: memref<4x32xf32, #tpu.memory_space<vmem>>, %arg1: memref<1x32xf32, #tpu.memory_space<vmem>>, %arg2: memref<1x32xf32, #tpu.memory_space<vmem>>, %arg3: memref<32x32xf32, #tpu.memory_space<vmem>>, %arg4: memref<1x32xf32, #tpu.memory_space<vmem>>, %arg5: memref<1x32xf32, #tpu.memory_space<vmem>>, %arg6: memref<1x32xf32, #tpu.memory_space<vmem>>, %arg7: memref<32x32xf32, #tpu.memory_space<vmem>>, %arg8: memref<1x32xf32, #tpu.memory_space<vmem>>, %arg9: memref<1x32xf32, #tpu.memory_space<vmem>>, %arg10: memref<1x32xf32, #tpu.memory_space<vmem>>, %arg11: memref<32x16xf32, #tpu.memory_space<vmem>>, %arg12: memref<1x16xf32, #tpu.memory_space<vmem>>, %arg13: memref<32x32xf32, #tpu.memory_space<vmem>>, %arg14: memref<1x32xf32, #tpu.memory_space<vmem>>, %arg15: memref<1x32xf32, #tpu.memory_space<vmem>>, %arg16: memref<1x32xf32, #tpu.memory_space<vmem>>, %arg17: memref<32x32xf32, #tpu.memory_space<vmem>>, %arg18: memref<1x32xf32, #tpu.memory_space<vmem>>, %arg19: memref<1x32xf32, #tpu.memory_space<vmem>>, %arg20: memref<1x32xf32, #tpu.memory_space<vmem>>, %arg21: memref<32x10xf32, #tpu.memory_space<vmem>>, %arg22: memref<1x10xf32, #tpu.memory_space<vmem>>, %arg23: memref<4x16xf32, #tpu.memory_space<vmem>>, %arg24: memref<4x10xf32, #tpu.memory_space<vmem>>) attributes {dimension_semantics = [], scalar_prefetch = 0 : i64, scratch_operands = 0 : i64, tpu.core_type = #tpu.core_type<tc>} {
    %c0 = arith.constant 0 : index
    %c0_0 = arith.constant 0 : index
    %0 = vector.load %arg0[%c0, %c0_0] : memref<4x32xf32, #tpu.memory_space<vmem>>, vector<4x32xf32>
    %c0_1 = arith.constant 0 : index
    %c0_2 = arith.constant 0 : index
    %1 = vector.load %arg1[%c0_1, %c0_2] : memref<1x32xf32, #tpu.memory_space<vmem>>, vector<1x32xf32>
    %c0_3 = arith.constant 0 : index
    %c0_4 = arith.constant 0 : index
    %2 = vector.load %arg2[%c0_3, %c0_4] : memref<1x32xf32, #tpu.memory_space<vmem>>, vector<1x32xf32>
    %cst = arith.constant dense<0.000000e+00> : vector<4xf32>
    %3 = vector.multi_reduction <add>, %0, %cst [1] : vector<4x32xf32> to vector<4xf32>
    %4 = vector.shape_cast %3 : vector<4xf32> to vector<4x1xf32>
    %cst_5 = arith.constant 3.200000e+01 : f32
    %5 = vector.broadcast %cst_5 : f32 to vector<4x1xf32>
    %6 = arith.divf %4, %5 : vector<4x1xf32>
    %7 = vector.broadcast %6 : vector<4x1xf32> to vector<4x32xf32>
    %8 = arith.subf %0, %7 : vector<4x32xf32>
    %9 = arith.mulf %8, %8 : vector<4x32xf32>
    %cst_6 = arith.constant dense<0.000000e+00> : vector<4xf32>
    %10 = vector.multi_reduction <add>, %9, %cst_6 [1] : vector<4x32xf32> to vector<4xf32>
    %11 = vector.shape_cast %10 : vector<4xf32> to vector<4x1xf32>
    %cst_7 = arith.constant 3.200000e+01 : f32
    %12 = vector.broadcast %cst_7 : f32 to vector<4x1xf32>
    %13 = arith.divf %11, %12 : vector<4x1xf32>
    %14 = vector.broadcast %6 : vector<4x1xf32> to vector<4x32xf32>
    %15 = arith.subf %0, %14 : vector<4x32xf32>
    %cst_8 = arith.constant 9.99999997E-7 : f32
    %16 = vector.broadcast %cst_8 : f32 to vector<4x1xf32>
    %17 = arith.addf %13, %16 : vector<4x1xf32>
    %18 = math.rsqrt %17 : vector<4x1xf32>
    %19 = vector.broadcast %18 : vector<4x1xf32> to vector<4x32xf32>
    %20 = arith.mulf %15, %19 : vector<4x32xf32>
    %21 = vector.broadcast %1 : vector<1x32xf32> to vector<4x32xf32>
    %22 = arith.mulf %20, %21 : vector<4x32xf32>
    %23 = vector.broadcast %2 : vector<1x32xf32> to vector<4x32xf32>
    %24 = arith.addf %22, %23 : vector<4x32xf32>
    %c0_9 = arith.constant 0 : index
    %c0_10 = arith.constant 0 : index
    %25 = vector.load %arg3[%c0_9, %c0_10] : memref<32x32xf32, #tpu.memory_space<vmem>>, vector<32x32xf32>
    %cst_11 = arith.constant dense<0.000000e+00> : vector<4x32xf32>
    %26 = tpu.matmul %24, %25, %cst_11 {dimension_numbers = #tpu.dot_dimension_numbers<[1], [0], [0], [1], [0, 0, 1, 1], [], []>} : vector<4x32xf32>, vector<32x32xf32>, vector<4x32xf32> -> vector<4x32xf32>
    %c0_12 = arith.constant 0 : index
    %c0_13 = arith.constant 0 : index
    %27 = vector.load %arg4[%c0_12, %c0_13] : memref<1x32xf32, #tpu.memory_space<vmem>>, vector<1x32xf32>
    %28 = vector.broadcast %27 : vector<1x32xf32> to vector<4x32xf32>
    %29 = arith.addf %26, %28 : vector<4x32xf32>
    %c0_14 = arith.constant 0 : index
    %c0_15 = arith.constant 0 : index
    %30 = vector.load %arg5[%c0_14, %c0_15] : memref<1x32xf32, #tpu.memory_space<vmem>>, vector<1x32xf32>
    %c0_16 = arith.constant 0 : index
    %c0_17 = arith.constant 0 : index
    %31 = vector.load %arg6[%c0_16, %c0_17] : memref<1x32xf32, #tpu.memory_space<vmem>>, vector<1x32xf32>
    %32 = tpu.iota {dimensions = array<i32: 0>} : vector<4x32xi32>
    %c2_i32 = arith.constant 2 : i32
    %33 = vector.broadcast %c2_i32 : i32 to vector<4x32xi32>
    %34 = arith.cmpi slt, %32, %33 : vector<4x32xi32>
    %cst_18 = arith.constant 0.000000e+00 : f32
    %35 = vector.broadcast %cst_18 : f32 to vector<4x32xf32>
    %36 = arith.select %34, %29, %35 : vector<4x32xi1>, vector<4x32xf32>
    %cst_19 = arith.constant dense<0.000000e+00> : vector<32xf32>
    %37 = vector.multi_reduction <add>, %36, %cst_19 [0] : vector<4x32xf32> to vector<32xf32>
    %38 = vector.shape_cast %37 : vector<32xf32> to vector<1x32xf32>
    %cst_20 = arith.constant 2.000000e+00 : f32
    %39 = vector.broadcast %cst_20 : f32 to vector<1x32xf32>
    %40 = arith.divf %38, %39 : vector<1x32xf32>
    %cst_21 = arith.constant 0.000000e+00 : f32
    %41 = vector.broadcast %cst_21 : f32 to vector<4x32xf32>
    %42 = arith.select %34, %41, %29 : vector<4x32xi1>, vector<4x32xf32>
    %cst_22 = arith.constant dense<0.000000e+00> : vector<32xf32>
    %43 = vector.multi_reduction <add>, %42, %cst_22 [0] : vector<4x32xf32> to vector<32xf32>
    %44 = vector.shape_cast %43 : vector<32xf32> to vector<1x32xf32>
    %cst_23 = arith.constant 2.000000e+00 : f32
    %45 = vector.broadcast %cst_23 : f32 to vector<1x32xf32>
    %46 = arith.divf %44, %45 : vector<1x32xf32>
    %47 = vector.shape_cast %40 : vector<1x32xf32> to vector<1x32xf32>
    %48 = vector.broadcast %47 : vector<1x32xf32> to vector<4x32xf32>
    %49 = vector.shape_cast %46 : vector<1x32xf32> to vector<1x32xf32>
    %50 = vector.broadcast %49 : vector<1x32xf32> to vector<4x32xf32>
    %51 = arith.select %34, %48, %50 : vector<4x32xi1>, vector<4x32xf32>
    %52 = arith.subf %29, %51 : vector<4x32xf32>
    %53 = arith.mulf %52, %52 : vector<4x32xf32>
    %cst_24 = arith.constant 0.000000e+00 : f32
    %54 = vector.broadcast %cst_24 : f32 to vector<4x32xf32>
    %55 = arith.select %34, %53, %54 : vector<4x32xi1>, vector<4x32xf32>
    %cst_25 = arith.constant dense<0.000000e+00> : vector<32xf32>
    %56 = vector.multi_reduction <add>, %55, %cst_25 [0] : vector<4x32xf32> to vector<32xf32>
    %57 = vector.shape_cast %56 : vector<32xf32> to vector<1x32xf32>
    %cst_26 = arith.constant 2.000000e+00 : f32
    %58 = vector.broadcast %cst_26 : f32 to vector<1x32xf32>
    %59 = arith.divf %57, %58 : vector<1x32xf32>
    %60 = arith.mulf %52, %52 : vector<4x32xf32>
    %cst_27 = arith.constant 0.000000e+00 : f32
    %61 = vector.broadcast %cst_27 : f32 to vector<4x32xf32>
    %62 = arith.select %34, %61, %60 : vector<4x32xi1>, vector<4x32xf32>
    %cst_28 = arith.constant dense<0.000000e+00> : vector<32xf32>
    %63 = vector.multi_reduction <add>, %62, %cst_28 [0] : vector<4x32xf32> to vector<32xf32>
    %64 = vector.shape_cast %63 : vector<32xf32> to vector<1x32xf32>
    %cst_29 = arith.constant 2.000000e+00 : f32
    %65 = vector.broadcast %cst_29 : f32 to vector<1x32xf32>
    %66 = arith.divf %64, %65 : vector<1x32xf32>
    %67 = vector.shape_cast %59 : vector<1x32xf32> to vector<1x32xf32>
    %68 = vector.broadcast %67 : vector<1x32xf32> to vector<4x32xf32>
    %69 = vector.shape_cast %66 : vector<1x32xf32> to vector<1x32xf32>
    %70 = vector.broadcast %69 : vector<1x32xf32> to vector<4x32xf32>
    %71 = arith.select %34, %68, %70 : vector<4x32xi1>, vector<4x32xf32>
    %cst_30 = arith.constant 9.99999974E-6 : f32
    %72 = vector.broadcast %cst_30 : f32 to vector<4x32xf32>
    %73 = arith.addf %71, %72 : vector<4x32xf32>
    %74 = math.rsqrt %73 : vector<4x32xf32>
    %75 = arith.mulf %52, %74 : vector<4x32xf32>
    %76 = vector.broadcast %30 : vector<1x32xf32> to vector<4x32xf32>
    %77 = arith.mulf %75, %76 : vector<4x32xf32>
    %78 = vector.broadcast %31 : vector<1x32xf32> to vector<4x32xf32>
    %79 = arith.addf %77, %78 : vector<4x32xf32>
    %cst_31 = arith.constant 0.000000e+00 : f32
    %80 = vector.broadcast %cst_31 : f32 to vector<4x32xf32>
    %81 = arith.maximumf %79, %80 : vector<4x32xf32>
    %c0_32 = arith.constant 0 : index
    %c0_33 = arith.constant 0 : index
    %82 = vector.load %arg7[%c0_32, %c0_33] : memref<32x32xf32, #tpu.memory_space<vmem>>, vector<32x32xf32>
    %cst_34 = arith.constant dense<0.000000e+00> : vector<4x32xf32>
    %83 = tpu.matmul %81, %82, %cst_34 {dimension_numbers = #tpu.dot_dimension_numbers<[1], [0], [0], [1], [0, 0, 1, 1], [], []>} : vector<4x32xf32>, vector<32x32xf32>, vector<4x32xf32> -> vector<4x32xf32>
    %c0_35 = arith.constant 0 : index
    %c0_36 = arith.constant 0 : index
    %84 = vector.load %arg8[%c0_35, %c0_36] : memref<1x32xf32, #tpu.memory_space<vmem>>, vector<1x32xf32>
    %85 = vector.broadcast %84 : vector<1x32xf32> to vector<4x32xf32>
    %86 = arith.addf %83, %85 : vector<4x32xf32>
    %c0_37 = arith.constant 0 : index
    %c0_38 = arith.constant 0 : index
    %87 = vector.load %arg9[%c0_37, %c0_38] : memref<1x32xf32, #tpu.memory_space<vmem>>, vector<1x32xf32>
    %c0_39 = arith.constant 0 : index
    %c0_40 = arith.constant 0 : index
    %88 = vector.load %arg10[%c0_39, %c0_40] : memref<1x32xf32, #tpu.memory_space<vmem>>, vector<1x32xf32>
    %89 = tpu.iota {dimensions = array<i32: 0>} : vector<4x32xi32>
    %c2_i32_41 = arith.constant 2 : i32
    %90 = vector.broadcast %c2_i32_41 : i32 to vector<4x32xi32>
    %91 = arith.cmpi slt, %89, %90 : vector<4x32xi32>
    %cst_42 = arith.constant 0.000000e+00 : f32
    %92 = vector.broadcast %cst_42 : f32 to vector<4x32xf32>
    %93 = arith.select %91, %86, %92 : vector<4x32xi1>, vector<4x32xf32>
    %cst_43 = arith.constant dense<0.000000e+00> : vector<32xf32>
    %94 = vector.multi_reduction <add>, %93, %cst_43 [0] : vector<4x32xf32> to vector<32xf32>
    %95 = vector.shape_cast %94 : vector<32xf32> to vector<1x32xf32>
    %cst_44 = arith.constant 2.000000e+00 : f32
    %96 = vector.broadcast %cst_44 : f32 to vector<1x32xf32>
    %97 = arith.divf %95, %96 : vector<1x32xf32>
    %cst_45 = arith.constant 0.000000e+00 : f32
    %98 = vector.broadcast %cst_45 : f32 to vector<4x32xf32>
    %99 = arith.select %91, %98, %86 : vector<4x32xi1>, vector<4x32xf32>
    %cst_46 = arith.constant dense<0.000000e+00> : vector<32xf32>
    %100 = vector.multi_reduction <add>, %99, %cst_46 [0] : vector<4x32xf32> to vector<32xf32>
    %101 = vector.shape_cast %100 : vector<32xf32> to vector<1x32xf32>
    %cst_47 = arith.constant 2.000000e+00 : f32
    %102 = vector.broadcast %cst_47 : f32 to vector<1x32xf32>
    %103 = arith.divf %101, %102 : vector<1x32xf32>
    %104 = vector.shape_cast %97 : vector<1x32xf32> to vector<1x32xf32>
    %105 = vector.broadcast %104 : vector<1x32xf32> to vector<4x32xf32>
    %106 = vector.shape_cast %103 : vector<1x32xf32> to vector<1x32xf32>
    %107 = vector.broadcast %106 : vector<1x32xf32> to vector<4x32xf32>
    %108 = arith.select %91, %105, %107 : vector<4x32xi1>, vector<4x32xf32>
    %109 = arith.subf %86, %108 : vector<4x32xf32>
    %110 = arith.mulf %109, %109 : vector<4x32xf32>
    %cst_48 = arith.constant 0.000000e+00 : f32
    %111 = vector.broadcast %cst_48 : f32 to vector<4x32xf32>
    %112 = arith.select %91, %110, %111 : vector<4x32xi1>, vector<4x32xf32>
    %cst_49 = arith.constant dense<0.000000e+00> : vector<32xf32>
    %113 = vector.multi_reduction <add>, %112, %cst_49 [0] : vector<4x32xf32> to vector<32xf32>
    %114 = vector.shape_cast %113 : vector<32xf32> to vector<1x32xf32>
    %cst_50 = arith.constant 2.000000e+00 : f32
    %115 = vector.broadcast %cst_50 : f32 to vector<1x32xf32>
    %116 = arith.divf %114, %115 : vector<1x32xf32>
    %117 = arith.mulf %109, %109 : vector<4x32xf32>
    %cst_51 = arith.constant 0.000000e+00 : f32
    %118 = vector.broadcast %cst_51 : f32 to vector<4x32xf32>
    %119 = arith.select %91, %118, %117 : vector<4x32xi1>, vector<4x32xf32>
    %cst_52 = arith.constant dense<0.000000e+00> : vector<32xf32>
    %120 = vector.multi_reduction <add>, %119, %cst_52 [0] : vector<4x32xf32> to vector<32xf32>
    %121 = vector.shape_cast %120 : vector<32xf32> to vector<1x32xf32>
    %cst_53 = arith.constant 2.000000e+00 : f32
    %122 = vector.broadcast %cst_53 : f32 to vector<1x32xf32>
    %123 = arith.divf %121, %122 : vector<1x32xf32>
    %124 = vector.shape_cast %116 : vector<1x32xf32> to vector<1x32xf32>
    %125 = vector.broadcast %124 : vector<1x32xf32> to vector<4x32xf32>
    %126 = vector.shape_cast %123 : vector<1x32xf32> to vector<1x32xf32>
    %127 = vector.broadcast %126 : vector<1x32xf32> to vector<4x32xf32>
    %128 = arith.select %91, %125, %127 : vector<4x32xi1>, vector<4x32xf32>
    %cst_54 = arith.constant 9.99999974E-6 : f32
    %129 = vector.broadcast %cst_54 : f32 to vector<4x32xf32>
    %130 = arith.addf %128, %129 : vector<4x32xf32>
    %131 = math.rsqrt %130 : vector<4x32xf32>
    %132 = arith.mulf %109, %131 : vector<4x32xf32>
    %133 = vector.broadcast %87 : vector<1x32xf32> to vector<4x32xf32>
    %134 = arith.mulf %132, %133 : vector<4x32xf32>
    %135 = vector.broadcast %88 : vector<1x32xf32> to vector<4x32xf32>
    %136 = arith.addf %134, %135 : vector<4x32xf32>
    %cst_55 = arith.constant 0.000000e+00 : f32
    %137 = vector.broadcast %cst_55 : f32 to vector<4x32xf32>
    %138 = arith.maximumf %136, %137 : vector<4x32xf32>
    %c0_56 = arith.constant 0 : index
    %c0_57 = arith.constant 0 : index
    %139 = vector.load %arg11[%c0_56, %c0_57] : memref<32x16xf32, #tpu.memory_space<vmem>>, vector<32x16xf32>
    %cst_58 = arith.constant dense<0.000000e+00> : vector<4x16xf32>
    %140 = tpu.matmul %138, %139, %cst_58 {dimension_numbers = #tpu.dot_dimension_numbers<[1], [0], [0], [1], [0, 0, 1, 1], [], []>} : vector<4x32xf32>, vector<32x16xf32>, vector<4x16xf32> -> vector<4x16xf32>
    %c0_59 = arith.constant 0 : index
    %c0_60 = arith.constant 0 : index
    %141 = vector.load %arg12[%c0_59, %c0_60] : memref<1x16xf32, #tpu.memory_space<vmem>>, vector<1x16xf32>
    %142 = vector.broadcast %141 : vector<1x16xf32> to vector<4x16xf32>
    %143 = arith.addf %140, %142 : vector<4x16xf32>
    %c0_61 = arith.constant 0 : index
    %c0_62 = arith.constant 0 : index
    %144 = vector.load %arg23[%c0_61, %c0_62] : memref<4x16xf32, #tpu.memory_space<vmem>>, vector<4x16xf32>
    tpu.vector_store %arg23[%c0_61, %c0_62], %143 {strides = array<i32>} : memref<4x16xf32, #tpu.memory_space<vmem>>, vector<4x16xf32>,
    %c0_63 = arith.constant 0 : index
    %c0_64 = arith.constant 0 : index
    %145 = vector.load %arg13[%c0_63, %c0_64] : memref<32x32xf32, #tpu.memory_space<vmem>>, vector<32x32xf32>
    %cst_65 = arith.constant dense<0.000000e+00> : vector<4x32xf32>
    %146 = tpu.matmul %24, %145, %cst_65 {dimension_numbers = #tpu.dot_dimension_numbers<[1], [0], [0], [1], [0, 0, 1, 1], [], []>} : vector<4x32xf32>, vector<32x32xf32>, vector<4x32xf32> -> vector<4x32xf32>
    %c0_66 = arith.constant 0 : index
    %c0_67 = arith.constant 0 : index
    %147 = vector.load %arg14[%c0_66, %c0_67] : memref<1x32xf32, #tpu.memory_space<vmem>>, vector<1x32xf32>
    %148 = vector.broadcast %147 : vector<1x32xf32> to vector<4x32xf32>
    %149 = arith.addf %146, %148 : vector<4x32xf32>
    %c0_68 = arith.constant 0 : index
    %c0_69 = arith.constant 0 : index
    %150 = vector.load %arg15[%c0_68, %c0_69] : memref<1x32xf32, #tpu.memory_space<vmem>>, vector<1x32xf32>
    %c0_70 = arith.constant 0 : index
    %c0_71 = arith.constant 0 : index
    %151 = vector.load %arg16[%c0_70, %c0_71] : memref<1x32xf32, #tpu.memory_space<vmem>>, vector<1x32xf32>
    %152 = tpu.iota {dimensions = array<i32: 0>} : vector<4x32xi32>
    %c2_i32_72 = arith.constant 2 : i32
    %153 = vector.broadcast %c2_i32_72 : i32 to vector<4x32xi32>
    %154 = arith.cmpi slt, %152, %153 : vector<4x32xi32>
    %cst_73 = arith.constant 0.000000e+00 : f32
    %155 = vector.broadcast %cst_73 : f32 to vector<4x32xf32>
    %156 = arith.select %154, %149, %155 : vector<4x32xi1>, vector<4x32xf32>
    %cst_74 = arith.constant dense<0.000000e+00> : vector<32xf32>
    %157 = vector.multi_reduction <add>, %156, %cst_74 [0] : vector<4x32xf32> to vector<32xf32>
    %158 = vector.shape_cast %157 : vector<32xf32> to vector<1x32xf32>
    %cst_75 = arith.constant 2.000000e+00 : f32
    %159 = vector.broadcast %cst_75 : f32 to vector<1x32xf32>
    %160 = arith.divf %158, %159 : vector<1x32xf32>
    %cst_76 = arith.constant 0.000000e+00 : f32
    %161 = vector.broadcast %cst_76 : f32 to vector<4x32xf32>
    %162 = arith.select %154, %161, %149 : vector<4x32xi1>, vector<4x32xf32>
    %cst_77 = arith.constant dense<0.000000e+00> : vector<32xf32>
    %163 = vector.multi_reduction <add>, %162, %cst_77 [0] : vector<4x32xf32> to vector<32xf32>
    %164 = vector.shape_cast %163 : vector<32xf32> to vector<1x32xf32>
    %cst_78 = arith.constant 2.000000e+00 : f32
    %165 = vector.broadcast %cst_78 : f32 to vector<1x32xf32>
    %166 = arith.divf %164, %165 : vector<1x32xf32>
    %167 = vector.shape_cast %160 : vector<1x32xf32> to vector<1x32xf32>
    %168 = vector.broadcast %167 : vector<1x32xf32> to vector<4x32xf32>
    %169 = vector.shape_cast %166 : vector<1x32xf32> to vector<1x32xf32>
    %170 = vector.broadcast %169 : vector<1x32xf32> to vector<4x32xf32>
    %171 = arith.select %154, %168, %170 : vector<4x32xi1>, vector<4x32xf32>
    %172 = arith.subf %149, %171 : vector<4x32xf32>
    %173 = arith.mulf %172, %172 : vector<4x32xf32>
    %cst_79 = arith.constant 0.000000e+00 : f32
    %174 = vector.broadcast %cst_79 : f32 to vector<4x32xf32>
    %175 = arith.select %154, %173, %174 : vector<4x32xi1>, vector<4x32xf32>
    %cst_80 = arith.constant dense<0.000000e+00> : vector<32xf32>
    %176 = vector.multi_reduction <add>, %175, %cst_80 [0] : vector<4x32xf32> to vector<32xf32>
    %177 = vector.shape_cast %176 : vector<32xf32> to vector<1x32xf32>
    %cst_81 = arith.constant 2.000000e+00 : f32
    %178 = vector.broadcast %cst_81 : f32 to vector<1x32xf32>
    %179 = arith.divf %177, %178 : vector<1x32xf32>
    %180 = arith.mulf %172, %172 : vector<4x32xf32>
    %cst_82 = arith.constant 0.000000e+00 : f32
    %181 = vector.broadcast %cst_82 : f32 to vector<4x32xf32>
    %182 = arith.select %154, %181, %180 : vector<4x32xi1>, vector<4x32xf32>
    %cst_83 = arith.constant dense<0.000000e+00> : vector<32xf32>
    %183 = vector.multi_reduction <add>, %182, %cst_83 [0] : vector<4x32xf32> to vector<32xf32>
    %184 = vector.shape_cast %183 : vector<32xf32> to vector<1x32xf32>
    %cst_84 = arith.constant 2.000000e+00 : f32
    %185 = vector.broadcast %cst_84 : f32 to vector<1x32xf32>
    %186 = arith.divf %184, %185 : vector<1x32xf32>
    %187 = vector.shape_cast %179 : vector<1x32xf32> to vector<1x32xf32>
    %188 = vector.broadcast %187 : vector<1x32xf32> to vector<4x32xf32>
    %189 = vector.shape_cast %186 : vector<1x32xf32> to vector<1x32xf32>
    %190 = vector.broadcast %189 : vector<1x32xf32> to vector<4x32xf32>
    %191 = arith.select %154, %188, %190 : vector<4x32xi1>, vector<4x32xf32>
    %cst_85 = arith.constant 9.99999974E-6 : f32
    %192 = vector.broadcast %cst_85 : f32 to vector<4x32xf32>
    %193 = arith.addf %191, %192 : vector<4x32xf32>
    %194 = math.rsqrt %193 : vector<4x32xf32>
    %195 = arith.mulf %172, %194 : vector<4x32xf32>
    %196 = vector.broadcast %150 : vector<1x32xf32> to vector<4x32xf32>
    %197 = arith.mulf %195, %196 : vector<4x32xf32>
    %198 = vector.broadcast %151 : vector<1x32xf32> to vector<4x32xf32>
    %199 = arith.addf %197, %198 : vector<4x32xf32>
    %cst_86 = arith.constant 0.000000e+00 : f32
    %200 = vector.broadcast %cst_86 : f32 to vector<4x32xf32>
    %201 = arith.maximumf %199, %200 : vector<4x32xf32>
    %c0_87 = arith.constant 0 : index
    %c0_88 = arith.constant 0 : index
    %202 = vector.load %arg17[%c0_87, %c0_88] : memref<32x32xf32, #tpu.memory_space<vmem>>, vector<32x32xf32>
    %cst_89 = arith.constant dense<0.000000e+00> : vector<4x32xf32>
    %203 = tpu.matmul %201, %202, %cst_89 {dimension_numbers = #tpu.dot_dimension_numbers<[1], [0], [0], [1], [0, 0, 1, 1], [], []>} : vector<4x32xf32>, vector<32x32xf32>, vector<4x32xf32> -> vector<4x32xf32>
    %c0_90 = arith.constant 0 : index
    %c0_91 = arith.constant 0 : index
    %204 = vector.load %arg18[%c0_90, %c0_91] : memref<1x32xf32, #tpu.memory_space<vmem>>, vector<1x32xf32>
    %205 = vector.broadcast %204 : vector<1x32xf32> to vector<4x32xf32>
    %206 = arith.addf %203, %205 : vector<4x32xf32>
    %c0_92 = arith.constant 0 : index
    %c0_93 = arith.constant 0 : index
    %207 = vector.load %arg19[%c0_92, %c0_93] : memref<1x32xf32, #tpu.memory_space<vmem>>, vector<1x32xf32>
    %c0_94 = arith.constant 0 : index
    %c0_95 = arith.constant 0 : index
    %208 = vector.load %arg20[%c0_94, %c0_95] : memref<1x32xf32, #tpu.memory_space<vmem>>, vector<1x32xf32>
    %209 = tpu.iota {dimensions = array<i32: 0>} : vector<4x32xi32>
    %c2_i32_96 = arith.constant 2 : i32
    %210 = vector.broadcast %c2_i32_96 : i32 to vector<4x32xi32>
    %211 = arith.cmpi slt, %209, %210 : vector<4x32xi32>
    %cst_97 = arith.constant 0.000000e+00 : f32
    %212 = vector.broadcast %cst_97 : f32 to vector<4x32xf32>
    %213 = arith.select %211, %206, %212 : vector<4x32xi1>, vector<4x32xf32>
    %cst_98 = arith.constant dense<0.000000e+00> : vector<32xf32>
    %214 = vector.multi_reduction <add>, %213, %cst_98 [0] : vector<4x32xf32> to vector<32xf32>
    %215 = vector.shape_cast %214 : vector<32xf32> to vector<1x32xf32>
    %cst_99 = arith.constant 2.000000e+00 : f32
    %216 = vector.broadcast %cst_99 : f32 to vector<1x32xf32>
    %217 = arith.divf %215, %216 : vector<1x32xf32>
    %cst_100 = arith.constant 0.000000e+00 : f32
    %218 = vector.broadcast %cst_100 : f32 to vector<4x32xf32>
    %219 = arith.select %211, %218, %206 : vector<4x32xi1>, vector<4x32xf32>
    %cst_101 = arith.constant dense<0.000000e+00> : vector<32xf32>
    %220 = vector.multi_reduction <add>, %219, %cst_101 [0] : vector<4x32xf32> to vector<32xf32>
    %221 = vector.shape_cast %220 : vector<32xf32> to vector<1x32xf32>
    %cst_102 = arith.constant 2.000000e+00 : f32
    %222 = vector.broadcast %cst_102 : f32 to vector<1x32xf32>
    %223 = arith.divf %221, %222 : vector<1x32xf32>
    %224 = vector.shape_cast %217 : vector<1x32xf32> to vector<1x32xf32>
    %225 = vector.broadcast %224 : vector<1x32xf32> to vector<4x32xf32>
    %226 = vector.shape_cast %223 : vector<1x32xf32> to vector<1x32xf32>
    %227 = vector.broadcast %226 : vector<1x32xf32> to vector<4x32xf32>
    %228 = arith.select %211, %225, %227 : vector<4x32xi1>, vector<4x32xf32>
    %229 = arith.subf %206, %228 : vector<4x32xf32>
    %230 = arith.mulf %229, %229 : vector<4x32xf32>
    %cst_103 = arith.constant 0.000000e+00 : f32
    %231 = vector.broadcast %cst_103 : f32 to vector<4x32xf32>
    %232 = arith.select %211, %230, %231 : vector<4x32xi1>, vector<4x32xf32>
    %cst_104 = arith.constant dense<0.000000e+00> : vector<32xf32>
    %233 = vector.multi_reduction <add>, %232, %cst_104 [0] : vector<4x32xf32> to vector<32xf32>
    %234 = vector.shape_cast %233 : vector<32xf32> to vector<1x32xf32>
    %cst_105 = arith.constant 2.000000e+00 : f32
    %235 = vector.broadcast %cst_105 : f32 to vector<1x32xf32>
    %236 = arith.divf %234, %235 : vector<1x32xf32>
    %237 = arith.mulf %229, %229 : vector<4x32xf32>
    %cst_106 = arith.constant 0.000000e+00 : f32
    %238 = vector.broadcast %cst_106 : f32 to vector<4x32xf32>
    %239 = arith.select %211, %238, %237 : vector<4x32xi1>, vector<4x32xf32>
    %cst_107 = arith.constant dense<0.000000e+00> : vector<32xf32>
    %240 = vector.multi_reduction <add>, %239, %cst_107 [0] : vector<4x32xf32> to vector<32xf32>
    %241 = vector.shape_cast %240 : vector<32xf32> to vector<1x32xf32>
    %cst_108 = arith.constant 2.000000e+00 : f32
    %242 = vector.broadcast %cst_108 : f32 to vector<1x32xf32>
    %243 = arith.divf %241, %242 : vector<1x32xf32>
    %244 = vector.shape_cast %236 : vector<1x32xf32> to vector<1x32xf32>
    %245 = vector.broadcast %244 : vector<1x32xf32> to vector<4x32xf32>
    %246 = vector.shape_cast %243 : vector<1x32xf32> to vector<1x32xf32>
    %247 = vector.broadcast %246 : vector<1x32xf32> to vector<4x32xf32>
    %248 = arith.select %211, %245, %247 : vector<4x32xi1>, vector<4x32xf32>
    %cst_109 = arith.constant 9.99999974E-6 : f32
    %249 = vector.broadcast %cst_109 : f32 to vector<4x32xf32>
    %250 = arith.addf %248, %249 : vector<4x32xf32>
    %251 = math.rsqrt %250 : vector<4x32xf32>
    %252 = arith.mulf %229, %251 : vector<4x32xf32>
    %253 = vector.broadcast %207 : vector<1x32xf32> to vector<4x32xf32>
    %254 = arith.mulf %252, %253 : vector<4x32xf32>
    %255 = vector.broadcast %208 : vector<1x32xf32> to vector<4x32xf32>
    %256 = arith.addf %254, %255 : vector<4x32xf32>
    %cst_110 = arith.constant 0.000000e+00 : f32
    %257 = vector.broadcast %cst_110 : f32 to vector<4x32xf32>
    %258 = arith.maximumf %256, %257 : vector<4x32xf32>
    %c0_111 = arith.constant 0 : index
    %c0_112 = arith.constant 0 : index
    %259 = vector.load %arg21[%c0_111, %c0_112] : memref<32x10xf32, #tpu.memory_space<vmem>>, vector<32x10xf32>
    %cst_113 = arith.constant dense<0.000000e+00> : vector<4x10xf32>
    %260 = tpu.matmul %258, %259, %cst_113 {dimension_numbers = #tpu.dot_dimension_numbers<[1], [0], [0], [1], [0, 0, 1, 1], [], []>} : vector<4x32xf32>, vector<32x10xf32>, vector<4x10xf32> -> vector<4x10xf32>
    %c0_114 = arith.constant 0 : index
    %c0_115 = arith.constant 0 : index
    %261 = vector.load %arg22[%c0_114, %c0_115] : memref<1x10xf32, #tpu.memory_space<vmem>>, vector<1x10xf32>
    %262 = vector.broadcast %261 : vector<1x10xf32> to vector<4x10xf32>
    %263 = arith.addf %260, %262 : vector<4x10xf32>
    %cst_116 = arith.constant dense<0xFF800000> : vector<4xf32>
    %264 = vector.multi_reduction <maximumf>, %263, %cst_116 [1] : vector<4x10xf32> to vector<4xf32>
    %265 = vector.shape_cast %264 : vector<4xf32> to vector<4x1xf32>
    %266 = vector.broadcast %265 : vector<4x1xf32> to vector<4x10xf32>
    %267 = arith.subf %263, %266 : vector<4x10xf32>
    %268 = math.exp %267 : vector<4x10xf32>
    %cst_117 = arith.constant dense<0.000000e+00> : vector<4xf32>
    %269 = vector.multi_reduction <add>, %268, %cst_117 [1] : vector<4x10xf32> to vector<4xf32>
    %270 = vector.shape_cast %269 : vector<4xf32> to vector<4x1xf32>
    %271 = vector.broadcast %270 : vector<4x1xf32> to vector<4x10xf32>
    %272 = arith.divf %268, %271 : vector<4x10xf32>
    %c0_118 = arith.constant 0 : index
    %c0_119 = arith.constant 0 : index
    %273 = vector.load %arg24[%c0_118, %c0_119] : memref<4x10xf32, #tpu.memory_space<vmem>>, vector<4x10xf32>
    tpu.vector_store %arg24[%c0_118, %c0_119], %272 {strides = array<i32>} : memref<4x10xf32, #tpu.memory_space<vmem>>, vector<4x10xf32>,
    return
  }
}

module attributes {stable_mosaic.version = 11 : i64} {
  func.func @_block_kernel(%arg0: i32, %arg1: memref<1x5x32xf32, #tpu.memory_space<vmem>>, %arg2: memref<1x32xf32, #tpu.memory_space<vmem>>, %arg3: memref<1x32xf32, #tpu.memory_space<vmem>>, %arg4: memref<32x96xf32, #tpu.memory_space<vmem>>, %arg5: memref<1x96xf32, #tpu.memory_space<vmem>>, %arg6: memref<32x32xf32, #tpu.memory_space<vmem>>, %arg7: memref<1x32xf32, #tpu.memory_space<vmem>>, %arg8: memref<1x32xf32, #tpu.memory_space<vmem>>, %arg9: memref<1x32xf32, #tpu.memory_space<vmem>>, %arg10: memref<32x128xf32, #tpu.memory_space<vmem>>, %arg11: memref<1x128xf32, #tpu.memory_space<vmem>>, %arg12: memref<128x32xf32, #tpu.memory_space<vmem>>, %arg13: memref<1x32xf32, #tpu.memory_space<vmem>>, %arg14: memref<1x5x32xf32, #tpu.memory_space<vmem>>) attributes {dimension_semantics = [#tpu.dimension_semantics<parallel>], iteration_bounds = array<i64: 4>, scalar_prefetch = 0 : i64, scratch_operands = 0 : i64, tpu.core_type = #tpu.core_type<tc>, window_params = [{transform_indices = @transform_0, window_bounds = array<i64: 1, 5, 32>}, {pipeline_mode = #tpu.pipeline_mode<synchronous>, transform_indices = @transform_1, window_bounds = array<i64: 1, 32>}, {pipeline_mode = #tpu.pipeline_mode<synchronous>, transform_indices = @transform_2, window_bounds = array<i64: 1, 32>}, {pipeline_mode = #tpu.pipeline_mode<synchronous>, transform_indices = @transform_3, window_bounds = array<i64: 32, 96>}, {pipeline_mode = #tpu.pipeline_mode<synchronous>, transform_indices = @transform_4, window_bounds = array<i64: 1, 96>}, {pipeline_mode = #tpu.pipeline_mode<synchronous>, transform_indices = @transform_5, window_bounds = array<i64: 32, 32>}, {pipeline_mode = #tpu.pipeline_mode<synchronous>, transform_indices = @transform_6, window_bounds = array<i64: 1, 32>}, {pipeline_mode = #tpu.pipeline_mode<synchronous>, transform_indices = @transform_7, window_bounds = array<i64: 1, 32>}, {pipeline_mode = #tpu.pipeline_mode<synchronous>, transform_indices = @transform_8, window_bounds = array<i64: 1, 32>}, {pipeline_mode = #tpu.pipeline_mode<synchronous>, transform_indices = @transform_9, window_bounds = array<i64: 32, 128>}, {pipeline_mode = #tpu.pipeline_mode<synchronous>, transform_indices = @transform_10, window_bounds = array<i64: 1, 128>}, {pipeline_mode = #tpu.pipeline_mode<synchronous>, transform_indices = @transform_11, window_bounds = array<i64: 128, 32>}, {pipeline_mode = #tpu.pipeline_mode<synchronous>, transform_indices = @transform_12, window_bounds = array<i64: 1, 32>}, {transform_indices = @transform_13, window_bounds = array<i64: 1, 5, 32>}]} {
    %c0 = arith.constant 0 : index
    %c0_0 = arith.constant 0 : index
    %c0_1 = arith.constant 0 : index
    %0 = vector.load %arg1[%c0, %c0_0, %c0_1] : memref<1x5x32xf32, #tpu.memory_space<vmem>>, vector<1x5x32xf32>
    %1 = vector.shape_cast %0 : vector<1x5x32xf32> to vector<5x32xf32>
    %c0_2 = arith.constant 0 : index
    %c0_3 = arith.constant 0 : index
    %2 = vector.load %arg2[%c0_2, %c0_3] : memref<1x32xf32, #tpu.memory_space<vmem>>, vector<1x32xf32>
    %c0_4 = arith.constant 0 : index
    %c0_5 = arith.constant 0 : index
    %3 = vector.load %arg3[%c0_4, %c0_5] : memref<1x32xf32, #tpu.memory_space<vmem>>, vector<1x32xf32>
    %cst = arith.constant dense<0.000000e+00> : vector<5xf32>
    %4 = vector.multi_reduction <add>, %1, %cst [1] : vector<5x32xf32> to vector<5xf32>
    %5 = vector.shape_cast %4 : vector<5xf32> to vector<5x1xf32>
    %cst_6 = arith.constant 3.200000e+01 : f32
    %6 = vector.broadcast %cst_6 : f32 to vector<5x1xf32>
    %7 = arith.divf %5, %6 : vector<5x1xf32>
    %8 = vector.broadcast %7 : vector<5x1xf32> to vector<5x32xf32>
    %9 = arith.subf %1, %8 : vector<5x32xf32>
    %10 = arith.mulf %9, %9 : vector<5x32xf32>
    %cst_7 = arith.constant dense<0.000000e+00> : vector<5xf32>
    %11 = vector.multi_reduction <add>, %10, %cst_7 [1] : vector<5x32xf32> to vector<5xf32>
    %12 = vector.shape_cast %11 : vector<5xf32> to vector<5x1xf32>
    %cst_8 = arith.constant 3.200000e+01 : f32
    %13 = vector.broadcast %cst_8 : f32 to vector<5x1xf32>
    %14 = arith.divf %12, %13 : vector<5x1xf32>
    %15 = vector.broadcast %7 : vector<5x1xf32> to vector<5x32xf32>
    %16 = arith.subf %1, %15 : vector<5x32xf32>
    %cst_9 = arith.constant 9.99999997E-7 : f32
    %17 = vector.broadcast %cst_9 : f32 to vector<5x1xf32>
    %18 = arith.addf %14, %17 : vector<5x1xf32>
    %19 = math.rsqrt %18 : vector<5x1xf32>
    %20 = vector.broadcast %19 : vector<5x1xf32> to vector<5x32xf32>
    %21 = arith.mulf %16, %20 : vector<5x32xf32>
    %22 = vector.broadcast %2 : vector<1x32xf32> to vector<5x32xf32>
    %23 = arith.mulf %21, %22 : vector<5x32xf32>
    %24 = vector.broadcast %3 : vector<1x32xf32> to vector<5x32xf32>
    %25 = arith.addf %23, %24 : vector<5x32xf32>
    %c0_10 = arith.constant 0 : index
    %c0_11 = arith.constant 0 : index
    %26 = vector.load %arg4[%c0_10, %c0_11] : memref<32x96xf32, #tpu.memory_space<vmem>>, vector<32x96xf32>
    %cst_12 = arith.constant dense<0.000000e+00> : vector<5x96xf32>
    %27 = tpu.matmul %25, %26, %cst_12 {dimension_numbers = #tpu.dot_dimension_numbers<[1], [0], [0], [1], [0, 0, 1, 1], [], []>} : vector<5x32xf32>, vector<32x96xf32>, vector<5x96xf32> -> vector<5x96xf32>
    %c0_13 = arith.constant 0 : index
    %c0_14 = arith.constant 0 : index
    %28 = vector.load %arg5[%c0_13, %c0_14] : memref<1x96xf32, #tpu.memory_space<vmem>>, vector<1x96xf32>
    %29 = vector.broadcast %28 : vector<1x96xf32> to vector<5x96xf32>
    %30 = arith.addf %27, %29 : vector<5x96xf32>
    %31 = vector.extract_strided_slice %30 {offsets = [0, 0], sizes = [5, 32], strides = [1, 1]} : vector<5x96xf32> to vector<5x32xf32>
    %32 = vector.extract_strided_slice %30 {offsets = [0, 32], sizes = [5, 32], strides = [1, 1]} : vector<5x96xf32> to vector<5x32xf32>
    %33 = vector.extract_strided_slice %30 {offsets = [0, 64], sizes = [5, 32], strides = [1, 1]} : vector<5x96xf32> to vector<5x32xf32>
    %c0_15 = arith.constant 0 : index
    %c0_16 = arith.constant 0 : index
    %34 = vector.load %arg6[%c0_15, %c0_16] : memref<32x32xf32, #tpu.memory_space<vmem>>, vector<32x32xf32>
    %cst_17 = arith.constant 0.000000e+00 : f32
    %35 = vector.broadcast %cst_17 : f32 to vector<5x32xf32>
    %36 = vector.extract_strided_slice %31 {offsets = [0, 0], sizes = [5, 8], strides = [1, 1]} : vector<5x32xf32> to vector<5x8xf32>
    %37 = vector.extract_strided_slice %32 {offsets = [0, 0], sizes = [5, 8], strides = [1, 1]} : vector<5x32xf32> to vector<5x8xf32>
    %38 = vector.extract_strided_slice %33 {offsets = [0, 0], sizes = [5, 8], strides = [1, 1]} : vector<5x32xf32> to vector<5x8xf32>
    %cst_18 = arith.constant dense<0.000000e+00> : vector<5x5xf32>
    %39 = tpu.matmul %36, %37, %cst_18 {dimension_numbers = #tpu.dot_dimension_numbers<[1], [1], [0], [0], [0, 0, 1, 0], [], []>} : vector<5x8xf32>, vector<5x8xf32>, vector<5x5xf32> -> vector<5x5xf32>
    %cst_19 = arith.constant 0.353553385 : f32
    %40 = vector.broadcast %cst_19 : f32 to vector<5x5xf32>
    %41 = arith.mulf %39, %40 : vector<5x5xf32>
    %cst_20 = arith.constant dense<0xFF800000> : vector<5xf32>
    %42 = vector.multi_reduction <maximumf>, %41, %cst_20 [1] : vector<5x5xf32> to vector<5xf32>
    %43 = vector.shape_cast %42 : vector<5xf32> to vector<5x1xf32>
    %44 = vector.broadcast %43 : vector<5x1xf32> to vector<5x5xf32>
    %45 = arith.subf %41, %44 : vector<5x5xf32>
    %46 = math.exp %45 : vector<5x5xf32>
    %cst_21 = arith.constant dense<0.000000e+00> : vector<5xf32>
    %47 = vector.multi_reduction <add>, %46, %cst_21 [1] : vector<5x5xf32> to vector<5xf32>
    %48 = vector.shape_cast %47 : vector<5xf32> to vector<5x1xf32>
    %49 = tpu.reciprocal %48 {approx = true} : vector<5x1xf32> -> vector<5x1xf32>
    %50 = vector.broadcast %49 : vector<5x1xf32> to vector<5x5xf32>
    %51 = arith.mulf %46, %50 : vector<5x5xf32>
    %cst_22 = arith.constant dense<0.000000e+00> : vector<5x8xf32>
    %52 = tpu.matmul %51, %38, %cst_22 {dimension_numbers = #tpu.dot_dimension_numbers<[1], [0], [0], [1], [0, 0, 1, 1], [], []>} : vector<5x5xf32>, vector<5x8xf32>, vector<5x8xf32> -> vector<5x8xf32>
    %53 = vector.extract_strided_slice %34 {offsets = [0, 0], sizes = [8, 32], strides = [1, 1]} : vector<32x32xf32> to vector<8x32xf32>
    %cst_23 = arith.constant dense<0.000000e+00> : vector<5x32xf32>
    %54 = tpu.matmul %52, %53, %cst_23 {dimension_numbers = #tpu.dot_dimension_numbers<[1], [0], [0], [1], [0, 0, 1, 1], [], []>} : vector<5x8xf32>, vector<8x32xf32>, vector<5x32xf32> -> vector<5x32xf32>
    %55 = arith.addf %35, %54 : vector<5x32xf32>
    %56 = vector.extract_strided_slice %31 {offsets = [0, 8], sizes = [5, 8], strides = [1, 1]} : vector<5x32xf32> to vector<5x8xf32>
    %57 = vector.extract_strided_slice %32 {offsets = [0, 8], sizes = [5, 8], strides = [1, 1]} : vector<5x32xf32> to vector<5x8xf32>
    %58 = vector.extract_strided_slice %33 {offsets = [0, 8], sizes = [5, 8], strides = [1, 1]} : vector<5x32xf32> to vector<5x8xf32>
    %cst_24 = arith.constant dense<0.000000e+00> : vector<5x5xf32>
    %59 = tpu.matmul %56, %57, %cst_24 {dimension_numbers = #tpu.dot_dimension_numbers<[1], [1], [0], [0], [0, 0, 1, 0], [], []>} : vector<5x8xf32>, vector<5x8xf32>, vector<5x5xf32> -> vector<5x5xf32>
    %cst_25 = arith.constant 0.353553385 : f32
    %60 = vector.broadcast %cst_25 : f32 to vector<5x5xf32>
    %61 = arith.mulf %59, %60 : vector<5x5xf32>
    %cst_26 = arith.constant dense<0xFF800000> : vector<5xf32>
    %62 = vector.multi_reduction <maximumf>, %61, %cst_26 [1] : vector<5x5xf32> to vector<5xf32>
    %63 = vector.shape_cast %62 : vector<5xf32> to vector<5x1xf32>
    %64 = vector.broadcast %63 : vector<5x1xf32> to vector<5x5xf32>
    %65 = arith.subf %61, %64 : vector<5x5xf32>
    %66 = math.exp %65 : vector<5x5xf32>
    %cst_27 = arith.constant dense<0.000000e+00> : vector<5xf32>
    %67 = vector.multi_reduction <add>, %66, %cst_27 [1] : vector<5x5xf32> to vector<5xf32>
    %68 = vector.shape_cast %67 : vector<5xf32> to vector<5x1xf32>
    %69 = tpu.reciprocal %68 {approx = true} : vector<5x1xf32> -> vector<5x1xf32>
    %70 = vector.broadcast %69 : vector<5x1xf32> to vector<5x5xf32>
    %71 = arith.mulf %66, %70 : vector<5x5xf32>
    %cst_28 = arith.constant dense<0.000000e+00> : vector<5x8xf32>
    %72 = tpu.matmul %71, %58, %cst_28 {dimension_numbers = #tpu.dot_dimension_numbers<[1], [0], [0], [1], [0, 0, 1, 1], [], []>} : vector<5x5xf32>, vector<5x8xf32>, vector<5x8xf32> -> vector<5x8xf32>
    %73 = vector.extract_strided_slice %34 {offsets = [8, 0], sizes = [8, 32], strides = [1, 1]} : vector<32x32xf32> to vector<8x32xf32>
    %cst_29 = arith.constant dense<0.000000e+00> : vector<5x32xf32>
    %74 = tpu.matmul %72, %73, %cst_29 {dimension_numbers = #tpu.dot_dimension_numbers<[1], [0], [0], [1], [0, 0, 1, 1], [], []>} : vector<5x8xf32>, vector<8x32xf32>, vector<5x32xf32> -> vector<5x32xf32>
    %75 = arith.addf %55, %74 : vector<5x32xf32>
    %76 = vector.extract_strided_slice %31 {offsets = [0, 16], sizes = [5, 8], strides = [1, 1]} : vector<5x32xf32> to vector<5x8xf32>
    %77 = vector.extract_strided_slice %32 {offsets = [0, 16], sizes = [5, 8], strides = [1, 1]} : vector<5x32xf32> to vector<5x8xf32>
    %78 = vector.extract_strided_slice %33 {offsets = [0, 16], sizes = [5, 8], strides = [1, 1]} : vector<5x32xf32> to vector<5x8xf32>
    %cst_30 = arith.constant dense<0.000000e+00> : vector<5x5xf32>
    %79 = tpu.matmul %76, %77, %cst_30 {dimension_numbers = #tpu.dot_dimension_numbers<[1], [1], [0], [0], [0, 0, 1, 0], [], []>} : vector<5x8xf32>, vector<5x8xf32>, vector<5x5xf32> -> vector<5x5xf32>
    %cst_31 = arith.constant 0.353553385 : f32
    %80 = vector.broadcast %cst_31 : f32 to vector<5x5xf32>
    %81 = arith.mulf %79, %80 : vector<5x5xf32>
    %cst_32 = arith.constant dense<0xFF800000> : vector<5xf32>
    %82 = vector.multi_reduction <maximumf>, %81, %cst_32 [1] : vector<5x5xf32> to vector<5xf32>
    %83 = vector.shape_cast %82 : vector<5xf32> to vector<5x1xf32>
    %84 = vector.broadcast %83 : vector<5x1xf32> to vector<5x5xf32>
    %85 = arith.subf %81, %84 : vector<5x5xf32>
    %86 = math.exp %85 : vector<5x5xf32>
    %cst_33 = arith.constant dense<0.000000e+00> : vector<5xf32>
    %87 = vector.multi_reduction <add>, %86, %cst_33 [1] : vector<5x5xf32> to vector<5xf32>
    %88 = vector.shape_cast %87 : vector<5xf32> to vector<5x1xf32>
    %89 = tpu.reciprocal %88 {approx = true} : vector<5x1xf32> -> vector<5x1xf32>
    %90 = vector.broadcast %89 : vector<5x1xf32> to vector<5x5xf32>
    %91 = arith.mulf %86, %90 : vector<5x5xf32>
    %cst_34 = arith.constant dense<0.000000e+00> : vector<5x8xf32>
    %92 = tpu.matmul %91, %78, %cst_34 {dimension_numbers = #tpu.dot_dimension_numbers<[1], [0], [0], [1], [0, 0, 1, 1], [], []>} : vector<5x5xf32>, vector<5x8xf32>, vector<5x8xf32> -> vector<5x8xf32>
    %93 = vector.extract_strided_slice %34 {offsets = [16, 0], sizes = [8, 32], strides = [1, 1]} : vector<32x32xf32> to vector<8x32xf32>
    %cst_35 = arith.constant dense<0.000000e+00> : vector<5x32xf32>
    %94 = tpu.matmul %92, %93, %cst_35 {dimension_numbers = #tpu.dot_dimension_numbers<[1], [0], [0], [1], [0, 0, 1, 1], [], []>} : vector<5x8xf32>, vector<8x32xf32>, vector<5x32xf32> -> vector<5x32xf32>
    %95 = arith.addf %75, %94 : vector<5x32xf32>
    %96 = vector.extract_strided_slice %31 {offsets = [0, 24], sizes = [5, 8], strides = [1, 1]} : vector<5x32xf32> to vector<5x8xf32>
    %97 = vector.extract_strided_slice %32 {offsets = [0, 24], sizes = [5, 8], strides = [1, 1]} : vector<5x32xf32> to vector<5x8xf32>
    %98 = vector.extract_strided_slice %33 {offsets = [0, 24], sizes = [5, 8], strides = [1, 1]} : vector<5x32xf32> to vector<5x8xf32>
    %cst_36 = arith.constant dense<0.000000e+00> : vector<5x5xf32>
    %99 = tpu.matmul %96, %97, %cst_36 {dimension_numbers = #tpu.dot_dimension_numbers<[1], [1], [0], [0], [0, 0, 1, 0], [], []>} : vector<5x8xf32>, vector<5x8xf32>, vector<5x5xf32> -> vector<5x5xf32>
    %cst_37 = arith.constant 0.353553385 : f32
    %100 = vector.broadcast %cst_37 : f32 to vector<5x5xf32>
    %101 = arith.mulf %99, %100 : vector<5x5xf32>
    %cst_38 = arith.constant dense<0xFF800000> : vector<5xf32>
    %102 = vector.multi_reduction <maximumf>, %101, %cst_38 [1] : vector<5x5xf32> to vector<5xf32>
    %103 = vector.shape_cast %102 : vector<5xf32> to vector<5x1xf32>
    %104 = vector.broadcast %103 : vector<5x1xf32> to vector<5x5xf32>
    %105 = arith.subf %101, %104 : vector<5x5xf32>
    %106 = math.exp %105 : vector<5x5xf32>
    %cst_39 = arith.constant dense<0.000000e+00> : vector<5xf32>
    %107 = vector.multi_reduction <add>, %106, %cst_39 [1] : vector<5x5xf32> to vector<5xf32>
    %108 = vector.shape_cast %107 : vector<5xf32> to vector<5x1xf32>
    %109 = tpu.reciprocal %108 {approx = true} : vector<5x1xf32> -> vector<5x1xf32>
    %110 = vector.broadcast %109 : vector<5x1xf32> to vector<5x5xf32>
    %111 = arith.mulf %106, %110 : vector<5x5xf32>
    %cst_40 = arith.constant dense<0.000000e+00> : vector<5x8xf32>
    %112 = tpu.matmul %111, %98, %cst_40 {dimension_numbers = #tpu.dot_dimension_numbers<[1], [0], [0], [1], [0, 0, 1, 1], [], []>} : vector<5x5xf32>, vector<5x8xf32>, vector<5x8xf32> -> vector<5x8xf32>
    %113 = vector.extract_strided_slice %34 {offsets = [24, 0], sizes = [8, 32], strides = [1, 1]} : vector<32x32xf32> to vector<8x32xf32>
    %cst_41 = arith.constant dense<0.000000e+00> : vector<5x32xf32>
    %114 = tpu.matmul %112, %113, %cst_41 {dimension_numbers = #tpu.dot_dimension_numbers<[1], [0], [0], [1], [0, 0, 1, 1], [], []>} : vector<5x8xf32>, vector<8x32xf32>, vector<5x32xf32> -> vector<5x32xf32>
    %115 = arith.addf %95, %114 : vector<5x32xf32>
    %116 = arith.addf %1, %115 : vector<5x32xf32>
    %c0_42 = arith.constant 0 : index
    %c0_43 = arith.constant 0 : index
    %117 = vector.load %arg7[%c0_42, %c0_43] : memref<1x32xf32, #tpu.memory_space<vmem>>, vector<1x32xf32>
    %118 = vector.broadcast %117 : vector<1x32xf32> to vector<5x32xf32>
    %119 = arith.addf %116, %118 : vector<5x32xf32>
    %c0_44 = arith.constant 0 : index
    %c0_45 = arith.constant 0 : index
    %120 = vector.load %arg8[%c0_44, %c0_45] : memref<1x32xf32, #tpu.memory_space<vmem>>, vector<1x32xf32>
    %c0_46 = arith.constant 0 : index
    %c0_47 = arith.constant 0 : index
    %121 = vector.load %arg9[%c0_46, %c0_47] : memref<1x32xf32, #tpu.memory_space<vmem>>, vector<1x32xf32>
    %cst_48 = arith.constant dense<0.000000e+00> : vector<5xf32>
    %122 = vector.multi_reduction <add>, %119, %cst_48 [1] : vector<5x32xf32> to vector<5xf32>
    %123 = vector.shape_cast %122 : vector<5xf32> to vector<5x1xf32>
    %cst_49 = arith.constant 3.200000e+01 : f32
    %124 = vector.broadcast %cst_49 : f32 to vector<5x1xf32>
    %125 = arith.divf %123, %124 : vector<5x1xf32>
    %126 = vector.broadcast %125 : vector<5x1xf32> to vector<5x32xf32>
    %127 = arith.subf %119, %126 : vector<5x32xf32>
    %128 = arith.mulf %127, %127 : vector<5x32xf32>
    %cst_50 = arith.constant dense<0.000000e+00> : vector<5xf32>
    %129 = vector.multi_reduction <add>, %128, %cst_50 [1] : vector<5x32xf32> to vector<5xf32>
    %130 = vector.shape_cast %129 : vector<5xf32> to vector<5x1xf32>
    %cst_51 = arith.constant 3.200000e+01 : f32
    %131 = vector.broadcast %cst_51 : f32 to vector<5x1xf32>
    %132 = arith.divf %130, %131 : vector<5x1xf32>
    %133 = vector.broadcast %125 : vector<5x1xf32> to vector<5x32xf32>
    %134 = arith.subf %119, %133 : vector<5x32xf32>
    %cst_52 = arith.constant 9.99999997E-7 : f32
    %135 = vector.broadcast %cst_52 : f32 to vector<5x1xf32>
    %136 = arith.addf %132, %135 : vector<5x1xf32>
    %137 = math.rsqrt %136 : vector<5x1xf32>
    %138 = vector.broadcast %137 : vector<5x1xf32> to vector<5x32xf32>
    %139 = arith.mulf %134, %138 : vector<5x32xf32>
    %140 = vector.broadcast %120 : vector<1x32xf32> to vector<5x32xf32>
    %141 = arith.mulf %139, %140 : vector<5x32xf32>
    %142 = vector.broadcast %121 : vector<1x32xf32> to vector<5x32xf32>
    %143 = arith.addf %141, %142 : vector<5x32xf32>
    %c0_53 = arith.constant 0 : index
    %c0_54 = arith.constant 0 : index
    %144 = vector.load %arg10[%c0_53, %c0_54] : memref<32x128xf32, #tpu.memory_space<vmem>>, vector<32x128xf32>
    %cst_55 = arith.constant dense<0.000000e+00> : vector<5x128xf32>
    %145 = tpu.matmul %143, %144, %cst_55 {dimension_numbers = #tpu.dot_dimension_numbers<[1], [0], [0], [1], [0, 0, 1, 1], [], []>} : vector<5x32xf32>, vector<32x128xf32>, vector<5x128xf32> -> vector<5x128xf32>
    %c0_56 = arith.constant 0 : index
    %c0_57 = arith.constant 0 : index
    %146 = vector.load %arg11[%c0_56, %c0_57] : memref<1x128xf32, #tpu.memory_space<vmem>>, vector<1x128xf32>
    %147 = vector.broadcast %146 : vector<1x128xf32> to vector<5x128xf32>
    %148 = arith.addf %145, %147 : vector<5x128xf32>
    %cst_58 = arith.constant 5.000000e-01 : f32
    %149 = vector.broadcast %cst_58 : f32 to vector<5x128xf32>
    %150 = arith.mulf %149, %148 : vector<5x128xf32>
    %cst_59 = arith.constant 0.707106769 : f32
    %151 = vector.broadcast %cst_59 : f32 to vector<5x128xf32>
    %152 = arith.mulf %148, %151 : vector<5x128xf32>
    %153 = math.absf %152 : vector<5x128xf32>
    %cst_60 = arith.constant 0.327591091 : f32
    %154 = vector.broadcast %cst_60 : f32 to vector<5x128xf32>
    %155 = arith.mulf %154, %153 : vector<5x128xf32>
    %cst_61 = arith.constant 1.000000e+00 : f32
    %156 = vector.broadcast %cst_61 : f32 to vector<5x128xf32>
    %157 = arith.addf %156, %155 : vector<5x128xf32>
    %cst_62 = arith.constant 1.000000e+00 : f32
    %158 = vector.broadcast %cst_62 : f32 to vector<5x128xf32>
    %159 = arith.divf %158, %157 : vector<5x128xf32>
    %cst_63 = arith.constant 1.06140542 : f32
    %160 = vector.broadcast %cst_63 : f32 to vector<5x128xf32>
    %161 = arith.mulf %160, %159 : vector<5x128xf32>
    %cst_64 = arith.constant -1.45315206 : f32
    %162 = vector.broadcast %cst_64 : f32 to vector<5x128xf32>
    %163 = arith.addf %161, %162 : vector<5x128xf32>
    %164 = arith.mulf %163, %159 : vector<5x128xf32>
    %cst_65 = arith.constant 1.42141378 : f32
    %165 = vector.broadcast %cst_65 : f32 to vector<5x128xf32>
    %166 = arith.addf %164, %165 : vector<5x128xf32>
    %167 = arith.mulf %166, %159 : vector<5x128xf32>
    %cst_66 = arith.constant -0.284496725 : f32
    %168 = vector.broadcast %cst_66 : f32 to vector<5x128xf32>
    %169 = arith.addf %167, %168 : vector<5x128xf32>
    %170 = arith.mulf %169, %159 : vector<5x128xf32>
    %cst_67 = arith.constant 0.254829586 : f32
    %171 = vector.broadcast %cst_67 : f32 to vector<5x128xf32>
    %172 = arith.addf %170, %171 : vector<5x128xf32>
    %173 = arith.mulf %172, %159 : vector<5x128xf32>
    %cst_68 = arith.constant 0.000000e+00 : f32
    %174 = vector.broadcast %cst_68 : f32 to vector<5x128xf32>
    %175 = arith.subf %174, %153 : vector<5x128xf32>
    %176 = arith.mulf %175, %153 : vector<5x128xf32>
    %177 = math.exp %176 : vector<5x128xf32>
    %178 = arith.mulf %173, %177 : vector<5x128xf32>
    %cst_69 = arith.constant 1.000000e+00 : f32
    %179 = vector.broadcast %cst_69 : f32 to vector<5x128xf32>
    %180 = arith.subf %179, %178 : vector<5x128xf32>
    %cst_70 = arith.constant 0.000000e+00 : f32
    %181 = vector.broadcast %cst_70 : f32 to vector<5x128xf32>
    %182 = arith.cmpf oge, %152, %181 : vector<5x128xf32>
    %cst_71 = arith.constant 0.000000e+00 : f32
    %183 = vector.broadcast %cst_71 : f32 to vector<5x128xf32>
    %184 = arith.subf %183, %180 : vector<5x128xf32>
    %185 = arith.select %182, %180, %184 : vector<5x128xi1>, vector<5x128xf32>
    %cst_72 = arith.constant 1.000000e+00 : f32
    %186 = vector.broadcast %cst_72 : f32 to vector<5x128xf32>
    %187 = arith.addf %186, %185 : vector<5x128xf32>
    %188 = arith.mulf %150, %187 : vector<5x128xf32>
    %c0_73 = arith.constant 0 : index
    %c0_74 = arith.constant 0 : index
    %189 = vector.load %arg12[%c0_73, %c0_74] : memref<128x32xf32, #tpu.memory_space<vmem>>, vector<128x32xf32>
    %cst_75 = arith.constant dense<0.000000e+00> : vector<5x32xf32>
    %190 = tpu.matmul %188, %189, %cst_75 {dimension_numbers = #tpu.dot_dimension_numbers<[1], [0], [0], [1], [0, 0, 1, 1], [], []>} : vector<5x128xf32>, vector<128x32xf32>, vector<5x32xf32> -> vector<5x32xf32>
    %191 = arith.addf %119, %190 : vector<5x32xf32>
    %c0_76 = arith.constant 0 : index
    %c0_77 = arith.constant 0 : index
    %192 = vector.load %arg13[%c0_76, %c0_77] : memref<1x32xf32, #tpu.memory_space<vmem>>, vector<1x32xf32>
    %193 = vector.broadcast %192 : vector<1x32xf32> to vector<5x32xf32>
    %194 = arith.addf %191, %193 : vector<5x32xf32>
    %c0_78 = arith.constant 0 : index
    %c0_79 = arith.constant 0 : index
    %c0_80 = arith.constant 0 : index
    %195 = vector.load %arg14[%c0_78, %c0_79, %c0_80] : memref<1x5x32xf32, #tpu.memory_space<vmem>>, vector<1x5x32xf32>
    %196 = vector.shape_cast %195 : vector<1x5x32xf32> to vector<5x32xf32>
    %197 = vector.shape_cast %194 : vector<5x32xf32> to vector<1x5x32xf32>
    tpu.vector_store %arg14[%c0_78, %c0_79, %c0_80], %197 {strides = array<i32>} : memref<1x5x32xf32, #tpu.memory_space<vmem>>, vector<1x5x32xf32>,
    return
  }
  func.func @transform_0(%arg0: i32) -> (i32, i32, i32) {
    %c0_i32 = arith.constant 0 : i32
    %c0_i32_0 = arith.constant 0 : i32
    %c0_i32_1 = arith.constant 0 : i32
    return %arg0, %c0_i32, %c0_i32_0 : i32, i32, i32
  }
  func.func @transform_1(%arg0: i32) -> (i32, i32) {
    %c0_i32 = arith.constant 0 : i32
    %c0_i32_0 = arith.constant 0 : i32
    %c0_i32_1 = arith.constant 0 : i32
    return %c0_i32, %c0_i32_0 : i32, i32
  }
  func.func @transform_2(%arg0: i32) -> (i32, i32) {
    %c0_i32 = arith.constant 0 : i32
    %c0_i32_0 = arith.constant 0 : i32
    %c0_i32_1 = arith.constant 0 : i32
    return %c0_i32, %c0_i32_0 : i32, i32
  }
  func.func @transform_3(%arg0: i32) -> (i32, i32) {
    %c0_i32 = arith.constant 0 : i32
    %c0_i32_0 = arith.constant 0 : i32
    %c0_i32_1 = arith.constant 0 : i32
    return %c0_i32, %c0_i32_0 : i32, i32
  }
  func.func @transform_4(%arg0: i32) -> (i32, i32) {
    %c0_i32 = arith.constant 0 : i32
    %c0_i32_0 = arith.constant 0 : i32
    %c0_i32_1 = arith.constant 0 : i32
    return %c0_i32, %c0_i32_0 : i32, i32
  }
  func.func @transform_5(%arg0: i32) -> (i32, i32) {
    %c0_i32 = arith.constant 0 : i32
    %c0_i32_0 = arith.constant 0 : i32
    %c0_i32_1 = arith.constant 0 : i32
    return %c0_i32, %c0_i32_0 : i32, i32
  }
  func.func @transform_6(%arg0: i32) -> (i32, i32) {
    %c0_i32 = arith.constant 0 : i32
    %c0_i32_0 = arith.constant 0 : i32
    %c0_i32_1 = arith.constant 0 : i32
    return %c0_i32, %c0_i32_0 : i32, i32
  }
  func.func @transform_7(%arg0: i32) -> (i32, i32) {
    %c0_i32 = arith.constant 0 : i32
    %c0_i32_0 = arith.constant 0 : i32
    %c0_i32_1 = arith.constant 0 : i32
    return %c0_i32, %c0_i32_0 : i32, i32
  }
  func.func @transform_8(%arg0: i32) -> (i32, i32) {
    %c0_i32 = arith.constant 0 : i32
    %c0_i32_0 = arith.constant 0 : i32
    %c0_i32_1 = arith.constant 0 : i32
    return %c0_i32, %c0_i32_0 : i32, i32
  }
  func.func @transform_9(%arg0: i32) -> (i32, i32) {
    %c0_i32 = arith.constant 0 : i32
    %c0_i32_0 = arith.constant 0 : i32
    %c0_i32_1 = arith.constant 0 : i32
    return %c0_i32, %c0_i32_0 : i32, i32
  }
  func.func @transform_10(%arg0: i32) -> (i32, i32) {
    %c0_i32 = arith.constant 0 : i32
    %c0_i32_0 = arith.constant 0 : i32
    %c0_i32_1 = arith.constant 0 : i32
    return %c0_i32, %c0_i32_0 : i32, i32
  }
  func.func @transform_11(%arg0: i32) -> (i32, i32) {
    %c0_i32 = arith.constant 0 : i32
    %c0_i32_0 = arith.constant 0 : i32
    %c0_i32_1 = arith.constant 0 : i32
    return %c0_i32, %c0_i32_0 : i32, i32
  }
  func.func @transform_12(%arg0: i32) -> (i32, i32) {
    %c0_i32 = arith.constant 0 : i32
    %c0_i32_0 = arith.constant 0 : i32
    %c0_i32_1 = arith.constant 0 : i32
    return %c0_i32, %c0_i32_0 : i32, i32
  }
  func.func @transform_13(%arg0: i32) -> (i32, i32, i32) {
    %c0_i32 = arith.constant 0 : i32
    %c0_i32_0 = arith.constant 0 : i32
    %c0_i32_1 = arith.constant 0 : i32
    return %arg0, %c0_i32, %c0_i32_0 : i32, i32, i32
  }
}

</mosaic_0001>

<bundles_post_ra>
// kernel: vitic_forward.7
= control target key start
LH: loop header
LB: loop body
LE: loop exit
PB: predicated region body
PF: predicated region fallthrough
CT: control target
= control target key end

     0   :  { %vm534_vm0 = vcmask 1042432   ;;  %vm149_vm1 = vcmask 220160   ;;  %vm4970_vm2 = vmmov 1   ;;  %vm1630_vm4 = vcmask 31744   ;;  %s9147_s1 = inlined_call_operand.vmem [shape: f32[27,4], index: 1, kind: input, shape index: {}]   ;;  %s9148_s0 = inlined_call_operand.vmem [shape: f32[1024,27], index: 0, kind: input, shape index: {}]   ;;  %s9149_s2 = inlined_call_operand.vmem [shape: f32[1,4], index: 2, kind: input, shape index: {}]   ;;  %s9150_s3 = inlined_call_operand.vmem [shape: f32[1,4], index: 3, kind: input, shape index: {}]   ;;  %s9151_s4 = inlined_call_operand.vmem [shape: f32[1024,4], index: 4, kind: output, shape index: {}]  }
   0x1   :  { %v145_v0 = vld [vmem:[%s9147_s1] sm:$0xff]  ;;  %v146_v1 = vld [vmem:[%s9147_s1 + $0x8] sm:$0xff]  ;;  %v147_v2 = vld [vmem:[%s9147_s1 + $0x10] sm:$0xff] }
   0x2   :  { %v4951_v3 = vpack.c.bf16 %v146_v1, %v145_v0  ;;  %v148_v4 = vld [vmem:[%s9147_s1 + $0x18] sm:$0x7]  ;;  %v17_v5 = vld [vmem:[%s9148_s0] sm:$0xff]  ;;  %vm4956_vm3 = vmpackc.low %vm534_vm0, %vm4970_vm2 }
   0x3   :  { %v4955_v6 = vpack.c.bf16 %v148_v4, %v147_v2  ;;  %4759 = vmatprep.mubr.msk.f32.mxu0 %vm149_vm1, %v17_v5  ;;  %v81_v7 = vld [vmem:[%s9148_s0 + $0x200] sm:$0xff]  ;;  %v18_v8 = vld [vmem:[%s9148_s0 + $0x8] sm:$0xff]  ;;  %v19_v10 = vld [vmem:[%s9148_s0 + $0x10] sm:$0xff] }
   0x4   :  { %4952 = vmatprep.subr.bf16.mxu0 %v4951_v3  ;;  %4961 = vmatprep.subr.bf16.mxu1 %v4951_v3  ;;  %v82_v9 = vld [vmem:[%s9148_s0 + $0x208] sm:$0xff]  ;;  %v83_v11 = vld [vmem:[%s9148_s0 + $0x210] sm:$0xff]  ;;  %v20_v12 = vld [vmem:[%s9148_s0 + $0x18] sm:$0xff] }
   0x5   :  { %4954 = vmatpush3.bf16.msra.mxu0 %v4951_v3  ;;  %4963 = vmatpush3.bf16.msra.mxu1 %v4951_v3  ;;  %v84_v13 = vld [vmem:[%s9148_s0 + $0x218] sm:$0xff]  ;;  %v21_v14 = vld [vmem:[%s9148_s0 + $0x20] sm:$0xff]  ;;  %v22_v16 = vld [vmem:[%s9148_s0 + $0x28] sm:$0xff] }
   0x6   :  { %4957 = vmatprep.subr.msk.bf16.mxu0 %vm4956_vm3, %v4955_v6  ;;  %4962 = vmatprep.subr.msk.bf16.mxu1 %vm4956_vm3, %v4955_v6  ;;  %v85_v15 = vld [vmem:[%s9148_s0 + $0x220] sm:$0xff]  ;;  %v86_v17 = vld [vmem:[%s9148_s0 + $0x228] sm:$0xff]  ;;  %v23_v18 = vld [vmem:[%s9148_s0 + $0x30] sm:$0xff] }
   0x7   :  { %4855 = vmatprep.mubr.msk.f32.mxu1 %vm149_vm1, %v81_v7  ;;  %v87_v19 = vld [vmem:[%s9148_s0 + $0x230] sm:$0xff]  ;;  %v24_v20 = vld [vmem:[%s9148_s0 + $0x38] sm:$0xff]  ;;  %v25_v22 = vld [vmem:[%s9148_s0 + $0x40] sm:$0xff] }
   0x8   :  { %v88_v21 = vld [vmem:[%s9148_s0 + $0x238] sm:$0xff]  ;;  %v89_v23 = vld [vmem:[%s9148_s0 + $0x240] sm:$0xff]  ;;  %v26_v24 = vld [vmem:[%s9148_s0 + $0x48] sm:$0xff] }
   0x9   :  { %4960 = vmatpush3.bf16.msk.msra.mxu0 %vm4956_vm3, %v4955_v6  ;;  %4964 = vmatpush3.bf16.msk.msra.mxu1 %vm4956_vm3, %v4955_v6  ;;  %v90_v25 = vld [vmem:[%s9148_s0 + $0x248] sm:$0xff]  ;;  %v27_v26 = vld [vmem:[%s9148_s0 + $0x50] sm:$0xff]  ;;  %v28_v28 = vld [vmem:[%s9148_s0 + $0x58] sm:$0xff] }
   0xa   :  { %v91_v27 = vld [vmem:[%s9148_s0 + $0x250] sm:$0xff]  ;;  %v92_v29 = vld [vmem:[%s9148_s0 + $0x258] sm:$0xff]  ;;  %v29_v30 = vld [vmem:[%s9148_s0 + $0x60] sm:$0xff] }
   0xb   :  { %v93_v31 = vld [vmem:[%s9148_s0 + $0x260] sm:$0xff]  ;;  %v30_v32 = vld [vmem:[%s9148_s0 + $0x68] sm:$0xff]  ;;  %v31_v34 = vld [vmem:[%s9148_s0 + $0x70] sm:$0xff] }
   0xc   :  { %4760 = vmatmul.mubr.msk.f32.vlgmr.msra.gmra.mrb[0].mxu0 %vm149_vm1, %v18_v8  ;;  %4856 = vmatmul.mubr.msk.f32.vlgmr.msra.gmra.mrb[0].mxu1 %vm149_vm1, %v82_v9  ;;  %v94_v33 = vld [vmem:[%s9148_s0 + $0x268] sm:$0xff]  ;;  %v95_v35 = vld [vmem:[%s9148_s0 + $0x270] sm:$0xff]  ;;  %v32_v36 = vld [vmem:[%s9148_s0 + $0x78] sm:$0xff] }
   0xd   :  { %4762 = vmatprep.mubr.msk.f32.mxu0 %vm149_vm1, %v19_v10  ;;  %4858 = vmatprep.mubr.msk.f32.mxu1 %vm149_vm1, %v83_v11  ;;  %v96_v37 = vld [vmem:[%s9148_s0 + $0x278] sm:$0xff]  ;;  %v33_v38 = vld [vmem:[%s9148_s0 + $0x80] sm:$0xff]  ;;  %v34_v40 = vld [vmem:[%s9148_s0 + $0x88] sm:$0xff] }
   0xe   :  { %v97_v39 = vld [vmem:[%s9148_s0 + $0x280] sm:$0xff]  ;;  %v98_v41 = vld [vmem:[%s9148_s0 + $0x288] sm:$0xff]  ;;  %v35_v42 = vld [vmem:[%s9148_s0 + $0x90] sm:$0xff] }
   0xf   :  { %v99_v43 = vld [vmem:[%s9148_s0 + $0x290] sm:$0xff]  ;;  %v36_v44 = vld [vmem:[%s9148_s0 + $0x98] sm:$0xff]  ;;  %v37_v46 = vld [vmem:[%s9148_s0 + $0xa0] sm:$0xff] }
  0x10   :  { %4763 = vmatmul.mubr.msk.f32.gmra.mrb[2].mxu0 %vm149_vm1, %v20_v12  ;;  %4859 = vmatmul.mubr.msk.f32.gmra.mrb[2].mxu1 %vm149_vm1, %v84_v13  ;;  %v100_v45 = vld [vmem:[%s9148_s0 + $0x298] sm:$0xff]  ;;  %v101_v47 = vld [vmem:[%s9148_s0 + $0x2a0] sm:$0xff]  ;;  %v38_v48 = vld [vmem:[%s9148_s0 + $0xa8] sm:$0xff] }
  0x11   :  { %4765 = vmatprep.mubr.msk.f32.mxu0 %vm149_vm1, %v21_v14  ;;  %4861 = vmatprep.mubr.msk.f32.mxu1 %vm149_vm1, %v85_v15  ;;  %v102_v49 = vld [vmem:[%s9148_s0 + $0x2a8] sm:$0xff]  ;;  %v39_v50 = vld [vmem:[%s9148_s0 + $0xb0] sm:$0xff]  ;;  %v40_v52 = vld [vmem:[%s9148_s0 + $0xb8] sm:$0xff] }
  0x12   :  { %v103_v51 = vld [vmem:[%s9148_s0 + $0x2b0] sm:$0xff]  ;;  %v104_v53 = vld [vmem:[%s9148_s0 + $0x2b8] sm:$0xff]  ;;  %v41_v54 = vld [vmem:[%s9148_s0 + $0xc0] sm:$0xff] }
  0x13   :  { %v105_v55 = vld [vmem:[%s9148_s0 + $0x2c0] sm:$0xff]  ;;  %v42_v56 = vld [vmem:[%s9148_s0 + $0xc8] sm:$0xff]  ;;  %v43_v58 = vld [vmem:[%s9148_s0 + $0xd0] sm:$0xff] }
  0x14   :  { %4766 = vmatmul.mubr.msk.f32.gmra.mrb[4].mxu0 %vm149_vm1, %v22_v16  ;;  %4862 = vmatmul.mubr.msk.f32.gmra.mrb[4].mxu1 %vm149_vm1, %v86_v17  ;;  %v106_v57 = vld [vmem:[%s9148_s0 + $0x2c8] sm:$0xff]  ;;  %v107_v59 = vld [vmem:[%s9148_s0 + $0x2d0] sm:$0xff]  ;;  %v44_v60 = vld [vmem:[%s9148_s0 + $0xd8] sm:$0xff] }
  0x15   :  { %4768 = vmatprep.mubr.msk.f32.mxu0 %vm149_vm1, %v23_v18  ;;  %4864 = vmatprep.mubr.msk.f32.mxu1 %vm149_vm1, %v87_v19  ;;  %v108_v61 = vld [vmem:[%s9148_s0 + $0x2d8] sm:$0xff]  ;;  %v45_v62 = vld [vmem:[%s9148_s0 + $0xe0] sm:$0xff]  ;;  %v46_v0 = vld [vmem:[%s9148_s0 + $0xe8] sm:$0xff] }
  0x16   :  { %v109_v63 = vld [vmem:[%s9148_s0 + $0x2e0] sm:$0xff]  ;;  %v110_v1 = vld [vmem:[%s9148_s0 + $0x2e8] sm:$0xff]  ;;  %v47_v2 = vld [vmem:[%s9148_s0 + $0xf0] sm:$0xff] }
  0x17   :  { %v111_v3 = vld [vmem:[%s9148_s0 + $0x2f0] sm:$0xff]  ;;  %v48_v4 = vld [vmem:[%s9148_s0 + $0xf8] sm:$0xff]  ;;  %v49_v6 = vld [vmem:[%s9148_s0 + $0x100] sm:$0xff] }
  0x18   :  { %4769 = vmatmul.mubr.msk.f32.gmra.mrb[6].mxu0 %vm149_vm1, %v24_v20  ;;  %4865 = vmatmul.mubr.msk.f32.gmra.mrb[6].mxu1 %vm149_vm1, %v88_v21  ;;  %v112_v5 = vld [vmem:[%s9148_s0 + $0x2f8] sm:$0xff]  ;;  %v113_v7 = vld [vmem:[%s9148_s0 + $0x300] sm:$0xff]  ;;  %v50_v8 = vld [vmem:[%s9148_s0 + $0x108] sm:$0xff] }
  0x19   :  { %4771 = vmatprep.mubr.msk.f32.mxu0 %vm149_vm1, %v25_v22  ;;  %4867 = vmatprep.mubr.msk.f32.mxu1 %vm149_vm1, %v89_v23  ;;  %v114_v9 = vld [vmem:[%s9148_s0 + $0x308] sm:$0xff]  ;;  %v51_v10 = vld [vmem:[%s9148_s0 + $0x110] sm:$0xff]  ;;  %v52_v12 = vld [vmem:[%s9148_s0 + $0x118] sm:$0xff] }
  0x1a   :  { %v115_v11 = vld [vmem:[%s9148_s0 + $0x310] sm:$0xff]  ;;  %v116_v13 = vld [vmem:[%s9148_s0 + $0x318] sm:$0xff]  ;;  %v53_v14 = vld [vmem:[%s9148_s0 + $0x120] sm:$0xff] }
  0x1b   :  { %v117_v15 = vld [vmem:[%s9148_s0 + $0x320] sm:$0xff]  ;;  %v54_v16 = vld [vmem:[%s9148_s0 + $0x128] sm:$0xff]  ;;  %v55_v18 = vld [vmem:[%s9148_s0 + $0x130] sm:$0xff] }
  0x1c   :  { %4772 = vmatmul.mubr.msk.f32.gmra.mrb[8].mxu0 %vm149_vm1, %v26_v24  ;;  %4868 = vmatmul.mubr.msk.f32.gmra.mrb[8].mxu1 %vm149_vm1, %v90_v25  ;;  %v118_v17 = vld [vmem:[%s9148_s0 + $0x328] sm:$0xff]  ;;  %v119_v19 = vld [vmem:[%s9148_s0 + $0x330] sm:$0xff]  ;;  %v56_v20 = vld [vmem:[%s9148_s0 + $0x138] sm:$0xff] }
  0x1d   :  { %4774 = vmatprep.mubr.msk.f32.mxu0 %vm149_vm1, %v27_v26  ;;  %4870 = vmatprep.mubr.msk.f32.mxu1 %vm149_vm1, %v91_v27  ;;  %v120_v21 = vld [vmem:[%s9148_s0 + $0x338] sm:$0xff]  ;;  %v57_v22 = vld [vmem:[%s9148_s0 + $0x140] sm:$0xff]  ;;  %v58_v24 = vld [vmem:[%s9148_s0 + $0x148] sm:$0xff] }
  0x1e   :  { %v121_v23 = vld [vmem:[%s9148_s0 + $0x340] sm:$0xff]  ;;  %v122_v25 = vld [vmem:[%s9148_s0 + $0x348] sm:$0xff]  ;;  %v59_v26 = vld [vmem:[%s9148_s0 + $0x150] sm:$0xff] }
  0x1f   :  { %v123_v27 = vld [vmem:[%s9148_s0 + $0x350] sm:$0xff] }
  0x20   :  { %4775 = vmatmul.mubr.msk.f32.gmra.mrb[10].mxu0 %vm149_vm1, %v28_v28  ;;  %4871 = vmatmul.mubr.msk.f32.gmra.mrb[10].mxu1 %vm149_vm1, %v92_v29  ;;  %v60_v28 = vld [vmem:[%s9148_s0 + $0x158] sm:$0xff] }
  0x21   :  { %4777 = vmatprep.mubr.msk.f32.mxu0 %vm149_vm1, %v29_v30  ;;  %4873 = vmatprep.mubr.msk.f32.mxu1 %vm149_vm1, %v93_v31  ;;  %v124_v29 = vld [vmem:[%s9148_s0 + $0x358] sm:$0xff]  ;;  %v61_v30 = vld [vmem:[%s9148_s0 + $0x160] sm:$0xff] }
  0x22   :  { %v125_v31 = vld [vmem:[%s9148_s0 + $0x360] sm:$0xff] }
  0x24   :  { %4778 = vmatmul.mubr.msk.f32.gmra.mrb[12].mxu0 %vm149_vm1, %v30_v32  ;;  %4874 = vmatmul.mubr.msk.f32.gmra.mrb[12].mxu1 %vm149_vm1, %v94_v33  ;;  %v62_v32 = vld [vmem:[%s9148_s0 + $0x168] sm:$0xff] }
  0x25   :  { %4780 = vmatprep.mubr.msk.f32.mxu0 %vm149_vm1, %v31_v34  ;;  %4876 = vmatprep.mubr.msk.f32.mxu1 %vm149_vm1, %v95_v35  ;;  %v126_v33 = vld [vmem:[%s9148_s0 + $0x368] sm:$0xff]  ;;  %v63_v34 = vld [vmem:[%s9148_s0 + $0x170] sm:$0xff] }
  0x26   :  { %v127_v35 = vld [vmem:[%s9148_s0 + $0x370] sm:$0xff] }
  0x28   :  { %4781 = vmatmul.mubr.msk.f32.gmra.mrb[14].mxu0 %vm149_vm1, %v32_v36  ;;  %4877 = vmatmul.mubr.msk.f32.gmra.mrb[14].mxu1 %vm149_vm1, %v96_v37  ;;  %v64_v36 = vld [vmem:[%s9148_s0 + $0x178] sm:$0xff] }
  0x29   :  { %4783 = vmatprep.mubr.msk.f32.mxu0 %vm149_vm1, %v33_v38  ;;  %4879 = vmatprep.mubr.msk.f32.mxu1 %vm149_vm1, %v97_v39  ;;  %v128_v37 = vld [vmem:[%s9148_s0 + $0x378] sm:$0xff]  ;;  %v65_v38 = vld [vmem:[%s9148_s0 + $0x180] sm:$0xff] }
  0x2a   :  { %v129_v39 = vld [vmem:[%s9148_s0 + $0x380] sm:$0xff] }
  0x2c   :  { %4784 = vmatmul.mubr.msk.f32.gmra.mrb[16].mxu0 %vm149_vm1, %v34_v40  ;;  %4880 = vmatmul.mubr.msk.f32.gmra.mrb[16].mxu1 %vm149_vm1, %v98_v41  ;;  %v66_v40 = vld [vmem:[%s9148_s0 + $0x188] sm:$0xff] }
  0x2d   :  { %4786 = vmatprep.mubr.msk.f32.mxu0 %vm149_vm1, %v35_v42  ;;  %4882 = vmatprep.mubr.msk.f32.mxu1 %vm149_vm1, %v99_v43  ;;  %v130_v41 = vld [vmem:[%s9148_s0 + $0x388] sm:$0xff]  ;;  %v67_v42 = vld [vmem:[%s9148_s0 + $0x190] sm:$0xff] }
  0x2e   :  { %v131_v43 = vld [vmem:[%s9148_s0 + $0x390] sm:$0xff] }
  0x30   :  { %4787 = vmatmul.mubr.msk.f32.gmra.mrb[18].mxu0 %vm149_vm1, %v36_v44  ;;  %4883 = vmatmul.mubr.msk.f32.gmra.mrb[18].mxu1 %vm149_vm1, %v100_v45  ;;  %v68_v44 = vld [vmem:[%s9148_s0 + $0x198] sm:$0xff] }
  0x31   :  { %4789 = vmatprep.mubr.msk.f32.mxu0 %vm149_vm1, %v37_v46  ;;  %4885 = vmatprep.mubr.msk.f32.mxu1 %vm149_vm1, %v101_v47  ;;  %v132_v45 = vld [vmem:[%s9148_s0 + $0x398] sm:$0xff]  ;;  %v69_v46 = vld [vmem:[%s9148_s0 + $0x1a0] sm:$0xff] }
  0x32   :  { %v133_v47 = vld [vmem:[%s9148_s0 + $0x3a0] sm:$0xff] }
  0x34   :  { %4790 = vmatmul.mubr.msk.f32.gmra.mrb[20].mxu0 %vm149_vm1, %v38_v48  ;;  %4886 = vmatmul.mubr.msk.f32.gmra.mrb[20].mxu1 %vm149_vm1, %v102_v49  ;;  %v70_v48 = vld [vmem:[%s9148_s0 + $0x1a8] sm:$0xff] }
  0x35   :  { %4792 = vmatprep.mubr.msk.f32.mxu0 %vm149_vm1, %v39_v50  ;;  %4888 = vmatprep.mubr.msk.f32.mxu1 %vm149_vm1, %v103_v51  ;;  %v134_v49 = vld [vmem:[%s9148_s0 + $0x3a8] sm:$0xff]  ;;  %v71_v50 = vld [vmem:[%s9148_s0 + $0x1b0] sm:$0xff] }
  0x36   :  { %v135_v51 = vld [vmem:[%s9148_s0 + $0x3b0] sm:$0xff] }
  0x38   :  { %4793 = vmatmul.mubr.msk.f32.gmra.mrb[22].mxu0 %vm149_vm1, %v40_v52  ;;  %4889 = vmatmul.mubr.msk.f32.gmra.mrb[22].mxu1 %vm149_vm1, %v104_v53  ;;  %v72_v52 = vld [vmem:[%s9148_s0 + $0x1b8] sm:$0xff] }
  0x39   :  { %4795 = vmatprep.mubr.msk.f32.mxu0 %vm149_vm1, %v41_v54  ;;  %4891 = vmatprep.mubr.msk.f32.mxu1 %vm149_vm1, %v105_v55  ;;  %v136_v53 = vld [vmem:[%s9148_s0 + $0x3b8] sm:$0xff]  ;;  %v73_v54 = vld [vmem:[%s9148_s0 + $0x1c0] sm:$0xff] }
  0x3a   :  { %v137_v55 = vld [vmem:[%s9148_s0 + $0x3c0] sm:$0xff] }
  0x3c   :  { %4796 = vmatmul.mubr.msk.f32.gmra.mrb[24].mxu0 %vm149_vm1, %v42_v56  ;;  %4892 = vmatmul.mubr.msk.f32.gmra.mrb[24].mxu1 %vm149_vm1, %v106_v57  ;;  %v74_v56 = vld [vmem:[%s9148_s0 + $0x1c8] sm:$0xff] }
  0x3d   :  { %4798 = vmatprep.mubr.msk.f32.mxu0 %vm149_vm1, %v43_v58  ;;  %4894 = vmatprep.mubr.msk.f32.mxu1 %vm149_vm1, %v107_v59  ;;  %v138_v57 = vld [vmem:[%s9148_s0 + $0x3c8] sm:$0xff]  ;;  %v75_v58 = vld [vmem:[%s9148_s0 + $0x1d0] sm:$0xff] }
  0x3e   :  { %v139_v59 = vld [vmem:[%s9148_s0 + $0x3d0] sm:$0xff] }
  0x40   :  { %4799 = vmatmul.mubr.msk.f32.gmra.mrb[26].mxu0 %vm149_vm1, %v44_v60  ;;  %4895 = vmatmul.mubr.msk.f32.gmra.mrb[26].mxu1 %vm149_vm1, %v108_v61  ;;  %v76_v60 = vld [vmem:[%s9148_s0 + $0x1d8] sm:$0xff] }
  0x41   :  { %4801 = vmatprep.mubr.msk.f32.mxu0 %vm149_vm1, %v45_v62  ;;  %4897 = vmatprep.mubr.msk.f32.mxu1 %vm149_vm1, %v109_v63  ;;  %v140_v61 = vld [vmem:[%s9148_s0 + $0x3d8] sm:$0xff]  ;;  %v77_v62 = vld [vmem:[%s9148_s0 + $0x1e0] sm:$0xff] }
  0x42   :  { %v141_v63 = vld [vmem:[%s9148_s0 + $0x3e0] sm:$0xff] }
  0x44   :  { %4802 = vmatmul.mubr.msk.f32.gmra.mrb[28].mxu0 %vm149_vm1, %v46_v0  ;;  %4898 = vmatmul.mubr.msk.f32.gmra.mrb[28].mxu1 %vm149_vm1, %v110_v1  ;;  %v78_v0 = vld [vmem:[%s9148_s0 + $0x1e8] sm:$0xff] }
  0x45   :  { %4804 = vmatprep.mubr.msk.f32.mxu0 %vm149_vm1, %v47_v2  ;;  %4900 = vmatprep.mubr.msk.f32.mxu1 %vm149_vm1, %v111_v3  ;;  %v142_v1 = vld [vmem:[%s9148_s0 + $0x3e8] sm:$0xff]  ;;  %v79_v2 = vld [vmem:[%s9148_s0 + $0x1f0] sm:$0xff] }
  0x46   :  { %v143_v3 = vld [vmem:[%s9148_s0 + $0x3f0] sm:$0xff] }
  0x48   :  { %4805 = vmatmul.mubr.msk.f32.gmra.mrb[30].mxu0 %vm149_vm1, %v48_v4  ;;  %4901 = vmatmul.mubr.msk.f32.gmra.mrb[30].mxu1 %vm149_vm1, %v112_v5  ;;  %v80_v4 = vld [vmem:[%s9148_s0 + $0x1f8] sm:$0xff] }
  0x49   :  { %4807 = vmatprep.mubr.msk.f32.mxu0 %vm149_vm1, %v49_v6  ;;  %4903 = vmatprep.mubr.msk.f32.mxu1 %vm149_vm1, %v113_v7  ;;  %v144_v5 = vld [vmem:[%s9148_s0 + $0x3f8] sm:$0xff] }
  0x4c   :  { %4808 = vmatmul.mubr.msk.f32.gmra.mrb[32].mxu0 %vm149_vm1, %v50_v8  ;;  %4904 = vmatmul.mubr.msk.f32.gmra.mrb[32].mxu1 %vm149_vm1, %v114_v9 }
  0x4d   :  { %4810 = vmatprep.mubr.msk.f32.mxu0 %vm149_vm1, %v51_v10  ;;  %4906 = vmatprep.mubr.msk.f32.mxu1 %vm149_vm1, %v115_v11 }
  0x50   :  { %4811 = vmatmul.mubr.msk.f32.gmra.mrb[34].mxu0 %vm149_vm1, %v52_v12  ;;  %4907 = vmatmul.mubr.msk.f32.gmra.mrb[34].mxu1 %vm149_vm1, %v116_v13 }
  0x51   :  { %4813 = vmatprep.mubr.msk.f32.mxu0 %vm149_vm1, %v53_v14  ;;  %4909 = vmatprep.mubr.msk.f32.mxu1 %vm149_vm1, %v117_v15 }
  0x54   :  { %4814 = vmatmul.mubr.msk.f32.gmra.mrb[36].mxu0 %vm149_vm1, %v54_v16  ;;  %4910 = vmatmul.mubr.msk.f32.gmra.mrb[36].mxu1 %vm149_vm1, %v118_v17 }
  0x55   :  { %4816 = vmatprep.mubr.msk.f32.mxu0 %vm149_vm1, %v55_v18  ;;  %4912 = vmatprep.mubr.msk.f32.mxu1 %vm149_vm1, %v119_v19 }
  0x58   :  { %4817 = vmatmul.mubr.msk.f32.gmra.mrb[38].mxu0 %vm149_vm1, %v56_v20  ;;  %4913 = vmatmul.mubr.msk.f32.gmra.mrb[38].mxu1 %vm149_vm1, %v120_v21 }
  0x59   :  { %4819 = vmatprep.mubr.msk.f32.mxu0 %vm149_vm1, %v57_v22  ;;  %4915 = vmatprep.mubr.msk.f32.mxu1 %vm149_vm1, %v121_v23 }
  0x5c   :  { %4820 = vmatmul.mubr.msk.f32.gmra.mrb[40].mxu0 %vm149_vm1, %v58_v24  ;;  %4916 = vmatmul.mubr.msk.f32.gmra.mrb[40].mxu1 %vm149_vm1, %v122_v25 }
  0x5d   :  { %4822 = vmatprep.mubr.msk.f32.mxu0 %vm149_vm1, %v59_v26  ;;  %4918 = vmatprep.mubr.msk.f32.mxu1 %vm149_vm1, %v123_v27 }
  0x60   :  { %4823 = vmatmul.mubr.msk.f32.gmra.mrb[42].mxu0 %vm149_vm1, %v60_v28  ;;  %4919 = vmatmul.mubr.msk.f32.gmra.mrb[42].mxu1 %vm149_vm1, %v124_v29 }
  0x61   :  { %4825 = vmatprep.mubr.msk.f32.mxu0 %vm149_vm1, %v61_v30  ;;  %4921 = vmatprep.mubr.msk.f32.mxu1 %vm149_vm1, %v125_v31 }
  0x64   :  { %4826 = vmatmul.mubr.msk.f32.gmra.mrb[44].mxu0 %vm149_vm1, %v62_v32  ;;  %4922 = vmatmul.mubr.msk.f32.gmra.mrb[44].mxu1 %vm149_vm1, %v126_v33 }
  0x65   :  { %4828 = vmatprep.mubr.msk.f32.mxu0 %vm149_vm1, %v63_v34  ;;  %4924 = vmatprep.mubr.msk.f32.mxu1 %vm149_vm1, %v127_v35 }
  0x68   :  { %4829 = vmatmul.mubr.msk.f32.gmra.mrb[46].mxu0 %vm149_vm1, %v64_v36  ;;  %4925 = vmatmul.mubr.msk.f32.gmra.mrb[46].mxu1 %vm149_vm1, %v128_v37 }
  0x69   :  { %4831 = vmatprep.mubr.msk.f32.mxu0 %vm149_vm1, %v65_v38  ;;  %4927 = vmatprep.mubr.msk.f32.mxu1 %vm149_vm1, %v129_v39 }
  0x6c   :  { %4832 = vmatmul.mubr.msk.f32.gmra.mrb[48].mxu0 %vm149_vm1, %v66_v40  ;;  %4928 = vmatmul.mubr.msk.f32.gmra.mrb[48].mxu1 %vm149_vm1, %v130_v41 }
  0x6d   :  { %4834 = vmatprep.mubr.msk.f32.mxu0 %vm149_vm1, %v67_v42  ;;  %4930 = vmatprep.mubr.msk.f32.mxu1 %vm149_vm1, %v131_v43 }
  0x70   :  { %4835 = vmatmul.mubr.msk.f32.gmra.mrb[50].mxu0 %vm149_vm1, %v68_v44  ;;  %4931 = vmatmul.mubr.msk.f32.gmra.mrb[50].mxu1 %vm149_vm1, %v132_v45 }
  0x71   :  { %4837 = vmatprep.mubr.msk.f32.mxu0 %vm149_vm1, %v69_v46  ;;  %4933 = vmatprep.mubr.msk.f32.mxu1 %vm149_vm1, %v133_v47 }
  0x74   :  { %4838 = vmatmul.mubr.msk.f32.gmra.mrb[52].mxu0 %vm149_vm1, %v70_v48  ;;  %4934 = vmatmul.mubr.msk.f32.gmra.mrb[52].mxu1 %vm149_vm1, %v134_v49 }
  0x75   :  { %4840 = vmatprep.mubr.msk.f32.mxu0 %vm149_vm1, %v71_v50  ;;  %4936 = vmatprep.mubr.msk.f32.mxu1 %vm149_vm1, %v135_v51 }
  0x78   :  { %4841 = vmatmul.mubr.msk.f32.gmra.mrb[54].mxu0 %vm149_vm1, %v72_v52  ;;  %4937 = vmatmul.mubr.msk.f32.gmra.mrb[54].mxu1 %vm149_vm1, %v136_v53 }
  0x79   :  { %4843 = vmatprep.mubr.msk.f32.mxu0 %vm149_vm1, %v73_v54  ;;  %4939 = vmatprep.mubr.msk.f32.mxu1 %vm149_vm1, %v137_v55 }
  0x7c   :  { %4844 = vmatmul.mubr.msk.f32.gmra.mrb[56].mxu0 %vm149_vm1, %v74_v56  ;;  %4940 = vmatmul.mubr.msk.f32.gmra.mrb[56].mxu1 %vm149_vm1, %v138_v57 }
  0x7d   :  { %4846 = vmatprep.mubr.msk.f32.mxu0 %vm149_vm1, %v75_v58  ;;  %4942 = vmatprep.mubr.msk.f32.mxu1 %vm149_vm1, %v139_v59 }
  0x80   :  { %4847 = vmatmul.mubr.msk.f32.gmra.mrb[58].mxu0 %vm149_vm1, %v76_v60  ;;  %4943 = vmatmul.mubr.msk.f32.gmra.mrb[58].mxu1 %vm149_vm1, %v140_v61 }
  0x81   :  { %4849 = vmatprep.mubr.msk.f32.mxu0 %vm149_vm1, %v77_v62  ;;  %4945 = vmatprep.mubr.msk.f32.mxu1 %vm149_vm1, %v141_v63 }
  0x84   :  { %4850 = vmatmul.mubr.msk.f32.gmra.mrb[60].mxu0 %vm149_vm1, %v78_v0  ;;  %4946 = vmatmul.mubr.msk.f32.gmra.mrb[60].mxu1 %vm149_vm1, %v142_v1 }
  0x85   :  { %4852 = vmatprep.mubr.msk.f32.mxu0 %vm149_vm1, %v79_v2  ;;  %4948 = vmatprep.mubr.msk.f32.mxu1 %vm149_vm1, %v143_v3 }
  0x88   :  { %4853 = vmatmul.mubr.msk.f32.gmra.mrb[62].mxu0 %vm149_vm1, %v80_v4  ;;  %4949 = vmatmul.mubr.msk.f32.gmra.mrb[62].mxu1 %vm149_vm1, %v144_v5 }
  0xdf   :  { %v5520_v6 = vpop.f32.mrb[0].mxu0  ;;  %v5522_v7 = vpop.f32.mrb[0].mxu1 }
  0xe0   :  { %9342 = vst [vmem:[#allocation2_spill] sm:$0xff] %v5522_v7  ;;  %v1632_v8 = vsel %vm1630_vm4, %v5520_v6, 0.0  ;;  %v2151_v9 = vsel %vm1630_vm4, %v5522_v7, 0.0  ;;  %v5528_v10 = vpop.f32.mrb[1].mxu0  ;;  %v5530_v11 = vpop.f32.mrb[1].mxu1 }
  0xe1   :  { %9343 = vst [vmem:[#allocation3_spill] sm:$0xff] %v5530_v11  ;;  %v1631_v12 = vsel %vm1630_vm4, %v5528_v10, 0.0  ;;  %v2149_v13 = vsel %vm1630_vm4, %v5530_v11, 0.0 }
  0xe2   :  { %v1633_v14 = vadd.f32 %v1632_v8, %v1631_v12  ;;  %v2152_v15 = vadd.f32 %v2151_v9, %v2149_v13 }
  0xe3   :  { %v5536_v16 = vpop.f32.mrb[2].mxu0  ;;  %v5538_v17 = vpop.f32.mrb[2].mxu1 }
  0xe4   :  { %9344 = vst [vmem:[#allocation4_spill] sm:$0xff] %v5538_v17  ;;  %v5540_v18 = vpop.f32.mrb[3].mxu0  ;;  %v5542_v19 = vpop.f32.mrb[3].mxu1  ;;  %v1636_v24 = vsel %vm1630_vm4, %v5536_v16, 0.0  ;;  %v2155_v25 = vsel %vm1630_vm4, %v5538_v17, 0.0 }
  0xe5   :  { %9345 = vst [vmem:[#allocation5_spill] sm:$0xff] %v5542_v19  ;;  %v1634_v20 = vsel %vm1630_vm4, %v5540_v18, 0.0  ;;  %v2153_v21 = vsel %vm1630_vm4, %v5542_v19, 0.0 }
  0xe6   :  { %v1635_v22 = vadd.f32 %v1634_v20, %v1633_v14  ;;  %v2154_v23 = vadd.f32 %v2153_v21, %v2152_v15 }
  0xe7   :  { %v5552_v26 = vpop.f32.mrb[4].mxu0  ;;  %v5554_v27 = vpop.f32.mrb[4].mxu1 }
  0xe8   :  { %9346 = vst [vmem:[#allocation6_spill] sm:$0xff] %v5554_v27  ;;  %v1637_v28 = vadd.f32 %v1636_v24, %v1635_v22  ;;  %v2156_v29 = vadd.f32 %v2155_v25, %v2154_v23  ;;  %v5556_v30 = vpop.f32.mrb[5].mxu0  ;;  %v5558_v31 = vpop.f32.mrb[5].mxu1  ;;  %v1640_v36 = vsel %vm1630_vm4, %v5552_v26, 0.0  ;;  %v2159_v37 = vsel %vm1630_vm4, %v5554_v27, 0.0 }
  0xe9   :  { %9347 = vst [vmem:[#allocation7_spill] sm:$0xff] %v5558_v31  ;;  %v1638_v32 = vsel %vm1630_vm4, %v5556_v30, 0.0  ;;  %v2157_v33 = vsel %vm1630_vm4, %v5558_v31, 0.0 }
  0xea   :  { %v1639_v34 = vadd.f32 %v1638_v32, %v1637_v28  ;;  %v2158_v35 = vadd.f32 %v2157_v33, %v2156_v29 }
  0xeb   :  { %v5568_v38 = vpop.f32.mrb[6].mxu0  ;;  %v5570_v39 = vpop.f32.mrb[6].mxu1 }
  0xec   :  { %9348 = vst [vmem:[#allocation8_spill] sm:$0xff] %v5570_v39  ;;  %v5572_v40 = vpop.f32.mrb[7].mxu0  ;;  %v1641_v41 = vadd.f32 %v1640_v36, %v1639_v34  ;;  %v5574_v42 = vpop.f32.mrb[7].mxu1  ;;  %v2160_v43 = vadd.f32 %v2159_v37, %v2158_v35  ;;  %v1644_v48 = vsel %vm1630_vm4, %v5568_v38, 0.0  ;;  %v2163_v49 = vsel %vm1630_vm4, %v5570_v39, 0.0 }
  0xed   :  { %9349 = vst [vmem:[#allocation9_spill] sm:$0xff] %v5574_v42  ;;  %v1642_v44 = vsel %vm1630_vm4, %v5572_v40, 0.0  ;;  %v2161_v45 = vsel %vm1630_vm4, %v5574_v42, 0.0 }
  0xee   :  { %v1643_v46 = vadd.f32 %v1642_v44, %v1641_v41  ;;  %v2162_v47 = vadd.f32 %v2161_v45, %v2160_v43 }
  0xef   :  { %v5584_v50 = vpop.f32.mrb[8].mxu0  ;;  %v5586_v51 = vpop.f32.mrb[8].mxu1 }
  0xf0   :  { %9350 = vst [vmem:[#allocation10_spill] sm:$0xff] %v5586_v51  ;;  %v5588_v52 = vpop.f32.mrb[9].mxu0  ;;  %v1645_v53 = vadd.f32 %v1644_v48, %v1643_v46  ;;  %v5590_v54 = vpop.f32.mrb[9].mxu1  ;;  %v2164_v55 = vadd.f32 %v2163_v49, %v2162_v47  ;;  %v1648_v60 = vsel %vm1630_vm4, %v5584_v50, 0.0  ;;  %v2167_v61 = vsel %vm1630_vm4, %v5586_v51, 0.0 }
  0xf1   :  { %9351 = vst [vmem:[#allocation11_spill] sm:$0xff] %v5590_v54  ;;  %v1646_v56 = vsel %vm1630_vm4, %v5588_v52, 0.0  ;;  %v2165_v57 = vsel %vm1630_vm4, %v5590_v54, 0.0 }
  0xf2   :  { %v1647_v58 = vadd.f32 %v1646_v56, %v1645_v53  ;;  %v2166_v59 = vadd.f32 %v2165_v57, %v2164_v55 }
  0xf3   :  { %v5600_v62 = vpop.f32.mrb[10].mxu0  ;;  %v5602_v63 = vpop.f32.mrb[10].mxu1 }
  0xf4   :  { %9352 = vst [vmem:[#allocation12_spill] sm:$0xff] %v5602_v63  ;;  %v5604_v0 = vpop.f32.mrb[11].mxu0  ;;  %v1649_v1 = vadd.f32 %v1648_v60, %v1647_v58  ;;  %v5606_v2 = vpop.f32.mrb[11].mxu1  ;;  %v2168_v3 = vadd.f32 %v2167_v61, %v2166_v59  ;;  %v1652_v12 = vsel %vm1630_vm4, %v5600_v62, 0.0  ;;  %v2171_v13 = vsel %vm1630_vm4, %v5602_v63, 0.0 }
  0xf5   :  { %9353 = vst [vmem:[#allocation13_spill] sm:$0xff] %v5606_v2  ;;  %v1650_v4 = vsel %vm1630_vm4, %v5604_v0, 0.0  ;;  %v2169_v5 = vsel %vm1630_vm4, %v5606_v2, 0.0 }
  0xf6   :  { %v1651_v8 = vadd.f32 %v1650_v4, %v1649_v1  ;;  %v2170_v9 = vadd.f32 %v2169_v5, %v2168_v3 }
  0xf7   :  { %v5616_v14 = vpop.f32.mrb[12].mxu0  ;;  %v5618_v15 = vpop.f32.mrb[12].mxu1 }
  0xf8   :  { %9354 = vst [vmem:[#allocation14_spill] sm:$0xff] %v5618_v15  ;;  %v5620_v20 = vpop.f32.mrb[13].mxu0  ;;  %v1653_v21 = vadd.f32 %v1652_v12, %v1651_v8  ;;  %v5622_v22 = vpop.f32.mrb[13].mxu1  ;;  %v2172_v23 = vadd.f32 %v2171_v13, %v2170_v9  ;;  %v1656_v32 = vsel %vm1630_vm4, %v5616_v14, 0.0  ;;  %v2175_v33 = vsel %vm1630_vm4, %v5618_v15, 0.0 }
  0xf9   :  { %9355 = vst [vmem:[#allocation15_spill] sm:$0xff] %v5622_v22  ;;  %v1654_v24 = vsel %vm1630_vm4, %v5620_v20, 0.0  ;;  %v2173_v25 = vsel %vm1630_vm4, %v5622_v22, 0.0 }
  0xfa   :  { %v1655_v28 = vadd.f32 %v1654_v24, %v1653_v21  ;;  %v2174_v29 = vadd.f32 %v2173_v25, %v2172_v23 }
  0xfb   :  { %v5632_v34 = vpop.f32.mrb[14].mxu0  ;;  %v5634_v35 = vpop.f32.mrb[14].mxu1 }
  0xfc   :  { %9356 = vst [vmem:[#allocation16_spill] sm:$0xff] %v5634_v35  ;;  %v5636_v36 = vpop.f32.mrb[15].mxu0  ;;  %v1657_v37 = vadd.f32 %v1656_v32, %v1655_v28  ;;  %v5638_v41 = vpop.f32.mrb[15].mxu1  ;;  %v2176_v43 = vadd.f32 %v2175_v33, %v2174_v29  ;;  %v1660_v48 = vsel %vm1630_vm4, %v5632_v34, 0.0  ;;  %v2179_v49 = vsel %vm1630_vm4, %v5634_v35, 0.0 }
  0xfd   :  { %9357 = vst [vmem:[#allocation17_spill] sm:$0xff] %v5638_v41  ;;  %v1658_v44 = vsel %vm1630_vm4, %v5636_v36, 0.0  ;;  %v2177_v45 = vsel %vm1630_vm4, %v5638_v41, 0.0 }
  0xfe   :  { %v1659_v46 = vadd.f32 %v1658_v44, %v1657_v37  ;;  %v2178_v47 = vadd.f32 %v2177_v45, %v2176_v43 }
  0xff   :  { %v5648_v53 = vpop.f32.mrb[16].mxu0  ;;  %v5650_v55 = vpop.f32.mrb[16].mxu1 }
 0x100   :  { %9358 = vst [vmem:[#allocation18_spill] sm:$0xff] %v5650_v55  ;;  %v5652_v56 = vpop.f32.mrb[17].mxu0  ;;  %v1661_v57 = vadd.f32 %v1660_v48, %v1659_v46  ;;  %v5654_v58 = vpop.f32.mrb[17].mxu1  ;;  %v2180_v59 = vadd.f32 %v2179_v49, %v2178_v47  ;;  %v1664_v4 = vsel %vm1630_vm4, %v5648_v53, 0.0  ;;  %v2183_v5 = vsel %vm1630_vm4, %v5650_v55, 0.0 }
 0x101   :  { %9359 = vst [vmem:[#allocation19_spill] sm:$0xff] %v5654_v58  ;;  %v1662_v60 = vsel %vm1630_vm4, %v5652_v56, 0.0  ;;  %v2181_v61 = vsel %vm1630_vm4, %v5654_v58, 0.0 }
 0x102   :  { %v1663_v1 = vadd.f32 %v1662_v60, %v1661_v57  ;;  %v2182_v3 = vadd.f32 %v2181_v61, %v2180_v59 }
 0x103   :  { %v5664_v8 = vpop.f32.mrb[18].mxu0  ;;  %v5666_v9 = vpop.f32.mrb[18].mxu1 }
 0x104   :  { %9360 = vst [vmem:[#allocation20_spill] sm:$0xff] %v5666_v9  ;;  %v5668_v12 = vpop.f32.mrb[19].mxu0  ;;  %v1665_v13 = vadd.f32 %v1664_v4, %v1663_v1  ;;  %v5670_v21 = vpop.f32.mrb[19].mxu1  ;;  %v2184_v23 = vadd.f32 %v2183_v5, %v2182_v3  ;;  %v1668_v32 = vsel %vm1630_vm4, %v5664_v8, 0.0  ;;  %v2187_v33 = vsel %vm1630_vm4, %v5666_v9, 0.0 }
 0x105   :  { %9361 = vst [vmem:[#allocation21_spill] sm:$0xff] %v5670_v21  ;;  %v1666_v24 = vsel %vm1630_vm4, %v5668_v12, 0.0  ;;  %v2185_v25 = vsel %vm1630_vm4, %v5670_v21, 0.0 }
 0x106   :  { %v1667_v28 = vadd.f32 %v1666_v24, %v1665_v13  ;;  %v2186_v29 = vadd.f32 %v2185_v25, %v2184_v23 }
 0x107   :  { %v5680_v37 = vpop.f32.mrb[20].mxu0  ;;  %v5682_v43 = vpop.f32.mrb[20].mxu1 }
 0x108   :  { %9362 = vst [vmem:[#allocation22_spill] sm:$0xff] %v5682_v43  ;;  %v5684_v44 = vpop.f32.mrb[21].mxu0  ;;  %v1669_v45 = vadd.f32 %v1668_v32, %v1667_v28  ;;  %v5686_v46 = vpop.f32.mrb[21].mxu1  ;;  %v2188_v47 = vadd.f32 %v2187_v33, %v2186_v29  ;;  %v1672_v60 = vsel %vm1630_vm4, %v5680_v37, 0.0  ;;  %v2191_v61 = vsel %vm1630_vm4, %v5682_v43, 0.0 }
 0x109   :  { %9363 = vst [vmem:[#allocation23_spill] sm:$0xff] %v5686_v46  ;;  %v1670_v48 = vsel %vm1630_vm4, %v5684_v44, 0.0  ;;  %v2189_v49 = vsel %vm1630_vm4, %v5686_v46, 0.0 }
 0x10a   :  { %v1671_v57 = vadd.f32 %v1670_v48, %v1669_v45  ;;  %v2190_v59 = vadd.f32 %v2189_v49, %v2188_v47 }
 0x10b   :  { %v5696_v1 = vpop.f32.mrb[22].mxu0  ;;  %v5698_v3 = vpop.f32.mrb[22].mxu1 }
 0x10c   :  { %9364 = vst [vmem:[#allocation24_spill] sm:$0xff] %v5698_v3  ;;  %v5700_v4 = vpop.f32.mrb[23].mxu0  ;;  %v1673_v5 = vadd.f32 %v1672_v60, %v1671_v57  ;;  %v5702_v13 = vpop.f32.mrb[23].mxu1  ;;  %v2192_v23 = vadd.f32 %v2191_v61, %v2190_v59  ;;  %v1676_v32 = vsel %vm1630_vm4, %v5696_v1, 0.0  ;;  %v2195_v33 = vsel %vm1630_vm4, %v5698_v3, 0.0 }
 0x10d   :  { %9365 = vst [vmem:[#allocation25_spill] sm:$0xff] %v5702_v13  ;;  %v1674_v24 = vsel %vm1630_vm4, %v5700_v4, 0.0  ;;  %v2193_v25 = vsel %vm1630_vm4, %v5702_v13, 0.0 }
 0x10e   :  { %v1675_v28 = vadd.f32 %v1674_v24, %v1673_v5  ;;  %v2194_v29 = vadd.f32 %v2193_v25, %v2192_v23 }
 0x10f   :  { %v5712_v45 = vpop.f32.mrb[24].mxu0  ;;  %v5714_v47 = vpop.f32.mrb[24].mxu1 }
 0x110   :  { %9366 = vst [vmem:[#allocation26_spill] sm:$0xff] %v5714_v47  ;;  %v5716_v48 = vpop.f32.mrb[25].mxu0  ;;  %v1677_v49 = vadd.f32 %v1676_v32, %v1675_v28  ;;  %v5718_v57 = vpop.f32.mrb[25].mxu1  ;;  %v2196_v59 = vadd.f32 %v2195_v33, %v2194_v29  ;;  %v1680_v24 = vsel %vm1630_vm4, %v5712_v45, 0.0  ;;  %v2199_v25 = vsel %vm1630_vm4, %v5714_v47, 0.0 }
 0x111   :  { %9367 = vst [vmem:[#allocation27_spill] sm:$0xff] %v5718_v57  ;;  %v1678_v60 = vsel %vm1630_vm4, %v5716_v48, 0.0  ;;  %v2197_v61 = vsel %vm1630_vm4, %v5718_v57, 0.0 }
 0x112   :  { %v1679_v5 = vadd.f32 %v1678_v60, %v1677_v49  ;;  %v2198_v23 = vadd.f32 %v2197_v61, %v2196_v59 }
 0x113   :  { %v5728_v3 = vpop.f32.mrb[26].mxu0  ;;  %v5730_v28 = vpop.f32.mrb[26].mxu1 }
 0x114   :  { %9368 = vst [vmem:[#allocation28_spill] sm:$0xff] %v5730_v28  ;;  %v5732_v32 = vpop.f32.mrb[27].mxu0  ;;  %v1681_v29 = vadd.f32 %v1680_v24, %v1679_v5  ;;  %v5734_v33 = vpop.f32.mrb[27].mxu1  ;;  %v2200_v13 = vadd.f32 %v2199_v25, %v2198_v23  ;;  %v1684_v47 = vsel %vm1630_vm4, %v5728_v3, 0.0  ;;  %v2203_v57 = vsel %vm1630_vm4, %v5730_v28, 0.0 }
 0x115   :  { %9369 = vst [vmem:[#allocation29_spill] sm:$0xff] %v5734_v33  ;;  %v1682_v49 = vsel %vm1630_vm4, %v5732_v32, 0.0  ;;  %v2201_v59 = vsel %vm1630_vm4, %v5734_v33, 0.0 }
 0x116   :  { %v1683_v60 = vadd.f32 %v1682_v49, %v1681_v29  ;;  %v2202_v61 = vadd.f32 %v2201_v59, %v2200_v13 }
 0x117   :  { %v5744_v43 = vpop.f32.mrb[28].mxu0  ;;  %v5746_v5 = vpop.f32.mrb[28].mxu1 }
 0x118   :  { %9370 = vst [vmem:[#allocation30_spill] sm:$0xff] %v5746_v5  ;;  %v5748_v24 = vpop.f32.mrb[29].mxu0  ;;  %v1685_v23 = vadd.f32 %v1684_v47, %v1683_v60  ;;  %v5750_v25 = vpop.f32.mrb[29].mxu1  ;;  %v2204_v46 = vadd.f32 %v2203_v57, %v2202_v61  ;;  %v1688_v28 = vsel %vm1630_vm4, %v5744_v43, 0.0  ;;  %v2207_v33 = vsel %vm1630_vm4, %v5746_v5, 0.0 }
 0x119   :  { %9371 = vst [vmem:[#allocation31_spill] sm:$0xff] %v5750_v25  ;;  %v1686_v29 = vsel %vm1630_vm4, %v5748_v24, 0.0  ;;  %v2205_v13 = vsel %vm1630_vm4, %v5750_v25, 0.0 }
 0x11a   :  { %v1687_v49 = vadd.f32 %v1686_v29, %v1685_v23  ;;  %v2206_v59 = vadd.f32 %v2205_v13, %v2204_v46 }
 0x11b   :  { %v5760_v9 = vpop.f32.mrb[30].mxu0  ;;  %v5762_v47 = vpop.f32.mrb[30].mxu1 }
 0x11c   :  { %9372 = vst [vmem:[#allocation32_spill] sm:$0xff] %v5762_v47  ;;  %v5764_v60 = vpop.f32.mrb[31].mxu0  ;;  %v1689_v57 = vadd.f32 %v1688_v28, %v1687_v49  ;;  %v5766_v61 = vpop.f32.mrb[31].mxu1  ;;  %v2208_v21 = vadd.f32 %v2207_v33, %v2206_v59  ;;  %v1692_v5 = vsel %vm1630_vm4, %v5760_v9, 0.0  ;;  %v2211_v25 = vsel %vm1630_vm4, %v5762_v47, 0.0 }
 0x11d   :  { %9373 = vst [vmem:[#allocation33_spill] sm:$0xff] %v5766_v61  ;;  %v1690_v23 = vsel %vm1630_vm4, %v5764_v60, 0.0  ;;  %v2209_v46 = vsel %vm1630_vm4, %v5766_v61, 0.0 }
 0x11e   :  { %v1691_v29 = vadd.f32 %v1690_v23, %v1689_v57  ;;  %v2210_v13 = vadd.f32 %v2209_v46, %v2208_v21 }
 0x11f   :  { %v5776_v55 = vpop.f32.mrb[32].mxu0  ;;  %v5778_v28 = vpop.f32.mrb[32].mxu1 }
 0x120   :  { %9374 = vst [vmem:[#allocation34_spill] sm:$0xff] %v5778_v28  ;;  %v5780_v49 = vpop.f32.mrb[33].mxu0  ;;  %v1693_v33 = vadd.f32 %v1692_v5, %v1691_v29  ;;  %v5782_v59 = vpop.f32.mrb[33].mxu1  ;;  %v2212_v58 = vadd.f32 %v2211_v25, %v2210_v13  ;;  %v1696_v47 = vsel %vm1630_vm4, %v5776_v55, 0.0  ;;  %v2215_v61 = vsel %vm1630_vm4, %v5778_v28, 0.0 }
 0x121   :  { %9375 = vst [vmem:[#allocation35_spill] sm:$0xff] %v5782_v59  ;;  %v1694_v57 = vsel %vm1630_vm4, %v5780_v49, 0.0  ;;  %v2213_v21 = vsel %vm1630_vm4, %v5782_v59, 0.0 }
 0x122   :  { %v1695_v23 = vadd.f32 %v1694_v57, %v1693_v33  ;;  %v2214_v46 = vadd.f32 %v2213_v21, %v2212_v58 }
 0x123   :  { %v5792_v35 = vpop.f32.mrb[34].mxu0  ;;  %v5794_v5 = vpop.f32.mrb[34].mxu1 }
 0x124   :  { %9376 = vst [vmem:[#allocation36_spill] sm:$0xff] %v5794_v5  ;;  %v5796_v29 = vpop.f32.mrb[35].mxu0  ;;  %v1697_v25 = vadd.f32 %v1696_v47, %v1695_v23  ;;  %v5798_v13 = vpop.f32.mrb[35].mxu1  ;;  %v2216_v41 = vadd.f32 %v2215_v61, %v2214_v46  ;;  %v1700_v28 = vsel %vm1630_vm4, %v5792_v35, 0.0  ;;  %v2219_v59 = vsel %vm1630_vm4, %v5794_v5, 0.0 }
 0x125   :  { %9377 = vst [vmem:[#allocation37_spill] sm:$0xff] %v5798_v13  ;;  %v1698_v33 = vsel %vm1630_vm4, %v5796_v29, 0.0  ;;  %v2217_v58 = vsel %vm1630_vm4, %v5798_v13, 0.0 }
 0x126   :  { %v1699_v57 = vadd.f32 %v1698_v33, %v1697_v25  ;;  %v2218_v21 = vadd.f32 %v2217_v58, %v2216_v41 }
 0x127   :  { %v5808_v15 = vpop.f32.mrb[36].mxu0  ;;  %v5810_v47 = vpop.f32.mrb[36].mxu1 }
 0x128   :  { %9378 = vst [vmem:[#allocation38_spill] sm:$0xff] %v5810_v47  ;;  %v5812_v23 = vpop.f32.mrb[37].mxu0  ;;  %v1701_v61 = vadd.f32 %v1700_v28, %v1699_v57  ;;  %v5814_v46 = vpop.f32.mrb[37].mxu1  ;;  %v2220_v22 = vadd.f32 %v2219_v59, %v2218_v21  ;;  %v1704_v5 = vsel %vm1630_vm4, %v5808_v15, 0.0  ;;  %v2223_v13 = vsel %vm1630_vm4, %v5810_v47, 0.0 }
 0x129   :  { %9379 = vst [vmem:[#allocation39_spill] sm:$0xff] %v5814_v46  ;;  %v1702_v25 = vsel %vm1630_vm4, %v5812_v23, 0.0  ;;  %v2221_v41 = vsel %vm1630_vm4, %v5814_v46, 0.0 }
 0x12a   :  { %v1703_v33 = vadd.f32 %v1702_v25, %v1701_v61  ;;  %v2222_v58 = vadd.f32 %v2221_v41, %v2220_v22 }
 0x12b   :  { %v5824_v63 = vpop.f32.mrb[38].mxu0  ;;  %v5826_v28 = vpop.f32.mrb[38].mxu1 }
 0x12c   :  { %9380 = vst [vmem:[#allocation40_spill] sm:$0xff] %v5826_v28  ;;  %v5828_v57 = vpop.f32.mrb[39].mxu0  ;;  %v1705_v59 = vadd.f32 %v1704_v5, %v1703_v33  ;;  %v5830_v21 = vpop.f32.mrb[39].mxu1  ;;  %v2224_v2 = vadd.f32 %v2223_v13, %v2222_v58  ;;  %v1708_v47 = vsel %vm1630_vm4, %v5824_v63, 0.0  ;;  %v2227_v46 = vsel %vm1630_vm4, %v5826_v28, 0.0 }
 0x12d   :  { %9381 = vst [vmem:[#allocation41_spill] sm:$0xff] %v5830_v21  ;;  %v1706_v61 = vsel %vm1630_vm4, %v5828_v57, 0.0  ;;  %v2225_v22 = vsel %vm1630_vm4, %v5830_v21, 0.0 }
 0x12e   :  { %v1707_v25 = vadd.f32 %v1706_v61, %v1705_v59  ;;  %v2226_v41 = vadd.f32 %v2225_v22, %v2224_v2 }
 0x12f   :  { %v5840_v51 = vpop.f32.mrb[40].mxu0  ;;  %v5842_v5 = vpop.f32.mrb[40].mxu1 }
 0x130   :  { %9382 = vst [vmem:[#allocation42_spill] sm:$0xff] %v5842_v5  ;;  %v5844_v33 = vpop.f32.mrb[41].mxu0  ;;  %v1709_v13 = vadd.f32 %v1708_v47, %v1707_v25  ;;  %v5846_v58 = vpop.f32.mrb[41].mxu1  ;;  %v2228_v54 = vadd.f32 %v2227_v46, %v2226_v41  ;;  %v1712_v28 = vsel %vm1630_vm4, %v5840_v51, 0.0  ;;  %v2231_v21 = vsel %vm1630_vm4, %v5842_v5, 0.0 }
 0x131   :  { %9383 = vst [vmem:[#allocation43_spill] sm:$0xff] %v5846_v58  ;;  %v1710_v59 = vsel %vm1630_vm4, %v5844_v33, 0.0  ;;  %v2229_v2 = vsel %vm1630_vm4, %v5846_v58, 0.0 }
 0x132   :  { %v1711_v61 = vadd.f32 %v1710_v59, %v1709_v13  ;;  %v2230_v22 = vadd.f32 %v2229_v2, %v2228_v54 }
 0x133   :  { %v5856_v39 = vpop.f32.mrb[42].mxu0  ;;  %v5858_v47 = vpop.f32.mrb[42].mxu1 }
 0x134   :  { %9384 = vst [vmem:[#allocation44_spill] sm:$0xff] %v5858_v47  ;;  %v5860_v25 = vpop.f32.mrb[43].mxu0  ;;  %v1713_v46 = vadd.f32 %v1712_v28, %v1711_v61  ;;  %v5862_v41 = vpop.f32.mrb[43].mxu1  ;;  %v2232_v42 = vadd.f32 %v2231_v21, %v2230_v22  ;;  %v1716_v5 = vsel %vm1630_vm4, %v5856_v39, 0.0  ;;  %v2235_v58 = vsel %vm1630_vm4, %v5858_v47, 0.0 }
 0x135   :  { %9385 = vst [vmem:[#allocation45_spill] sm:$0xff] %v5862_v41  ;;  %v1714_v13 = vsel %vm1630_vm4, %v5860_v25, 0.0  ;;  %v2233_v54 = vsel %vm1630_vm4, %v5862_v41, 0.0 }
 0x136   :  { %v1715_v59 = vadd.f32 %v1714_v13, %v1713_v46  ;;  %v2234_v2 = vadd.f32 %v2233_v54, %v2232_v42 }
 0x137   :  { %v5872_v27 = vpop.f32.mrb[44].mxu0  ;;  %v5874_v28 = vpop.f32.mrb[44].mxu1 }
 0x138   :  { %9386 = vst [vmem:[#allocation46_spill] sm:$0xff] %v5872_v27  ;;  %9387 = vst [vmem:[#allocation47_spill] sm:$0xff] %v5874_v28  ;;  %v5876_v61 = vpop.f32.mrb[45].mxu0  ;;  %v1717_v21 = vadd.f32 %v1716_v5, %v1715_v59  ;;  %v5878_v22 = vpop.f32.mrb[45].mxu1  ;;  %v2236_v31 = vadd.f32 %v2235_v58, %v2234_v2  ;;  %v1720_v47 = vsel %vm1630_vm4, %v5872_v27, 0.0  ;;  %v2239_v41 = vsel %vm1630_vm4, %v5874_v28, 0.0 }
 0x139   :  { %9388 = vst [vmem:[#allocation48_spill] sm:$0xff] %v5876_v61  ;;  %9389 = vst [vmem:[#allocation49_spill] sm:$0xff] %v5878_v22  ;;  %v1718_v46 = vsel %vm1630_vm4, %v5876_v61, 0.0  ;;  %v2237_v42 = vsel %vm1630_vm4, %v5878_v22, 0.0 }
 0x13a   :  { %v1719_v13 = vadd.f32 %v1718_v46, %v1717_v21  ;;  %v2238_v54 = vadd.f32 %v2237_v42, %v2236_v31 }
 0x13b   :  { %v5888_v17 = vpop.f32.mrb[46].mxu0  ;;  %v5890_v5 = vpop.f32.mrb[46].mxu1 }
 0x13c   :  { %9390 = vst [vmem:[#allocation50_spill] sm:$0xff] %v5888_v17  ;;  %9391 = vst [vmem:[#allocation51_spill] sm:$0xff] %v5890_v5  ;;  %v5892_v59 = vpop.f32.mrb[47].mxu0  ;;  %v1721_v58 = vadd.f32 %v1720_v47, %v1719_v13  ;;  %v5894_v2 = vpop.f32.mrb[47].mxu1  ;;  %v2240_v19 = vadd.f32 %v2239_v41, %v2238_v54  ;;  %v1724_v28 = vsel %vm1630_vm4, %v5888_v17, 0.0  ;;  %v2243_v22 = vsel %vm1630_vm4, %v5890_v5, 0.0 }
 0x13d   :  { %9392 = vst [vmem:[#allocation52_spill] sm:$0xff] %v5892_v59  ;;  %9393 = vst [vmem:[#allocation53_spill] sm:$0xff] %v5894_v2  ;;  %v1722_v21 = vsel %vm1630_vm4, %v5892_v59, 0.0  ;;  %v2241_v31 = vsel %vm1630_vm4, %v5894_v2, 0.0 }
 0x13e   :  { %v1723_v46 = vadd.f32 %v1722_v21, %v1721_v58  ;;  %v2242_v42 = vadd.f32 %v2241_v31, %v2240_v19 }
 0x13f   :  { %v5904_v7 = vpop.f32.mrb[48].mxu0  ;;  %v5906_v47 = vpop.f32.mrb[48].mxu1 }
 0x140   :  { %9394 = vst [vmem:[#allocation54_spill] sm:$0xff] %v5904_v7  ;;  %9395 = vst [vmem:[#allocation55_spill] sm:$0xff] %v5906_v47  ;;  %v5908_v13 = vpop.f32.mrb[49].mxu0  ;;  %v1725_v41 = vadd.f32 %v1724_v28, %v1723_v46  ;;  %v5910_v54 = vpop.f32.mrb[49].mxu1  ;;  %v2244_v11 = vadd.f32 %v2243_v22, %v2242_v42  ;;  %v1728_v5 = vsel %vm1630_vm4, %v5904_v7, 0.0  ;;  %v2247_v2 = vsel %vm1630_vm4, %v5906_v47, 0.0 }
 0x141   :  { %9396 = vst [vmem:[#allocation56_spill] sm:$0xff] %v5908_v13  ;;  %9397 = vst [vmem:[#allocation57_spill] sm:$0xff] %v5910_v54  ;;  %v1726_v58 = vsel %vm1630_vm4, %v5908_v13, 0.0  ;;  %v2245_v19 = vsel %vm1630_vm4, %v5910_v54, 0.0 }
 0x142   :  { %v1727_v21 = vadd.f32 %v1726_v58, %v1725_v41  ;;  %v2246_v31 = vadd.f32 %v2245_v19, %v2244_v11 }
 0x143   :  { %v5920_v17 = vpop.f32.mrb[50].mxu0  ;;  %v5922_v28 = vpop.f32.mrb[50].mxu1 }
 0x144   :  { %9398 = vst [vmem:[#allocation58_spill] sm:$0xff] %v5920_v17  ;;  %9399 = vst [vmem:[#allocation59_spill] sm:$0xff] %v5922_v28  ;;  %v5924_v46 = vpop.f32.mrb[51].mxu0  ;;  %v1729_v22 = vadd.f32 %v1728_v5, %v1727_v21  ;;  %v5926_v42 = vpop.f32.mrb[51].mxu1  ;;  %v2248_v13 = vadd.f32 %v2247_v2, %v2246_v31  ;;  %v1732_v47 = vsel %vm1630_vm4, %v5920_v17, 0.0  ;;  %v2251_v54 = vsel %vm1630_vm4, %v5922_v28, 0.0 }
 0x145   :  { %9400 = vst [vmem:[#allocation60_spill] sm:$0xff] %v5924_v46  ;;  %9401 = vst [vmem:[#allocation61_spill] sm:$0xff] %v5926_v42  ;;  %v1730_v41 = vsel %vm1630_vm4, %v5924_v46, 0.0  ;;  %v2249_v11 = vsel %vm1630_vm4, %v5926_v42, 0.0 }
 0x146   :  { %v1731_v58 = vadd.f32 %v1730_v41, %v1729_v22  ;;  %v2250_v19 = vadd.f32 %v2249_v11, %v2248_v13 }
 0x147   :  { %v5936_v7 = vpop.f32.mrb[52].mxu0  ;;  %v5938_v5 = vpop.f32.mrb[52].mxu1 }
 0x148   :  { %9402 = vst [vmem:[#allocation62_spill] sm:$0xff] %v5936_v7  ;;  %9403 = vst [vmem:[#allocation63_spill] sm:$0xff] %v5938_v5  ;;  %v5940_v21 = vpop.f32.mrb[53].mxu0  ;;  %v1733_v2 = vadd.f32 %v1732_v47, %v1731_v58  ;;  %v5942_v31 = vpop.f32.mrb[53].mxu1  ;;  %v2252_v46 = vadd.f32 %v2251_v54, %v2250_v19  ;;  %v1736_v28 = vsel %vm1630_vm4, %v5936_v7, 0.0  ;;  %v2255_v42 = vsel %vm1630_vm4, %v5938_v5, 0.0 }
 0x149   :  { %9404 = vst [vmem:[#allocation64_spill] sm:$0xff] %v5940_v21  ;;  %9405 = vst [vmem:[#allocation65_spill] sm:$0xff] %v5942_v31  ;;  %v1734_v22 = vsel %vm1630_vm4, %v5940_v21, 0.0  ;;  %v2253_v13 = vsel %vm1630_vm4, %v5942_v31, 0.0 }
 0x14a   :  { %v1735_v41 = vadd.f32 %v1734_v22, %v1733_v2  ;;  %v2254_v11 = vadd.f32 %v2253_v13, %v2252_v46 }
 0x14b   :  { %v5952_v17 = vpop.f32.mrb[54].mxu0  ;;  %v5954_v47 = vpop.f32.mrb[54].mxu1 }
 0x14c   :  { %9406 = vst [vmem:[#allocation66_spill] sm:$0xff] %v5952_v17  ;;  %9407 = vst [vmem:[#allocation67_spill] sm:$0xff] %v5954_v47  ;;  %v5956_v58 = vpop.f32.mrb[55].mxu0  ;;  %v1737_v54 = vadd.f32 %v1736_v28, %v1735_v41  ;;  %v5958_v19 = vpop.f32.mrb[55].mxu1  ;;  %v2256_v21 = vadd.f32 %v2255_v42, %v2254_v11  ;;  %v1740_v5 = vsel %vm1630_vm4, %v5952_v17, 0.0  ;;  %v2259_v31 = vsel %vm1630_vm4, %v5954_v47, 0.0 }
 0x14d   :  { %9408 = vst [vmem:[#allocation68_spill] sm:$0xff] %v5956_v58  ;;  %9409 = vst [vmem:[#allocation69_spill] sm:$0xff] %v5958_v19  ;;  %v1738_v2 = vsel %vm1630_vm4, %v5956_v58, 0.0  ;;  %v2257_v46 = vsel %vm1630_vm4, %v5958_v19, 0.0 }
 0x14e   :  { %v1739_v22 = vadd.f32 %v1738_v2, %v1737_v54  ;;  %v2258_v13 = vadd.f32 %v2257_v46, %v2256_v21 }
 0x14f   :  { %v5968_v7 = vpop.f32.mrb[56].mxu0  ;;  %v5970_v28 = vpop.f32.mrb[56].mxu1 }
 0x150   :  { %9410 = vst [vmem:[#allocation70_spill] sm:$0xff] %v5968_v7  ;;  %9411 = vst [vmem:[#allocation71_spill] sm:$0xff] %v5970_v28  ;;  %v5972_v41 = vpop.f32.mrb[57].mxu0  ;;  %v1741_v42 = vadd.f32 %v1740_v5, %v1739_v22  ;;  %v5974_v11 = vpop.f32.mrb[57].mxu1  ;;  %v2260_v58 = vadd.f32 %v2259_v31, %v2258_v13  ;;  %v1744_v47 = vsel %vm1630_vm4, %v5968_v7, 0.0  ;;  %v2263_v19 = vsel %vm1630_vm4, %v5970_v28, 0.0 }
 0x151   :  { %9412 = vst [vmem:[#allocation72_spill] sm:$0xff] %v5972_v41  ;;  %9413 = vst [vmem:[#allocation73_spill] sm:$0xff] %v5974_v11  ;;  %v1742_v54 = vsel %vm1630_vm4, %v5972_v41, 0.0  ;;  %v2261_v21 = vsel %vm1630_vm4, %v5974_v11, 0.0 }
 0x152   :  { %v1743_v2 = vadd.f32 %v1742_v54, %v1741_v42  ;;  %v2262_v46 = vadd.f32 %v2261_v21, %v2260_v58 }
 0x153   :  { %v5984_v17 = vpop.f32.mrb[58].mxu0  ;;  %v5986_v5 = vpop.f32.mrb[58].mxu1 }
 0x154   :  { %9414 = vst [vmem:[#allocation74_spill] sm:$0xff] %v5984_v17  ;;  %9415 = vst [vmem:[#allocation75_spill] sm:$0xff] %v5986_v5  ;;  %v5988_v22 = vpop.f32.mrb[59].mxu0  ;;  %v1745_v31 = vadd.f32 %v1744_v47, %v1743_v2  ;;  %v5990_v13 = vpop.f32.mrb[59].mxu1  ;;  %v2264_v41 = vadd.f32 %v2263_v19, %v2262_v46  ;;  %v1748_v28 = vsel %vm1630_vm4, %v5984_v17, 0.0  ;;  %v2267_v11 = vsel %vm1630_vm4, %v5986_v5, 0.0 }
 0x155   :  { %9416 = vst [vmem:[#allocation76_spill] sm:$0xff] %v5988_v22  ;;  %9417 = vst [vmem:[#allocation77_spill] sm:$0xff] %v5990_v13  ;;  %v1746_v42 = vsel %vm1630_vm4, %v5988_v22, 0.0  ;;  %v2265_v58 = vsel %vm1630_vm4, %v5990_v13, 0.0 }
 0x156   :  { %v1747_v54 = vadd.f32 %v1746_v42, %v1745_v31  ;;  %v2266_v21 = vadd.f32 %v2265_v58, %v2264_v41 }
 0x157   :  { %v6000_v7 = vpop.f32.mrb[60].mxu0  ;;  %v6002_v47 = vpop.f32.mrb[60].mxu1 }
 0x158   :  { %9418 = vst [vmem:[#allocation78_spill] sm:$0xff] %v6000_v7  ;;  %9419 = vst [vmem:[#allocation79_spill] sm:$0xff] %v6002_v47  ;;  %v6004_v2 = vpop.f32.mrb[61].mxu0  ;;  %v1749_v19 = vadd.f32 %v1748_v28, %v1747_v54  ;;  %v6006_v46 = vpop.f32.mrb[61].mxu1  ;;  %v2268_v22 = vadd.f32 %v2267_v11, %v2266_v21  ;;  %v1752_v5 = vsel %vm1630_vm4, %v6000_v7, 0.0  ;;  %v2271_v13 = vsel %vm1630_vm4, %v6002_v47, 0.0 }
 0x159   :  { %9420 = vst [vmem:[#allocation80_spill] sm:$0xff] %v6004_v2  ;;  %9421 = vst [vmem:[#allocation81_spill] sm:$0xff] %v6006_v46  ;;  %v1750_v31 = vsel %vm1630_vm4, %v6004_v2, 0.0  ;;  %v2269_v41 = vsel %vm1630_vm4, %v6006_v46, 0.0 }
 0x15a   :  { %v1751_v42 = vadd.f32 %v1750_v31, %v1749_v19  ;;  %v2270_v58 = vadd.f32 %v2269_v41, %v2268_v22 }
 0x15b   :  { %v6016_v17 = vpop.f32.mrb[62].mxu0  ;;  %v6018_v28 = vpop.f32.mrb[62].mxu1 }
 0x15c   :  { %v6020_v54 = vpop.f32.mrb[63].mxu0  ;;  %v1753_v11 = vadd.f32 %v1752_v5, %v1751_v42  ;;  %v6022_v21 = vpop.f32.mrb[63].mxu1  ;;  %v2272_v2 = vadd.f32 %v2271_v13, %v2270_v58  ;;  %v1756_v47 = vsel %vm1630_vm4, %v6016_v17, 0.0  ;;  %v2275_v46 = vsel %vm1630_vm4, %v6018_v28, 0.0 }
 0x15d   :  { %9422 = vst [vmem:[#allocation82_spill] sm:$0xff] %v6020_v54  ;;  %v1754_v19 = vsel %vm1630_vm4, %v6020_v54, 0.0  ;;  %v2273_v22 = vsel %vm1630_vm4, %v6022_v21, 0.0 }
 0x15e   :  { %v1755_v31 = vadd.f32 %v1754_v19, %v1753_v11  ;;  %v2274_v41 = vadd.f32 %v2273_v22, %v2272_v2  ;;  %v9448_v19 = vld [vmem:[#allocation52_spill] sm:$0xff]  ;;  %v9450_v22 = vld [vmem:[#allocation50_spill] sm:$0xff] }
 0x160   :  { %v1757_v7 = vadd.f32 %v1756_v47, %v1755_v31  ;;  %v6032_v59 = vadd.f32 %v2275_v46, %v2274_v41  ;;  %v9444_v46 = vld [vmem:[#allocation48_spill] sm:$0xff]  ;;  %v9454_v41 = vld [vmem:[#allocation54_spill] sm:$0xff] }
 0x161   :  { %v9452_v31 = vld [vmem:[#allocation56_spill] sm:$0xff] }
 0x162   :  { %v1886_v5 = vrot.slane %v1757_v7, 4 }
 0x164   :  { %v1887_v42 = vadd.f32 %v1886_v5, %v1757_v7 }
 0x166   :  { %v1888_v13 = vrot.slane %v1887_v42, 2 }
 0x168   :  { %v1889_v58 = vadd.f32 %v1888_v13, %v1887_v42  ;;  %v9456_v42 = vld [vmem:[#allocation60_spill] sm:$0xff] }
 0x16a   :  { %v1890_v27 = vrot.slane %v1889_v58, 1 }
 0x16c   :  { %v1891_v54 = vadd.f32 %v1890_v27, %v1889_v58  ;;  %v9458_v58 = vld [vmem:[#allocation58_spill] sm:$0xff] }
 0x16e   :  { %v6034_v61 = vmul.f32 0.001953125, %v1891_v54  ;;  %v9446_v54 = vld [vmem:[#allocation46_spill] sm:$0xff] }
 0x170   :  { %v6038_v2 = vsub.f32 %v5528_v10, %v6034_v61  ;;  %v6042_v11 = vsub.f32 %v5520_v6, %v6034_v61  ;;  %v6046_v47 = vsub.f32 %v5540_v18, %v6034_v61  ;;  %v6050_v7 = vsub.f32 %v5536_v16, %v6034_v61 }
 0x171   :  { %v6054_v27 = vsub.f32 %v5556_v30, %v6034_v61  ;;  %v6058_v10 = vsub.f32 %v5552_v26, %v6034_v61  ;;  %v6062_v6 = vsub.f32 %v5572_v40, %v6034_v61  ;;  %v6066_v18 = vsub.f32 %v5568_v38, %v6034_v61 }
 0x172   :  { %9423 = vst [vmem:[#allocation83_spill] sm:$0xff] %v6038_v2  ;;  %9424 = vst [vmem:[#allocation84_spill] sm:$0xff] %v6042_v11  ;;  %v6070_v16 = vsub.f32 %v5588_v52, %v6034_v61  ;;  %v6074_v30 = vsub.f32 %v5584_v50, %v6034_v61  ;;  %v6078_v26 = vsub.f32 %v5604_v0, %v6034_v61 }
 0x173   :  { %9425 = vst [vmem:[#allocation85_spill] sm:$0xff] %v6046_v47  ;;  %9426 = vst [vmem:[#allocation86_spill] sm:$0xff] %v6050_v7  ;;  %v6082_v40 = vsub.f32 %v5600_v62, %v6034_v61  ;;  %v6086_v38 = vsub.f32 %v5620_v20, %v6034_v61  ;;  %v6090_v52 = vsub.f32 %v5616_v14, %v6034_v61 }
 0x174   :  { %9427 = vst [vmem:[#allocation87_spill] sm:$0xff] %v6054_v27  ;;  %9428 = vst [vmem:[#allocation88_spill] sm:$0xff] %v6058_v10  ;;  %v6094_v50 = vsub.f32 %v5636_v36, %v6034_v61  ;;  %v6098_v0 = vsub.f32 %v5632_v34, %v6034_v61  ;;  %v6102_v62 = vsub.f32 %v5652_v56, %v6034_v61 }
 0x175   :  { %9429 = vst [vmem:[#allocation89_spill] sm:$0xff] %v6062_v6  ;;  %9430 = vst [vmem:[#allocation90_spill] sm:$0xff] %v6066_v18  ;;  %v6106_v20 = vsub.f32 %v5648_v53, %v6034_v61  ;;  %v6110_v14 = vsub.f32 %v5668_v12, %v6034_v61  ;;  %v6114_v36 = vsub.f32 %v5664_v8, %v6034_v61 }
 0x176   :  { %9431 = vst [vmem:[#allocation91_spill] sm:$0xff] %v6070_v16  ;;  %9432 = vst [vmem:[#allocation92_spill] sm:$0xff] %v6074_v30  ;;  %v6118_v34 = vsub.f32 %v5684_v44, %v6034_v61  ;;  %v6122_v56 = vsub.f32 %v5680_v37, %v6034_v61  ;;  %v6126_v53 = vsub.f32 %v5700_v4, %v6034_v61 }
 0x177   :  { %9433 = vst [vmem:[#allocation93_spill] sm:$0xff] %v6078_v26  ;;  %9434 = vst [vmem:[#allocation94_spill] sm:$0xff] %v6082_v40  ;;  %v6130_v12 = vsub.f32 %v5696_v1, %v6034_v61  ;;  %v6134_v8 = vsub.f32 %v5716_v48, %v6034_v61  ;;  %v6138_v44 = vsub.f32 %v5712_v45, %v6034_v61 }
 0x178   :  { %9435 = vst [vmem:[#allocation95_spill] sm:$0xff] %v6086_v38  ;;  %9436 = vst [vmem:[#allocation96_spill] sm:$0xff] %v6090_v52  ;;  %v6142_v37 = vsub.f32 %v5732_v32, %v6034_v61  ;;  %v6146_v4 = vsub.f32 %v5728_v3, %v6034_v61  ;;  %v6150_v1 = vsub.f32 %v5748_v24, %v6034_v61 }
 0x179   :  { %9437 = vst [vmem:[#allocation97_spill] sm:$0xff] %v6094_v50  ;;  %9438 = vst [vmem:[#allocation98_spill] sm:$0xff] %v6098_v0  ;;  %v6154_v48 = vsub.f32 %v5744_v43, %v6034_v61  ;;  %v6158_v45 = vsub.f32 %v5764_v60, %v6034_v61  ;;  %v6162_v32 = vsub.f32 %v5760_v9, %v6034_v61 }
 0x17a   :  { %9439 = vst [vmem:[#allocation99_spill] sm:$0xff] %v6102_v62  ;;  %9440 = vst [vmem:[#allocation100_spill] sm:$0xff] %v6106_v20  ;;  %v6166_v3 = vsub.f32 %v5780_v49, %v6034_v61  ;;  %v6170_v24 = vsub.f32 %v5776_v55, %v6034_v61  ;;  %v6174_v43 = vsub.f32 %v5796_v29, %v6034_v61 }
 0x17b   :  { %9441 = vst [vmem:[#allocation101_spill] sm:$0xff] %v6110_v14  ;;  %9442 = vst [vmem:[#allocation102_spill] sm:$0xff] %v6114_v36  ;;  %v6178_v60 = vsub.f32 %v5792_v35, %v6034_v61  ;;  %v6182_v9 = vsub.f32 %v5812_v23, %v6034_v61  ;;  %v6186_v49 = vsub.f32 %v5808_v15, %v6034_v61 }
 0x17c   :  { %9443 = vst [vmem:[#allocation103_spill] sm:$0xff] %v6118_v34  ;;  %v6190_v55 = vsub.f32 %v5828_v57, %v6034_v61  ;;  %v6194_v29 = vsub.f32 %v5824_v63, %v6034_v61  ;;  %v6198_v35 = vsub.f32 %v5844_v33, %v6034_v61  ;;  %v6202_v23 = vsub.f32 %v5840_v51, %v6034_v61 }
 0x17d   :  { %v6206_v15 = vsub.f32 %v5860_v25, %v6034_v61  ;;  %v6210_v57 = vsub.f32 %v5856_v39, %v6034_v61  ;;  %v6214_v63 = vsub.f32 %v9444_v46, %v6034_v61  ;;  %v6218_v33 = vsub.f32 %v9446_v54, %v6034_v61  ;;  %v9460_v54 = vld [vmem:[#allocation64_spill] sm:$0xff] }
 0x17e   :  { %v6222_v51 = vsub.f32 %v9448_v19, %v6034_v61  ;;  %v6226_v25 = vsub.f32 %v9450_v22, %v6034_v61  ;;  %v6230_v39 = vsub.f32 %v9452_v31, %v6034_v61  ;;  %v6234_v5 = vsub.f32 %v9454_v41, %v6034_v61  ;;  %v9462_v22 = vld [vmem:[#allocation62_spill] sm:$0xff] }
 0x17f   :  { %9445 = vst [vmem:[#allocation48_spill] sm:$0xff] %v6214_v63  ;;  %9447 = vst [vmem:[#allocation46_spill] sm:$0xff] %v6218_v33  ;;  %v6238_v13 = vsub.f32 %v9456_v42, %v6034_v61  ;;  %v6242_v46 = vsub.f32 %v9458_v58, %v6034_v61  ;;  %v6246_v19 = vsub.f32 %v9460_v54, %v6034_v61 }
 0x180   :  { %9449 = vst [vmem:[#allocation52_spill] sm:$0xff] %v6222_v51  ;;  %9451 = vst [vmem:[#allocation50_spill] sm:$0xff] %v6226_v25  ;;  %v6250_v31 = vsub.f32 %v9462_v22, %v6034_v61 }
 0x181   :  { %9453 = vst [vmem:[#allocation56_spill] sm:$0xff] %v6230_v39  ;;  %9455 = vst [vmem:[#allocation54_spill] sm:$0xff] %v6234_v5  ;;  %v9464_v39 = vld [vmem:[#allocation68_spill] sm:$0xff]  ;;  %v9466_v5 = vld [vmem:[#allocation66_spill] sm:$0xff] }
 0x182   :  { %9457 = vst [vmem:[#allocation60_spill] sm:$0xff] %v6238_v13  ;;  %9459 = vst [vmem:[#allocation58_spill] sm:$0xff] %v6242_v46  ;;  %v6254_v41 = vsub.f32 %v9464_v39, %v6034_v61  ;;  %v6258_v42 = vsub.f32 %v9466_v5, %v6034_v61  ;;  %v9468_v13 = vld [vmem:[#allocation72_spill] sm:$0xff]  ;;  %v9470_v46 = vld [vmem:[#allocation70_spill] sm:$0xff] }
 0x183   :  { %9461 = vst [vmem:[#allocation64_spill] sm:$0xff] %v6246_v19  ;;  %9463 = vst [vmem:[#allocation62_spill] sm:$0xff] %v6250_v31  ;;  %v6262_v58 = vsub.f32 %v9468_v13, %v6034_v61  ;;  %v6266_v54 = vsub.f32 %v9470_v46, %v6034_v61  ;;  %v9472_v19 = vld [vmem:[#allocation76_spill] sm:$0xff]  ;;  %v9474_v31 = vld [vmem:[#allocation74_spill] sm:$0xff] }
 0x184   :  { %9465 = vst [vmem:[#allocation68_spill] sm:$0xff] %v6254_v41  ;;  %9467 = vst [vmem:[#allocation66_spill] sm:$0xff] %v6258_v42  ;;  %v6270_v22 = vsub.f32 %v9472_v19, %v6034_v61  ;;  %v6274_v39 = vsub.f32 %v9474_v31, %v6034_v61  ;;  %v9476_v41 = vld [vmem:[#allocation80_spill] sm:$0xff]  ;;  %v9478_v42 = vld [vmem:[#allocation78_spill] sm:$0xff]  ;;  %v6290_v19 = vsub.f32 %v6016_v17, %v6034_v61 }
 0x185   :  { %9469 = vst [vmem:[#allocation72_spill] sm:$0xff] %v6262_v58  ;;  %9471 = vst [vmem:[#allocation70_spill] sm:$0xff] %v6266_v54  ;;  %v6278_v5 = vsub.f32 %v9476_v41, %v6034_v61  ;;  %v6282_v13 = vsub.f32 %v9478_v42, %v6034_v61  ;;  %v9480_v58 = vld [vmem:[#allocation82_spill] sm:$0xff]  ;;  %v2540_v41 = vmul.f32 %v6038_v2, %v6038_v2 }
 0x186   :  { %9473 = vst [vmem:[#allocation76_spill] sm:$0xff] %v6270_v22  ;;  %9475 = vst [vmem:[#allocation74_spill] sm:$0xff] %v6274_v39  ;;  %v6286_v46 = vsub.f32 %v9480_v58, %v6034_v61  ;;  %v2277_v22 = vrot.slane %v6032_v59, 4  ;;  %v2542_v42 = vmul.f32 %v6046_v47, %v6046_v47  ;;  %v2543_v58 = vmul.f32 %v6050_v7, %v6050_v7 }
 0x187   :  { %9477 = vst [vmem:[#allocation80_spill] sm:$0xff] %v6278_v5  ;;  %9479 = vst [vmem:[#allocation78_spill] sm:$0xff] %v6282_v13  ;;  %v2541_v5 = vmul.f32 %v6042_v11, %v6042_v11  ;;  %v2796_v17 = vsel %vm1630_vm4, %v2540_v41, 0.0  ;;  %v2545_v11 = vmul.f32 %v6058_v10, %v6058_v10  ;;  %v2546_v7 = vmul.f32 %v6062_v6, %v6062_v6 }
 0x188   :  { %9481 = vst [vmem:[#allocation82_spill] sm:$0xff] %v6286_v46  ;;  %9482 = vst [vmem:[#allocation104_spill] sm:$0xff] %v6290_v19  ;;  %v2278_v31 = vadd.f32 %v2277_v22, %v6032_v59  ;;  %v2544_v59 = vmul.f32 %v6054_v27, %v6054_v27  ;;  %v2799_v22 = vsel %vm1630_vm4, %v2542_v42, 0.0  ;;  %v2801_v47 = vsel %vm1630_vm4, %v2543_v58, 0.0 }
 0x189   :  { %v2797_v61 = vsel %vm1630_vm4, %v2541_v5, 0.0  ;;  %v2805_v42 = vsel %vm1630_vm4, %v2545_v11, 0.0  ;;  %v2552_v11 = vmul.f32 %v6086_v38, %v6086_v38 }
 0x18a   :  { %v2279_v13 = vrot.slane %v2278_v31, 2  ;;  %v2798_v19 = vadd.f32 %v2797_v61, %v2796_v17  ;;  %v2803_v41 = vsel %vm1630_vm4, %v2544_v59, 0.0  ;;  %v2547_v61 = vmul.f32 %v6066_v18, %v6066_v18 }
 0x18c   :  { %v2280_v2 = vadd.f32 %v2279_v13, %v2278_v31  ;;  %v2800_v46 = vadd.f32 %v2799_v22, %v2798_v19  ;;  %v2548_v19 = vmul.f32 %v6070_v16, %v6070_v16  ;;  %v2807_v31 = vsel %vm1630_vm4, %v2546_v7, 0.0 }
 0x18d   :  { %v2553_v22 = vmul.f32 %v6090_v52, %v6090_v52  ;;  %v2554_v7 = vmul.f32 %v6094_v50, %v6094_v50 }
 0x18e   :  { %v2802_v39 = vadd.f32 %v2801_v47, %v2800_v46  ;;  %v2281_v5 = vrot.slane %v2280_v2, 1  ;;  %v2549_v47 = vmul.f32 %v6074_v30, %v6074_v30  ;;  %v2550_v46 = vmul.f32 %v6078_v26, %v6078_v26 }
 0x18f   :  { %v2811_v50 = vsel %vm1630_vm4, %v2548_v19, 0.0 }
 0x190   :  { %v2804_v17 = vadd.f32 %v2803_v41, %v2802_v39  ;;  %v2282_v58 = vadd.f32 %v2281_v5, %v2280_v2  ;;  %v2551_v39 = vmul.f32 %v6082_v40, %v6082_v40  ;;  %v2809_v2 = vsel %vm1630_vm4, %v2547_v61, 0.0 }
 0x191   :  { %v2555_v41 = vmul.f32 %v6098_v0, %v6098_v0  ;;  %v2556_v5 = vmul.f32 %v6102_v62, %v6102_v62  ;;  %v6349_v0 = vmul.f32 %v6118_v34, %v6118_v34  ;;  %v2813_v52 = vsel %vm1630_vm4, %v2549_v47, 0.0  ;;  %v9483_v47 = vld [vmem:[#allocation3_spill] sm:$0xff] }
 0x192   :  { %v2806_v13 = vadd.f32 %v2805_v42, %v2804_v17  ;;  %v2557_v17 = vmul.f32 %v6106_v20, %v6106_v20  ;;  %v6345_v61 = vmul.f32 0.001953125, %v2282_v58  ;;  %v2823_v20 = vsel %vm1630_vm4, %v2554_v7, 0.0  ;;  %v9489_v7 = vld [vmem:[#allocation4_spill] sm:$0xff] }
 0x193   :  { %v2825_v58 = vsel %vm1630_vm4, %v2555_v41, 0.0  ;;  %v2827_v38 = vsel %vm1630_vm4, %v2556_v5, 0.0  ;;  %v9491_v5 = vld [vmem:[#allocation7_spill] sm:$0xff] }
 0x194   :  { %v2808_v59 = vadd.f32 %v2807_v31, %v2806_v13  ;;  %v2558_v13 = vmul.f32 %v6110_v14, %v6110_v14  ;;  %v6342_v31 = vmul.f32 %v6114_v36, %v6114_v36  ;;  %v2819_v14 = vsel %vm1630_vm4, %v2552_v11, 0.0 }
 0x195   :  { %v2821_v36 = vsel %vm1630_vm4, %v2553_v22, 0.0  ;;  %v2829_v34 = vsel %vm1630_vm4, %v2557_v17, 0.0  ;;  %v9487_v22 = vld [vmem:[#allocation5_spill] sm:$0xff]  ;;  %v6377_v41 = vsub.f32 %v9489_v7, %v6345_v61  ;;  %v6381_v17 = vsub.f32 %v9491_v5, %v6345_v61  ;;  %v9501_v7 = vld [vmem:[#allocation10_spill] sm:$0xff] }
 0x196   :  { %v2810_v42 = vadd.f32 %v2809_v2, %v2808_v59  ;;  %v2815_v59 = vsel %vm1630_vm4, %v2550_v46, 0.0  ;;  %v2817_v2 = vsel %vm1630_vm4, %v2551_v39, 0.0  ;;  %v6365_v46 = vsub.f32 %v9483_v47, %v6345_v61  ;;  %v9485_v39 = vld [vmem:[#allocation2_spill] sm:$0xff]  ;;  %v9495_v47 = vld [vmem:[#allocation9_spill] sm:$0xff] }
 0x197   :  { %v6369_v11 = vsub.f32 %v9485_v39, %v6345_v61  ;;  %9490 = vst [vmem:[#allocation4_spill] sm:$0xff] %v6377_v41  ;;  %9492 = vst [vmem:[#allocation7_spill] sm:$0xff] %v6381_v17  ;;  %v6389_v39 = vsub.f32 %v9495_v47, %v6345_v61  ;;  %v6401_v5 = vsub.f32 %v9501_v7, %v6345_v61  ;;  %v9505_v47 = vld [vmem:[#allocation12_spill] sm:$0xff]  ;;  %v9511_v7 = vld [vmem:[#allocation17_spill] sm:$0xff] }
 0x198   :  { %v2812_v62 = vadd.f32 %v2811_v50, %v2810_v42  ;;  %v6361_v50 = vsel %vm1630_vm4, %v2558_v13, 0.0  ;;  %9484 = vst [vmem:[#allocation3_spill] sm:$0xff] %v6365_v46  ;;  %v9493_v42 = vld [vmem:[#allocation6_spill] sm:$0xff]  ;;  %v6409_v16 = vsub.f32 %v9505_v47, %v6345_v61  ;;  %v6421_v10 = vsub.f32 %v9511_v7, %v6345_v61  ;;  %v9521_v7 = vld [vmem:[#allocation20_spill] sm:$0xff] }
 0x199   :  { %9486 = vst [vmem:[#allocation2_spill] sm:$0xff] %v6369_v11  ;;  %v6385_v13 = vsub.f32 %v9493_v42, %v6345_v61  ;;  %9496 = vst [vmem:[#allocation9_spill] sm:$0xff] %v6389_v39  ;;  %v9503_v42 = vld [vmem:[#allocation13_spill] sm:$0xff]  ;;  %v6441_v51 = vsub.f32 %v9521_v7, %v6345_v61  ;;  %v9531_v7 = vld [vmem:[#allocation27_spill] sm:$0xff] }
 0x19a   :  { %v2814_v19 = vadd.f32 %v2813_v52, %v2812_v62  ;;  %v6373_v52 = vsub.f32 %v9487_v22, %v6345_v61  ;;  %v9497_v22 = vld [vmem:[#allocation8_spill] sm:$0xff]  ;;  %9502 = vst [vmem:[#allocation10_spill] sm:$0xff] %v6401_v5  ;;  %v6405_v30 = vsub.f32 %v9503_v42, %v6345_v61  ;;  %9506 = vst [vmem:[#allocation12_spill] sm:$0xff] %v6409_v16  ;;  %v9515_v42 = vld [vmem:[#allocation19_spill] sm:$0xff] }
 0x19b   :  { %9494 = vst [vmem:[#allocation6_spill] sm:$0xff] %v6385_v13  ;;  %v6393_v40 = vsub.f32 %v9497_v22, %v6345_v61  ;;  %v9507_v22 = vld [vmem:[#allocation15_spill] sm:$0xff]  ;;  %9512 = vst [vmem:[#allocation17_spill] sm:$0xff] %v6421_v10  ;;  %v6429_v47 = vsub.f32 %v9515_v42, %v6345_v61  ;;  %v9525_v42 = vld [vmem:[#allocation22_spill] sm:$0xff] }
 0x19c   :  { %9488 = vst [vmem:[#allocation5_spill] sm:$0xff] %v6373_v52  ;;  %v2816_v62 = vadd.f32 %v2815_v59, %v2814_v19  ;;  %v9499_v59 = vld [vmem:[#allocation11_spill] sm:$0xff]  ;;  %9504 = vst [vmem:[#allocation13_spill] sm:$0xff] %v6405_v30  ;;  %v6413_v18 = vsub.f32 %v9507_v22, %v6345_v61  ;;  %v9517_v22 = vld [vmem:[#allocation18_spill] sm:$0xff]  ;;  %v6449_v63 = vsub.f32 %v9525_v42, %v6345_v61 }
 0x19d   :  { %9498 = vst [vmem:[#allocation8_spill] sm:$0xff] %v6393_v40  ;;  %v6397_v19 = vsub.f32 %v9499_v59, %v6345_v61  ;;  %v9509_v59 = vld [vmem:[#allocation14_spill] sm:$0xff]  ;;  %9516 = vst [vmem:[#allocation19_spill] sm:$0xff] %v6429_v47  ;;  %v6433_v54 = vsub.f32 %v9517_v22, %v6345_v61  ;;  %v9529_v22 = vld [vmem:[#allocation24_spill] sm:$0xff] }
 0x19e   :  { %v2818_v26 = vadd.f32 %v2817_v2, %v2816_v62  ;;  %9508 = vst [vmem:[#allocation15_spill] sm:$0xff] %v6413_v18  ;;  %v6417_v6 = vsub.f32 %v9509_v59, %v6345_v61  ;;  %v9513_v2 = vld [vmem:[#allocation16_spill] sm:$0xff]  ;;  %v9519_v59 = vld [vmem:[#allocation21_spill] sm:$0xff]  ;;  %9522 = vst [vmem:[#allocation20_spill] sm:$0xff] %v6441_v51  ;;  %v6461_v51 = vsub.f32 %v9531_v7, %v6345_v61 }
 0x19f   :  { %9500 = vst [vmem:[#allocation11_spill] sm:$0xff] %v6397_v19  ;;  %v6425_v62 = vsub.f32 %v9513_v2, %v6345_v61  ;;  %9518 = vst [vmem:[#allocation18_spill] sm:$0xff] %v6433_v54  ;;  %v6437_v25 = vsub.f32 %v9519_v59, %v6345_v61  ;;  %v9523_v2 = vld [vmem:[#allocation23_spill] sm:$0xff]  ;;  %v6457_v59 = vsub.f32 %v9529_v22, %v6345_v61  ;;  %v9535_v42 = vld [vmem:[#allocation29_spill] sm:$0xff] }
 0x1a0   :  { %9510 = vst [vmem:[#allocation14_spill] sm:$0xff] %v6417_v6  ;;  %v2820_v27 = vadd.f32 %v2819_v14, %v2818_v26  ;;  %v6445_v33 = vsub.f32 %v9523_v2, %v6345_v61  ;;  %9526 = vst [vmem:[#allocation22_spill] sm:$0xff] %v6449_v63  ;;  %v9527_v26 = vld [vmem:[#allocation25_spill] sm:$0xff]  ;;  %v9533_v2 = vld [vmem:[#allocation26_spill] sm:$0xff]  ;;  %v6469_v63 = vsub.f32 %v9535_v42, %v6345_v61 }
 0x1a1   :  { %9514 = vst [vmem:[#allocation16_spill] sm:$0xff] %v6425_v62  ;;  %9520 = vst [vmem:[#allocation21_spill] sm:$0xff] %v6437_v25  ;;  %v6453_v14 = vsub.f32 %v9527_v26, %v6345_v61  ;;  %v9537_v26 = vld [vmem:[#allocation28_spill] sm:$0xff]  ;;  %v9539_v22 = vld [vmem:[#allocation31_spill] sm:$0xff] }
 0x1a2   :  { %9524 = vst [vmem:[#allocation23_spill] sm:$0xff] %v6445_v33  ;;  %9530 = vst [vmem:[#allocation24_spill] sm:$0xff] %v6457_v59  ;;  %v2822_v25 = vadd.f32 %v2821_v36, %v2820_v27  ;;  %v6465_v33 = vsub.f32 %v9533_v2, %v6345_v61  ;;  %v6477_v59 = vsub.f32 %v9539_v22, %v6345_v61  ;;  %v9541_v27 = vld [vmem:[#allocation30_spill] sm:$0xff]  ;;  %v9543_v7 = vld [vmem:[#allocation33_spill] sm:$0xff] }
 0x1a3   :  { %9528 = vst [vmem:[#allocation25_spill] sm:$0xff] %v6453_v14  ;;  %9532 = vst [vmem:[#allocation27_spill] sm:$0xff] %v6461_v51  ;;  %v6473_v14 = vsub.f32 %v9537_v26, %v6345_v61  ;;  %v6481_v36 = vsub.f32 %v9541_v27, %v6345_v61  ;;  %v6485_v2 = vsub.f32 %v9543_v7, %v6345_v61  ;;  %v9545_v42 = vld [vmem:[#allocation32_spill] sm:$0xff]  ;;  %v9547_v26 = vld [vmem:[#allocation35_spill] sm:$0xff] }
 0x1a4   :  { %9534 = vst [vmem:[#allocation26_spill] sm:$0xff] %v6465_v33  ;;  %9536 = vst [vmem:[#allocation29_spill] sm:$0xff] %v6469_v63  ;;  %v2824_v33 = vadd.f32 %v2823_v20, %v2822_v25  ;;  %v6489_v63 = vsub.f32 %v9545_v42, %v6345_v61  ;;  %v9549_v22 = vld [vmem:[#allocation34_spill] sm:$0xff]  ;;  %v9551_v27 = vld [vmem:[#allocation37_spill] sm:$0xff] }
 0x1a5   :  { %9538 = vst [vmem:[#allocation28_spill] sm:$0xff] %v6473_v14  ;;  %9540 = vst [vmem:[#allocation31_spill] sm:$0xff] %v6477_v59  ;;  %v6493_v14 = vsub.f32 %v9547_v26, %v6345_v61  ;;  %v6497_v59 = vsub.f32 %v9549_v22, %v6345_v61  ;;  %v9553_v7 = vld [vmem:[#allocation36_spill] sm:$0xff]  ;;  %v9555_v20 = vld [vmem:[#allocation39_spill] sm:$0xff] }
 0x1a6   :  { %9542 = vst [vmem:[#allocation30_spill] sm:$0xff] %v6481_v36  ;;  %9544 = vst [vmem:[#allocation33_spill] sm:$0xff] %v6485_v2  ;;  %v6501_v36 = vsub.f32 %v9551_v27, %v6345_v61  ;;  %v6505_v2 = vsub.f32 %v9553_v7, %v6345_v61  ;;  %v6509_v25 = vsub.f32 %v9555_v20, %v6345_v61  ;;  %v9557_v42 = vld [vmem:[#allocation38_spill] sm:$0xff]  ;;  %v9559_v22 = vld [vmem:[#allocation41_spill] sm:$0xff] }
 0x1a7   :  { %9546 = vst [vmem:[#allocation32_spill] sm:$0xff] %v6489_v63  ;;  %9548 = vst [vmem:[#allocation35_spill] sm:$0xff] %v6493_v14  ;;  %v6513_v26 = vsub.f32 %v9557_v42, %v6345_v61  ;;  %v2826_v14 = vadd.f32 %v2825_v58, %v2824_v33  ;;  %v9561_v27 = vld [vmem:[#allocation40_spill] sm:$0xff]  ;;  %v9563_v7 = vld [vmem:[#allocation43_spill] sm:$0xff] }
 0x1a8   :  { %9550 = vst [vmem:[#allocation34_spill] sm:$0xff] %v6497_v59  ;;  %9552 = vst [vmem:[#allocation37_spill] sm:$0xff] %v6501_v36  ;;  %v6517_v59 = vsub.f32 %v9559_v22, %v6345_v61  ;;  %v6521_v36 = vsub.f32 %v9561_v27, %v6345_v61  ;;  %v9565_v20 = vld [vmem:[#allocation42_spill] sm:$0xff]  ;;  %v9567_v42 = vld [vmem:[#allocation45_spill] sm:$0xff] }
 0x1a9   :  { %9554 = vst [vmem:[#allocation36_spill] sm:$0xff] %v6505_v2  ;;  %9556 = vst [vmem:[#allocation39_spill] sm:$0xff] %v6509_v25  ;;  %v6525_v2 = vsub.f32 %v9563_v7, %v6345_v61  ;;  %v6529_v25 = vsub.f32 %v9565_v20, %v6345_v61  ;;  %v9569_v33 = vld [vmem:[#allocation44_spill] sm:$0xff]  ;;  %v9571_v22 = vld [vmem:[#allocation49_spill] sm:$0xff] }
 0x1aa   :  { %9558 = vst [vmem:[#allocation38_spill] sm:$0xff] %v6513_v26  ;;  %9560 = vst [vmem:[#allocation41_spill] sm:$0xff] %v6517_v59  ;;  %v6533_v26 = vsub.f32 %v9567_v42, %v6345_v61  ;;  %v6537_v58 = vsub.f32 %v9569_v33, %v6345_v61  ;;  %v6541_v27 = vsub.f32 %v9571_v22, %v6345_v61  ;;  %v9573_v7 = vld [vmem:[#allocation47_spill] sm:$0xff]  ;;  %v9575_v20 = vld [vmem:[#allocation53_spill] sm:$0xff] }
 0x1ab   :  { %9562 = vst [vmem:[#allocation40_spill] sm:$0xff] %v6521_v36  ;;  %9564 = vst [vmem:[#allocation43_spill] sm:$0xff] %v6525_v2  ;;  %v2828_v36 = vadd.f32 %v2827_v38, %v2826_v14  ;;  %v6545_v2 = vsub.f32 %v9573_v7, %v6345_v61  ;;  %v9577_v42 = vld [vmem:[#allocation51_spill] sm:$0xff]  ;;  %v9579_v33 = vld [vmem:[#allocation57_spill] sm:$0xff] }
 0x1ac   :  { %9566 = vst [vmem:[#allocation42_spill] sm:$0xff] %v6529_v25  ;;  %9568 = vst [vmem:[#allocation45_spill] sm:$0xff] %v6533_v26  ;;  %v6549_v25 = vsub.f32 %v9575_v20, %v6345_v61  ;;  %v6553_v26 = vsub.f32 %v9577_v42, %v6345_v61  ;;  %v9581_v22 = vld [vmem:[#allocation55_spill] sm:$0xff]  ;;  %v9583_v38 = vld [vmem:[#allocation61_spill] sm:$0xff] }
 0x1ad   :  { %9570 = vst [vmem:[#allocation44_spill] sm:$0xff] %v6537_v58  ;;  %9572 = vst [vmem:[#allocation49_spill] sm:$0xff] %v6541_v27  ;;  %v6557_v58 = vsub.f32 %v9579_v33, %v6345_v61  ;;  %v6561_v27 = vsub.f32 %v9581_v22, %v6345_v61  ;;  %v6565_v14 = vsub.f32 %v9583_v38, %v6345_v61  ;;  %v9585_v7 = vld [vmem:[#allocation59_spill] sm:$0xff]  ;;  %v9587_v42 = vld [vmem:[#allocation65_spill] sm:$0xff] }
 0x1ae   :  { %9574 = vst [vmem:[#allocation47_spill] sm:$0xff] %v6545_v2  ;;  %9576 = vst [vmem:[#allocation53_spill] sm:$0xff] %v6549_v25  ;;  %v6569_v20 = vsub.f32 %v9585_v7, %v6345_v61  ;;  %v2830_v25 = vadd.f32 %v2829_v34, %v2828_v36  ;;  %v9589_v33 = vld [vmem:[#allocation63_spill] sm:$0xff]  ;;  %v9591_v22 = vld [vmem:[#allocation69_spill] sm:$0xff] }
 0x1af   :  { %9578 = vst [vmem:[#allocation51_spill] sm:$0xff] %v6553_v26  ;;  %9580 = vst [vmem:[#allocation57_spill] sm:$0xff] %v6557_v58  ;;  %v6573_v26 = vsub.f32 %v9587_v42, %v6345_v61  ;;  %v6577_v58 = vsub.f32 %v9589_v33, %v6345_v61  ;;  %v9593_v38 = vld [vmem:[#allocation67_spill] sm:$0xff]  ;;  %v9595_v7 = vld [vmem:[#allocation73_spill] sm:$0xff] }
 0x1b0   :  { %9582 = vst [vmem:[#allocation55_spill] sm:$0xff] %v6561_v27  ;;  %9584 = vst [vmem:[#allocation61_spill] sm:$0xff] %v6565_v14  ;;  %v6581_v27 = vsub.f32 %v9591_v22, %v6345_v61  ;;  %v6585_v14 = vsub.f32 %v9593_v38, %v6345_v61  ;;  %v9597_v34 = vld [vmem:[#allocation71_spill] sm:$0xff]  ;;  %v9599_v42 = vld [vmem:[#allocation77_spill] sm:$0xff] }
 0x1b1   :  { %9586 = vst [vmem:[#allocation59_spill] sm:$0xff] %v6569_v20  ;;  %9588 = vst [vmem:[#allocation65_spill] sm:$0xff] %v6573_v26  ;;  %v6589_v20 = vsub.f32 %v9595_v7, %v6345_v61  ;;  %v6593_v36 = vsub.f32 %v9597_v34, %v6345_v61  ;;  %v6597_v33 = vsub.f32 %v9599_v42, %v6345_v61  ;;  %v9601_v22 = vld [vmem:[#allocation75_spill] sm:$0xff]  ;;  %v9603_v38 = vld [vmem:[#allocation81_spill] sm:$0xff]  ;;  %v2833_v42 = vsel %vm1630_vm4, %v6342_v31, 0.0 }
 0x1b2   :  { %9590 = vst [vmem:[#allocation63_spill] sm:$0xff] %v6577_v58  ;;  %9592 = vst [vmem:[#allocation69_spill] sm:$0xff] %v6581_v27  ;;  %v2832_v58 = vadd.f32 %v6361_v50, %v2830_v25  ;;  %v6602_v27 = vsub.f32 %v9601_v22, %v6345_v61  ;;  %v9605_v7 = vld [vmem:[#allocation79_spill] sm:$0xff]  ;;  %v2561_v34 = vmul.f32 %v6122_v56, %v6122_v56 }
 0x1b3   :  { %9594 = vst [vmem:[#allocation67_spill] sm:$0xff] %v6585_v14  ;;  %9596 = vst [vmem:[#allocation73_spill] sm:$0xff] %v6589_v20  ;;  %v6606_v14 = vsub.f32 %v9603_v38, %v6345_v61  ;;  %v6610_v20 = vsub.f32 %v9605_v7, %v6345_v61  ;;  %v6618_v50 = vsub.f32 %v6022_v21, %v6345_v61  ;;  %v2835_v7 = vsel %vm1630_vm4, %v6349_v0, 0.0 }
 0x1b4   :  { %9598 = vst [vmem:[#allocation71_spill] sm:$0xff] %v6593_v36  ;;  %9600 = vst [vmem:[#allocation77_spill] sm:$0xff] %v6597_v33  ;;  %v6622_v25 = vsub.f32 %v6018_v28, %v6345_v61  ;;  %v2834_v22 = vadd.f32 %v2833_v42, %v2832_v58  ;;  %v2562_v38 = vmul.f32 %v6126_v53, %v6126_v53  ;;  %v2837_v31 = vsel %vm1630_vm4, %v2561_v34, 0.0 }
 0x1b5   :  { %9602 = vst [vmem:[#allocation75_spill] sm:$0xff] %v6602_v27  ;;  %9604 = vst [vmem:[#allocation81_spill] sm:$0xff] %v6606_v14  ;;  %v2563_v14 = vmul.f32 %v6130_v12, %v6130_v12  ;;  %v2564_v21 = vmul.f32 %v6134_v8, %v6134_v8  ;;  %v2565_v58 = vmul.f32 %v6138_v44, %v6138_v44 }
 0x1b6   :  { %9606 = vst [vmem:[#allocation79_spill] sm:$0xff] %v6610_v20  ;;  %9607 = vst [vmem:[#allocation105_spill] sm:$0xff] %v6618_v50  ;;  %v2836_v20 = vadd.f32 %v2835_v7, %v2834_v22  ;;  %v2839_v28 = vsel %vm1630_vm4, %v2562_v38, 0.0  ;;  %v2566_v0 = vmul.f32 %v6142_v37, %v6142_v37 }
 0x1b7   :  { %9608 = vst [vmem:[#allocation106_spill] sm:$0xff] %v6622_v25  ;;  %v2841_v42 = vsel %vm1630_vm4, %v2563_v14, 0.0  ;;  %v2843_v22 = vsel %vm1630_vm4, %v2564_v21, 0.0  ;;  %v2845_v34 = vsel %vm1630_vm4, %v2565_v58, 0.0  ;;  %v2604_v14 = vmul.f32 %v6365_v46, %v6365_v46 }
 0x1b8   :  { %v2838_v27 = vadd.f32 %v2837_v31, %v2836_v20  ;;  %v2567_v20 = vmul.f32 %v6146_v4, %v6146_v4  ;;  %v2847_v38 = vsel %vm1630_vm4, %v2566_v0, 0.0  ;;  %v2606_v58 = vmul.f32 %v6373_v52, %v6373_v52 }
 0x1ba   :  { %v2840_v61 = vadd.f32 %v2839_v28, %v2838_v27  ;;  %v2568_v27 = vmul.f32 %v6150_v1, %v6150_v1  ;;  %v2849_v21 = vsel %vm1630_vm4, %v2567_v20, 0.0  ;;  %v2571_v20 = vmul.f32 %v6162_v32, %v6162_v32 }
 0x1bc   :  { %v2842_v25 = vadd.f32 %v2841_v42, %v2840_v61  ;;  %v2605_v61 = vmul.f32 %v6369_v11, %v6369_v11  ;;  %v2851_v0 = vsel %vm1630_vm4, %v2568_v27, 0.0  ;;  %v2608_v11 = vmul.f32 %v6381_v17, %v6381_v17 }
 0x1bd   :  { %v3317_v27 = vsel %vm1630_vm4, %v2606_v58, 0.0  ;;  %v2610_v58 = vmul.f32 %v6389_v39, %v6389_v39 }
 0x1be   :  { %v2844_v7 = vadd.f32 %v2843_v22, %v2842_v25  ;;  %v2569_v25 = vmul.f32 %v6154_v48, %v6154_v48  ;;  %v2570_v22 = vmul.f32 %v6158_v45, %v6158_v45 }
 0x1c0   :  { %v2846_v31 = vadd.f32 %v2845_v34, %v2844_v7  ;;  %v3313_v7 = vsel %vm1630_vm4, %v2604_v14, 0.0  ;;  %v2572_v14 = vmul.f32 %v6166_v3, %v6166_v3 }
 0x1c2   :  { %v2848_v28 = vadd.f32 %v2847_v38, %v2846_v31  ;;  %v2607_v31 = vmul.f32 %v6377_v41, %v6377_v41  ;;  %v3315_v38 = vsel %vm1630_vm4, %v2605_v61, 0.0  ;;  %v2609_v61 = vmul.f32 %v6385_v13, %v6385_v13 }
 0x1c4   :  { %v2850_v42 = vadd.f32 %v2849_v21, %v2848_v28  ;;  %v2853_v28 = vsel %vm1630_vm4, %v2569_v25, 0.0  ;;  %v3316_v21 = vadd.f32 %v3315_v38, %v3313_v7  ;;  %v3319_v46 = vsel %vm1630_vm4, %v2607_v31, 0.0 }
 0x1c5   :  { %v2573_v25 = vmul.f32 %v6170_v24, %v6170_v24  ;;  %v2857_v7 = vsel %vm1630_vm4, %v2571_v20, 0.0  ;;  %v2611_v31 = vmul.f32 %v6393_v40, %v6393_v40 }
 0x1c6   :  { %v2852_v34 = vadd.f32 %v2851_v0, %v2850_v42  ;;  %v2855_v42 = vsel %vm1630_vm4, %v2570_v22, 0.0  ;;  %v3318_v0 = vadd.f32 %v3317_v27, %v3316_v21  ;;  %v2859_v22 = vsel %vm1630_vm4, %v2572_v14, 0.0 }
 0x1c7   :  { %v2576_v14 = vmul.f32 %v6182_v9, %v6182_v9 }
 0x1c8   :  { %v2854_v52 = vadd.f32 %v2853_v28, %v2852_v34  ;;  %v3320_v34 = vadd.f32 %v3319_v46, %v3318_v0  ;;  %v3321_v28 = vsel %vm1630_vm4, %v2608_v11, 0.0  ;;  %v2575_v46 = vmul.f32 %v6178_v60, %v6178_v60 }
 0x1c9   :  { %v2612_v11 = vmul.f32 %v6397_v19, %v6397_v19 }
 0x1ca   :  { %v2856_v41 = vadd.f32 %v2855_v42, %v2854_v52  ;;  %v2574_v52 = vmul.f32 %v6174_v43, %v6174_v43  ;;  %v3322_v21 = vadd.f32 %v3321_v28, %v3320_v34  ;;  %v3323_v42 = vsel %vm1630_vm4, %v2609_v61, 0.0 }
 0x1cb   :  { %v2613_v61 = vmul.f32 %v6401_v5, %v6401_v5 }
 0x1cc   :  { %v2858_v38 = vadd.f32 %v2857_v7, %v2856_v41  ;;  %v2861_v41 = vsel %vm1630_vm4, %v2573_v25, 0.0  ;;  %v3324_v20 = vadd.f32 %v3323_v42, %v3322_v21  ;;  %v3325_v7 = vsel %vm1630_vm4, %v2610_v58, 0.0 }
 0x1cd   :  { %v2863_v34 = vsel %vm1630_vm4, %v2574_v52, 0.0  ;;  %v2577_v25 = vmul.f32 %v6186_v49, %v6186_v49  ;;  %v2865_v21 = vsel %vm1630_vm4, %v2575_v46, 0.0  ;;  %v2614_v58 = vmul.f32 %v6405_v30, %v6405_v30 }
 0x1ce   :  { %v2860_v27 = vadd.f32 %v2859_v22, %v2858_v38  ;;  %v3326_v38 = vadd.f32 %v3325_v7, %v3324_v20  ;;  %v3327_v22 = vsel %vm1630_vm4, %v2611_v31, 0.0  ;;  %v2578_v52 = vmul.f32 %v6190_v55, %v6190_v55 }
 0x1cf   :  { %v2867_v20 = vsel %vm1630_vm4, %v2576_v14, 0.0  ;;  %v2615_v31 = vmul.f32 %v6409_v16, %v6409_v16  ;;  %v2579_v46 = vmul.f32 %v6194_v29, %v6194_v29  ;;  %v2580_v14 = vmul.f32 %v6198_v35, %v6198_v35 }
 0x1d0   :  { %v2862_v0 = vadd.f32 %v2861_v41, %v2860_v27  ;;  %v3328_v27 = vadd.f32 %v3327_v22, %v3326_v38  ;;  %v3329_v41 = vsel %vm1630_vm4, %v2612_v11, 0.0  ;;  %v2869_v38 = vsel %vm1630_vm4, %v2577_v25, 0.0 }
 0x1d1   :  { %v2616_v11 = vmul.f32 %v6413_v18, %v6413_v18  ;;  %v2581_v25 = vmul.f32 %v6202_v23, %v6202_v23 }
 0x1d2   :  { %v2864_v28 = vadd.f32 %v2863_v34, %v2862_v0  ;;  %v3330_v0 = vadd.f32 %v3329_v41, %v3328_v27  ;;  %v3331_v34 = vsel %vm1630_vm4, %v2613_v61, 0.0  ;;  %v2871_v27 = vsel %vm1630_vm4, %v2578_v52, 0.0 }
 0x1d3   :  { %v2617_v61 = vmul.f32 %v6417_v6, %v6417_v6  ;;  %v2582_v52 = vmul.f32 %v6206_v15, %v6206_v15 }
 0x1d4   :  { %v2866_v42 = vadd.f32 %v2865_v21, %v2864_v28  ;;  %v3332_v28 = vadd.f32 %v3331_v34, %v3330_v0  ;;  %v3333_v21 = vsel %vm1630_vm4, %v2614_v58, 0.0  ;;  %v2873_v0 = vsel %vm1630_vm4, %v2579_v46, 0.0 }
 0x1d5   :  { %v2618_v58 = vmul.f32 %v6421_v10, %v6421_v10  ;;  %v2583_v46 = vmul.f32 %v6210_v57, %v6210_v57 }
 0x1d6   :  { %v2868_v7 = vadd.f32 %v2867_v20, %v2866_v42  ;;  %v3334_v42 = vadd.f32 %v3333_v21, %v3332_v28  ;;  %v3335_v20 = vsel %vm1630_vm4, %v2615_v31, 0.0  ;;  %v2875_v28 = vsel %vm1630_vm4, %v2580_v14, 0.0  ;;  %v9609_v14 = vld [vmem:[#allocation48_spill] sm:$0xff] }
 0x1d7   :  { %v2619_v31 = vmul.f32 %v6425_v62, %v6425_v62 }
 0x1d8   :  { %v2870_v22 = vadd.f32 %v2869_v38, %v2868_v7  ;;  %v3336_v7 = vadd.f32 %v3335_v20, %v3334_v42  ;;  %v3337_v38 = vsel %vm1630_vm4, %v2616_v11, 0.0  ;;  %v2877_v42 = vsel %vm1630_vm4, %v2581_v25, 0.0  ;;  %v9610_v25 = vld [vmem:[#allocation46_spill] sm:$0xff] }
 0x1d9   :  { %v2620_v11 = vmul.f32 %v6429_v47, %v6429_v47  ;;  %v3343_v62 = vsel %vm1630_vm4, %v2619_v31, 0.0  ;;  %v9613_v31 = vld [vmem:[#allocation20_spill] sm:$0xff] }
 0x1da   :  { %v2872_v41 = vadd.f32 %v2871_v27, %v2870_v22  ;;  %v3338_v22 = vadd.f32 %v3337_v38, %v3336_v7  ;;  %v3339_v27 = vsel %vm1630_vm4, %v2617_v61, 0.0  ;;  %v2584_v7 = vmul.f32 %v9609_v14, %v9609_v14 }
 0x1db   :  { %v2621_v61 = vmul.f32 %v6433_v54, %v6433_v54  ;;  %v3345_v10 = vsel %vm1630_vm4, %v2620_v11, 0.0  ;;  %v2623_v54 = vmul.f32 %v9613_v31, %v9613_v31  ;;  %v9615_v11 = vld [vmem:[#allocation23_spill] sm:$0xff] }
 0x1dc   :  { %v2874_v34 = vadd.f32 %v2873_v0, %v2872_v41  ;;  %v3340_v41 = vadd.f32 %v3339_v27, %v3338_v22  ;;  %v3341_v0 = vsel %vm1630_vm4, %v2618_v58, 0.0  ;;  %v2585_v22 = vmul.f32 %v9610_v25, %v9610_v25  ;;  %v9611_v58 = vld [vmem:[#allocation21_spill] sm:$0xff] }
 0x1dd   :  { %v2622_v47 = vmul.f32 %v9611_v58, %v9611_v58  ;;  %v3347_v6 = vsel %vm1630_vm4, %v2621_v61, 0.0  ;;  %v2624_v58 = vmul.f32 %v9615_v11, %v9615_v11  ;;  %v9617_v61 = vld [vmem:[#allocation22_spill] sm:$0xff]  ;;  %v3351_v16 = vsel %vm1630_vm4, %v2623_v54, 0.0  ;;  %v9621_v54 = vld [vmem:[#allocation24_spill] sm:$0xff] }
 0x1de   :  { %v2876_v21 = vadd.f32 %v2875_v28, %v2874_v34  ;;  %v2879_v34 = vsel %vm1630_vm4, %v2582_v52, 0.0  ;;  %v3342_v38 = vadd.f32 %v3341_v0, %v3340_v41  ;;  %v9612_v52 = vld [vmem:[#allocation52_spill] sm:$0xff]  ;;  %v2625_v31 = vmul.f32 %v9617_v61, %v9617_v61 }
 0x1df   :  { %v2586_v41 = vmul.f32 %v9612_v52, %v9612_v52  ;;  %v3349_v18 = vsel %vm1630_vm4, %v2622_v47, 0.0  ;;  %v9619_v47 = vld [vmem:[#allocation25_spill] sm:$0xff]  ;;  %v3353_v30 = vsel %vm1630_vm4, %v2624_v58, 0.0  ;;  %v2627_v61 = vmul.f32 %v9621_v54, %v9621_v54 }
 0x1e0   :  { %v2878_v20 = vadd.f32 %v2877_v42, %v2876_v21  ;;  %v2881_v21 = vsel %vm1630_vm4, %v2583_v46, 0.0  ;;  %v3344_v27 = vadd.f32 %v3343_v62, %v3342_v38  ;;  %v9614_v46 = vld [vmem:[#allocation50_spill] sm:$0xff]  ;;  %v2885_v38 = vsel %vm1630_vm4, %v2585_v22, 0.0 }
 0x1e1   :  { %v2587_v62 = vmul.f32 %v9614_v46, %v9614_v46  ;;  %v9618_v22 = vld [vmem:[#allocation54_spill] sm:$0xff]  ;;  %v2626_v11 = vmul.f32 %v9619_v47, %v9619_v47  ;;  %v3355_v5 = vsel %vm1630_vm4, %v2625_v31, 0.0  ;;  %v2628_v58 = vmul.f32 %v6461_v51, %v6461_v51 }
 0x1e2   :  { %v2880_v28 = vadd.f32 %v2879_v34, %v2878_v20  ;;  %v2883_v20 = vsel %vm1630_vm4, %v2584_v7, 0.0  ;;  %v3346_v0 = vadd.f32 %v3345_v10, %v3344_v27  ;;  %v9616_v7 = vld [vmem:[#allocation56_spill] sm:$0xff]  ;;  %v2887_v27 = vsel %vm1630_vm4, %v2586_v41, 0.0  ;;  %v9624_v31 = vld [vmem:[#allocation26_spill] sm:$0xff] }
 0x1e3   :  { %v2588_v10 = vmul.f32 %v9616_v7, %v9616_v7  ;;  %v9620_v41 = vld [vmem:[#allocation60_spill] sm:$0xff]  ;;  %v3357_v47 = vsel %vm1630_vm4, %v2626_v11, 0.0  ;;  %v2629_v54 = vmul.f32 %v9624_v31, %v9624_v31  ;;  %v3359_v19 = vsel %vm1630_vm4, %v2627_v61, 0.0  ;;  %v9626_v11 = vld [vmem:[#allocation29_spill] sm:$0xff] }
 0x1e4   :  { %v2882_v42 = vadd.f32 %v2881_v21, %v2880_v28  ;;  %v3348_v28 = vadd.f32 %v3347_v6, %v3346_v0  ;;  %v2589_v6 = vmul.f32 %v9618_v22, %v9618_v22  ;;  %v2889_v0 = vsel %vm1630_vm4, %v2587_v62, 0.0  ;;  %v9622_v62 = vld [vmem:[#allocation58_spill] sm:$0xff]  ;;  %v9628_v61 = vld [vmem:[#allocation28_spill] sm:$0xff] }
 0x1e5   :  { %v2630_v51 = vmul.f32 %v9626_v11, %v9626_v11  ;;  %v3361_v40 = vsel %vm1630_vm4, %v2628_v58, 0.0  ;;  %v2631_v31 = vmul.f32 %v9628_v61, %v9628_v61  ;;  %v3363_v39 = vsel %vm1630_vm4, %v2629_v54, 0.0  ;;  %v9630_v58 = vld [vmem:[#allocation31_spill] sm:$0xff]  ;;  %v9632_v54 = vld [vmem:[#allocation30_spill] sm:$0xff] }
 0x1e6   :  { %v2884_v34 = vadd.f32 %v2883_v20, %v2882_v42  ;;  %v3350_v42 = vadd.f32 %v3349_v18, %v3348_v28  ;;  %v2590_v18 = vmul.f32 %v9620_v41, %v9620_v41  ;;  %v2891_v28 = vsel %vm1630_vm4, %v2588_v10, 0.0  ;;  %v9623_v10 = vld [vmem:[#allocation64_spill] sm:$0xff] }
 0x1e7   :  { %v2632_v11 = vmul.f32 %v9630_v58, %v9630_v58  ;;  %v3365_v13 = vsel %vm1630_vm4, %v2630_v51, 0.0  ;;  %v2633_v61 = vmul.f32 %v9632_v54, %v9632_v54  ;;  %v3367_v17 = vsel %vm1630_vm4, %v2631_v31, 0.0  ;;  %v9634_v51 = vld [vmem:[#allocation33_spill] sm:$0xff] }
 0x1e8   :  { %v2886_v21 = vadd.f32 %v2885_v38, %v2884_v34  ;;  %v3352_v34 = vadd.f32 %v3351_v16, %v3350_v42  ;;  %v2591_v16 = vmul.f32 %v9622_v62, %v9622_v62  ;;  %v2893_v42 = vsel %vm1630_vm4, %v2589_v6, 0.0  ;;  %v9625_v6 = vld [vmem:[#allocation62_spill] sm:$0xff] }
 0x1e9   :  { %v2634_v58 = vmul.f32 %v9634_v51, %v9634_v51  ;;  %v3369_v50 = vsel %vm1630_vm4, %v2632_v11, 0.0  ;;  %v2635_v31 = vmul.f32 %v6489_v63, %v6489_v63  ;;  %v3371_v54 = vsel %vm1630_vm4, %v2633_v61, 0.0  ;;  %v9637_v11 = vld [vmem:[#allocation35_spill] sm:$0xff]  ;;  %v9639_v61 = vld [vmem:[#allocation34_spill] sm:$0xff] }
 0x1ea   :  { %v2888_v20 = vadd.f32 %v2887_v27, %v2886_v21  ;;  %v3354_v21 = vadd.f32 %v3353_v30, %v3352_v34  ;;  %v2592_v30 = vmul.f32 %v9623_v10, %v9623_v10  ;;  %v2895_v34 = vsel %vm1630_vm4, %v2590_v18, 0.0  ;;  %v9627_v18 = vld [vmem:[#allocation68_spill] sm:$0xff] }
 0x1eb   :  { %v2636_v51 = vmul.f32 %v9637_v11, %v9637_v11  ;;  %v3373_v33 = vsel %vm1630_vm4, %v2634_v58, 0.0  ;;  %v2637_v63 = vmul.f32 %v9639_v61, %v9639_v61  ;;  %v3375_v36 = vsel %vm1630_vm4, %v2635_v31, 0.0  ;;  %v9641_v58 = vld [vmem:[#allocation37_spill] sm:$0xff]  ;;  %v9643_v31 = vld [vmem:[#allocation36_spill] sm:$0xff] }
 0x1ec   :  { %v2890_v38 = vadd.f32 %v2889_v0, %v2888_v20  ;;  %v3356_v20 = vadd.f32 %v3355_v5, %v3354_v21  ;;  %v2593_v5 = vmul.f32 %v9625_v6, %v9625_v6  ;;  %v2897_v21 = vsel %vm1630_vm4, %v2591_v16, 0.0  ;;  %v9629_v16 = vld [vmem:[#allocation66_spill] sm:$0xff] }
 0x1ed   :  { %v2638_v11 = vmul.f32 %v9641_v58, %v9641_v58  ;;  %v2639_v61 = vmul.f32 %v9643_v31, %v9643_v31 }
 0x1ee   :  { %v2892_v27 = vadd.f32 %v2891_v28, %v2890_v38  ;;  %v3358_v38 = vadd.f32 %v3357_v47, %v3356_v20  ;;  %v2594_v47 = vmul.f32 %v9627_v18, %v9627_v18  ;;  %v2899_v20 = vsel %vm1630_vm4, %v2592_v30, 0.0  ;;  %v9631_v30 = vld [vmem:[#allocation72_spill] sm:$0xff] }
 0x1f0   :  { %v2894_v0 = vadd.f32 %v2893_v42, %v2892_v27  ;;  %v3360_v27 = vadd.f32 %v3359_v19, %v3358_v38  ;;  %v2595_v19 = vmul.f32 %v9629_v16, %v9629_v16  ;;  %v2901_v38 = vsel %vm1630_vm4, %v2593_v5, 0.0  ;;  %v9633_v5 = vld [vmem:[#allocation70_spill] sm:$0xff] }
 0x1f2   :  { %v2896_v28 = vadd.f32 %v2895_v34, %v2894_v0  ;;  %v3362_v0 = vadd.f32 %v3361_v40, %v3360_v27  ;;  %v2596_v40 = vmul.f32 %v9631_v30, %v9631_v30  ;;  %v2903_v27 = vsel %vm1630_vm4, %v2594_v47, 0.0  ;;  %v9635_v47 = vld [vmem:[#allocation76_spill] sm:$0xff] }
 0x1f4   :  { %v2898_v42 = vadd.f32 %v2897_v21, %v2896_v28  ;;  %v3364_v28 = vadd.f32 %v3363_v39, %v3362_v0  ;;  %v2597_v39 = vmul.f32 %v9633_v5, %v9633_v5  ;;  %v2905_v0 = vsel %vm1630_vm4, %v2595_v19, 0.0  ;;  %v9636_v19 = vld [vmem:[#allocation74_spill] sm:$0xff] }
 0x1f6   :  { %v2900_v34 = vadd.f32 %v2899_v20, %v2898_v42  ;;  %v3366_v42 = vadd.f32 %v3365_v13, %v3364_v28  ;;  %v2598_v13 = vmul.f32 %v9635_v47, %v9635_v47  ;;  %v2907_v28 = vsel %vm1630_vm4, %v2596_v40, 0.0  ;;  %v9638_v40 = vld [vmem:[#allocation80_spill] sm:$0xff] }
 0x1f8   :  { %v2902_v21 = vadd.f32 %v2901_v38, %v2900_v34  ;;  %v3368_v34 = vadd.f32 %v3367_v17, %v3366_v42  ;;  %v2599_v17 = vmul.f32 %v9636_v19, %v9636_v19  ;;  %v2909_v42 = vsel %vm1630_vm4, %v2597_v39, 0.0  ;;  %v9640_v39 = vld [vmem:[#allocation78_spill] sm:$0xff] }
 0x1fa   :  { %v2904_v20 = vadd.f32 %v2903_v27, %v2902_v21  ;;  %v3370_v21 = vadd.f32 %v3369_v50, %v3368_v34  ;;  %v2600_v50 = vmul.f32 %v9638_v40, %v9638_v40  ;;  %v2911_v34 = vsel %vm1630_vm4, %v2598_v13, 0.0  ;;  %v9642_v13 = vld [vmem:[#allocation82_spill] sm:$0xff] }
 0x1fb   :  { %v3377_v40 = vsel %vm1630_vm4, %v2636_v51, 0.0  ;;  %v9645_v51 = vld [vmem:[#allocation39_spill] sm:$0xff] }
 0x1fc   :  { %v2906_v38 = vadd.f32 %v2905_v0, %v2904_v20  ;;  %v3372_v20 = vadd.f32 %v3371_v54, %v3370_v21  ;;  %v2601_v54 = vmul.f32 %v9640_v39, %v9640_v39  ;;  %v2913_v21 = vsel %vm1630_vm4, %v2599_v17, 0.0  ;;  %v9644_v17 = vld [vmem:[#allocation104_spill] sm:$0xff] }
 0x1fd   :  { %v3379_v39 = vsel %vm1630_vm4, %v2637_v63, 0.0  ;;  %v2640_v58 = vmul.f32 %v9645_v51, %v9645_v51  ;;  %v3383_v63 = vsel %vm1630_vm4, %v2639_v61, 0.0  ;;  %v9678_v51 = vld [vmem:[#allocation97_spill] sm:$0xff] }
 0x1fe   :  { %v2908_v27 = vadd.f32 %v2907_v28, %v2906_v38  ;;  %v3374_v38 = vadd.f32 %v3373_v33, %v3372_v20  ;;  %v2602_v33 = vmul.f32 %v9642_v13, %v9642_v13  ;;  %v2915_v20 = vsel %vm1630_vm4, %v2600_v50, 0.0 }
 0x1ff   :  { %v3381_v13 = vsel %vm1630_vm4, %v2638_v11, 0.0 }
 0x200   :  { %v2910_v0 = vadd.f32 %v2909_v42, %v2908_v27  ;;  %v3376_v27 = vadd.f32 %v3375_v36, %v3374_v38  ;;  %v2603_v36 = vmul.f32 %v9644_v17, %v9644_v17  ;;  %v2917_v38 = vsel %vm1630_vm4, %v2601_v54, 0.0 }
 0x202   :  { %v2912_v28 = vadd.f32 %v2911_v34, %v2910_v0  ;;  %v3378_v0 = vadd.f32 %v3377_v40, %v3376_v27  ;;  %v2919_v40 = vsel %vm1630_vm4, %v2602_v33, 0.0  ;;  %v2921_v31 = vsel %vm1630_vm4, %v2603_v36, 0.0 }
 0x204   :  { %v2914_v42 = vadd.f32 %v2913_v21, %v2912_v28  ;;  %v3380_v28 = vadd.f32 %v3379_v39, %v3378_v0  ;;  %v2642_v39 = vmul.f32 %v6517_v59, %v6517_v59  ;;  %v3385_v0 = vsel %vm1630_vm4, %v2640_v58, 0.0  ;;  %v9650_v59 = vld [vmem:[#allocation45_spill] sm:$0xff] }
 0x206   :  { %v2916_v34 = vadd.f32 %v2915_v20, %v2914_v42  ;;  %v3382_v50 = vadd.f32 %v3381_v13, %v3380_v28  ;;  %v9646_v42 = vld [vmem:[#allocation38_spill] sm:$0xff]  ;;  %v3389_v36 = vsel %vm1630_vm4, %v2642_v39, 0.0 }
 0x207   :  { %v2641_v20 = vmul.f32 %v9646_v42, %v9646_v42  ;;  %v9676_v42 = vld [vmem:[#allocation96_spill] sm:$0xff] }
 0x208   :  { %v2918_v21 = vadd.f32 %v2917_v38, %v2916_v34  ;;  %v3384_v17 = vadd.f32 %v3383_v63, %v3382_v50  ;;  %v9647_v38 = vld [vmem:[#allocation40_spill] sm:$0xff] }
 0x209   :  { %v2643_v13 = vmul.f32 %v9647_v38, %v9647_v38  ;;  %v3387_v33 = vsel %vm1630_vm4, %v2641_v20, 0.0  ;;  %v2646_v38 = vmul.f32 %v9650_v59, %v9650_v59  ;;  %v9675_v59 = vld [vmem:[#allocation95_spill] sm:$0xff] }
 0x20a   :  { %v2920_v27 = vadd.f32 %v2919_v40, %v2918_v21  ;;  %v3386_v34 = vadd.f32 %v3385_v0, %v3384_v17  ;;  %v9648_v40 = vld [vmem:[#allocation43_spill] sm:$0xff] }
 0x20b   :  { %v2644_v61 = vmul.f32 %v9648_v40, %v9648_v40  ;;  %v3391_v58 = vsel %vm1630_vm4, %v2643_v13, 0.0  ;;  %v9652_v40 = vld [vmem:[#allocation49_spill] sm:$0xff]  ;;  %v3397_v13 = vsel %vm1630_vm4, %v2646_v38, 0.0 }
 0x20c   :  { %v2922_v54 = vadd.f32 %v2921_v31, %v2920_v27  ;;  %v3388_v28 = vadd.f32 %v3387_v33, %v3386_v34  ;;  %v9649_v27 = vld [vmem:[#allocation42_spill] sm:$0xff] }
 0x20d   :  { %v2645_v63 = vmul.f32 %v9649_v27, %v9649_v27  ;;  %v3393_v20 = vsel %vm1630_vm4, %v2644_v61, 0.0  ;;  %v2648_v27 = vmul.f32 %v9652_v40, %v9652_v40  ;;  %v9674_v40 = vld [vmem:[#allocation94_spill] sm:$0xff] }
 0x20e   :  { %v3051_v11 = vrot.slane %v2922_v54, 4  ;;  %v3390_v31 = vadd.f32 %v3389_v36, %v3388_v28 }
 0x20f   :  { %v3395_v39 = vsel %vm1630_vm4, %v2645_v63, 0.0  ;;  %v3401_v63 = vsel %vm1630_vm4, %v2648_v27, 0.0 }
 0x210   :  { %v3052_v21 = vadd.f32 %v3051_v11, %v2922_v54  ;;  %v3392_v17 = vadd.f32 %v3391_v58, %v3390_v31  ;;  %v9651_v11 = vld [vmem:[#allocation44_spill] sm:$0xff] }
 0x211   :  { %v2647_v33 = vmul.f32 %v9651_v11, %v9651_v11 }
 0x212   :  { %v3053_v50 = vrot.slane %v3052_v21, 2  ;;  %v3394_v54 = vadd.f32 %v3393_v20, %v3392_v17  ;;  %v9653_v20 = vld [vmem:[#allocation53_spill] sm:$0xff] }
 0x213   :  { %v3399_v61 = vsel %vm1630_vm4, %v2647_v33, 0.0  ;;  %v2650_v11 = vmul.f32 %v9653_v20, %v9653_v20  ;;  %v9672_v20 = vld [vmem:[#allocation92_spill] sm:$0xff] }
 0x214   :  { %v3054_v0 = vadd.f32 %v3053_v50, %v3052_v21  ;;  %v3396_v28 = vadd.f32 %v3395_v39, %v3394_v54  ;;  %v2649_v50 = vmul.f32 %v6545_v2, %v6545_v2  ;;  %v9654_v54 = vld [vmem:[#allocation51_spill] sm:$0xff]  ;;  %v9673_v2 = vld [vmem:[#allocation93_spill] sm:$0xff] }
 0x215   :  { %v3405_v33 = vsel %vm1630_vm4, %v2650_v11, 0.0 }
 0x216   :  { %v3055_v34 = vrot.slane %v3054_v0, 1  ;;  %v3398_v21 = vadd.f32 %v3397_v13, %v3396_v28  ;;  %v3403_v38 = vsel %vm1630_vm4, %v2649_v50, 0.0  ;;  %v9655_v28 = vld [vmem:[#allocation57_spill] sm:$0xff] }
 0x218   :  { %v3056_v36 = vadd.f32 %v3055_v34, %v3054_v0  ;;  %v3400_v58 = vadd.f32 %v3399_v61, %v3398_v21  ;;  %v2651_v34 = vmul.f32 %v9654_v54, %v9654_v54 }
 0x21a   :  { %v3057_v31 = vmul.f32 0.001953125, %v3056_v36  ;;  %v3402_v0 = vadd.f32 %v3401_v63, %v3400_v58  ;;  %v2652_v36 = vmul.f32 %v9655_v28, %v9655_v28  ;;  %v3407_v21 = vsel %vm1630_vm4, %v2651_v34, 0.0  ;;  %v9657_v58 = vld [vmem:[#allocation61_spill] sm:$0xff]  ;;  %v9671_v28 = vld [vmem:[#allocation91_spill] sm:$0xff] }
 0x21b   :  { %v6913_v34 = vmul.f32 %v6573_v26, %v6573_v26 }
 0x21c   :  { %v3576_v17 = vadd.f32 1e-05, %v3057_v31  ;;  %v3404_v39 = vadd.f32 %v3403_v38, %v3402_v0  ;;  %v9656_v31 = vld [vmem:[#allocation55_spill] sm:$0xff]  ;;  %v3409_v63 = vsel %vm1630_vm4, %v2652_v36, 0.0 }
 0x21d   :  { %v2653_v61 = vmul.f32 %v9656_v31, %v9656_v31  ;;  %v9658_v38 = vld [vmem:[#allocation59_spill] sm:$0xff]  ;;  %9660 = vst [vmem:[#allocation46_spill] sm:$0xff] %v6913_v34  ;;  %v9670_v31 = vld [vmem:[#allocation90_spill] sm:$0xff] }
 0x21e   :  { %4966 = vrsqrt.f32 %v3576_v17  ;;  %v3406_v13 = vadd.f32 %v3405_v33, %v3404_v39  ;;  %v2654_v17 = vmul.f32 %v9657_v58, %v9657_v58  ;;  %v6909_v11 = vmul.f32 %v9658_v38, %v9658_v38  ;;  %v9666_v38 = vld [vmem:[#allocation86_spill] sm:$0xff]  ;;  %v9669_v58 = vld [vmem:[#allocation89_spill] sm:$0xff] }
 0x21f   :  { %v3411_v50 = vsel %vm1630_vm4, %v2653_v61, 0.0  ;;  %v9680_v34 = vld [vmem:[#allocation98_spill] sm:$0xff] }
 0x220   :  { %v3408_v27 = vadd.f32 %v3407_v21, %v3406_v13  ;;  %9659 = vst [vmem:[#allocation48_spill] sm:$0xff] %v6909_v11  ;;  %v6918_v33 = vsel %vm1630_vm4, %v2654_v17, 0.0  ;;  %v9663_v13 = vld [vmem:[#allocation83_spill] sm:$0xff]  ;;  %v9664_v21 = vld [vmem:[#allocation84_spill] sm:$0xff] }
 0x221   :  { %9662 = vst [vmem:[#allocation50_spill] sm:$0xff] %v6918_v33  ;;  %v9681_v11 = vld [vmem:[#allocation99_spill] sm:$0xff]  ;;  %v9682_v33 = vld [vmem:[#allocation100_spill] sm:$0xff] }
 0x222   :  { %v3410_v54 = vadd.f32 %v3409_v63, %v3408_v27  ;;  %v9665_v27 = vld [vmem:[#allocation85_spill] sm:$0xff] }
 0x224   :  { %v6915_v39 = vadd.f32 %v3411_v50, %v3410_v54  ;;  %v9667_v54 = vld [vmem:[#allocation87_spill] sm:$0xff]  ;;  %v9668_v50 = vld [vmem:[#allocation88_spill] sm:$0xff] }
 0x226   :  { %9661 = vst [vmem:[#allocation52_spill] sm:$0xff] %v6915_v39  ;;  %v9683_v39 = vld [vmem:[#allocation101_spill] sm:$0xff] }
 0x228   :  { %v6905_v0 = vpop.eup %4966 }
 0x229   :  { %v6922_v36 = vmul.f32 %v6905_v0, %v9663_v13  ;;  %v6926_v61 = vmul.f32 %v6905_v0, %v9664_v21  ;;  %v6930_v63 = vmul.f32 %v6905_v0, %v9665_v27  ;;  %v6934_v26 = vmul.f32 %v6905_v0, %v9666_v38 }
 0x22a   :  { %v6938_v17 = vmul.f32 %v6905_v0, %v9667_v54  ;;  %v6942_v13 = vmul.f32 %v6905_v0, %v9668_v50  ;;  %v6946_v21 = vmul.f32 %v6905_v0, %v9669_v58  ;;  %v6950_v27 = vmul.f32 %v6905_v0, %v9670_v31 }
 0x22b   :  { %v6954_v38 = vmul.f32 %v6905_v0, %v9671_v28  ;;  %v6958_v54 = vmul.f32 %v6905_v0, %v9672_v20  ;;  %v6962_v50 = vmul.f32 %v6905_v0, %v9673_v2  ;;  %v6966_v58 = vmul.f32 %v6905_v0, %v9674_v40 }
 0x22c   :  { %v6970_v31 = vmul.f32 %v6905_v0, %v9675_v59  ;;  %v6974_v28 = vmul.f32 %v6905_v0, %v9676_v42  ;;  %v6978_v20 = vmul.f32 %v6905_v0, %v9678_v51  ;;  %v6982_v2 = vmul.f32 %v6905_v0, %v9680_v34 }
 0x22d   :  { %v6986_v40 = vmul.f32 %v6905_v0, %v9681_v11  ;;  %v6990_v59 = vmul.f32 %v6905_v0, %v9682_v33  ;;  %v6994_v42 = vmul.f32 %v6905_v0, %v9683_v39  ;;  %v7006_v11 = vmul.f32 %v6905_v0, %v6122_v56 }
 0x22e   :  { %9677 = vst [vmem:[#allocation56_spill] sm:$0xff] %v6974_v28  ;;  %9679 = vst [vmem:[#allocation54_spill] sm:$0xff] %v6978_v20  ;;  %v9684_v28 = vld [vmem:[#allocation102_spill] sm:$0xff]  ;;  %v9685_v20 = vld [vmem:[#allocation103_spill] sm:$0xff]  ;;  %v7010_v33 = vmul.f32 %v6905_v0, %v6126_v53  ;;  %v7014_v39 = vmul.f32 %v6905_v0, %v6130_v12  ;;  %v7026_v56 = vmul.f32 %v6905_v0, %v6142_v37 }
 0x22f   :  { %v6998_v51 = vmul.f32 %v6905_v0, %v9684_v28  ;;  %v7002_v34 = vmul.f32 %v6905_v0, %v9685_v20  ;;  %v7018_v28 = vmul.f32 %v6905_v0, %v6134_v8  ;;  %v7022_v20 = vmul.f32 %v6905_v0, %v6138_v44 }
 0x230   :  { %v7030_v53 = vmul.f32 %v6905_v0, %v6146_v4  ;;  %v7034_v12 = vmul.f32 %v6905_v0, %v6150_v1  ;;  %v7038_v8 = vmul.f32 %v6905_v0, %v6154_v48  ;;  %v7042_v44 = vmul.f32 %v6905_v0, %v6158_v45 }
 0x231   :  { %v7046_v37 = vmul.f32 %v6905_v0, %v6162_v32  ;;  %v7050_v4 = vmul.f32 %v6905_v0, %v6166_v3  ;;  %v7054_v1 = vmul.f32 %v6905_v0, %v6170_v24  ;;  %v7058_v48 = vmul.f32 %v6905_v0, %v6174_v43 }
 0x232   :  { %v7062_v45 = vmul.f32 %v6905_v0, %v6178_v60  ;;  %v7066_v32 = vmul.f32 %v6905_v0, %v6182_v9  ;;  %v7070_v3 = vmul.f32 %v6905_v0, %v6186_v49  ;;  %v7074_v24 = vmul.f32 %v6905_v0, %v6190_v55 }
 0x233   :  { %v7078_v43 = vmul.f32 %v6905_v0, %v6194_v29  ;;  %v7082_v60 = vmul.f32 %v6905_v0, %v6198_v35  ;;  %v7086_v9 = vmul.f32 %v6905_v0, %v6202_v23  ;;  %v7090_v49 = vmul.f32 %v6905_v0, %v6206_v15 }
 0x234   :  { %v7094_v55 = vmul.f32 %v6905_v0, %v6210_v57  ;;  %v7098_v29 = vmul.f32 %v6905_v0, %v9609_v14  ;;  %v7102_v35 = vmul.f32 %v6905_v0, %v9610_v25  ;;  %v7106_v23 = vmul.f32 %v6905_v0, %v9612_v52 }
 0x235   :  { %v7110_v15 = vmul.f32 %v6905_v0, %v9614_v46  ;;  %v7114_v57 = vmul.f32 %v6905_v0, %v9616_v7  ;;  %v7118_v14 = vmul.f32 %v6905_v0, %v9618_v22  ;;  %v7122_v25 = vmul.f32 %v6905_v0, %v9620_v41  ;;  %v7131_v46 = vld [vmem:[%s9149_s2] ss:$0 sm:$0xff] }
 0x236   :  { %v7126_v52 = vmul.f32 %v6905_v0, %v9622_v62  ;;  %9687 = vst [vmem:[#allocation58_spill] sm:$0xff] %v7131_v46  ;;  %v7135_v7 = vmul.f32 %v6905_v0, %v9623_v10  ;;  %v7139_v22 = vmul.f32 %v6905_v0, %v9625_v6  ;;  %v7143_v41 = vmul.f32 %v6905_v0, %v9627_v18 }
 0x237   :  { %v7147_v62 = vmul.f32 %v6905_v0, %v9629_v16  ;;  %v7155_v10 = vmul.f32 %v6905_v0, %v9633_v5  ;;  %v7159_v6 = vmul.f32 %v6905_v0, %v9635_v47  ;;  %v7163_v18 = vmul.f32 %v6905_v0, %v9636_v19 }
 0x238   :  { %9686 = vst [vmem:[#allocation60_spill] sm:$0xff] %v7126_v52  ;;  %9688 = vst [vmem:[#allocation64_spill] sm:$0xff] %v7143_v41  ;;  %v7151_v52 = vmul.f32 %v6905_v0, %v9631_v30  ;;  %v9692_v41 = vld [vmem:[#allocation80_spill] sm:$0xff]  ;;  %v7183_v19 = vmul.f32 %v7131_v46, %v6922_v36  ;;  %v7203_v36 = vmul.f32 %v7131_v46, %v6942_v13 }
 0x239   :  { %9689 = vst [vmem:[#allocation62_spill] sm:$0xff] %v7147_v62  ;;  %9691 = vst [vmem:[#allocation66_spill] sm:$0xff] %v7155_v10  ;;  %v7167_v16 = vmul.f32 %v6905_v0, %v9692_v41  ;;  %v9693_v62 = vld [vmem:[#allocation78_spill] sm:$0xff]  ;;  %v9695_v10 = vld [vmem:[#allocation104_spill] sm:$0xff]  ;;  %v7187_v41 = vmul.f32 %v7131_v46, %v6926_v61  ;;  %v7207_v61 = vmul.f32 %v7131_v46, %v6946_v21 }
 0x23a   :  { %9690 = vst [vmem:[#allocation68_spill] sm:$0xff] %v7151_v52  ;;  %v7171_v30 = vmul.f32 %v6905_v0, %v9693_v62  ;;  %v9694_v52 = vld [vmem:[#allocation82_spill] sm:$0xff]  ;;  %v7179_v47 = vmul.f32 %v6905_v0, %v9695_v10  ;;  %v7191_v62 = vmul.f32 %v7131_v46, %v6930_v63  ;;  %v7211_v63 = vmul.f32 %v7131_v46, %v6950_v27  ;;  %v9697_v10 = vld [vmem:[#allocation56_spill] sm:$0xff] }
 0x23b   :  { %v7175_v5 = vmul.f32 %v6905_v0, %v9694_v52  ;;  %v7195_v52 = vmul.f32 %v7131_v46, %v6934_v26  ;;  %v7199_v0 = vmul.f32 %v7131_v46, %v6938_v17  ;;  %v7215_v26 = vmul.f32 %v7131_v46, %v6954_v38 }
 0x23c   :  { %v7219_v17 = vmul.f32 %v7131_v46, %v6958_v54  ;;  %v7223_v13 = vmul.f32 %v7131_v46, %v6962_v50  ;;  %v7227_v21 = vmul.f32 %v7131_v46, %v6966_v58  ;;  %v7231_v27 = vmul.f32 %v7131_v46, %v6970_v31 }
 0x23d   :  { %9696 = vst [vmem:[#allocation72_spill] sm:$0xff] %v7215_v26  ;;  %v7235_v38 = vmul.f32 %v7131_v46, %v9697_v10  ;;  %v9698_v26 = vld [vmem:[#allocation54_spill] sm:$0xff]  ;;  %v7243_v50 = vmul.f32 %v7131_v46, %v6982_v2  ;;  %v7247_v58 = vmul.f32 %v7131_v46, %v6986_v40  ;;  %v7251_v31 = vmul.f32 %v7131_v46, %v6990_v59 }
 0x23e   :  { %v7239_v54 = vmul.f32 %v7131_v46, %v9698_v26  ;;  %v7255_v10 = vmul.f32 %v7131_v46, %v6994_v42  ;;  %v7259_v26 = vmul.f32 %v7131_v46, %v6998_v51  ;;  %v7263_v2 = vmul.f32 %v7131_v46, %v7002_v34 }
 0x23f   :  { %v7267_v40 = vmul.f32 %v7131_v46, %v7006_v11  ;;  %v7271_v59 = vmul.f32 %v7131_v46, %v7010_v33  ;;  %v7275_v42 = vmul.f32 %v7131_v46, %v7014_v39  ;;  %v7279_v51 = vmul.f32 %v7131_v46, %v7018_v28 }
 0x240   :  { %v7283_v34 = vmul.f32 %v7131_v46, %v7022_v20  ;;  %v7287_v11 = vmul.f32 %v7131_v46, %v7026_v56  ;;  %v7291_v33 = vmul.f32 %v7131_v46, %v7030_v53  ;;  %v7295_v39 = vmul.f32 %v7131_v46, %v7034_v12 }
 0x241   :  { %v7299_v28 = vmul.f32 %v7131_v46, %v7038_v8  ;;  %v7303_v20 = vmul.f32 %v7131_v46, %v7042_v44  ;;  %v7307_v56 = vmul.f32 %v7131_v46, %v7046_v37  ;;  %v7311_v53 = vmul.f32 %v7131_v46, %v7050_v4 }
 0x242   :  { %v7315_v12 = vmul.f32 %v7131_v46, %v7054_v1  ;;  %v7319_v8 = vmul.f32 %v7131_v46, %v7058_v48  ;;  %v7323_v44 = vmul.f32 %v7131_v46, %v7062_v45  ;;  %v7327_v37 = vmul.f32 %v7131_v46, %v7066_v32 }
 0x243   :  { %v7331_v4 = vmul.f32 %v7131_v46, %v7070_v3  ;;  %v7335_v1 = vmul.f32 %v7131_v46, %v7074_v24  ;;  %v7339_v48 = vmul.f32 %v7131_v46, %v7078_v43  ;;  %v7343_v45 = vmul.f32 %v7131_v46, %v7082_v60 }
 0x244   :  { %v7347_v32 = vmul.f32 %v7131_v46, %v7086_v9  ;;  %v7351_v3 = vmul.f32 %v7131_v46, %v7090_v49  ;;  %v7355_v24 = vmul.f32 %v7131_v46, %v7094_v55  ;;  %v7359_v43 = vmul.f32 %v7131_v46, %v7098_v29 }
 0x245   :  { %v7363_v60 = vmul.f32 %v7131_v46, %v7102_v35  ;;  %v7367_v9 = vmul.f32 %v7131_v46, %v7106_v23  ;;  %v7371_v49 = vmul.f32 %v7131_v46, %v7110_v15  ;;  %v7375_v55 = vmul.f32 %v7131_v46, %v7114_v57  ;;  %v7392_v15 = vld [vmem:[%s9150_s3] ss:$0 sm:$0xff] }
 0x246   :  { %v7379_v29 = vmul.f32 %v7131_v46, %v7118_v14  ;;  %v7383_v35 = vmul.f32 %v7131_v46, %v7122_v25  ;;  %9706 = vst [vmem:[#allocation86_spill] sm:$0xff] %v7392_v15  ;;  %v7396_v57 = vmul.f32 %v7131_v46, %v7135_v7  ;;  %v7400_v14 = vmul.f32 %v7131_v46, %v7139_v22 }
 0x247   :  { %9699 = vst [vmem:[#allocation70_spill] sm:$0xff] %v7363_v60  ;;  %9700 = vst [vmem:[#allocation76_spill] sm:$0xff] %v7371_v49  ;;  %v9704_v60 = vld [vmem:[#allocation60_spill] sm:$0xff]  ;;  %v9710_v49 = vld [vmem:[#allocation66_spill] sm:$0xff]  ;;  %v7420_v22 = vmul.f32 %v7131_v46, %v7159_v6  ;;  %v7440_v6 = vmul.f32 %v7131_v46, %v7179_v47  ;;  %v7460_v47 = vadd.f32 %v7392_v15, %v7199_v0 }
 0x248   :  { %9701 = vst [vmem:[#allocation74_spill] sm:$0xff] %v7375_v55  ;;  %9702 = vst [vmem:[#allocation83_spill] sm:$0xff] %v7379_v29  ;;  %v7387_v23 = vmul.f32 %v7131_v46, %v9704_v60  ;;  %v9707_v29 = vld [vmem:[#allocation64_spill] sm:$0xff]  ;;  %v7416_v7 = vmul.f32 %v7131_v46, %v9710_v49  ;;  %v7436_v49 = vmul.f32 %v7131_v46, %v7175_v5 }
 0x249   :  { %9703 = vst [vmem:[#allocation84_spill] sm:$0xff] %v7383_v35  ;;  %v7404_v25 = vmul.f32 %v7131_v46, %v9707_v29  ;;  %v9708_v35 = vld [vmem:[#allocation62_spill] sm:$0xff]  ;;  %v7424_v29 = vmul.f32 %v7131_v46, %v7163_v18  ;;  %v7444_v18 = vadd.f32 %v7392_v15, %v7183_v19  ;;  %v7456_v5 = vadd.f32 %v7392_v15, %v7195_v52 }
 0x24a   :  { %9705 = vst [vmem:[#allocation85_spill] sm:$0xff] %v7387_v23  ;;  %v7408_v60 = vmul.f32 %v7131_v46, %v9708_v35  ;;  %v9709_v23 = vld [vmem:[#allocation68_spill] sm:$0xff]  ;;  %v7428_v35 = vmul.f32 %v7131_v46, %v7167_v16  ;;  %v7448_v16 = vadd.f32 %v7392_v15, %v7187_v41  ;;  %v7464_v19 = vadd.f32 %v7392_v15, %v7203_v36 }
 0x24b   :  { %v7412_v55 = vmul.f32 %v7131_v46, %v9709_v23  ;;  %v7432_v23 = vmul.f32 %v7131_v46, %v7171_v30  ;;  %v7452_v30 = vadd.f32 %v7392_v15, %v7191_v62  ;;  %v7468_v41 = vadd.f32 %v7392_v15, %v7207_v61  ;;  %v9711_v46 = vld [vmem:[#allocation72_spill] sm:$0xff] }
 0x24c   :  { %v7472_v62 = vadd.f32 %v7392_v15, %v7211_v63  ;;  %v7476_v52 = vadd.f32 %v7392_v15, %v9711_v46  ;;  %v7480_v0 = vadd.f32 %v7392_v15, %v7219_v17  ;;  %v7484_v36 = vadd.f32 %v7392_v15, %v7223_v13 }
 0x24d   :  { %v7488_v61 = vadd.f32 %v7392_v15, %v7227_v21  ;;  %v7492_v63 = vadd.f32 %v7392_v15, %v7231_v27  ;;  %v7496_v46 = vadd.f32 %v7392_v15, %v7235_v38  ;;  %v7500_v17 = vadd.f32 %v7392_v15, %v7239_v54 }
 0x24e   :  { %v7504_v13 = vadd.f32 %v7392_v15, %v7243_v50  ;;  %v7508_v21 = vadd.f32 %v7392_v15, %v7247_v58  ;;  %v7512_v27 = vadd.f32 %v7392_v15, %v7251_v31  ;;  %v7516_v38 = vadd.f32 %v7392_v15, %v7255_v10 }
 0x24f   :  { %v7520_v54 = vadd.f32 %v7392_v15, %v7259_v26  ;;  %v7524_v50 = vadd.f32 %v7392_v15, %v7263_v2  ;;  %v7528_v58 = vadd.f32 %v7392_v15, %v7267_v40  ;;  %v7532_v31 = vadd.f32 %v7392_v15, %v7271_v59 }
 0x250   :  { %v7536_v10 = vadd.f32 %v7392_v15, %v7275_v42  ;;  %v7540_v26 = vadd.f32 %v7392_v15, %v7279_v51  ;;  %v7544_v2 = vadd.f32 %v7392_v15, %v7283_v34  ;;  %v7548_v40 = vadd.f32 %v7392_v15, %v7287_v11 }
 0x251   :  { %v7552_v59 = vadd.f32 %v7392_v15, %v7291_v33  ;;  %v7556_v42 = vadd.f32 %v7392_v15, %v7295_v39  ;;  %v7560_v51 = vadd.f32 %v7392_v15, %v7299_v28  ;;  %v7564_v34 = vadd.f32 %v7392_v15, %v7303_v20 }
 0x252   :  { %v7568_v11 = vadd.f32 %v7392_v15, %v7307_v56  ;;  %v7572_v33 = vadd.f32 %v7392_v15, %v7311_v53  ;;  %v7576_v39 = vadd.f32 %v7392_v15, %v7315_v12  ;;  %v7580_v28 = vadd.f32 %v7392_v15, %v7319_v8 }
 0x253   :  { %v7584_v20 = vadd.f32 %v7392_v15, %v7323_v44  ;;  %v7588_v56 = vadd.f32 %v7392_v15, %v7327_v37  ;;  %v7592_v53 = vadd.f32 %v7392_v15, %v7331_v4  ;;  %v7596_v12 = vadd.f32 %v7392_v15, %v7335_v1 }
 0x254   :  { %v7600_v8 = vadd.f32 %v7392_v15, %v7339_v48  ;;  %v7604_v44 = vadd.f32 %v7392_v15, %v7343_v45  ;;  %v7608_v37 = vadd.f32 %v7392_v15, %v7347_v32  ;;  %v7612_v4 = vadd.f32 %v7392_v15, %v7351_v3 }
 0x255   :  { %v7616_v1 = vadd.f32 %v7392_v15, %v7355_v24  ;;  %v7620_v48 = vadd.f32 %v7392_v15, %v7359_v43  ;;  %v7628_v32 = vadd.f32 %v7392_v15, %v7367_v9 }
 0x256   :  { %9712 = vst [vmem:[#allocation87_spill] sm:$0xff] %v7600_v8  ;;  %9713 = vst [vmem:[#allocation88_spill] sm:$0xff] %v7608_v37  ;;  %v9717_v8 = vld [vmem:[#allocation70_spill] sm:$0xff]  ;;  %v9719_v37 = vld [vmem:[#allocation76_spill] sm:$0xff] }
 0x257   :  { %9714 = vst [vmem:[#allocation89_spill] sm:$0xff] %v7612_v4  ;;  %9715 = vst [vmem:[#allocation90_spill] sm:$0xff] %v7616_v1  ;;  %v7624_v45 = vadd.f32 %v7392_v15, %v9717_v8  ;;  %v7632_v3 = vadd.f32 %v7392_v15, %v9719_v37  ;;  %v9720_v4 = vld [vmem:[#allocation74_spill] sm:$0xff]  ;;  %v9721_v1 = vld [vmem:[#allocation83_spill] sm:$0xff]  ;;  %v7652_v37 = vadd.f32 %v7392_v15, %v7396_v57 }
 0x258   :  { %9716 = vst [vmem:[#allocation91_spill] sm:$0xff] %v7620_v48  ;;  %v7636_v24 = vadd.f32 %v7392_v15, %v9720_v4  ;;  %v7640_v43 = vadd.f32 %v7392_v15, %v9721_v1  ;;  %v9722_v48 = vld [vmem:[#allocation84_spill] sm:$0xff]  ;;  %v7656_v4 = vadd.f32 %v7392_v15, %v7400_v14  ;;  %v7660_v1 = vadd.f32 %v7392_v15, %v7404_v25 }
 0x259   :  { %9718 = vst [vmem:[#allocation92_spill] sm:$0xff] %v7624_v45  ;;  %v7644_v8 = vadd.f32 %v7392_v15, %v9722_v48  ;;  %v9723_v45 = vld [vmem:[#allocation85_spill] sm:$0xff]  ;;  %v7664_v48 = vadd.f32 %v7392_v15, %v7408_v60  ;;  %v7672_v57 = vadd.f32 %v7392_v15, %v7416_v7  ;;  %v7676_v14 = vadd.f32 %v7392_v15, %v7420_v22 }
 0x25a   :  { %v7648_v9 = vadd.f32 %v7392_v15, %v9723_v45  ;;  %v7668_v45 = vadd.f32 %v7392_v15, %v7412_v55  ;;  %v7680_v25 = vadd.f32 %v7392_v15, %v7424_v29  ;;  %v7684_v60 = vadd.f32 %v7392_v15, %v7428_v35 }
 0x25b   :  { %9724 = vst [vmem:[#allocation93_spill] sm:$0xff] %v7676_v14  ;;  %v7688_v55 = vadd.f32 %v7392_v15, %v7432_v23  ;;  %v7692_v7 = vadd.f32 %v7392_v15, %v7436_v49  ;;  %v7696_v22 = vadd.f32 %v7392_v15, %v7440_v6  ;;  %v4228_v14 = vmax.f32 %v7444_v18, 0.0  ;;  %v9806_v15 = vld [vmem:[#allocation53_spill] sm:$0xff] }
 0x25c   :  { %9725 = vst [vmem:[#allocation94_spill] sm:$0xff] %v7680_v25  ;;  %9726 = vst [vmem:[#allocation95_spill] sm:$0xff] %v7684_v60  ;;  %v4229_v29 = vmax.f32 %v7448_v16, 0.0  ;;  %v4230_v25 = vmax.f32 %v7452_v30, 0.0  ;;  %v4231_v35 = vmax.f32 %v7456_v5, 0.0  ;;  %v4232_v60 = vmax.f32 %v7460_v47, 0.0 }
 0x25d   :  { %9727 = vst [vmem:[#allocation96_spill] sm:$0xff] %v7688_v55  ;;  %9728 = vst [vmem:[#allocation97_spill] sm:$0xff] %v7692_v7  ;;  %v4233_v23 = vmax.f32 %v7464_v19, 0.0  ;;  %v4234_v55 = vmax.f32 %v7468_v41, 0.0  ;;  %v4235_v49 = vmax.f32 %v7472_v62, 0.0  ;;  %v4236_v7 = vmax.f32 %v7476_v52, 0.0 }
 0x25e   :  { %v4237_v6 = vmax.f32 %v7480_v0, 0.0  ;;  %v4238_v18 = vmax.f32 %v7484_v36, 0.0  ;;  %v4239_v16 = vmax.f32 %v7488_v61, 0.0  ;;  %4356 = vst.msk [vmem:[%s9151_s4] sm:$0xff] %vm1630_vm4, %v4228_v14  ;;  %4357 = vst.msk [vmem:[%s9151_s4 + $0x8] sm:$0xff] %vm1630_vm4, %v4229_v29  ;;  %v4240_v30 = vmax.f32 %v7492_v63, 0.0 }
 0x25f   :  { %4358 = vst.msk [vmem:[%s9151_s4 + $0x10] sm:$0xff] %vm1630_vm4, %v4230_v25  ;;  %4359 = vst.msk [vmem:[%s9151_s4 + $0x18] sm:$0xff] %vm1630_vm4, %v4231_v35  ;;  %v4241_v5 = vmax.f32 %v7496_v46, 0.0  ;;  %v4242_v47 = vmax.f32 %v7500_v17, 0.0  ;;  %v4243_v19 = vmax.f32 %v7504_v13, 0.0  ;;  %v4244_v41 = vmax.f32 %v7508_v21, 0.0 }
 0x260   :  { %4360 = vst.msk [vmem:[%s9151_s4 + $0x20] sm:$0xff] %vm1630_vm4, %v4232_v60  ;;  %4361 = vst.msk [vmem:[%s9151_s4 + $0x28] sm:$0xff] %vm1630_vm4, %v4233_v23  ;;  %v4245_v62 = vmax.f32 %v7512_v27, 0.0  ;;  %v4246_v52 = vmax.f32 %v7516_v38, 0.0  ;;  %v4247_v0 = vmax.f32 %v7520_v54, 0.0  ;;  %v4248_v36 = vmax.f32 %v7524_v50, 0.0 }
 0x261   :  { %4362 = vst.msk [vmem:[%s9151_s4 + $0x30] sm:$0xff] %vm1630_vm4, %v4234_v55  ;;  %4363 = vst.msk [vmem:[%s9151_s4 + $0x38] sm:$0xff] %vm1630_vm4, %v4235_v49  ;;  %v4249_v61 = vmax.f32 %v7528_v58, 0.0  ;;  %v4250_v63 = vmax.f32 %v7532_v31, 0.0  ;;  %v4251_v46 = vmax.f32 %v7536_v10, 0.0  ;;  %v4252_v17 = vmax.f32 %v7540_v26, 0.0 }
 0x262   :  { %4364 = vst.msk [vmem:[%s9151_s4 + $0x40] sm:$0xff] %vm1630_vm4, %v4236_v7  ;;  %4365 = vst.msk [vmem:[%s9151_s4 + $0x48] sm:$0xff] %vm1630_vm4, %v4237_v6  ;;  %v4253_v13 = vmax.f32 %v7544_v2, 0.0  ;;  %v4254_v21 = vmax.f32 %v7548_v40, 0.0  ;;  %v4255_v27 = vmax.f32 %v7552_v59, 0.0  ;;  %v4256_v38 = vmax.f32 %v7556_v42, 0.0 }
 0x263   :  { %4366 = vst.msk [vmem:[%s9151_s4 + $0x50] sm:$0xff] %vm1630_vm4, %v4238_v18  ;;  %4367 = vst.msk [vmem:[%s9151_s4 + $0x58] sm:$0xff] %vm1630_vm4, %v4239_v16  ;;  %v4257_v54 = vmax.f32 %v7560_v51, 0.0  ;;  %v4258_v50 = vmax.f32 %v7564_v34, 0.0  ;;  %v4259_v58 = vmax.f32 %v7568_v11, 0.0  ;;  %v4260_v31 = vmax.f32 %v7572_v33, 0.0 }
 0x264   :  { %4368 = vst.msk [vmem:[%s9151_s4 + $0x60] sm:$0xff] %vm1630_vm4, %v4240_v30  ;;  %4369 = vst.msk [vmem:[%s9151_s4 + $0x68] sm:$0xff] %vm1630_vm4, %v4241_v5  ;;  %v4261_v10 = vmax.f32 %v7576_v39, 0.0  ;;  %v4262_v26 = vmax.f32 %v7580_v28, 0.0  ;;  %v4263_v2 = vmax.f32 %v7584_v20, 0.0  ;;  %v4264_v40 = vmax.f32 %v7588_v56, 0.0 }
 0x265   :  { %4370 = vst.msk [vmem:[%s9151_s4 + $0x70] sm:$0xff] %vm1630_vm4, %v4242_v47  ;;  %4371 = vst.msk [vmem:[%s9151_s4 + $0x78] sm:$0xff] %vm1630_vm4, %v4243_v19  ;;  %v4265_v59 = vmax.f32 %v7592_v53, 0.0  ;;  %v4266_v42 = vmax.f32 %v7596_v12, 0.0  ;;  %v9729_v51 = vld [vmem:[#allocation87_spill] sm:$0xff]  ;;  %v4268_v11 = vmax.f32 %v7604_v44, 0.0 }
 0x266   :  { %4372 = vst.msk [vmem:[%s9151_s4 + $0x80] sm:$0xff] %vm1630_vm4, %v4244_v41  ;;  %4373 = vst.msk [vmem:[%s9151_s4 + $0x88] sm:$0xff] %vm1630_vm4, %v4245_v62  ;;  %v4267_v34 = vmax.f32 %v9729_v51, 0.0  ;;  %v9730_v33 = vld [vmem:[#allocation88_spill] sm:$0xff]  ;;  %v9731_v28 = vld [vmem:[#allocation89_spill] sm:$0xff]  ;;  %v4274_v60 = vmax.f32 %v7628_v32, 0.0 }
 0x267   :  { %4374 = vst.msk [vmem:[%s9151_s4 + $0x90] sm:$0xff] %vm1630_vm4, %v4246_v52  ;;  %4375 = vst.msk [vmem:[%s9151_s4 + $0x98] sm:$0xff] %vm1630_vm4, %v4247_v0  ;;  %v4269_v39 = vmax.f32 %v9730_v33, 0.0  ;;  %v4270_v20 = vmax.f32 %v9731_v28, 0.0  ;;  %v9732_v56 = vld [vmem:[#allocation90_spill] sm:$0xff]  ;;  %v9733_v12 = vld [vmem:[#allocation91_spill] sm:$0xff] }
 0x268   :  { %4376 = vst.msk [vmem:[%s9151_s4 + $0xa0] sm:$0xff] %vm1630_vm4, %v4248_v36  ;;  %4377 = vst.msk [vmem:[%s9151_s4 + $0xa8] sm:$0xff] %vm1630_vm4, %v4249_v61  ;;  %v4271_v53 = vmax.f32 %v9732_v56, 0.0  ;;  %v4272_v44 = vmax.f32 %v9733_v12, 0.0  ;;  %v9734_v14 = vld [vmem:[#allocation92_spill] sm:$0xff]  ;;  %v4275_v55 = vmax.f32 %v7632_v3, 0.0 }
 0x269   :  { %4378 = vst.msk [vmem:[%s9151_s4 + $0xb0] sm:$0xff] %vm1630_vm4, %v4250_v63  ;;  %4379 = vst.msk [vmem:[%s9151_s4 + $0xb8] sm:$0xff] %vm1630_vm4, %v4251_v46  ;;  %v4273_v25 = vmax.f32 %v9734_v14, 0.0  ;;  %v4276_v32 = vmax.f32 %v7636_v24, 0.0  ;;  %v4277_v3 = vmax.f32 %v7640_v43, 0.0  ;;  %v4278_v7 = vmax.f32 %v7644_v8, 0.0 }
 0x26a   :  { %4380 = vst.msk [vmem:[%s9151_s4 + $0xc0] sm:$0xff] %vm1630_vm4, %v4252_v17  ;;  %4381 = vst.msk [vmem:[%s9151_s4 + $0xc8] sm:$0xff] %vm1630_vm4, %v4253_v13  ;;  %v4279_v29 = vmax.f32 %v7648_v9, 0.0  ;;  %v4280_v24 = vmax.f32 %v7652_v37, 0.0  ;;  %v4281_v43 = vmax.f32 %v7656_v4, 0.0  ;;  %v4282_v8 = vmax.f32 %v7660_v1, 0.0 }
 0x26b   :  { %4382 = vst.msk [vmem:[%s9151_s4 + $0xd0] sm:$0xff] %vm1630_vm4, %v4254_v21  ;;  %4383 = vst.msk [vmem:[%s9151_s4 + $0xd8] sm:$0xff] %vm1630_vm4, %v4255_v27  ;;  %v4283_v9 = vmax.f32 %v7664_v48, 0.0  ;;  %v4284_v37 = vmax.f32 %v7668_v45, 0.0  ;;  %v4285_v4 = vmax.f32 %v7672_v57, 0.0  ;;  %v9735_v1 = vld [vmem:[#allocation93_spill] sm:$0xff] }
 0x26c   :  { %4384 = vst.msk [vmem:[%s9151_s4 + $0xe0] sm:$0xff] %vm1630_vm4, %v4256_v38  ;;  %4385 = vst.msk [vmem:[%s9151_s4 + $0xe8] sm:$0xff] %vm1630_vm4, %v4257_v54  ;;  %v4286_v48 = vmax.f32 %v9735_v1, 0.0  ;;  %v9736_v35 = vld [vmem:[#allocation94_spill] sm:$0xff]  ;;  %v9737_v45 = vld [vmem:[#allocation95_spill] sm:$0xff]  ;;  %v4291_v30 = vmax.f32 %v7696_v22, 0.0 }
 0x26d   :  { %4386 = vst.msk [vmem:[%s9151_s4 + $0xf0] sm:$0xff] %vm1630_vm4, %v4258_v50  ;;  %4387 = vst.msk [vmem:[%s9151_s4 + $0xf8] sm:$0xff] %vm1630_vm4, %v4259_v58  ;;  %v4287_v23 = vmax.f32 %v9736_v35, 0.0  ;;  %v4288_v57 = vmax.f32 %v9737_v45, 0.0  ;;  %v9738_v49 = vld [vmem:[#allocation96_spill] sm:$0xff]  ;;  %v9739_v18 = vld [vmem:[#allocation97_spill] sm:$0xff] }
 0x26e   :  { %4388 = vst.msk [vmem:[%s9151_s4 + $0x100] sm:$0xff] %vm1630_vm4, %v4260_v31  ;;  %4389 = vst.msk [vmem:[%s9151_s4 + $0x108] sm:$0xff] %vm1630_vm4, %v4261_v10  ;;  %v4289_v6 = vmax.f32 %v9738_v49, 0.0  ;;  %v4290_v16 = vmax.f32 %v9739_v18, 0.0  ;;  %v9740_v22 = vld [vmem:[#allocation52_spill] sm:$0xff]  ;;  %v9741_v5 = vld [vmem:[#allocation50_spill] sm:$0xff] }
 0x26f   :  { %4390 = vst.msk [vmem:[%s9151_s4 + $0x110] sm:$0xff] %vm1630_vm4, %v4262_v26  ;;  %4391 = vst.msk [vmem:[%s9151_s4 + $0x118] sm:$0xff] %vm1630_vm4, %v4263_v2  ;;  %v3414_v47 = vadd.f32 %v9741_v5, %v9740_v22  ;;  %v9742_v19 = vld [vmem:[#allocation63_spill] sm:$0xff]  ;;  %v9743_v62 = vld [vmem:[#allocation48_spill] sm:$0xff] }
 0x270   :  { %4392 = vst.msk [vmem:[%s9151_s4 + $0x120] sm:$0xff] %vm1630_vm4, %v4264_v40  ;;  %4393 = vst.msk [vmem:[%s9151_s4 + $0x128] sm:$0xff] %vm1630_vm4, %v4265_v59  ;;  %v2657_v41 = vmul.f32 %v9742_v19, %v9742_v19  ;;  %v3415_v52 = vsel %vm1630_vm4, %v9743_v62, 0.0  ;;  %v9744_v36 = vld [vmem:[#allocation69_spill] sm:$0xff]  ;;  %v9745_v63 = vld [vmem:[#allocation46_spill] sm:$0xff] }
 0x271   :  { %4394 = vst.msk [vmem:[%s9151_s4 + $0x130] sm:$0xff] %vm1630_vm4, %v4266_v42  ;;  %4395 = vst.msk [vmem:[%s9151_s4 + $0x138] sm:$0xff] %vm1630_vm4, %v4267_v34  ;;  %v3416_v0 = vadd.f32 %v3415_v52, %v3414_v47  ;;  %v2658_v61 = vmul.f32 %v9744_v36, %v9744_v36  ;;  %v3417_v46 = vsel %vm1630_vm4, %v9745_v63, 0.0  ;;  %v9746_v13 = vld [vmem:[#allocation67_spill] sm:$0xff]  ;;  %v9747_v54 = vld [vmem:[#allocation73_spill] sm:$0xff] }
 0x272   :  { %4396 = vst.msk [vmem:[%s9151_s4 + $0x140] sm:$0xff] %vm1630_vm4, %v4268_v11  ;;  %4397 = vst.msk [vmem:[%s9151_s4 + $0x148] sm:$0xff] %vm1630_vm4, %v4269_v39  ;;  %v2659_v21 = vmul.f32 %v9746_v13, %v9746_v13  ;;  %v3419_v27 = vsel %vm1630_vm4, %v2657_v41, 0.0  ;;  %v2660_v50 = vmul.f32 %v9747_v54, %v9747_v54  ;;  %v9748_v10 = vld [vmem:[#allocation71_spill] sm:$0xff]  ;;  %v9749_v59 = vld [vmem:[#allocation77_spill] sm:$0xff] }
 0x273   :  { %4398 = vst.msk [vmem:[%s9151_s4 + $0x150] sm:$0xff] %vm1630_vm4, %v4270_v20  ;;  %4399 = vst.msk [vmem:[%s9151_s4 + $0x158] sm:$0xff] %vm1630_vm4, %v4271_v53  ;;  %v3418_v17 = vadd.f32 %v3417_v46, %v3416_v0  ;;  %v3421_v58 = vsel %vm1630_vm4, %v2658_v61, 0.0  ;;  %v2661_v26 = vmul.f32 %v9748_v10, %v9748_v10  ;;  %v2662_v42 = vmul.f32 %v9749_v59, %v9749_v59  ;;  %v9750_v11 = vld [vmem:[#allocation75_spill] sm:$0xff]  ;;  %v9751_v20 = vld [vmem:[#allocation81_spill] sm:$0xff] }
 0x274   :  { %4400 = vst.msk [vmem:[%s9151_s4 + $0x160] sm:$0xff] %vm1630_vm4, %v4272_v44  ;;  %4401 = vst.msk [vmem:[%s9151_s4 + $0x168] sm:$0xff] %vm1630_vm4, %v4273_v25  ;;  %v3423_v2 = vsel %vm1630_vm4, %v2659_v21, 0.0  ;;  %v3425_v51 = vsel %vm1630_vm4, %v2660_v50, 0.0  ;;  %v2663_v33 = vmul.f32 %v9750_v11, %v9750_v11  ;;  %v2664_v56 = vmul.f32 %v9751_v20, %v9751_v20  ;;  %v9752_v44 = vld [vmem:[#allocation79_spill] sm:$0xff]  ;;  %v9756_v5 = vld [vmem:[#allocation2_spill] sm:$0xff] }
 0x275   :  { %4402 = vst.msk [vmem:[%s9151_s4 + $0x170] sm:$0xff] %vm1630_vm4, %v4274_v60  ;;  %4403 = vst.msk [vmem:[%s9151_s4 + $0x178] sm:$0xff] %vm1630_vm4, %v4275_v55  ;;  %v3420_v38 = vadd.f32 %v3419_v27, %v3418_v17  ;;  %v3427_v39 = vsel %vm1630_vm4, %v2661_v26, 0.0  ;;  %v3429_v53 = vsel %vm1630_vm4, %v2662_v42, 0.0  ;;  %v2665_v14 = vmul.f32 %v9752_v44, %v9752_v44  ;;  %v9753_v55 = vld [vmem:[#allocation105_spill] sm:$0xff]  ;;  %v9758_v52 = vld [vmem:[#allocation4_spill] sm:$0xff] }
 0x276   :  { %4404 = vst.msk [vmem:[%s9151_s4 + $0x180] sm:$0xff] %vm1630_vm4, %v4276_v32  ;;  %4405 = vst.msk [vmem:[%s9151_s4 + $0x188] sm:$0xff] %vm1630_vm4, %v4277_v3  ;;  %v3431_v25 = vsel %vm1630_vm4, %v2663_v33, 0.0  ;;  %v2666_v32 = vmul.f32 %v9753_v55, %v9753_v55  ;;  %v3433_v3 = vsel %vm1630_vm4, %v2664_v56, 0.0  ;;  %v9757_v41 = vld [vmem:[#allocation5_spill] sm:$0xff]  ;;  %v9759_v61 = vld [vmem:[#allocation7_spill] sm:$0xff] }
 0x277   :  { %4406 = vst.msk [vmem:[%s9151_s4 + $0x190] sm:$0xff] %vm1630_vm4, %v4278_v7  ;;  %4407 = vst.msk [vmem:[%s9151_s4 + $0x198] sm:$0xff] %vm1630_vm4, %v4279_v29  ;;  %v3422_v31 = vadd.f32 %v3421_v58, %v3420_v38  ;;  %v9754_v29 = vld [vmem:[#allocation106_spill] sm:$0xff]  ;;  %v9761_v21 = vld [vmem:[#allocation9_spill] sm:$0xff] }
 0x278   :  { %4408 = vst.msk [vmem:[%s9151_s4 + $0x1a0] sm:$0xff] %vm1630_vm4, %v4280_v24  ;;  %4409 = vst.msk [vmem:[%s9151_s4 + $0x1a8] sm:$0xff] %vm1630_vm4, %v4281_v43  ;;  %v2667_v24 = vmul.f32 %v9754_v29, %v9754_v29  ;;  %v3435_v43 = vsel %vm1630_vm4, %v2665_v14, 0.0  ;;  %v9760_v46 = vld [vmem:[#allocation6_spill] sm:$0xff]  ;;  %v9762_v38 = vld [vmem:[#allocation8_spill] sm:$0xff] }
 0x279   :  { %4410 = vst.msk [vmem:[%s9151_s4 + $0x1b0] sm:$0xff] %vm1630_vm4, %v4282_v8  ;;  %4411 = vst.msk [vmem:[%s9151_s4 + $0x1b8] sm:$0xff] %vm1630_vm4, %v4283_v9  ;;  %v3424_v40 = vadd.f32 %v3423_v2, %v3422_v31  ;;  %v3437_v9 = vsel %vm1630_vm4, %v2666_v32, 0.0  ;;  %v9763_v58 = vld [vmem:[#allocation11_spill] sm:$0xff]  ;;  %v9764_v26 = vld [vmem:[#allocation10_spill] sm:$0xff] }
 0x27a   :  { %4412 = vst.msk [vmem:[%s9151_s4 + $0x1c0] sm:$0xff] %vm1630_vm4, %v4284_v37  ;;  %4413 = vst.msk [vmem:[%s9151_s4 + $0x1c8] sm:$0xff] %vm1630_vm4, %v4285_v4  ;;  %v3439_v4 = vsel %vm1630_vm4, %v2667_v24, 0.0  ;;  %v9767_v33 = vld [vmem:[#allocation15_spill] sm:$0xff]  ;;  %v9770_v14 = vld [vmem:[#allocation16_spill] sm:$0xff] }
 0x27b   :  { %4414 = vst.msk [vmem:[%s9151_s4 + $0x1d0] sm:$0xff] %vm1630_vm4, %v4286_v48  ;;  %4415 = vst.msk [vmem:[%s9151_s4 + $0x1d8] sm:$0xff] %vm1630_vm4, %v4287_v23  ;;  %v3426_v34 = vadd.f32 %v3425_v51, %v3424_v40  ;;  %v9765_v40 = vld [vmem:[#allocation13_spill] sm:$0xff]  ;;  %v9766_v51 = vld [vmem:[#allocation12_spill] sm:$0xff] }
 0x27c   :  { %4416 = vst.msk [vmem:[%s9151_s4 + $0x1e0] sm:$0xff] %vm1630_vm4, %v4288_v57  ;;  %4417 = vst.msk [vmem:[%s9151_s4 + $0x1e8] sm:$0xff] %vm1630_vm4, %v4289_v6  ;;  %v9773_v24 = vld [vmem:[#allocation21_spill] sm:$0xff] }
 0x27d   :  { %4418 = vst.msk [vmem:[%s9151_s4 + $0x1f0] sm:$0xff] %vm1630_vm4, %v4290_v16  ;;  %4419 = vst.msk [vmem:[%s9151_s4 + $0x1f8] sm:$0xff] %vm1630_vm4, %v4291_v30  ;;  %v3428_v28 = vadd.f32 %v3427_v39, %v3426_v34  ;;  %v9755_v30 = vld [vmem:[#allocation3_spill] sm:$0xff] }
 0x27f   :  { %v3430_v12 = vadd.f32 %v3429_v53, %v3428_v28  ;;  %v9768_v28 = vld [vmem:[#allocation14_spill] sm:$0xff]  ;;  %v9769_v53 = vld [vmem:[#allocation17_spill] sm:$0xff] }
 0x281   :  { %v3432_v60 = vadd.f32 %v3431_v25, %v3430_v12 }
 0x283   :  { %v3434_v7 = vadd.f32 %v3433_v3, %v3432_v60  ;;  %v9771_v60 = vld [vmem:[#allocation19_spill] sm:$0xff]  ;;  %v9772_v3 = vld [vmem:[#allocation18_spill] sm:$0xff] }
 0x285   :  { %v3436_v8 = vadd.f32 %v3435_v43, %v3434_v7 }
 0x287   :  { %v3438_v37 = vadd.f32 %v3437_v9, %v3436_v8  ;;  %v9774_v8 = vld [vmem:[#allocation20_spill] sm:$0xff] }
 0x289   :  { %v3440_v1 = vadd.f32 %v3439_v4, %v3438_v37  ;;  %v9775_v37 = vld [vmem:[#allocation23_spill] sm:$0xff] }
 0x28b   :  { %v3441_v48 = vrot.slane %v3440_v1, 4 }
 0x28d   :  { %v3442_v35 = vadd.f32 %v3441_v48, %v3440_v1  ;;  %v9776_v1 = vld [vmem:[#allocation22_spill] sm:$0xff] }
 0x28f   :  { %v3443_v23 = vrot.slane %v3442_v35, 2 }
 0x291   :  { %v3444_v45 = vadd.f32 %v3443_v23, %v3442_v35  ;;  %v9777_v35 = vld [vmem:[#allocation25_spill] sm:$0xff] }
 0x293   :  { %v3445_v57 = vrot.slane %v3444_v45, 1 }
 0x295   :  { %v3446_v49 = vadd.f32 %v3445_v57, %v3444_v45  ;;  %v9778_v45 = vld [vmem:[#allocation24_spill] sm:$0xff] }
 0x297   :  { %v3447_v6 = vmul.f32 0.001953125, %v3446_v49  ;;  %v9779_v49 = vld [vmem:[#allocation27_spill] sm:$0xff] }
 0x299   :  { %v3640_v18 = vadd.f32 1e-05, %v3447_v6 }
 0x29b   :  { %4968 = vrsqrt.f32 %v3640_v18  ;;  %v9780_v18 = vld [vmem:[#allocation26_spill] sm:$0xff] }
 0x2a5   :  { %v8057_v16 = vpop.eup %4968 }
 0x2a6   :  { %v8061_v22 = vmul.f32 %v8057_v16, %v9755_v30  ;;  %v8065_v47 = vmul.f32 %v8057_v16, %v9756_v5  ;;  %v8069_v62 = vmul.f32 %v8057_v16, %v9757_v41  ;;  %v8073_v0 = vmul.f32 %v8057_v16, %v9758_v52  ;;  %v9781_v5 = vld [vmem:[#allocation29_spill] sm:$0xff]  ;;  %v9782_v52 = vld [vmem:[#allocation28_spill] sm:$0xff] }
 0x2a7   :  { %v8077_v63 = vmul.f32 %v8057_v16, %v9759_v61  ;;  %v8081_v17 = vmul.f32 %v8057_v16, %v9760_v46  ;;  %v8085_v27 = vmul.f32 %v8057_v16, %v9761_v21  ;;  %v8089_v50 = vmul.f32 %v8057_v16, %v9762_v38  ;;  %v9783_v46 = vld [vmem:[#allocation31_spill] sm:$0xff]  ;;  %v9784_v38 = vld [vmem:[#allocation30_spill] sm:$0xff] }
 0x2a8   :  { %v8093_v31 = vmul.f32 %v8057_v16, %v9763_v58  ;;  %v8097_v2 = vmul.f32 %v8057_v16, %v9764_v26  ;;  %v8101_v42 = vmul.f32 %v8057_v16, %v9765_v40  ;;  %v8105_v34 = vmul.f32 %v8057_v16, %v9766_v51  ;;  %v9785_v26 = vld [vmem:[#allocation33_spill] sm:$0xff]  ;;  %v9786_v51 = vld [vmem:[#allocation32_spill] sm:$0xff] }
 0x2a9   :  { %v8109_v39 = vmul.f32 %v8057_v16, %v9767_v33  ;;  %v8113_v56 = vmul.f32 %v8057_v16, %v9768_v28  ;;  %v8117_v12 = vmul.f32 %v8057_v16, %v9769_v53  ;;  %v8121_v25 = vmul.f32 %v8057_v16, %v9770_v14  ;;  %v9787_v28 = vld [vmem:[#allocation35_spill] sm:$0xff]  ;;  %v9788_v14 = vld [vmem:[#allocation34_spill] sm:$0xff] }
 0x2aa   :  { %v8125_v32 = vmul.f32 %v8057_v16, %v9771_v60  ;;  %v8129_v7 = vmul.f32 %v8057_v16, %v9772_v3  ;;  %v8133_v43 = vmul.f32 %v8057_v16, %v9773_v24  ;;  %v8137_v9 = vmul.f32 %v8057_v16, %v9774_v8  ;;  %v9789_v3 = vld [vmem:[#allocation37_spill] sm:$0xff]  ;;  %v9790_v8 = vld [vmem:[#allocation36_spill] sm:$0xff] }
 0x2ab   :  { %v8141_v4 = vmul.f32 %v8057_v16, %v9775_v37  ;;  %v8145_v48 = vmul.f32 %v8057_v16, %v9776_v1  ;;  %v8149_v23 = vmul.f32 %v8057_v16, %v9777_v35  ;;  %v8153_v57 = vmul.f32 %v8057_v16, %v9778_v45  ;;  %v9791_v1 = vld [vmem:[#allocation39_spill] sm:$0xff]  ;;  %v9792_v45 = vld [vmem:[#allocation38_spill] sm:$0xff] }
 0x2ac   :  { %v8157_v6 = vmul.f32 %v8057_v16, %v9779_v49  ;;  %v8161_v30 = vmul.f32 %v8057_v16, %v9780_v18  ;;  %v8165_v41 = vmul.f32 %v8057_v16, %v9781_v5  ;;  %v8169_v61 = vmul.f32 %v8057_v16, %v9782_v52  ;;  %v9793_v18 = vld [vmem:[#allocation41_spill] sm:$0xff]  ;;  %v9794_v52 = vld [vmem:[#allocation40_spill] sm:$0xff] }
 0x2ad   :  { %v8173_v21 = vmul.f32 %v8057_v16, %v9783_v46  ;;  %v8177_v58 = vmul.f32 %v8057_v16, %v9784_v38  ;;  %v8181_v40 = vmul.f32 %v8057_v16, %v9785_v26  ;;  %v8185_v33 = vmul.f32 %v8057_v16, %v9786_v51  ;;  %v9795_v38 = vld [vmem:[#allocation43_spill] sm:$0xff]  ;;  %v9796_v51 = vld [vmem:[#allocation42_spill] sm:$0xff] }
 0x2ae   :  { %v8189_v53 = vmul.f32 %v8057_v16, %v9787_v28  ;;  %v8193_v60 = vmul.f32 %v8057_v16, %v9788_v14  ;;  %v8197_v24 = vmul.f32 %v8057_v16, %v9789_v3  ;;  %v8201_v37 = vmul.f32 %v8057_v16, %v9790_v8  ;;  %v9798_v14 = vld [vmem:[#allocation45_spill] sm:$0xff]  ;;  %v9800_v8 = vld [vmem:[#allocation44_spill] sm:$0xff] }
 0x2af   :  { %v8205_v35 = vmul.f32 %v8057_v16, %v9791_v1  ;;  %v8209_v49 = vmul.f32 %v8057_v16, %v9792_v45  ;;  %v8213_v5 = vmul.f32 %v8057_v16, %v9793_v18  ;;  %v8217_v46 = vmul.f32 %v8057_v16, %v9794_v52  ;;  %v9802_v45 = vld [vmem:[#allocation49_spill] sm:$0xff]  ;;  %v9804_v52 = vld [vmem:[#allocation47_spill] sm:$0xff] }
 0x2b0   :  { %v8221_v26 = vmul.f32 %v8057_v16, %v9795_v38  ;;  %v8225_v28 = vmul.f32 %v8057_v16, %v9796_v51  ;;  %v8229_v3 = vmul.f32 %v8057_v16, %v9798_v14  ;;  %v8233_v1 = vmul.f32 %v8057_v16, %v9800_v8 }
 0x2b1   :  { %v8237_v18 = vmul.f32 %v8057_v16, %v9802_v45  ;;  %v8241_v38 = vmul.f32 %v8057_v16, %v9804_v52  ;;  %v8245_v51 = vmul.f32 %v8057_v16, %v9806_v15 }
 0x2b2   :  { %9797 = vst [vmem:[#allocation98_spill] sm:$0xff] %v8225_v28  ;;  %9799 = vst [vmem:[#allocation99_spill] sm:$0xff] %v8229_v3  ;;  %v9808_v28 = vld [vmem:[#allocation51_spill] sm:$0xff]  ;;  %v9809_v3 = vld [vmem:[#allocation57_spill] sm:$0xff] }
 0x2b3   :  { %9801 = vst [vmem:[#allocation100_spill] sm:$0xff] %v8233_v1  ;;  %9803 = vst [vmem:[#allocation101_spill] sm:$0xff] %v8237_v18  ;;  %v8249_v14 = vmul.f32 %v8057_v16, %v9808_v28  ;;  %v8253_v8 = vmul.f32 %v8057_v16, %v9809_v3  ;;  %v9810_v1 = vld [vmem:[#allocation55_spill] sm:$0xff]  ;;  %v9811_v18 = vld [vmem:[#allocation61_spill] sm:$0xff]  ;;  %v8273_v3 = vmul.f32 %v8057_v16, %v9742_v19 }
 0x2b4   :  { %9805 = vst [vmem:[#allocation102_spill] sm:$0xff] %v8241_v38  ;;  %9807 = vst [vmem:[#allocation103_spill] sm:$0xff] %v8245_v51  ;;  %v8257_v45 = vmul.f32 %v8057_v16, %v9810_v1  ;;  %v8261_v52 = vmul.f32 %v8057_v16, %v9811_v18  ;;  %v9812_v38 = vld [vmem:[#allocation59_spill] sm:$0xff]  ;;  %v9813_v51 = vld [vmem:[#allocation65_spill] sm:$0xff]  ;;  %v8277_v1 = vmul.f32 %v8057_v16, %v9744_v36 }
 0x2b5   :  { %v8265_v15 = vmul.f32 %v8057_v16, %v9812_v38  ;;  %v8269_v28 = vmul.f32 %v8057_v16, %v9813_v51  ;;  %v8281_v18 = vmul.f32 %v8057_v16, %v9746_v13  ;;  %v8285_v38 = vmul.f32 %v8057_v16, %v9747_v54 }
 0x2b6   :  { %v8289_v51 = vmul.f32 %v8057_v16, %v9748_v10  ;;  %v8293_v19 = vmul.f32 %v8057_v16, %v9749_v59  ;;  %v8297_v36 = vmul.f32 %v8057_v16, %v9750_v11  ;;  %v8301_v13 = vmul.f32 %v8057_v16, %v9751_v20 }
 0x2b7   :  { %v8305_v54 = vmul.f32 %v8057_v16, %v9752_v44  ;;  %v8309_v10 = vmul.f32 %v8057_v16, %v9753_v55  ;;  %v8313_v59 = vmul.f32 %v8057_v16, %v9754_v29 }
 0x2b8   :  { %9814 = vst [vmem:[#allocation80_spill] sm:$0xff] %v8293_v19  ;;  %v9815_v19 = vld [vmem:[#allocation58_spill] sm:$0xff] }
 0x2b9   :  { %v8317_v11 = vmul.f32 %v9815_v19, %v8061_v22  ;;  %v8321_v20 = vmul.f32 %v9815_v19, %v8065_v47  ;;  %v8325_v44 = vmul.f32 %v9815_v19, %v8069_v62  ;;  %v8329_v55 = vmul.f32 %v9815_v19, %v8073_v0 }
 0x2ba   :  { %v8333_v29 = vmul.f32 %v9815_v19, %v8077_v63  ;;  %v8337_v16 = vmul.f32 %v9815_v19, %v8081_v17  ;;  %v8341_v22 = vmul.f32 %v9815_v19, %v8085_v27  ;;  %v8345_v47 = vmul.f32 %v9815_v19, %v8089_v50 }
 0x2bb   :  { %v8349_v62 = vmul.f32 %v9815_v19, %v8093_v31  ;;  %v8353_v0 = vmul.f32 %v9815_v19, %v8097_v2  ;;  %v8357_v63 = vmul.f32 %v9815_v19, %v8101_v42  ;;  %v8361_v17 = vmul.f32 %v9815_v19, %v8105_v34 }
 0x2bc   :  { %v8365_v27 = vmul.f32 %v9815_v19, %v8109_v39  ;;  %v8369_v50 = vmul.f32 %v9815_v19, %v8113_v56  ;;  %v8373_v31 = vmul.f32 %v9815_v19, %v8117_v12  ;;  %v8377_v2 = vmul.f32 %v9815_v19, %v8121_v25 }
 0x2bd   :  { %v8381_v42 = vmul.f32 %v9815_v19, %v8125_v32  ;;  %v8385_v34 = vmul.f32 %v9815_v19, %v8129_v7  ;;  %v8389_v39 = vmul.f32 %v9815_v19, %v8133_v43  ;;  %v8393_v56 = vmul.f32 %v9815_v19, %v8137_v9 }
 0x2be   :  { %v8397_v12 = vmul.f32 %v9815_v19, %v8141_v4  ;;  %v8401_v25 = vmul.f32 %v9815_v19, %v8145_v48  ;;  %v8405_v32 = vmul.f32 %v9815_v19, %v8149_v23  ;;  %v8409_v7 = vmul.f32 %v9815_v19, %v8153_v57 }
 0x2bf   :  { %v8413_v43 = vmul.f32 %v9815_v19, %v8157_v6  ;;  %v8417_v9 = vmul.f32 %v9815_v19, %v8161_v30  ;;  %v8421_v4 = vmul.f32 %v9815_v19, %v8165_v41  ;;  %v8425_v48 = vmul.f32 %v9815_v19, %v8169_v61 }
 0x2c0   :  { %v8429_v23 = vmul.f32 %v9815_v19, %v8173_v21  ;;  %v8433_v57 = vmul.f32 %v9815_v19, %v8177_v58  ;;  %v8437_v6 = vmul.f32 %v9815_v19, %v8181_v40  ;;  %v8441_v30 = vmul.f32 %v9815_v19, %v8185_v33 }
 0x2c1   :  { %v8445_v41 = vmul.f32 %v9815_v19, %v8189_v53  ;;  %v8449_v61 = vmul.f32 %v9815_v19, %v8193_v60  ;;  %v8453_v21 = vmul.f32 %v9815_v19, %v8197_v24  ;;  %v8457_v58 = vmul.f32 %v9815_v19, %v8201_v37  ;;  %v9821_v37 = vld [vmem:[#allocation98_spill] sm:$0xff] }
 0x2c2   :  { %v8461_v40 = vmul.f32 %v9815_v19, %v8205_v35  ;;  %v8465_v33 = vmul.f32 %v9815_v19, %v8209_v49  ;;  %v8469_v53 = vmul.f32 %v9815_v19, %v8213_v5  ;;  %v8473_v60 = vmul.f32 %v9815_v19, %v8217_v46 }
 0x2c3   :  { %v8477_v24 = vmul.f32 %v9815_v19, %v8221_v26  ;;  %v8481_v35 = vmul.f32 %v9815_v19, %v9821_v37 }
 0x2c4   :  { %9816 = vst [vmem:[#allocation78_spill] sm:$0xff] %v8461_v40  ;;  %9817 = vst [vmem:[#allocation82_spill] sm:$0xff] %v8465_v33  ;;  %v9822_v40 = vld [vmem:[#allocation99_spill] sm:$0xff]  ;;  %v9823_v33 = vld [vmem:[#allocation100_spill] sm:$0xff] }
 0x2c5   :  { %9818 = vst [vmem:[#allocation104_spill] sm:$0xff] %v8469_v53  ;;  %9819 = vst [vmem:[#allocation56_spill] sm:$0xff] %v8473_v60  ;;  %v8485_v49 = vmul.f32 %v9815_v19, %v9822_v40  ;;  %v8489_v5 = vmul.f32 %v9815_v19, %v9823_v33  ;;  %v9824_v53 = vld [vmem:[#allocation101_spill] sm:$0xff]  ;;  %v9825_v60 = vld [vmem:[#allocation102_spill] sm:$0xff]  ;;  %v8505_v40 = vmul.f32 %v9815_v19, %v8249_v14 }
 0x2c6   :  { %9820 = vst [vmem:[#allocation54_spill] sm:$0xff] %v8477_v24  ;;  %v8493_v46 = vmul.f32 %v9815_v19, %v9824_v53  ;;  %v8497_v26 = vmul.f32 %v9815_v19, %v9825_v60  ;;  %v9826_v24 = vld [vmem:[#allocation103_spill] sm:$0xff]  ;;  %v8509_v33 = vmul.f32 %v9815_v19, %v8253_v8  ;;  %v8513_v53 = vmul.f32 %v9815_v19, %v8257_v45 }
 0x2c7   :  { %v8501_v37 = vmul.f32 %v9815_v19, %v9826_v24  ;;  %v8517_v60 = vmul.f32 %v9815_v19, %v8261_v52  ;;  %v8521_v24 = vmul.f32 %v9815_v19, %v8265_v15  ;;  %v8525_v14 = vmul.f32 %v9815_v19, %v8269_v28 }
 0x2c8   :  { %v8529_v8 = vmul.f32 %v9815_v19, %v8273_v3  ;;  %v8533_v45 = vmul.f32 %v9815_v19, %v8277_v1  ;;  %v8537_v52 = vmul.f32 %v9815_v19, %v8281_v18  ;;  %v8541_v15 = vmul.f32 %v9815_v19, %v8285_v38 }
 0x2c9   :  { %9827 = vst [vmem:[#allocation60_spill] sm:$0xff] %v8525_v14  ;;  %v8545_v28 = vmul.f32 %v9815_v19, %v8289_v51  ;;  %v9828_v14 = vld [vmem:[#allocation80_spill] sm:$0xff]  ;;  %v8553_v1 = vmul.f32 %v9815_v19, %v8297_v36  ;;  %v8557_v18 = vmul.f32 %v9815_v19, %v8301_v13  ;;  %v8561_v38 = vmul.f32 %v9815_v19, %v8305_v54 }
 0x2ca   :  { %v8549_v3 = vmul.f32 %v9815_v19, %v9828_v14  ;;  %v8565_v51 = vmul.f32 %v9815_v19, %v8309_v10  ;;  %v8569_v14 = vmul.f32 %v9815_v19, %v8313_v59 }
 0x2cc   :  { %9829 = vst [vmem:[#allocation64_spill] sm:$0xff] %v8549_v3  ;;  %v9830_v3 = vld [vmem:[#allocation86_spill] sm:$0xff] }
 0x2cd   :  { %v8573_v36 = vadd.f32 %v9830_v3, %v8317_v11  ;;  %v8577_v13 = vadd.f32 %v9830_v3, %v8321_v20  ;;  %v8581_v54 = vadd.f32 %v9830_v3, %v8325_v44  ;;  %v8585_v10 = vadd.f32 %v9830_v3, %v8329_v55 }
 0x2ce   :  { %v8589_v19 = vadd.f32 %v9830_v3, %v8333_v29  ;;  %v8593_v59 = vadd.f32 %v9830_v3, %v8337_v16  ;;  %v8597_v11 = vadd.f32 %v9830_v3, %v8341_v22  ;;  %v8601_v20 = vadd.f32 %v9830_v3, %v8345_v47 }
 0x2cf   :  { %v8605_v44 = vadd.f32 %v9830_v3, %v8349_v62  ;;  %v8609_v55 = vadd.f32 %v9830_v3, %v8353_v0  ;;  %v8613_v29 = vadd.f32 %v9830_v3, %v8357_v63  ;;  %v8617_v16 = vadd.f32 %v9830_v3, %v8361_v17 }
 0x2d0   :  { %v8621_v22 = vadd.f32 %v9830_v3, %v8365_v27  ;;  %v8625_v47 = vadd.f32 %v9830_v3, %v8369_v50  ;;  %v8629_v62 = vadd.f32 %v9830_v3, %v8373_v31  ;;  %v8633_v0 = vadd.f32 %v9830_v3, %v8377_v2 }
 0x2d1   :  { %v8637_v63 = vadd.f32 %v9830_v3, %v8381_v42  ;;  %v8641_v17 = vadd.f32 %v9830_v3, %v8385_v34  ;;  %v8645_v27 = vadd.f32 %v9830_v3, %v8389_v39  ;;  %v8649_v50 = vadd.f32 %v9830_v3, %v8393_v56 }
 0x2d2   :  { %v8653_v31 = vadd.f32 %v9830_v3, %v8397_v12  ;;  %v8657_v2 = vadd.f32 %v9830_v3, %v8401_v25  ;;  %v8661_v42 = vadd.f32 %v9830_v3, %v8405_v32  ;;  %v8665_v34 = vadd.f32 %v9830_v3, %v8409_v7 }
 0x2d3   :  { %v8669_v39 = vadd.f32 %v9830_v3, %v8413_v43  ;;  %v8673_v56 = vadd.f32 %v9830_v3, %v8417_v9  ;;  %v8677_v12 = vadd.f32 %v9830_v3, %v8421_v4  ;;  %v8681_v25 = vadd.f32 %v9830_v3, %v8425_v48 }
 0x2d4   :  { %v8685_v32 = vadd.f32 %v9830_v3, %v8429_v23  ;;  %v8689_v7 = vadd.f32 %v9830_v3, %v8433_v57  ;;  %v8693_v43 = vadd.f32 %v9830_v3, %v8437_v6  ;;  %v8697_v9 = vadd.f32 %v9830_v3, %v8441_v30  ;;  %v9835_v6 = vld [vmem:[#allocation78_spill] sm:$0xff] }
 0x2d5   :  { %v8701_v4 = vadd.f32 %v9830_v3, %v8445_v41  ;;  %v8705_v48 = vadd.f32 %v9830_v3, %v8449_v61  ;;  %v8709_v23 = vadd.f32 %v9830_v3, %v8453_v21  ;;  %v8713_v57 = vadd.f32 %v9830_v3, %v8457_v58 }
 0x2d6   :  { %9831 = vst [vmem:[#allocation62_spill] sm:$0xff] %v8697_v9  ;;  %v8717_v30 = vadd.f32 %v9830_v3, %v9835_v6  ;;  %v9836_v9 = vld [vmem:[#allocation82_spill] sm:$0xff]  ;;  %v8737_v6 = vadd.f32 %v9830_v3, %v8481_v35  ;;  %v8757_v35 = vadd.f32 %v9830_v3, %v8501_v37  ;;  %v8777_v37 = vadd.f32 %v9830_v3, %v8521_v24 }
 0x2d7   :  { %9832 = vst [vmem:[#allocation68_spill] sm:$0xff] %v8701_v4  ;;  %9833 = vst [vmem:[#allocation66_spill] sm:$0xff] %v8705_v48  ;;  %v8721_v41 = vadd.f32 %v9830_v3, %v9836_v9  ;;  %v9837_v4 = vld [vmem:[#allocation104_spill] sm:$0xff]  ;;  %v8741_v9 = vadd.f32 %v9830_v3, %v8485_v49  ;;  %v8761_v49 = vadd.f32 %v9830_v3, %v8505_v40 }
 0x2d8   :  { %9834 = vst [vmem:[#allocation72_spill] sm:$0xff] %v8709_v23  ;;  %v8725_v61 = vadd.f32 %v9830_v3, %v9837_v4  ;;  %v9838_v48 = vld [vmem:[#allocation56_spill] sm:$0xff]  ;;  %v9839_v23 = vld [vmem:[#allocation54_spill] sm:$0xff]  ;;  %v8745_v4 = vadd.f32 %v9830_v3, %v8489_v5  ;;  %9840 = vst [vmem:[#allocation70_spill] sm:$0xff] %v8757_v35  ;;  %v8765_v5 = vadd.f32 %v9830_v3, %v8509_v33 }
 0x2d9   :  { %v8729_v21 = vadd.f32 %v9830_v3, %v9838_v48  ;;  %v8733_v58 = vadd.f32 %v9830_v3, %v9839_v23  ;;  %v8749_v48 = vadd.f32 %v9830_v3, %v8493_v46  ;;  %v8753_v23 = vadd.f32 %v9830_v3, %v8497_v26  ;;  %v9841_v35 = vld [vmem:[#allocation60_spill] sm:$0xff] }
 0x2da   :  { %v8769_v46 = vadd.f32 %v9830_v3, %v8513_v53  ;;  %v8773_v26 = vadd.f32 %v9830_v3, %v8517_v60  ;;  %v8781_v40 = vadd.f32 %v9830_v3, %v9841_v35  ;;  %v8785_v33 = vadd.f32 %v9830_v3, %v8529_v8 }
 0x2db   :  { %v8789_v53 = vadd.f32 %v9830_v3, %v8533_v45  ;;  %v8793_v60 = vadd.f32 %v9830_v3, %v8537_v52  ;;  %v8797_v24 = vadd.f32 %v9830_v3, %v8541_v15  ;;  %v8801_v35 = vadd.f32 %v9830_v3, %v8545_v28 }
 0x2dc   :  { %9842 = vst [vmem:[#allocation76_spill] sm:$0xff] %v8781_v40  ;;  %v9843_v40 = vld [vmem:[#allocation64_spill] sm:$0xff]  ;;  %v8809_v45 = vadd.f32 %v9830_v3, %v8553_v1  ;;  %v8813_v52 = vadd.f32 %v9830_v3, %v8557_v18  ;;  %v8817_v15 = vadd.f32 %v9830_v3, %v8561_v38  ;;  %v8821_v28 = vadd.f32 %v9830_v3, %v8565_v51 }
 0x2dd   :  { %v8805_v8 = vadd.f32 %v9830_v3, %v9843_v40  ;;  %v8825_v40 = vadd.f32 %v9830_v3, %v8569_v14  ;;  %v4293_v1 = vmax.f32 %v8577_v13, 0.0  ;;  %v4295_v18 = vmax.f32 %v8585_v10, 0.0 }
 0x2de   :  { %9845 = vst [vmem:[#allocation83_spill] sm:$0xff] %v8809_v45  ;;  %9846 = vst [vmem:[#allocation84_spill] sm:$0xff] %v8813_v52  ;;  %v4294_v45 = vmax.f32 %v8581_v54, 0.0  ;;  %v4296_v52 = vmax.f32 %v8589_v19, 0.0  ;;  %v4297_v38 = vmax.f32 %v8593_v59, 0.0  ;;  %v4299_v51 = vmax.f32 %v8601_v20, 0.0 }
 0x2df   :  { %9844 = vst [vmem:[#allocation74_spill] sm:$0xff] %v8805_v8  ;;  %9847 = vst [vmem:[#allocation85_spill] sm:$0xff] %v8817_v15  ;;  %v4292_v8 = vmax.f32 %v8573_v36, 0.0  ;;  %v4298_v15 = vmax.f32 %v8597_v11, 0.0  ;;  %v4301_v3 = vmax.f32 %v8609_v55, 0.0  ;;  %v4302_v14 = vmax.f32 %v8613_v29, 0.0 }
 0x2e0   :  { %9848 = vst [vmem:[#allocation87_spill] sm:$0xff] %v8821_v28  ;;  %v4300_v28 = vmax.f32 %v8605_v44, 0.0  ;;  %v4303_v36 = vmax.f32 %v8617_v16, 0.0  ;;  %4421 = vst.msk [vmem:[%s9151_s4 + $0x208] sm:$0xff] %vm1630_vm4, %v4293_v1  ;;  %v4304_v13 = vmax.f32 %v8621_v22, 0.0  ;;  %v4305_v54 = vmax.f32 %v8625_v47, 0.0 }
 0x2e1   :  { %4420 = vst.msk [vmem:[%s9151_s4 + $0x200] sm:$0xff] %vm1630_vm4, %v4292_v8  ;;  %4422 = vst.msk [vmem:[%s9151_s4 + $0x210] sm:$0xff] %vm1630_vm4, %v4294_v45  ;;  %v4306_v10 = vmax.f32 %v8629_v62, 0.0  ;;  %v4307_v19 = vmax.f32 %v8633_v0, 0.0  ;;  %v4308_v59 = vmax.f32 %v8637_v63, 0.0  ;;  %v4309_v11 = vmax.f32 %v8641_v17, 0.0 }
 0x2e2   :  { %4423 = vst.msk [vmem:[%s9151_s4 + $0x218] sm:$0xff] %vm1630_vm4, %v4295_v18  ;;  %4424 = vst.msk [vmem:[%s9151_s4 + $0x220] sm:$0xff] %vm1630_vm4, %v4296_v52  ;;  %v4310_v20 = vmax.f32 %v8645_v27, 0.0  ;;  %v4311_v44 = vmax.f32 %v8649_v50, 0.0  ;;  %v4312_v55 = vmax.f32 %v8653_v31, 0.0  ;;  %v4313_v29 = vmax.f32 %v8657_v2, 0.0 }
 0x2e3   :  { %4425 = vst.msk [vmem:[%s9151_s4 + $0x228] sm:$0xff] %vm1630_vm4, %v4297_v38  ;;  %4426 = vst.msk [vmem:[%s9151_s4 + $0x230] sm:$0xff] %vm1630_vm4, %v4298_v15  ;;  %v4314_v16 = vmax.f32 %v8661_v42, 0.0  ;;  %v4315_v22 = vmax.f32 %v8665_v34, 0.0  ;;  %v4316_v47 = vmax.f32 %v8669_v39, 0.0  ;;  %v4317_v62 = vmax.f32 %v8673_v56, 0.0 }
 0x2e4   :  { %4427 = vst.msk [vmem:[%s9151_s4 + $0x238] sm:$0xff] %vm1630_vm4, %v4299_v51  ;;  %4428 = vst.msk [vmem:[%s9151_s4 + $0x240] sm:$0xff] %vm1630_vm4, %v4300_v28  ;;  %v4318_v0 = vmax.f32 %v8677_v12, 0.0  ;;  %v4319_v63 = vmax.f32 %v8681_v25, 0.0  ;;  %v4320_v17 = vmax.f32 %v8685_v32, 0.0  ;;  %v4321_v27 = vmax.f32 %v8689_v7, 0.0 }
 0x2e5   :  { %4429 = vst.msk [vmem:[%s9151_s4 + $0x248] sm:$0xff] %vm1630_vm4, %v4301_v3  ;;  %4430 = vst.msk [vmem:[%s9151_s4 + $0x250] sm:$0xff] %vm1630_vm4, %v4302_v14  ;;  %v4322_v50 = vmax.f32 %v8693_v43, 0.0  ;;  %v9849_v31 = vld [vmem:[#allocation62_spill] sm:$0xff]  ;;  %v9850_v42 = vld [vmem:[#allocation68_spill] sm:$0xff]  ;;  %v4327_v32 = vmax.f32 %v8713_v57, 0.0 }
 0x2e6   :  { %4431 = vst.msk [vmem:[%s9151_s4 + $0x258] sm:$0xff] %vm1630_vm4, %v4303_v36  ;;  %4432 = vst.msk [vmem:[%s9151_s4 + $0x260] sm:$0xff] %vm1630_vm4, %v4304_v13  ;;  %v4323_v2 = vmax.f32 %v9849_v31, 0.0  ;;  %v4324_v34 = vmax.f32 %v9850_v42, 0.0  ;;  %v9851_v39 = vld [vmem:[#allocation66_spill] sm:$0xff]  ;;  %v9852_v12 = vld [vmem:[#allocation72_spill] sm:$0xff] }
 0x2e7   :  { %4433 = vst.msk [vmem:[%s9151_s4 + $0x268] sm:$0xff] %vm1630_vm4, %v4305_v54  ;;  %4434 = vst.msk [vmem:[%s9151_s4 + $0x270] sm:$0xff] %vm1630_vm4, %v4306_v10  ;;  %v4325_v56 = vmax.f32 %v9851_v39, 0.0  ;;  %v4326_v25 = vmax.f32 %v9852_v12, 0.0  ;;  %v4328_v7 = vmax.f32 %v8717_v30, 0.0  ;;  %v4329_v43 = vmax.f32 %v8721_v41, 0.0 }
 0x2e8   :  { %4435 = vst.msk [vmem:[%s9151_s4 + $0x278] sm:$0xff] %vm1630_vm4, %v4307_v19  ;;  %4436 = vst.msk [vmem:[%s9151_s4 + $0x280] sm:$0xff] %vm1630_vm4, %v4308_v59  ;;  %v4330_v57 = vmax.f32 %v8725_v61, 0.0  ;;  %v4331_v8 = vmax.f32 %v8729_v21, 0.0  ;;  %v4332_v30 = vmax.f32 %v8733_v58, 0.0  ;;  %v4333_v41 = vmax.f32 %v8737_v6, 0.0 }
 0x2e9   :  { %4437 = vst.msk [vmem:[%s9151_s4 + $0x288] sm:$0xff] %vm1630_vm4, %v4309_v11  ;;  %4438 = vst.msk [vmem:[%s9151_s4 + $0x290] sm:$0xff] %vm1630_vm4, %v4310_v20  ;;  %v4334_v61 = vmax.f32 %v8741_v9, 0.0  ;;  %v4335_v21 = vmax.f32 %v8745_v4, 0.0  ;;  %v4336_v58 = vmax.f32 %v8749_v48, 0.0  ;;  %v4337_v6 = vmax.f32 %v8753_v23, 0.0 }
 0x2ea   :  { %4439 = vst.msk [vmem:[%s9151_s4 + $0x298] sm:$0xff] %vm1630_vm4, %v4311_v44  ;;  %4440 = vst.msk [vmem:[%s9151_s4 + $0x2a0] sm:$0xff] %vm1630_vm4, %v4312_v55  ;;  %v9853_v9 = vld [vmem:[#allocation70_spill] sm:$0xff]  ;;  %v4339_v45 = vmax.f32 %v8761_v49, 0.0  ;;  %v4340_v48 = vmax.f32 %v8765_v5, 0.0  ;;  %v4341_v23 = vmax.f32 %v8769_v46, 0.0 }
 0x2eb   :  { %4441 = vst.msk [vmem:[%s9151_s4 + $0x2a8] sm:$0xff] %vm1630_vm4, %v4313_v29  ;;  %4442 = vst.msk [vmem:[%s9151_s4 + $0x2b0] sm:$0xff] %vm1630_vm4, %v4314_v16  ;;  %v4338_v4 = vmax.f32 %v9853_v9, 0.0  ;;  %v4342_v49 = vmax.f32 %v8773_v26, 0.0  ;;  %v4343_v52 = vmax.f32 %v8777_v37, 0.0  ;;  %v9854_v5 = vld [vmem:[#allocation76_spill] sm:$0xff] }
 0x2ec   :  { %4443 = vst.msk [vmem:[%s9151_s4 + $0x2b8] sm:$0xff] %vm1630_vm4, %v4315_v22  ;;  %4444 = vst.msk [vmem:[%s9151_s4 + $0x2c0] sm:$0xff] %vm1630_vm4, %v4316_v47  ;;  %v4344_v46 = vmax.f32 %v9854_v5, 0.0  ;;  %v4345_v26 = vmax.f32 %v8785_v33, 0.0  ;;  %v4346_v37 = vmax.f32 %v8789_v53, 0.0  ;;  %v4347_v15 = vmax.f32 %v8793_v60, 0.0 }
 0x2ed   :  { %4445 = vst.msk [vmem:[%s9151_s4 + $0x2c8] sm:$0xff] %vm1630_vm4, %v4317_v62  ;;  %4446 = vst.msk [vmem:[%s9151_s4 + $0x2d0] sm:$0xff] %vm1630_vm4, %v4318_v0  ;;  %v4348_v33 = vmax.f32 %v8797_v24, 0.0  ;;  %v4349_v53 = vmax.f32 %v8801_v35, 0.0  ;;  %v9855_v60 = vld [vmem:[#allocation74_spill] sm:$0xff]  ;;  %v9856_v1 = vld [vmem:[#allocation83_spill] sm:$0xff] }
 0x2ee   :  { %4447 = vst.msk [vmem:[%s9151_s4 + $0x2d8] sm:$0xff] %vm1630_vm4, %v4319_v63  ;;  %4448 = vst.msk [vmem:[%s9151_s4 + $0x2e0] sm:$0xff] %vm1630_vm4, %v4320_v17  ;;  %v4350_v28 = vmax.f32 %v9855_v60, 0.0  ;;  %v4351_v18 = vmax.f32 %v9856_v1, 0.0  ;;  %v9857_v24 = vld [vmem:[#allocation84_spill] sm:$0xff]  ;;  %v9858_v38 = vld [vmem:[#allocation85_spill] sm:$0xff] }
 0x2ef   :  { %4449 = vst.msk [vmem:[%s9151_s4 + $0x2e8] sm:$0xff] %vm1630_vm4, %v4321_v27  ;;  %4450 = vst.msk [vmem:[%s9151_s4 + $0x2f0] sm:$0xff] %vm1630_vm4, %v4322_v50  ;;  %v4352_v35 = vmax.f32 %v9857_v24, 0.0  ;;  %v4353_v51 = vmax.f32 %v9858_v38, 0.0  ;;  %v9859_v3 = vld [vmem:[#allocation87_spill] sm:$0xff]  ;;  %v4355_v36 = vmax.f32 %v8825_v40, 0.0 }
 0x2f0   :  { %4451 = vst.msk [vmem:[%s9151_s4 + $0x2f8] sm:$0xff] %vm1630_vm4, %v4323_v2  ;;  %4452 = vst.msk [vmem:[%s9151_s4 + $0x300] sm:$0xff] %vm1630_vm4, %v4324_v34  ;;  %v4354_v14 = vmax.f32 %v9859_v3, 0.0 }
 0x2f1   :  { %4453 = vst.msk [vmem:[%s9151_s4 + $0x308] sm:$0xff] %vm1630_vm4, %v4325_v56  ;;  %4454 = vst.msk [vmem:[%s9151_s4 + $0x310] sm:$0xff] %vm1630_vm4, %v4326_v25 }
 0x2f2   :  { %4455 = vst.msk [vmem:[%s9151_s4 + $0x318] sm:$0xff] %vm1630_vm4, %v4327_v32  ;;  %4456 = vst.msk [vmem:[%s9151_s4 + $0x320] sm:$0xff] %vm1630_vm4, %v4328_v7 }
 0x2f3   :  { %4457 = vst.msk [vmem:[%s9151_s4 + $0x328] sm:$0xff] %vm1630_vm4, %v4329_v43  ;;  %4458 = vst.msk [vmem:[%s9151_s4 + $0x330] sm:$0xff] %vm1630_vm4, %v4330_v57 }
 0x2f4   :  { %4459 = vst.msk [vmem:[%s9151_s4 + $0x338] sm:$0xff] %vm1630_vm4, %v4331_v8  ;;  %4460 = vst.msk [vmem:[%s9151_s4 + $0x340] sm:$0xff] %vm1630_vm4, %v4332_v30 }
 0x2f5   :  { %4461 = vst.msk [vmem:[%s9151_s4 + $0x348] sm:$0xff] %vm1630_vm4, %v4333_v41  ;;  %4462 = vst.msk [vmem:[%s9151_s4 + $0x350] sm:$0xff] %vm1630_vm4, %v4334_v61 }
 0x2f6   :  { %4463 = vst.msk [vmem:[%s9151_s4 + $0x358] sm:$0xff] %vm1630_vm4, %v4335_v21  ;;  %4464 = vst.msk [vmem:[%s9151_s4 + $0x360] sm:$0xff] %vm1630_vm4, %v4336_v58 }
 0x2f7   :  { %4465 = vst.msk [vmem:[%s9151_s4 + $0x368] sm:$0xff] %vm1630_vm4, %v4337_v6  ;;  %4466 = vst.msk [vmem:[%s9151_s4 + $0x370] sm:$0xff] %vm1630_vm4, %v4338_v4 }
 0x2f8   :  { %4467 = vst.msk [vmem:[%s9151_s4 + $0x378] sm:$0xff] %vm1630_vm4, %v4339_v45  ;;  %4468 = vst.msk [vmem:[%s9151_s4 + $0x380] sm:$0xff] %vm1630_vm4, %v4340_v48 }
 0x2f9   :  { %4469 = vst.msk [vmem:[%s9151_s4 + $0x388] sm:$0xff] %vm1630_vm4, %v4341_v23  ;;  %4470 = vst.msk [vmem:[%s9151_s4 + $0x390] sm:$0xff] %vm1630_vm4, %v4342_v49 }
 0x2fa   :  { %4471 = vst.msk [vmem:[%s9151_s4 + $0x398] sm:$0xff] %vm1630_vm4, %v4343_v52  ;;  %4472 = vst.msk [vmem:[%s9151_s4 + $0x3a0] sm:$0xff] %vm1630_vm4, %v4344_v46 }
 0x2fb   :  { %4473 = vst.msk [vmem:[%s9151_s4 + $0x3a8] sm:$0xff] %vm1630_vm4, %v4345_v26  ;;  %4474 = vst.msk [vmem:[%s9151_s4 + $0x3b0] sm:$0xff] %vm1630_vm4, %v4346_v37 }
 0x2fc   :  { %4475 = vst.msk [vmem:[%s9151_s4 + $0x3b8] sm:$0xff] %vm1630_vm4, %v4347_v15  ;;  %4476 = vst.msk [vmem:[%s9151_s4 + $0x3c0] sm:$0xff] %vm1630_vm4, %v4348_v33 }
 0x2fd   :  { %4477 = vst.msk [vmem:[%s9151_s4 + $0x3c8] sm:$0xff] %vm1630_vm4, %v4349_v53  ;;  %4478 = vst.msk [vmem:[%s9151_s4 + $0x3d0] sm:$0xff] %vm1630_vm4, %v4350_v28 }
 0x2fe   :  { %4479 = vst.msk [vmem:[%s9151_s4 + $0x3d8] sm:$0xff] %vm1630_vm4, %v4351_v18  ;;  %4480 = vst.msk [vmem:[%s9151_s4 + $0x3e0] sm:$0xff] %vm1630_vm4, %v4352_v35 }
 0x2ff   :  { %4481 = vst.msk [vmem:[%s9151_s4 + $0x3e8] sm:$0xff] %vm1630_vm4, %v4353_v51  ;;  %4482 = vst.msk [vmem:[%s9151_s4 + $0x3f0] sm:$0xff] %vm1630_vm4, %v4354_v14 }
 0x300   :  { %4483 = vst.msk [vmem:[%s9151_s4 + $0x3f8] sm:$0xff] %vm1630_vm4, %v4355_v36 }

// kernel: vitic_forward.8
= control target key start
LH: loop header
LB: loop body
LE: loop exit
PB: predicated region body
PF: predicated region fallthrough
CT: control target
= control target key end

     0   :  { %vm54_vm0 = vcmask 293888   ;;  %vm151_vm1 = vcmask 1043456   ;;  %vm479_vm2 = vcmask 64512   ;;  %s2074_s1 = inlined_call_operand.vmem [shape: f32[36,8], index: 1, kind: input, shape index: {}]   ;;  %s2075_s0 = inlined_call_operand.vmem [shape: f32[256,36], index: 0, kind: input, shape index: {}]   ;;  %s2076_s2 = inlined_call_operand.vmem [shape: f32[1,8], index: 2, kind: input, shape index: {}]   ;;  %s2077_s3 = inlined_call_operand.vmem [shape: f32[1,8], index: 3, kind: input, shape index: {}]   ;;  %s2078_s4 = inlined_call_operand.vmem [shape: f32[256,8], index: 4, kind: output, shape index: {}]  }
   0x1   :  { %v49_v0 = vld [vmem:[%s2074_s1] sm:$0xff]  ;;  %v50_v1 = vld [vmem:[%s2074_s1 + $0x8] sm:$0xff]  ;;  %v51_v2 = vld [vmem:[%s2074_s1 + $0x10] sm:$0xff] }
   0x2   :  { %v1355_v3 = vpack.c.bf16 %v50_v1, %v49_v0  ;;  %v52_v4 = vld [vmem:[%s2074_s1 + $0x18] sm:$0xff]  ;;  %v17_v5 = vld [vmem:[%s2075_s0] sm:$0xff]  ;;  %v18_v9 = vld [vmem:[%s2075_s0 + $0x8] sm:$0xff] }
   0x3   :  { %v1359_v6 = vpack.c.bf16 %v52_v4, %v51_v2  ;;  %1307 = vmatprep.mubr.msk.f32.mxu0 %vm54_vm0, %v17_v5  ;;  %v33_v7 = vld [vmem:[%s2075_s0 + $0x80] sm:$0xff]  ;;  %v34_v10 = vld [vmem:[%s2075_s0 + $0x88] sm:$0xff]  ;;  %v19_v11 = vld [vmem:[%s2075_s0 + $0x10] sm:$0xff] }
   0x4   :  { %1356 = vmatprep.subr.bf16.mxu0 %v1355_v3  ;;  %1363 = vmatprep.subr.bf16.mxu1 %v1355_v3  ;;  %v53_v8 = vld [vmem:[%s2074_s1 + $0x20] sm:$0xf]  ;;  %v35_v12 = vld [vmem:[%s2075_s0 + $0x90] sm:$0xff]  ;;  %v20_v13 = vld [vmem:[%s2075_s0 + $0x18] sm:$0xff] }
   0x5   :  { %1358 = vmatpush3.bf16.msra.mxu0 %v1355_v3  ;;  %1366 = vmatpush3.bf16.msra.mxu1 %v1355_v3  ;;  %v36_v14 = vld [vmem:[%s2075_s0 + $0x98] sm:$0xff]  ;;  %v21_v15 = vld [vmem:[%s2075_s0 + $0x20] sm:$0xff]  ;;  %v22_v17 = vld [vmem:[%s2075_s0 + $0x28] sm:$0xff] }
   0x6   :  { %1360 = vmatprep.subr.bf16.mxu0 %v1359_v6  ;;  %1364 = vmatprep.subr.bf16.mxu1 %v1359_v6  ;;  %v37_v16 = vld [vmem:[%s2075_s0 + $0xa0] sm:$0xff]  ;;  %v38_v18 = vld [vmem:[%s2075_s0 + $0xa8] sm:$0xff]  ;;  %v23_v19 = vld [vmem:[%s2075_s0 + $0x30] sm:$0xff] }
   0x7   :  { %1331 = vmatprep.mubr.msk.f32.mxu1 %vm54_vm0, %v33_v7  ;;  %v39_v20 = vld [vmem:[%s2075_s0 + $0xb0] sm:$0xff]  ;;  %v24_v21 = vld [vmem:[%s2075_s0 + $0x38] sm:$0xff]  ;;  %v25_v23 = vld [vmem:[%s2075_s0 + $0x40] sm:$0xff] }
   0x8   :  { %v40_v22 = vld [vmem:[%s2075_s0 + $0xb8] sm:$0xff]  ;;  %v41_v24 = vld [vmem:[%s2075_s0 + $0xc0] sm:$0xff]  ;;  %v26_v25 = vld [vmem:[%s2075_s0 + $0x48] sm:$0xff] }
   0x9   :  { %1362 = vmatpush3.bf16.msra.mxu0 %v1359_v6  ;;  %1367 = vmatpush3.bf16.msra.mxu1 %v1359_v6  ;;  %v42_v26 = vld [vmem:[%s2075_s0 + $0xc8] sm:$0xff]  ;;  %v27_v27 = vld [vmem:[%s2075_s0 + $0x50] sm:$0xff]  ;;  %v28_v29 = vld [vmem:[%s2075_s0 + $0x58] sm:$0xff] }
   0xa   :  { %1305 = vmatprep.subr.msk.mxu0 %vm151_vm1, %v53_v8  ;;  %1365 = vmatprep.subr.msk.mxu1 %vm151_vm1, %v53_v8  ;;  %v43_v28 = vld [vmem:[%s2075_s0 + $0xd0] sm:$0xff]  ;;  %v44_v30 = vld [vmem:[%s2075_s0 + $0xd8] sm:$0xff]  ;;  %v29_v31 = vld [vmem:[%s2075_s0 + $0x60] sm:$0xff] }
   0xb   :  { %v45_v32 = vld [vmem:[%s2075_s0 + $0xe0] sm:$0xff]  ;;  %v30_v33 = vld [vmem:[%s2075_s0 + $0x68] sm:$0xff]  ;;  %v31_v35 = vld [vmem:[%s2075_s0 + $0x70] sm:$0xff] }
   0xc   :  { %v46_v34 = vld [vmem:[%s2075_s0 + $0xe8] sm:$0xff]  ;;  %v47_v36 = vld [vmem:[%s2075_s0 + $0xf0] sm:$0xff]  ;;  %v32_v37 = vld [vmem:[%s2075_s0 + $0x78] sm:$0xff] }
   0xd   :  { %1306 = vmatpush3.msk.msra.mxu0 %vm151_vm1, %v53_v8  ;;  %1368 = vmatpush3.msk.msra.mxu1 %vm151_vm1, %v53_v8  ;;  %v48_v38 = vld [vmem:[%s2075_s0 + $0xf8] sm:$0xff] }
   0xe   :  { %1308 = vmatmul.mubr.msk.f32.vlgmr.msra.gmra.mrb[0].mxu0 %vm54_vm0, %v18_v9  ;;  %1332 = vmatmul.mubr.msk.f32.vlgmr.msra.gmra.mrb[0].mxu1 %vm54_vm0, %v34_v10 }
   0xf   :  { %1310 = vmatprep.mubr.msk.f32.mxu0 %vm54_vm0, %v19_v11  ;;  %1334 = vmatprep.mubr.msk.f32.mxu1 %vm54_vm0, %v35_v12 }
  0x12   :  { %1311 = vmatmul.mubr.msk.f32.gmra.mrb[2].mxu0 %vm54_vm0, %v20_v13  ;;  %1335 = vmatmul.mubr.msk.f32.gmra.mrb[2].mxu1 %vm54_vm0, %v36_v14 }
  0x13   :  { %1313 = vmatprep.mubr.msk.f32.mxu0 %vm54_vm0, %v21_v15  ;;  %1337 = vmatprep.mubr.msk.f32.mxu1 %vm54_vm0, %v37_v16 }
  0x16   :  { %1314 = vmatmul.mubr.msk.f32.gmra.mrb[4].mxu0 %vm54_vm0, %v22_v17  ;;  %1338 = vmatmul.mubr.msk.f32.gmra.mrb[4].mxu1 %vm54_vm0, %v38_v18 }
  0x17   :  { %1316 = vmatprep.mubr.msk.f32.mxu0 %vm54_vm0, %v23_v19  ;;  %1340 = vmatprep.mubr.msk.f32.mxu1 %vm54_vm0, %v39_v20 }
  0x1a   :  { %1317 = vmatmul.mubr.msk.f32.gmra.mrb[6].mxu0 %vm54_vm0, %v24_v21  ;;  %1341 = vmatmul.mubr.msk.f32.gmra.mrb[6].mxu1 %vm54_vm0, %v40_v22 }
  0x1b   :  { %1319 = vmatprep.mubr.msk.f32.mxu0 %vm54_vm0, %v25_v23  ;;  %1343 = vmatprep.mubr.msk.f32.mxu1 %vm54_vm0, %v41_v24 }
  0x1e   :  { %1320 = vmatmul.mubr.msk.f32.gmra.mrb[8].mxu0 %vm54_vm0, %v26_v25  ;;  %1344 = vmatmul.mubr.msk.f32.gmra.mrb[8].mxu1 %vm54_vm0, %v42_v26 }
  0x1f   :  { %1322 = vmatprep.mubr.msk.f32.mxu0 %vm54_vm0, %v27_v27  ;;  %1346 = vmatprep.mubr.msk.f32.mxu1 %vm54_vm0, %v43_v28 }
  0x22   :  { %1323 = vmatmul.mubr.msk.f32.gmra.mrb[10].mxu0 %vm54_vm0, %v28_v29  ;;  %1347 = vmatmul.mubr.msk.f32.gmra.mrb[10].mxu1 %vm54_vm0, %v44_v30 }
  0x23   :  { %1325 = vmatprep.mubr.msk.f32.mxu0 %vm54_vm0, %v29_v31  ;;  %1349 = vmatprep.mubr.msk.f32.mxu1 %vm54_vm0, %v45_v32 }
  0x26   :  { %1326 = vmatmul.mubr.msk.f32.gmra.mrb[12].mxu0 %vm54_vm0, %v30_v33  ;;  %1350 = vmatmul.mubr.msk.f32.gmra.mrb[12].mxu1 %vm54_vm0, %v46_v34 }
  0x27   :  { %1328 = vmatprep.mubr.msk.f32.mxu0 %vm54_vm0, %v31_v35  ;;  %1352 = vmatprep.mubr.msk.f32.mxu1 %vm54_vm0, %v47_v36 }
  0x2a   :  { %1329 = vmatmul.mubr.msk.f32.gmra.mrb[14].mxu0 %vm54_vm0, %v32_v37  ;;  %1353 = vmatmul.mubr.msk.f32.gmra.mrb[14].mxu1 %vm54_vm0, %v48_v38 }
  0xe1   :  { %v1541_v39 = vpop.f32.mrb[0].mxu0  ;;  %v1543_v40 = vpop.f32.mrb[0].mxu1 }
  0xe2   :  { %v481_v41 = vsel %vm479_vm2, %v1541_v39, 0.0  ;;  %v616_v42 = vsel %vm479_vm2, %v1543_v40, 0.0  ;;  %v1549_v43 = vpop.f32.mrb[1].mxu0  ;;  %v1551_v44 = vpop.f32.mrb[1].mxu1 }
  0xe3   :  { %v480_v45 = vsel %vm479_vm2, %v1549_v43, 0.0  ;;  %v614_v46 = vsel %vm479_vm2, %v1551_v44, 0.0 }
  0xe4   :  { %v482_v47 = vadd.f32 %v481_v41, %v480_v45  ;;  %v617_v48 = vadd.f32 %v616_v42, %v614_v46 }
  0xe5   :  { %v1557_v49 = vpop.f32.mrb[2].mxu0  ;;  %v1559_v50 = vpop.f32.mrb[2].mxu1 }
  0xe6   :  { %v1561_v51 = vpop.f32.mrb[3].mxu0  ;;  %v1563_v52 = vpop.f32.mrb[3].mxu1  ;;  %v485_v57 = vsel %vm479_vm2, %v1557_v49, 0.0  ;;  %v620_v58 = vsel %vm479_vm2, %v1559_v50, 0.0 }
  0xe7   :  { %v483_v53 = vsel %vm479_vm2, %v1561_v51, 0.0  ;;  %v618_v54 = vsel %vm479_vm2, %v1563_v52, 0.0 }
  0xe8   :  { %v484_v55 = vadd.f32 %v483_v53, %v482_v47  ;;  %v619_v56 = vadd.f32 %v618_v54, %v617_v48 }
  0xe9   :  { %v1573_v59 = vpop.f32.mrb[4].mxu0  ;;  %v1575_v60 = vpop.f32.mrb[4].mxu1 }
  0xea   :  { %v1577_v61 = vpop.f32.mrb[5].mxu0  ;;  %v486_v62 = vadd.f32 %v485_v57, %v484_v55  ;;  %v1579_v63 = vpop.f32.mrb[5].mxu1  ;;  %v621_v0 = vadd.f32 %v620_v58, %v619_v56  ;;  %v489_v5 = vsel %vm479_vm2, %v1573_v59, 0.0  ;;  %v624_v6 = vsel %vm479_vm2, %v1575_v60, 0.0 }
  0xeb   :  { %v487_v1 = vsel %vm479_vm2, %v1577_v61, 0.0  ;;  %v622_v2 = vsel %vm479_vm2, %v1579_v63, 0.0 }
  0xec   :  { %v488_v3 = vadd.f32 %v487_v1, %v486_v62  ;;  %v623_v4 = vadd.f32 %v622_v2, %v621_v0 }
  0xed   :  { %v1589_v7 = vpop.f32.mrb[6].mxu0  ;;  %v1591_v8 = vpop.f32.mrb[6].mxu1 }
  0xee   :  { %v1593_v9 = vpop.f32.mrb[7].mxu0  ;;  %v490_v10 = vadd.f32 %v489_v5, %v488_v3  ;;  %v1595_v11 = vpop.f32.mrb[7].mxu1  ;;  %v625_v12 = vadd.f32 %v624_v6, %v623_v4  ;;  %v493_v17 = vsel %vm479_vm2, %v1589_v7, 0.0  ;;  %v628_v18 = vsel %vm479_vm2, %v1591_v8, 0.0 }
  0xef   :  { %v491_v13 = vsel %vm479_vm2, %v1593_v9, 0.0  ;;  %v626_v14 = vsel %vm479_vm2, %v1595_v11, 0.0 }
  0xf0   :  { %v492_v15 = vadd.f32 %v491_v13, %v490_v10  ;;  %v627_v16 = vadd.f32 %v626_v14, %v625_v12 }
  0xf1   :  { %v1605_v19 = vpop.f32.mrb[8].mxu0  ;;  %v1607_v20 = vpop.f32.mrb[8].mxu1 }
  0xf2   :  { %v1609_v21 = vpop.f32.mrb[9].mxu0  ;;  %v494_v22 = vadd.f32 %v493_v17, %v492_v15  ;;  %v1611_v23 = vpop.f32.mrb[9].mxu1  ;;  %v629_v24 = vadd.f32 %v628_v18, %v627_v16  ;;  %v497_v29 = vsel %vm479_vm2, %v1605_v19, 0.0  ;;  %v632_v30 = vsel %vm479_vm2, %v1607_v20, 0.0 }
  0xf3   :  { %v495_v25 = vsel %vm479_vm2, %v1609_v21, 0.0  ;;  %v630_v26 = vsel %vm479_vm2, %v1611_v23, 0.0 }
  0xf4   :  { %v496_v27 = vadd.f32 %v495_v25, %v494_v22  ;;  %v631_v28 = vadd.f32 %v630_v26, %v629_v24 }
  0xf5   :  { %v1324_v31 = vpop.f32.mrb[10].mxu0  ;;  %v1621_v32 = vpop.f32.mrb[10].mxu1 }
  0xf6   :  { %v271_v33 = vpop.f32.mrb[11].mxu0  ;;  %v498_v34 = vadd.f32 %v497_v29, %v496_v27  ;;  %v1623_v35 = vpop.f32.mrb[11].mxu1  ;;  %v633_v36 = vadd.f32 %v632_v30, %v631_v28  ;;  %v501_v45 = vsel %vm479_vm2, %v1324_v31, 0.0  ;;  %v636_v46 = vsel %vm479_vm2, %v1621_v32, 0.0 }
  0xf7   :  { %v499_v37 = vsel %vm479_vm2, %v271_v33, 0.0  ;;  %v634_v38 = vsel %vm479_vm2, %v1623_v35, 0.0 }
  0xf8   :  { %v500_v41 = vadd.f32 %v499_v37, %v498_v34  ;;  %v635_v42 = vadd.f32 %v634_v38, %v633_v36 }
  0xf9   :  { %v1327_v47 = vpop.f32.mrb[12].mxu0  ;;  %v1631_v48 = vpop.f32.mrb[12].mxu1 }
  0xfa   :  { %v281_v53 = vpop.f32.mrb[13].mxu0  ;;  %v502_v54 = vadd.f32 %v501_v45, %v500_v41  ;;  %v1633_v55 = vpop.f32.mrb[13].mxu1  ;;  %v637_v56 = vadd.f32 %v636_v46, %v635_v42  ;;  %v505_v1 = vsel %vm479_vm2, %v1327_v47, 0.0  ;;  %v640_v2 = vsel %vm479_vm2, %v1631_v48, 0.0 }
  0xfb   :  { %v503_v57 = vsel %vm479_vm2, %v281_v53, 0.0  ;;  %v638_v58 = vsel %vm479_vm2, %v1633_v55, 0.0 }
  0xfc   :  { %v504_v62 = vadd.f32 %v503_v57, %v502_v54  ;;  %v639_v0 = vadd.f32 %v638_v58, %v637_v56 }
  0xfd   :  { %v1330_v3 = vpop.f32.mrb[14].mxu0  ;;  %v1641_v4 = vpop.f32.mrb[14].mxu1 }
  0xfe   :  { %v291_v5 = vpop.f32.mrb[15].mxu0  ;;  %v506_v6 = vadd.f32 %v505_v1, %v504_v62  ;;  %v1643_v10 = vpop.f32.mrb[15].mxu1  ;;  %v641_v12 = vadd.f32 %v640_v2, %v639_v0  ;;  %v509_v17 = vsel %vm479_vm2, %v1330_v3, 0.0  ;;  %v644_v18 = vsel %vm479_vm2, %v1641_v4, 0.0 }
  0xff   :  { %v507_v13 = vsel %vm479_vm2, %v291_v5, 0.0  ;;  %v642_v14 = vsel %vm479_vm2, %v1643_v10, 0.0 }
 0x100   :  { %v508_v15 = vadd.f32 %v507_v13, %v506_v6  ;;  %v643_v16 = vadd.f32 %v642_v14, %v641_v12 }
 0x102   :  { %v510_v22 = vadd.f32 %v509_v17, %v508_v15  ;;  %v645_v24 = vadd.f32 %v644_v18, %v643_v16 }
 0x104   :  { %v543_v25 = vrot.slane %v510_v22, 4  ;;  %v646_v26 = vrot.slane %v645_v24, 4 }
 0x106   :  { %v544_v27 = vadd.f32 %v543_v25, %v510_v22  ;;  %v647_v28 = vadd.f32 %v646_v26, %v645_v24 }
 0x108   :  { %v545_v29 = vrot.slane %v544_v27, 2  ;;  %v648_v30 = vrot.slane %v647_v28, 2 }
 0x10a   :  { %v546_v34 = vadd.f32 %v545_v29, %v544_v27  ;;  %v649_v36 = vadd.f32 %v648_v30, %v647_v28 }
 0x10c   :  { %v547_v37 = vrot.slane %v546_v34, 1  ;;  %v650_v38 = vrot.slane %v649_v36, 1 }
 0x10e   :  { %v548_v41 = vadd.f32 %v547_v37, %v546_v34  ;;  %v651_v45 = vadd.f32 %v650_v38, %v649_v36 }
 0x110   :  { %v550_v42 = vmul.f32 0.0078125, %v548_v41 }
 0x112   :  { %v1652_v46 = vsub.f32 %v1549_v43, %v550_v42  ;;  %v1655_v54 = vsub.f32 %v1541_v39, %v550_v42  ;;  %v1658_v56 = vsub.f32 %v1561_v51, %v550_v42  ;;  %v1661_v57 = vsub.f32 %v1557_v49, %v550_v42 }
 0x113   :  { %v1664_v58 = vsub.f32 %v1577_v61, %v550_v42  ;;  %v1667_v62 = vsub.f32 %v1573_v59, %v550_v42  ;;  %v1670_v0 = vsub.f32 %v1593_v9, %v550_v42  ;;  %v1673_v43 = vsub.f32 %v1589_v7, %v550_v42 }
 0x114   :  { %v1676_v39 = vsub.f32 %v1609_v21, %v550_v42  ;;  %v1679_v51 = vsub.f32 %v1605_v19, %v550_v42  ;;  %v1681_v49 = vsub.f32 %v271_v33, %v550_v42  ;;  %v1683_v1 = vsub.f32 %v1324_v31, %v550_v42 }
 0x115   :  { %v1685_v61 = vsub.f32 %v281_v53, %v550_v42  ;;  %v1687_v59 = vsub.f32 %v1327_v47, %v550_v42  ;;  %v1689_v2 = vsub.f32 %v291_v5, %v550_v42  ;;  %v1691_v9 = vsub.f32 %v1330_v3, %v550_v42 }
 0x116   :  { %v717_v7 = vmul.f32 %v1652_v46, %v1652_v46  ;;  %v718_v21 = vmul.f32 %v1655_v54, %v1655_v54  ;;  %v719_v19 = vmul.f32 %v1658_v56, %v1658_v56  ;;  %v720_v31 = vmul.f32 %v1661_v57, %v1661_v57 }
 0x117   :  { %v652_v33 = vmul.f32 0.0078125, %v651_v45  ;;  %v721_v47 = vmul.f32 %v1664_v58, %v1664_v58  ;;  %v722_v53 = vmul.f32 %v1667_v62, %v1667_v62  ;;  %v723_v13 = vmul.f32 %v1670_v0, %v1670_v0 }
 0x118   :  { %v781_v3 = vsel %vm479_vm2, %v717_v7, 0.0  ;;  %v782_v5 = vsel %vm479_vm2, %v718_v21, 0.0  ;;  %v784_v12 = vsel %vm479_vm2, %v719_v19, 0.0  ;;  %v724_v14 = vmul.f32 %v1673_v43, %v1673_v43 }
 0x119   :  { %v783_v6 = vadd.f32 %v782_v5, %v781_v3  ;;  %v786_v16 = vsel %vm479_vm2, %v720_v31, 0.0  ;;  %v788_v17 = vsel %vm479_vm2, %v721_v47, 0.0  ;;  %v790_v18 = vsel %vm479_vm2, %v722_v53, 0.0 }
 0x11a   :  { %v1716_v22 = vsub.f32 %v1551_v44, %v652_v33  ;;  %v1719_v24 = vsub.f32 %v1543_v40, %v652_v33  ;;  %v1722_v26 = vsub.f32 %v1563_v52, %v652_v33  ;;  %v1725_v27 = vsub.f32 %v1559_v50, %v652_v33 }
 0x11b   :  { %v785_v15 = vadd.f32 %v784_v12, %v783_v6  ;;  %v1728_v28 = vsub.f32 %v1579_v63, %v652_v33  ;;  %v1731_v29 = vsub.f32 %v1575_v60, %v652_v33  ;;  %v1734_v30 = vsub.f32 %v1595_v11, %v652_v33 }
 0x11c   :  { %v1737_v44 = vsub.f32 %v1591_v8, %v652_v33  ;;  %v1740_v40 = vsub.f32 %v1611_v23, %v652_v33  ;;  %v1743_v34 = vsub.f32 %v1607_v20, %v652_v33  ;;  %v1746_v50 = vsub.f32 %v1623_v35, %v652_v33 }
 0x11d   :  { %v787_v25 = vadd.f32 %v786_v16, %v785_v15  ;;  %v1749_v63 = vsub.f32 %v1621_v32, %v652_v33  ;;  %v1752_v60 = vsub.f32 %v1633_v55, %v652_v33  ;;  %v1755_v11 = vsub.f32 %v1631_v48, %v652_v33 }
 0x11e   :  { %v1758_v8 = vsub.f32 %v1643_v10, %v652_v33  ;;  %v1761_v23 = vsub.f32 %v1641_v4, %v652_v33  ;;  %v733_v35 = vmul.f32 %v1716_v22, %v1716_v22  ;;  %v725_v32 = vmul.f32 %v1676_v39, %v1676_v39 }
 0x11f   :  { %v789_v52 = vadd.f32 %v788_v17, %v787_v25  ;;  %v792_v36 = vsel %vm479_vm2, %v723_v13, 0.0  ;;  %v734_v55 = vmul.f32 %v1719_v24, %v1719_v24  ;;  %v726_v10 = vmul.f32 %v1679_v51, %v1679_v51 }
 0x120   :  { %v794_v37 = vsel %vm479_vm2, %v724_v14, 0.0  ;;  %v735_v4 = vmul.f32 %v1722_v26, %v1722_v26  ;;  %v914_v41 = vsel %vm479_vm2, %v733_v35, 0.0  ;;  %v727_v42 = vmul.f32 %v1681_v49, %v1681_v49 }
 0x121   :  { %v791_v20 = vadd.f32 %v790_v18, %v789_v52  ;;  %v796_v45 = vsel %vm479_vm2, %v725_v32, 0.0  ;;  %v736_v7 = vmul.f32 %v1725_v27, %v1725_v27  ;;  %v916_v21 = vsel %vm479_vm2, %v734_v55, 0.0 }
 0x122   :  { %v917_v31 = vadd.f32 %v916_v21, %v914_v41  ;;  %v728_v33 = vmul.f32 %v1683_v1, %v1683_v1  ;;  %v798_v47 = vsel %vm479_vm2, %v726_v10, 0.0  ;;  %v737_v53 = vmul.f32 %v1728_v28, %v1728_v28 }
 0x123   :  { %v793_v48 = vadd.f32 %v792_v36, %v791_v20  ;;  %v918_v3 = vsel %vm479_vm2, %v735_v4, 0.0  ;;  %v729_v12 = vmul.f32 %v1685_v61, %v1685_v61  ;;  %v800_v13 = vsel %vm479_vm2, %v727_v42, 0.0 }
 0x124   :  { %v919_v6 = vadd.f32 %v918_v3, %v917_v31  ;;  %v738_v14 = vmul.f32 %v1731_v29, %v1731_v29  ;;  %v920_v15 = vsel %vm479_vm2, %v736_v7, 0.0  ;;  %v730_v18 = vmul.f32 %v1687_v59, %v1687_v59 }
 0x125   :  { %v795_v38 = vadd.f32 %v794_v37, %v793_v48  ;;  %v802_v25 = vsel %vm479_vm2, %v728_v33, 0.0  ;;  %v739_v52 = vmul.f32 %v1734_v30, %v1734_v30  ;;  %v922_v20 = vsel %vm479_vm2, %v737_v53, 0.0 }
 0x126   :  { %v921_v17 = vadd.f32 %v920_v15, %v919_v6  ;;  %v731_v36 = vmul.f32 %v1689_v2, %v1689_v2  ;;  %v804_v55 = vsel %vm479_vm2, %v729_v12, 0.0  ;;  %v740_v48 = vmul.f32 %v1737_v44, %v1737_v44 }
 0x127   :  { %v797_v19 = vadd.f32 %v796_v45, %v795_v38  ;;  %v924_v10 = vsel %vm479_vm2, %v738_v14, 0.0  ;;  %v732_v38 = vmul.f32 %v1691_v9, %v1691_v9  ;;  %v806_v41 = vsel %vm479_vm2, %v730_v18, 0.0 }
 0x128   :  { %v923_v32 = vadd.f32 %v922_v20, %v921_v17  ;;  %v741_v42 = vmul.f32 %v1740_v40, %v1740_v40  ;;  %v926_v45 = vsel %vm479_vm2, %v739_v52, 0.0  ;;  %v742_v31 = vmul.f32 %v1743_v34, %v1743_v34 }
 0x129   :  { %v799_v5 = vadd.f32 %v798_v47, %v797_v19  ;;  %v808_v19 = vsel %vm479_vm2, %v731_v36, 0.0  ;;  %v928_v33 = vsel %vm479_vm2, %v740_v48, 0.0  ;;  %v810_v3 = vsel %vm479_vm2, %v732_v38, 0.0 }
 0x12a   :  { %v925_v4 = vadd.f32 %v924_v10, %v923_v32  ;;  %v930_v6 = vsel %vm479_vm2, %v741_v42, 0.0  ;;  %v744_v14 = vmul.f32 %v1749_v63, %v1749_v63  ;;  %v932_v15 = vsel %vm479_vm2, %v742_v31, 0.0 }
 0x12b   :  { %v801_v16 = vadd.f32 %v800_v13, %v799_v5  ;;  %v743_v5 = vmul.f32 %v1746_v50, %v1746_v50  ;;  %v745_v18 = vmul.f32 %v1752_v60, %v1752_v60  ;;  %v747_v48 = vmul.f32 %v1758_v8, %v1758_v8 }
 0x12c   :  { %v927_v21 = vadd.f32 %v926_v45, %v925_v4  ;;  %v936_v32 = vsel %vm479_vm2, %v744_v14, 0.0  ;;  %v748_v38 = vmul.f32 %v1761_v23, %v1761_v23 }
 0x12d   :  { %v803_v35 = vadd.f32 %v802_v25, %v801_v16  ;;  %v934_v25 = vsel %vm479_vm2, %v743_v5, 0.0  ;;  %v938_v10 = vsel %vm479_vm2, %v745_v18, 0.0 }
 0x12e   :  { %v929_v53 = vadd.f32 %v928_v33, %v927_v21  ;;  %v944_v31 = vsel %vm479_vm2, %v748_v38, 0.0 }
 0x12f   :  { %v805_v37 = vadd.f32 %v804_v55, %v803_v35  ;;  %v746_v35 = vmul.f32 %v1755_v11, %v1755_v11 }
 0x130   :  { %v931_v13 = vadd.f32 %v930_v6, %v929_v53 }
 0x131   :  { %v807_v7 = vadd.f32 %v806_v41, %v805_v37  ;;  %v940_v41 = vsel %vm479_vm2, %v746_v35, 0.0 }
 0x132   :  { %v933_v17 = vadd.f32 %v932_v15, %v931_v13 }
 0x133   :  { %v809_v47 = vadd.f32 %v808_v19, %v807_v7  ;;  %v942_v7 = vsel %vm479_vm2, %v747_v48, 0.0 }
 0x134   :  { %v935_v20 = vadd.f32 %v934_v25, %v933_v17 }
 0x135   :  { %v811_v12 = vadd.f32 %v810_v3, %v809_v47 }
 0x136   :  { %v937_v55 = vadd.f32 %v936_v32, %v935_v20  ;;  %v1846_v20 = vld [vmem:[%s2076_s2] ss:$0 sm:$0xff] }
 0x137   :  { %v844_v16 = vrot.slane %v811_v12, 4 }
 0x138   :  { %v939_v4 = vadd.f32 %v938_v10, %v937_v55 }
 0x139   :  { %v845_v52 = vadd.f32 %v844_v16, %v811_v12 }
 0x13a   :  { %v941_v45 = vadd.f32 %v940_v41, %v939_v4 }
 0x13b   :  { %v846_v36 = vrot.slane %v845_v52, 2 }
 0x13c   :  { %v943_v19 = vadd.f32 %v942_v7, %v941_v45 }
 0x13d   :  { %v847_v37 = vadd.f32 %v846_v36, %v845_v52 }
 0x13e   :  { %v945_v47 = vadd.f32 %v944_v31, %v943_v19 }
 0x13f   :  { %v848_v42 = vrot.slane %v847_v37, 1 }
 0x140   :  { %v946_v3 = vrot.slane %v945_v47, 4 }
 0x141   :  { %v849_v21 = vadd.f32 %v848_v42, %v847_v37 }
 0x142   :  { %v947_v5 = vadd.f32 %v946_v3, %v945_v47 }
 0x143   :  { %v850_v33 = vmul.f32 0.0078125, %v849_v21 }
 0x144   :  { %v948_v6 = vrot.slane %v947_v5, 2 }
 0x145   :  { %v985_v53 = vadd.f32 1e-05, %v850_v33 }
 0x146   :  { %v949_v12 = vadd.f32 %v948_v6, %v947_v5 }
 0x147   :  { %1369 = vrsqrt.f32 %v985_v53 }
 0x148   :  { %v950_v13 = vrot.slane %v949_v12, 1 }
 0x14a   :  { %v951_v14 = vadd.f32 %v950_v13, %v949_v12 }
 0x14c   :  { %v1837_v16 = vmul.f32 0.0078125, %v951_v14 }
 0x151   :  { %v1370_v15 = vpop.eup %1369 }
 0x152   :  { %v1049_v17 = vmul.f32 %v1370_v15, %v1652_v46  ;;  %v1050_v18 = vmul.f32 %v1370_v15, %v1655_v54  ;;  %v1051_v25 = vmul.f32 %v1370_v15, %v1658_v56  ;;  %v1052_v52 = vmul.f32 %v1370_v15, %v1661_v57 }
 0x153   :  { %v1053_v35 = vmul.f32 %v1370_v15, %v1664_v58  ;;  %v1054_v32 = vmul.f32 %v1370_v15, %v1667_v62  ;;  %v1055_v36 = vmul.f32 %v1370_v15, %v1670_v0  ;;  %v1056_v55 = vmul.f32 %v1370_v15, %v1673_v43 }
 0x154   :  { %v1057_v46 = vmul.f32 %v1370_v15, %v1676_v39  ;;  %v1058_v54 = vmul.f32 %v1370_v15, %v1679_v51  ;;  %v1059_v56 = vmul.f32 %v1370_v15, %v1681_v49  ;;  %v1060_v57 = vmul.f32 %v1370_v15, %v1683_v1  ;;  %v1867_v49 = vld [vmem:[%s2077_s3] ss:$0 sm:$0xff] }
 0x155   :  { %v1061_v48 = vmul.f32 %v1370_v15, %v1685_v61  ;;  %v1062_v10 = vmul.f32 %v1370_v15, %v1687_v59  ;;  %v1063_v58 = vmul.f32 %v1370_v15, %v1689_v2  ;;  %v1064_v62 = vmul.f32 %v1370_v15, %v1691_v9 }
 0x156   :  { %v1087_v0 = vmul.f32 %v1846_v20, %v1049_v17  ;;  %v1088_v43 = vmul.f32 %v1846_v20, %v1050_v18  ;;  %v1089_v39 = vmul.f32 %v1846_v20, %v1051_v25  ;;  %v1090_v51 = vmul.f32 %v1846_v20, %v1052_v52 }
 0x157   :  { %v1091_v1 = vmul.f32 %v1846_v20, %v1053_v35  ;;  %v1092_v61 = vmul.f32 %v1846_v20, %v1054_v32  ;;  %v1093_v59 = vmul.f32 %v1846_v20, %v1055_v36  ;;  %v1094_v2 = vmul.f32 %v1846_v20, %v1056_v55 }
 0x158   :  { %v1095_v9 = vmul.f32 %v1846_v20, %v1057_v46  ;;  %v1096_v37 = vmul.f32 %v1846_v20, %v1058_v54  ;;  %v1097_v4 = vmul.f32 %v1846_v20, %v1059_v56  ;;  %v1098_v38 = vmul.f32 %v1846_v20, %v1060_v57 }
 0x159   :  { %v1099_v41 = vmul.f32 %v1846_v20, %v1061_v48  ;;  %v1100_v42 = vmul.f32 %v1846_v20, %v1062_v10  ;;  %v1101_v45 = vmul.f32 %v1846_v20, %v1063_v58  ;;  %v1102_v7 = vmul.f32 %v1846_v20, %v1064_v62 }
 0x15a   :  { %v1125_v21 = vadd.f32 %v1867_v49, %v1087_v0  ;;  %v1126_v19 = vadd.f32 %v1867_v49, %v1088_v43  ;;  %v1127_v31 = vadd.f32 %v1867_v49, %v1089_v39  ;;  %v1128_v33 = vadd.f32 %v1867_v49, %v1090_v51 }
 0x15b   :  { %v1129_v47 = vadd.f32 %v1867_v49, %v1091_v1  ;;  %v1130_v53 = vadd.f32 %v1867_v49, %v1092_v61  ;;  %v1131_v3 = vadd.f32 %v1867_v49, %v1093_v59  ;;  %v1132_v5 = vadd.f32 %v1867_v49, %v1094_v2 }
 0x15c   :  { %v1133_v6 = vadd.f32 %v1867_v49, %v1095_v9  ;;  %v1134_v12 = vadd.f32 %v1867_v49, %v1096_v37  ;;  %v1135_v13 = vadd.f32 %v1867_v49, %v1097_v4  ;;  %v1136_v14 = vadd.f32 %v1867_v49, %v1098_v38 }
 0x15d   :  { %v1137_v15 = vadd.f32 %v1867_v49, %v1099_v41  ;;  %v1138_v17 = vadd.f32 %v1867_v49, %v1100_v42  ;;  %v1139_v18 = vadd.f32 %v1867_v49, %v1101_v45  ;;  %v1140_v25 = vadd.f32 %v1867_v49, %v1102_v7 }
 0x15e   :  { %v1157_v52 = vmax.f32 %v1125_v21, 0.0  ;;  %v1158_v35 = vmax.f32 %v1126_v19, 0.0  ;;  %v1159_v32 = vmax.f32 %v1127_v31, 0.0  ;;  %v1160_v36 = vmax.f32 %v1128_v33, 0.0 }
 0x15f   :  { %v1161_v55 = vmax.f32 %v1129_v47, 0.0  ;;  %v1162_v46 = vmax.f32 %v1130_v53, 0.0  ;;  %v1163_v54 = vmax.f32 %v1131_v3, 0.0  ;;  %v1164_v56 = vmax.f32 %v1132_v5, 0.0 }
 0x160   :  { %v1165_v57 = vmax.f32 %v1133_v6, 0.0  ;;  %v1166_v48 = vmax.f32 %v1134_v12, 0.0  ;;  %v1167_v10 = vmax.f32 %v1135_v13, 0.0  ;;  %v1168_v58 = vmax.f32 %v1136_v14, 0.0  ;;  %1189 = vst.msk [vmem:[%s2078_s4] sm:$0xff] %vm479_vm2, %v1157_v52  ;;  %1190 = vst.msk [vmem:[%s2078_s4 + $0x8] sm:$0xff] %vm479_vm2, %v1158_v35 }
 0x161   :  { %1191 = vst.msk [vmem:[%s2078_s4 + $0x10] sm:$0xff] %vm479_vm2, %v1159_v32  ;;  %1192 = vst.msk [vmem:[%s2078_s4 + $0x18] sm:$0xff] %vm479_vm2, %v1160_v36  ;;  %v1169_v62 = vmax.f32 %v1137_v15, 0.0  ;;  %v1170_v0 = vmax.f32 %v1138_v17, 0.0  ;;  %v1171_v43 = vmax.f32 %v1139_v18, 0.0  ;;  %v1172_v39 = vmax.f32 %v1140_v25, 0.0 }
 0x162   :  { %1193 = vst.msk [vmem:[%s2078_s4 + $0x20] sm:$0xff] %vm479_vm2, %v1161_v55  ;;  %1194 = vst.msk [vmem:[%s2078_s4 + $0x28] sm:$0xff] %vm479_vm2, %v1162_v46  ;;  %v1001_v51 = vadd.f32 1e-05, %v1837_v16 }
 0x163   :  { %1195 = vst.msk [vmem:[%s2078_s4 + $0x30] sm:$0xff] %vm479_vm2, %v1163_v54  ;;  %1196 = vst.msk [vmem:[%s2078_s4 + $0x38] sm:$0xff] %vm479_vm2, %v1164_v56 }
 0x164   :  { %1197 = vst.msk [vmem:[%s2078_s4 + $0x40] sm:$0xff] %vm479_vm2, %v1165_v57  ;;  %1198 = vst.msk [vmem:[%s2078_s4 + $0x48] sm:$0xff] %vm479_vm2, %v1166_v48  ;;  %1371 = vrsqrt.f32 %v1001_v51 }
 0x165   :  { %1199 = vst.msk [vmem:[%s2078_s4 + $0x50] sm:$0xff] %vm479_vm2, %v1167_v10  ;;  %1200 = vst.msk [vmem:[%s2078_s4 + $0x58] sm:$0xff] %vm479_vm2, %v1168_v58 }
 0x166   :  { %1201 = vst.msk [vmem:[%s2078_s4 + $0x60] sm:$0xff] %vm479_vm2, %v1169_v62  ;;  %1202 = vst.msk [vmem:[%s2078_s4 + $0x68] sm:$0xff] %vm479_vm2, %v1170_v0 }
 0x167   :  { %1203 = vst.msk [vmem:[%s2078_s4 + $0x70] sm:$0xff] %vm479_vm2, %v1171_v43  ;;  %1204 = vst.msk [vmem:[%s2078_s4 + $0x78] sm:$0xff] %vm479_vm2, %v1172_v39 }
 0x16e   :  { %v1372_v16 = vpop.eup %1371 }
 0x16f   :  { %v1065_v1 = vmul.f32 %v1372_v16, %v1716_v22  ;;  %v1066_v61 = vmul.f32 %v1372_v16, %v1719_v24  ;;  %v1067_v59 = vmul.f32 %v1372_v16, %v1722_v26  ;;  %v1068_v2 = vmul.f32 %v1372_v16, %v1725_v27 }
 0x170   :  { %v1069_v9 = vmul.f32 %v1372_v16, %v1728_v28  ;;  %v1070_v37 = vmul.f32 %v1372_v16, %v1731_v29  ;;  %v1071_v4 = vmul.f32 %v1372_v16, %v1734_v30  ;;  %v1072_v38 = vmul.f32 %v1372_v16, %v1737_v44 }
 0x171   :  { %v1073_v41 = vmul.f32 %v1372_v16, %v1740_v40  ;;  %v1074_v42 = vmul.f32 %v1372_v16, %v1743_v34  ;;  %v1075_v22 = vmul.f32 %v1372_v16, %v1746_v50  ;;  %v1076_v24 = vmul.f32 %v1372_v16, %v1749_v63 }
 0x172   :  { %v1077_v26 = vmul.f32 %v1372_v16, %v1752_v60  ;;  %v1078_v27 = vmul.f32 %v1372_v16, %v1755_v11  ;;  %v1079_v28 = vmul.f32 %v1372_v16, %v1758_v8  ;;  %v1080_v29 = vmul.f32 %v1372_v16, %v1761_v23 }
 0x173   :  { %v1103_v30 = vmul.f32 %v1846_v20, %v1065_v1  ;;  %v1104_v44 = vmul.f32 %v1846_v20, %v1066_v61  ;;  %v1105_v40 = vmul.f32 %v1846_v20, %v1067_v59  ;;  %v1106_v34 = vmul.f32 %v1846_v20, %v1068_v2 }
 0x174   :  { %v1107_v50 = vmul.f32 %v1846_v20, %v1069_v9  ;;  %v1108_v63 = vmul.f32 %v1846_v20, %v1070_v37  ;;  %v1109_v60 = vmul.f32 %v1846_v20, %v1071_v4  ;;  %v1110_v11 = vmul.f32 %v1846_v20, %v1072_v38 }
 0x175   :  { %v1111_v8 = vmul.f32 %v1846_v20, %v1073_v41  ;;  %v1112_v23 = vmul.f32 %v1846_v20, %v1074_v42  ;;  %v1113_v45 = vmul.f32 %v1846_v20, %v1075_v22  ;;  %v1114_v7 = vmul.f32 %v1846_v20, %v1076_v24 }
 0x176   :  { %v1115_v21 = vmul.f32 %v1846_v20, %v1077_v26  ;;  %v1116_v19 = vmul.f32 %v1846_v20, %v1078_v27  ;;  %v1117_v31 = vmul.f32 %v1846_v20, %v1079_v28  ;;  %v1118_v33 = vmul.f32 %v1846_v20, %v1080_v29 }
 0x177   :  { %v1141_v47 = vadd.f32 %v1867_v49, %v1103_v30  ;;  %v1142_v53 = vadd.f32 %v1867_v49, %v1104_v44  ;;  %v1143_v3 = vadd.f32 %v1867_v49, %v1105_v40  ;;  %v1144_v5 = vadd.f32 %v1867_v49, %v1106_v34 }
 0x178   :  { %v1145_v6 = vadd.f32 %v1867_v49, %v1107_v50  ;;  %v1146_v12 = vadd.f32 %v1867_v49, %v1108_v63  ;;  %v1147_v13 = vadd.f32 %v1867_v49, %v1109_v60  ;;  %v1148_v14 = vadd.f32 %v1867_v49, %v1110_v11 }
 0x179   :  { %v1149_v15 = vadd.f32 %v1867_v49, %v1111_v8  ;;  %v1150_v20 = vadd.f32 %v1867_v49, %v1112_v23  ;;  %v1151_v17 = vadd.f32 %v1867_v49, %v1113_v45  ;;  %v1152_v18 = vadd.f32 %v1867_v49, %v1114_v7 }
 0x17a   :  { %v1153_v25 = vadd.f32 %v1867_v49, %v1115_v21  ;;  %v1154_v52 = vadd.f32 %v1867_v49, %v1116_v19  ;;  %v1155_v35 = vadd.f32 %v1867_v49, %v1117_v31  ;;  %v1156_v32 = vadd.f32 %v1867_v49, %v1118_v33 }
 0x17b   :  { %v1173_v36 = vmax.f32 %v1141_v47, 0.0  ;;  %v1174_v55 = vmax.f32 %v1142_v53, 0.0  ;;  %v1175_v46 = vmax.f32 %v1143_v3, 0.0  ;;  %v1176_v54 = vmax.f32 %v1144_v5, 0.0 }
 0x17c   :  { %v1177_v56 = vmax.f32 %v1145_v6, 0.0  ;;  %v1178_v57 = vmax.f32 %v1146_v12, 0.0  ;;  %v1179_v48 = vmax.f32 %v1147_v13, 0.0  ;;  %v1180_v10 = vmax.f32 %v1148_v14, 0.0 }
 0x17d   :  { %v1181_v58 = vmax.f32 %v1149_v15, 0.0  ;;  %v1182_v62 = vmax.f32 %v1150_v20, 0.0  ;;  %v1183_v0 = vmax.f32 %v1151_v17, 0.0  ;;  %v1184_v43 = vmax.f32 %v1152_v18, 0.0  ;;  %1205 = vst.msk [vmem:[%s2078_s4 + $0x80] sm:$0xff] %vm479_vm2, %v1173_v36  ;;  %1206 = vst.msk [vmem:[%s2078_s4 + $0x88] sm:$0xff] %vm479_vm2, %v1174_v55 }
 0x17e   :  { %1207 = vst.msk [vmem:[%s2078_s4 + $0x90] sm:$0xff] %vm479_vm2, %v1175_v46  ;;  %1208 = vst.msk [vmem:[%s2078_s4 + $0x98] sm:$0xff] %vm479_vm2, %v1176_v54  ;;  %v1185_v49 = vmax.f32 %v1153_v25, 0.0  ;;  %v1186_v39 = vmax.f32 %v1154_v52, 0.0  ;;  %v1187_v51 = vmax.f32 %v1155_v35, 0.0  ;;  %v1188_v16 = vmax.f32 %v1156_v32, 0.0 }
 0x17f   :  { %1209 = vst.msk [vmem:[%s2078_s4 + $0xa0] sm:$0xff] %vm479_vm2, %v1177_v56  ;;  %1210 = vst.msk [vmem:[%s2078_s4 + $0xa8] sm:$0xff] %vm479_vm2, %v1178_v57 }
 0x180   :  { %1211 = vst.msk [vmem:[%s2078_s4 + $0xb0] sm:$0xff] %vm479_vm2, %v1179_v48  ;;  %1212 = vst.msk [vmem:[%s2078_s4 + $0xb8] sm:$0xff] %vm479_vm2, %v1180_v10 }
 0x181   :  { %1213 = vst.msk [vmem:[%s2078_s4 + $0xc0] sm:$0xff] %vm479_vm2, %v1181_v58  ;;  %1214 = vst.msk [vmem:[%s2078_s4 + $0xc8] sm:$0xff] %vm479_vm2, %v1182_v62 }
 0x182   :  { %1215 = vst.msk [vmem:[%s2078_s4 + $0xd0] sm:$0xff] %vm479_vm2, %v1183_v0  ;;  %1216 = vst.msk [vmem:[%s2078_s4 + $0xd8] sm:$0xff] %vm479_vm2, %v1184_v43 }
 0x183   :  { %1217 = vst.msk [vmem:[%s2078_s4 + $0xe0] sm:$0xff] %vm479_vm2, %v1185_v49  ;;  %1218 = vst.msk [vmem:[%s2078_s4 + $0xe8] sm:$0xff] %vm479_vm2, %v1186_v39 }
 0x184   :  { %1219 = vst.msk [vmem:[%s2078_s4 + $0xf0] sm:$0xff] %vm479_vm2, %v1187_v51  ;;  %1220 = vst.msk [vmem:[%s2078_s4 + $0xf8] sm:$0xff] %vm479_vm2, %v1188_v16 }

// kernel: vitic_forward.9
= control target key start
LH: loop header
LB: loop body
LE: loop exit
PB: predicated region body
PF: predicated region fallthrough
CT: control target
= control target key end

     0   :  { %vm34_vm0 = vcmask 588800   ;;  %vm191_vm1 = vcmask 130048   ;;  %s634_s1 = inlined_call_operand.vmem [shape: f32[72,16], index: 1, kind: input, shape index: {}]   ;;  %s635_s0 = inlined_call_operand.vmem [shape: f32[64,72], index: 0, kind: input, shape index: {}]   ;;  %s636_s2 = inlined_call_operand.vmem [shape: f32[1,16], index: 2, kind: input, shape index: {}]   ;;  %s637_s3 = inlined_call_operand.vmem [shape: f32[1,16], index: 3, kind: input, shape index: {}]   ;;  %s638_s4 = inlined_call_operand.vmem [shape: f32[64,16], index: 4, kind: output, shape index: {}]  }
   0x1   :  { %v25_v0 = vld [vmem:[%s634_s1] sm:$0xff]  ;;  %v26_v1 = vld [vmem:[%s634_s1 + $0x8] sm:$0xff]  ;;  %v27_v2 = vld [vmem:[%s634_s1 + $0x10] sm:$0xff] }
   0x2   :  { %v466_v3 = vpack.c.bf16 %v26_v1, %v25_v0  ;;  %v28_v4 = vld [vmem:[%s634_s1 + $0x18] sm:$0xff]  ;;  %v29_v6 = vld [vmem:[%s634_s1 + $0x20] sm:$0xff]  ;;  %v30_v7 = vld [vmem:[%s634_s1 + $0x28] sm:$0xff] }
   0x3   :  { %v470_v5 = vpack.c.bf16 %v28_v4, %v27_v2  ;;  %v17_v8 = vld [vmem:[%s635_s0] sm:$0xff]  ;;  %v474_v10 = vpack.c.bf16 %v30_v7, %v29_v6  ;;  %v31_v11 = vld [vmem:[%s634_s1 + $0x30] sm:$0xff]  ;;  %v32_v12 = vld [vmem:[%s634_s1 + $0x38] sm:$0xff] }
   0x4   :  { %467 = vmatprep.subr.bf16.mxu0 %v466_v3  ;;  %482 = vmatprep.subr.bf16.mxu1 %v466_v3  ;;  %v21_v9 = vld [vmem:[%s635_s0 + $0x20] sm:$0xff]  ;;  %v478_v13 = vpack.c.bf16 %v32_v12, %v31_v11  ;;  %v18_v15 = vld [vmem:[%s635_s0 + $0x8] sm:$0xff]  ;;  %v19_v17 = vld [vmem:[%s635_s0 + $0x10] sm:$0xff] }
   0x5   :  { %469 = vmatpush3.bf16.msra.mxu0 %v466_v3  ;;  %487 = vmatpush3.bf16.msra.mxu1 %v466_v3  ;;  %v33_v14 = vld [vmem:[%s634_s1 + $0x40] sm:$0xff]  ;;  %v22_v16 = vld [vmem:[%s635_s0 + $0x28] sm:$0xff]  ;;  %v23_v18 = vld [vmem:[%s635_s0 + $0x30] sm:$0xff] }
   0x6   :  { %471 = vmatprep.subr.bf16.mxu0 %v470_v5  ;;  %483 = vmatprep.subr.bf16.mxu1 %v470_v5  ;;  %v20_v19 = vld [vmem:[%s635_s0 + $0x18] sm:$0xff] }
   0x7   :  { %454 = vmatprep.mubr.msk.f32.mxu0 %vm34_vm0, %v17_v8  ;;  %460 = vmatprep.mubr.msk.f32.mxu1 %vm34_vm0, %v21_v9  ;;  %v24_v20 = vld [vmem:[%s635_s0 + $0x38] sm:$0xff] }
   0x9   :  { %473 = vmatpush3.bf16.msra.mxu0 %v470_v5  ;;  %488 = vmatpush3.bf16.msra.mxu1 %v470_v5 }
   0xa   :  { %475 = vmatprep.subr.bf16.mxu0 %v474_v10  ;;  %484 = vmatprep.subr.bf16.mxu1 %v474_v10 }
   0xd   :  { %477 = vmatpush3.bf16.msra.mxu0 %v474_v10  ;;  %489 = vmatpush3.bf16.msra.mxu1 %v474_v10 }
   0xe   :  { %479 = vmatprep.subr.bf16.mxu0 %v478_v13  ;;  %485 = vmatprep.subr.bf16.mxu1 %v478_v13 }
  0x11   :  { %481 = vmatpush3.bf16.msra.mxu0 %v478_v13  ;;  %490 = vmatpush3.bf16.msra.mxu1 %v478_v13 }
  0x12   :  { %452 = vmatprep.subr.mxu0 %v33_v14  ;;  %486 = vmatprep.subr.mxu1 %v33_v14 }
  0x15   :  { %453 = vmatpush3.msra.mxu0 %v33_v14  ;;  %491 = vmatpush3.msra.mxu1 %v33_v14 }
  0x16   :  { %455 = vmatmul.mubr.msk.f32.vlgmr.msra.gmra.mrb[0].mxu0 %vm34_vm0, %v18_v15  ;;  %461 = vmatmul.mubr.msk.f32.vlgmr.msra.gmra.mrb[0].mxu1 %vm34_vm0, %v22_v16 }
  0x17   :  { %457 = vmatprep.mubr.msk.f32.mxu0 %vm34_vm0, %v19_v17  ;;  %463 = vmatprep.mubr.msk.f32.mxu1 %vm34_vm0, %v23_v18 }
  0x1a   :  { %458 = vmatmul.mubr.msk.f32.gmra.mrb[2].mxu0 %vm34_vm0, %v20_v19  ;;  %464 = vmatmul.mubr.msk.f32.gmra.mrb[2].mxu1 %vm34_vm0, %v24_v20 }
  0xe9   :  { %v456_v21 = vpop.f32.mrb[0].mxu0  ;;  %v462_v22 = vpop.f32.mrb[0].mxu1 }
  0xea   :  { %v193_v23 = vsel %vm191_vm1, %v456_v21, 0.0  ;;  %v232_v24 = vsel %vm191_vm1, %v462_v22, 0.0  ;;  %v125_v25 = vpop.f32.mrb[1].mxu0  ;;  %v145_v26 = vpop.f32.mrb[1].mxu1 }
  0xeb   :  { %v192_v27 = vsel %vm191_vm1, %v125_v25, 0.0  ;;  %v230_v28 = vsel %vm191_vm1, %v145_v26, 0.0 }
  0xec   :  { %v194_v29 = vadd.f32 %v193_v23, %v192_v27  ;;  %v233_v30 = vadd.f32 %v232_v24, %v230_v28 }
  0xed   :  { %v459_v31 = vpop.f32.mrb[2].mxu0  ;;  %v465_v32 = vpop.f32.mrb[2].mxu1 }
  0xee   :  { %v135_v33 = vpop.f32.mrb[3].mxu0  ;;  %v155_v34 = vpop.f32.mrb[3].mxu1  ;;  %v197_v39 = vsel %vm191_vm1, %v459_v31, 0.0  ;;  %v236_v40 = vsel %vm191_vm1, %v465_v32, 0.0 }
  0xef   :  { %v195_v35 = vsel %vm191_vm1, %v135_v33, 0.0  ;;  %v234_v36 = vsel %vm191_vm1, %v155_v34, 0.0 }
  0xf0   :  { %v196_v37 = vadd.f32 %v195_v35, %v194_v29  ;;  %v235_v38 = vadd.f32 %v234_v36, %v233_v30 }
  0xf2   :  { %v198_v41 = vadd.f32 %v197_v39, %v196_v37  ;;  %v237_v42 = vadd.f32 %v236_v40, %v235_v38  ;;  %v417_v40 = vld [vmem:[%s636_s2] ss:$0 sm:$0xff] }
  0xf4   :  { %v207_v43 = vrot.slane %v198_v41, 4  ;;  %v238_v44 = vrot.slane %v237_v42, 4 }
  0xf6   :  { %v208_v45 = vadd.f32 %v207_v43, %v198_v41  ;;  %v239_v46 = vadd.f32 %v238_v44, %v237_v42 }
  0xf8   :  { %v209_v47 = vrot.slane %v208_v45, 2  ;;  %v240_v48 = vrot.slane %v239_v46, 2 }
  0xfa   :  { %v210_v49 = vadd.f32 %v209_v47, %v208_v45  ;;  %v241_v50 = vadd.f32 %v240_v48, %v239_v46  ;;  %v418_v46 = vld [vmem:[%s637_s3] ss:$0 sm:$0xff] }
  0xfc   :  { %v211_v51 = vrot.slane %v210_v49, 1  ;;  %v242_v52 = vrot.slane %v241_v50, 1 }
  0xfe   :  { %v212_v53 = vadd.f32 %v211_v51, %v210_v49  ;;  %v243_v54 = vadd.f32 %v242_v52, %v241_v50 }
 0x100   :  { %v214_v55 = vmul.f32 0.03125, %v212_v53  ;;  %v244_v56 = vmul.f32 0.03125, %v243_v54 }
 0x102   :  { %v253_v57 = vsub.f32 %v125_v25, %v214_v55  ;;  %v254_v58 = vsub.f32 %v456_v21, %v214_v55  ;;  %v255_v59 = vsub.f32 %v135_v33, %v214_v55  ;;  %v256_v60 = vsub.f32 %v459_v31, %v214_v55 }
 0x103   :  { %v257_v61 = vsub.f32 %v145_v26, %v244_v56  ;;  %v258_v62 = vsub.f32 %v462_v22, %v244_v56  ;;  %v259_v63 = vsub.f32 %v155_v34, %v244_v56  ;;  %v260_v0 = vsub.f32 %v465_v32, %v244_v56 }
 0x104   :  { %v261_v1 = vmul.f32 %v253_v57, %v253_v57  ;;  %v262_v2 = vmul.f32 %v254_v58, %v254_v58  ;;  %v263_v3 = vmul.f32 %v255_v59, %v255_v59  ;;  %v264_v7 = vmul.f32 %v256_v60, %v256_v60 }
 0x105   :  { %v265_v4 = vmul.f32 %v257_v61, %v257_v61  ;;  %v266_v5 = vmul.f32 %v258_v62, %v258_v62  ;;  %v267_v6 = vmul.f32 %v259_v63, %v259_v63  ;;  %v268_v11 = vmul.f32 %v260_v0, %v260_v0 }
 0x106   :  { %v277_v8 = vsel %vm191_vm1, %v261_v1, 0.0  ;;  %v278_v9 = vsel %vm191_vm1, %v262_v2, 0.0  ;;  %v280_v14 = vsel %vm191_vm1, %v263_v3, 0.0  ;;  %v282_v18 = vsel %vm191_vm1, %v264_v7, 0.0 }
 0x107   :  { %v279_v10 = vadd.f32 %v278_v9, %v277_v8  ;;  %v314_v12 = vsel %vm191_vm1, %v265_v4, 0.0  ;;  %v316_v13 = vsel %vm191_vm1, %v266_v5, 0.0  ;;  %v318_v17 = vsel %vm191_vm1, %v267_v6, 0.0 }
 0x108   :  { %v317_v15 = vadd.f32 %v316_v13, %v314_v12  ;;  %v320_v21 = vsel %vm191_vm1, %v268_v11, 0.0 }
 0x109   :  { %v281_v16 = vadd.f32 %v280_v14, %v279_v10 }
 0x10a   :  { %v319_v19 = vadd.f32 %v318_v17, %v317_v15 }
 0x10b   :  { %v283_v20 = vadd.f32 %v282_v18, %v281_v16 }
 0x10c   :  { %v321_v22 = vadd.f32 %v320_v21, %v319_v19 }
 0x10d   :  { %v292_v23 = vrot.slane %v283_v20, 4 }
 0x10e   :  { %v322_v24 = vrot.slane %v321_v22, 4 }
 0x10f   :  { %v293_v25 = vadd.f32 %v292_v23, %v283_v20 }
 0x110   :  { %v323_v26 = vadd.f32 %v322_v24, %v321_v22 }
 0x111   :  { %v294_v27 = vrot.slane %v293_v25, 2 }
 0x112   :  { %v324_v28 = vrot.slane %v323_v26, 2 }
 0x113   :  { %v295_v29 = vadd.f32 %v294_v27, %v293_v25 }
 0x114   :  { %v325_v30 = vadd.f32 %v324_v28, %v323_v26 }
 0x115   :  { %v296_v31 = vrot.slane %v295_v29, 1 }
 0x116   :  { %v326_v32 = vrot.slane %v325_v30, 1 }
 0x117   :  { %v297_v33 = vadd.f32 %v296_v31, %v295_v29 }
 0x118   :  { %v327_v34 = vadd.f32 %v326_v32, %v325_v30 }
 0x119   :  { %v298_v35 = vmul.f32 0.03125, %v297_v33 }
 0x11a   :  { %v328_v36 = vmul.f32 0.03125, %v327_v34 }
 0x11b   :  { %v337_v37 = vadd.f32 1e-05, %v298_v35 }
 0x11c   :  { %v341_v38 = vadd.f32 1e-05, %v328_v36 }
 0x11d   :  { %492 = vrsqrt.f32 %v337_v37 }
 0x11e   :  { %494 = vrsqrt.f32 %v341_v38 }
 0x127   :  { %v493_v39 = vpop.eup %492 }
 0x128   :  { %v495_v41 = vpop.eup %494  ;;  %v353_v42 = vmul.f32 %v493_v39, %v253_v57  ;;  %v354_v43 = vmul.f32 %v493_v39, %v254_v58  ;;  %v355_v44 = vmul.f32 %v493_v39, %v255_v59  ;;  %v356_v45 = vmul.f32 %v493_v39, %v256_v60 }
 0x129   :  { %v357_v47 = vmul.f32 %v495_v41, %v257_v61  ;;  %v358_v48 = vmul.f32 %v495_v41, %v258_v62  ;;  %v359_v49 = vmul.f32 %v495_v41, %v259_v63  ;;  %v360_v50 = vmul.f32 %v495_v41, %v260_v0 }
 0x12a   :  { %v367_v51 = vmul.f32 %v417_v40, %v353_v42  ;;  %v368_v52 = vmul.f32 %v417_v40, %v354_v43  ;;  %v369_v53 = vmul.f32 %v417_v40, %v355_v44  ;;  %v370_v54 = vmul.f32 %v417_v40, %v356_v45 }
 0x12b   :  { %v371_v55 = vmul.f32 %v417_v40, %v357_v47  ;;  %v372_v56 = vmul.f32 %v417_v40, %v358_v48  ;;  %v373_v1 = vmul.f32 %v417_v40, %v359_v49  ;;  %v374_v2 = vmul.f32 %v417_v40, %v360_v50 }
 0x12c   :  { %v381_v57 = vadd.f32 %v418_v46, %v367_v51  ;;  %v382_v58 = vadd.f32 %v418_v46, %v368_v52  ;;  %v383_v59 = vadd.f32 %v418_v46, %v369_v53  ;;  %v384_v60 = vadd.f32 %v418_v46, %v370_v54 }
 0x12d   :  { %v385_v3 = vadd.f32 %v418_v46, %v371_v55  ;;  %v386_v4 = vadd.f32 %v418_v46, %v372_v56  ;;  %v387_v5 = vadd.f32 %v418_v46, %v373_v1  ;;  %v388_v6 = vadd.f32 %v418_v46, %v374_v2 }
 0x12e   :  { %v389_v61 = vmax.f32 %v381_v57, 0.0  ;;  %v390_v62 = vmax.f32 %v382_v58, 0.0  ;;  %v391_v63 = vmax.f32 %v383_v59, 0.0  ;;  %v392_v0 = vmax.f32 %v384_v60, 0.0 }
 0x12f   :  { %v393_v7 = vmax.f32 %v385_v3, 0.0  ;;  %v394_v8 = vmax.f32 %v386_v4, 0.0  ;;  %v395_v9 = vmax.f32 %v387_v5, 0.0  ;;  %v396_v10 = vmax.f32 %v388_v6, 0.0 }
 0x130   :  { %397 = vst.msk [vmem:[%s638_s4] sm:$0xff] %vm191_vm1, %v389_v61  ;;  %398 = vst.msk [vmem:[%s638_s4 + $0x8] sm:$0xff] %vm191_vm1, %v390_v62 }
 0x131   :  { %399 = vst.msk [vmem:[%s638_s4 + $0x10] sm:$0xff] %vm191_vm1, %v391_v63  ;;  %400 = vst.msk [vmem:[%s638_s4 + $0x18] sm:$0xff] %vm191_vm1, %v392_v0 }
 0x132   :  { %401 = vst.msk [vmem:[%s638_s4 + $0x20] sm:$0xff] %vm191_vm1, %v393_v7  ;;  %402 = vst.msk [vmem:[%s638_s4 + $0x28] sm:$0xff] %vm191_vm1, %v394_v8 }
 0x133   :  { %403 = vst.msk [vmem:[%s638_s4 + $0x30] sm:$0xff] %vm191_vm1, %v395_v9  ;;  %404 = vst.msk [vmem:[%s638_s4 + $0x38] sm:$0xff] %vm191_vm1, %v396_v10 }

// kernel: vitic_forward.10
= control target key start
LH: loop header
LB: loop body
LE: loop exit
PB: predicated region body
PF: predicated region fallthrough
CT: control target
= control target key end

     0   :  { %v378_v0 = vmov 0.0|0.0   ;;  %vm45_vm0 = vcmask 130048   ;;  %vm136_vm1 = vcmask 261120   ;;  %s517_s1 = inlined_call_operand.vmem [shape: f32[144,32], index: 1, kind: input, shape index: {}]   ;;  %s518_s0 = inlined_call_operand.vmem [shape: f32[16,144], index: 0, kind: input, shape index: {}]   ;;  %s519_s4 = inlined_call_operand.vmem [shape: f32[32,32], index: 4, kind: input, shape index: {}]   ;;  %s520_s2 = inlined_call_operand.vmem [shape: f32[1,32], index: 2, kind: input, shape index: {}]   ;;  %s521_s3 = inlined_call_operand.vmem [shape: f32[1,32], index: 3, kind: input, shape index: {}]   ;;  %s522_s5 = inlined_call_operand.vmem [shape: f32[1,32], index: 5, kind: input, shape index: {}]   ;;  %s523_s6 = inlined_call_operand.vmem [shape: f32[16,32], index: 6, kind: output, shape index: {}]  }
   0x1   :  { %338 = vmatprep.subr.bf16.mxu0 %v378_v0  ;;  %v27_v1 = vld [vmem:[%s517_s1] sm:$0xff]  ;;  %v28_v2 = vld [vmem:[%s517_s1 + $0x8] sm:$0xff]  ;;  %v29_v3 = vld [vmem:[%s517_s1 + $0x10] sm:$0xff] }
   0x2   :  { %v339_v4 = vpack.c.bf16 %v28_v2, %v27_v1  ;;  %v30_v5 = vld [vmem:[%s517_s1 + $0x18] sm:$0xff]  ;;  %v31_v7 = vld [vmem:[%s517_s1 + $0x20] sm:$0xff]  ;;  %v32_v8 = vld [vmem:[%s517_s1 + $0x28] sm:$0xff] }
   0x3   :  { %v342_v6 = vpack.c.bf16 %v30_v5, %v29_v3  ;;  %v24_v9 = vld [vmem:[%s518_s0 + $0x8] sm:$0xff]  ;;  %v345_v10 = vpack.c.bf16 %v32_v8, %v31_v7  ;;  %v33_v11 = vld [vmem:[%s517_s1 + $0x30] sm:$0xff]  ;;  %v34_v12 = vld [vmem:[%s517_s1 + $0x38] sm:$0xff] }
   0x4   :  { %340 = vmatpush1.bf16.msra.mxu0 %v339_v4  ;;  %314 = vmatprep.mubr.msk.f32.mxu0 %vm45_vm0, %v24_v9  ;;  %v348_v13 = vpack.c.bf16 %v34_v12, %v33_v11  ;;  %v35_v14 = vld [vmem:[%s517_s1 + $0x40] sm:$0xff]  ;;  %v36_v15 = vld [vmem:[%s517_s1 + $0x48] sm:$0xff]  ;;  %v37_v17 = vld [vmem:[%s517_s1 + $0x50] sm:$0xff] }
   0x5   :  { %341 = vmatprep.subr.bf16.mxu0 %v378_v0  ;;  %v351_v16 = vpack.c.bf16 %v36_v15, %v35_v14  ;;  %v38_v18 = vld [vmem:[%s517_s1 + $0x58] sm:$0xff]  ;;  %v39_v20 = vld [vmem:[%s517_s1 + $0x60] sm:$0xff]  ;;  %v40_v21 = vld [vmem:[%s517_s1 + $0x68] sm:$0xff] }
   0x6   :  { %v354_v19 = vpack.c.bf16 %v38_v18, %v37_v17  ;;  %v357_v22 = vpack.c.bf16 %v40_v21, %v39_v20  ;;  %v41_v23 = vld [vmem:[%s517_s1 + $0x70] sm:$0xff]  ;;  %v42_v24 = vld [vmem:[%s517_s1 + $0x78] sm:$0xff]  ;;  %v43_v26 = vld [vmem:[%s517_s1 + $0x80] sm:$0xff] }
   0x7   :  { %v360_v25 = vpack.c.bf16 %v42_v24, %v41_v23  ;;  %v44_v27 = vld [vmem:[%s517_s1 + $0x88] sm:$0xff]  ;;  %v23_v29 = vld [vmem:[%s518_s0] sm:$0xff]  ;;  %v26_v30 = vld [vmem:[%s518_s0 + $0x18] sm:$0xff] }
   0x8   :  { %343 = vmatpush1.bf16.msra.mxu0 %v342_v6  ;;  %v363_v28 = vpack.c.bf16 %v44_v27, %v43_v26  ;;  %v25_v31 = vld [vmem:[%s518_s0 + $0x10] sm:$0xff]  ;;  %v216_v32 = vld [vmem:[%s519_s4] sm:$0xff]  ;;  %v217_v33 = vld [vmem:[%s519_s4 + $0x8] sm:$0xff] }
   0x9   :  { %344 = vmatprep.subr.bf16.mxu0 %v378_v0  ;;  %v365_v34 = vpack.c.bf16 %v217_v33, %v216_v32  ;;  %v218_v35 = vld [vmem:[%s519_s4 + $0x10] sm:$0xff]  ;;  %v219_v36 = vld [vmem:[%s519_s4 + $0x18] sm:$0xff]  ;;  %v316_v17 = vld [vmem:[%s520_s2] ss:$0 sm:$0xff] }
   0xa   :  { %v369_v37 = vpack.c.bf16 %v219_v36, %v218_v35 }
   0xb   :  { %366 = vmatprep.subr.bf16.mxu1 %v365_v34 }
   0xc   :  { %346 = vmatpush1.bf16.msra.mxu0 %v345_v10  ;;  %368 = vmatpush3.bf16.msra.mxu1 %v365_v34 }
   0xd   :  { %347 = vmatprep.subr.bf16.mxu0 %v378_v0  ;;  %370 = vmatprep.subr.bf16.mxu1 %v369_v37 }
  0x10   :  { %349 = vmatpush1.bf16.msra.mxu0 %v348_v13  ;;  %372 = vmatpush3.bf16.msra.mxu1 %v369_v37 }
  0x11   :  { %350 = vmatprep.subr.bf16.mxu0 %v378_v0 }
  0x14   :  { %352 = vmatpush1.bf16.msra.mxu0 %v351_v16 }
  0x15   :  { %353 = vmatprep.subr.bf16.mxu0 %v378_v0 }
  0x18   :  { %355 = vmatpush1.bf16.msra.mxu0 %v354_v19  ;;  %v317_v19 = vld [vmem:[%s521_s3] ss:$0 sm:$0xff] }
  0x19   :  { %356 = vmatprep.subr.bf16.mxu0 %v378_v0 }
  0x1c   :  { %358 = vmatpush1.bf16.msra.mxu0 %v357_v22 }
  0x1d   :  { %359 = vmatprep.subr.bf16.mxu0 %v378_v0 }
  0x20   :  { %361 = vmatpush1.bf16.msra.mxu0 %v360_v25 }
  0x21   :  { %362 = vmatprep.subr.bf16.mxu0 %v378_v0 }
  0x24   :  { %364 = vmatpush1.bf16.msra.mxu0 %v363_v28  ;;  %v318_v28 = vld [vmem:[%s522_s5] ss:$0 sm:$0xff] }
  0x27   :  { %117 = vmatmul.mubr.f32.vlgmr.msra.gmra.mrb[0].mxu0 %v23_v29 }
  0x28   :  { %315 = vmatprep.mubr.msk.f32.mxu0 %vm45_vm0, %v26_v30 }
  0x2b   :  { %122 = vmatmul.mubr.f32.gmra.mrb[2].mxu0 %v25_v31 }
  0xfa   :  { %v118_v38 = vpop.f32.mrb[0].mxu0 }
  0xfb   :  { %v137_v39 = vsel %vm136_vm1, %v118_v38, 0.0  ;;  %v120_v40 = vpop.f32.mrb[1].mxu0 }
  0xfc   :  { %v140_v41 = vrot.slane %v137_v39, 4 }
  0xfe   :  { %v141_v42 = vadd.f32 %v140_v41, %v137_v39  ;;  %v123_v43 = vpop.f32.mrb[2].mxu0 }
  0xff   :  { %v151_v44 = vsel %vm136_vm1, %v123_v43, 0.0  ;;  %v125_v45 = vpop.f32.mrb[3].mxu0 }
 0x100   :  { %v142_v46 = vrot.slane %v141_v42, 2  ;;  %v153_v47 = vrot.slane %v151_v44, 4 }
 0x102   :  { %v143_v48 = vadd.f32 %v142_v46, %v141_v42  ;;  %v154_v49 = vadd.f32 %v153_v47, %v151_v44 }
 0x104   :  { %v144_v50 = vrot.slane %v143_v48, 1  ;;  %v155_v51 = vrot.slane %v154_v49, 2 }
 0x106   :  { %v145_v52 = vadd.f32 %v144_v50, %v143_v48  ;;  %v156_v53 = vadd.f32 %v155_v51, %v154_v49 }
 0x108   :  { %v147_v54 = vmul.f32 0.125, %v145_v52  ;;  %v157_v55 = vrot.slane %v156_v53, 1 }
 0x10a   :  { %v162_v56 = vsub.f32 %v118_v38, %v147_v54  ;;  %v158_v57 = vadd.f32 %v157_v55, %v156_v53 }
 0x10c   :  { %v164_v58 = vmul.f32 %v162_v56, %v162_v56  ;;  %v159_v59 = vmul.f32 0.125, %v158_v57 }
 0x10e   :  { %v168_v60 = vsel %vm136_vm1, %v164_v58, 0.0  ;;  %v163_v61 = vsub.f32 %v123_v43, %v159_v59 }
 0x10f   :  { %v171_v62 = vrot.slane %v168_v60, 4 }
 0x110   :  { %v165_v63 = vmul.f32 %v163_v61, %v163_v61 }
 0x111   :  { %v172_v0 = vadd.f32 %v171_v62, %v168_v60 }
 0x112   :  { %v181_v1 = vsel %vm136_vm1, %v165_v63, 0.0 }
 0x113   :  { %v173_v2 = vrot.slane %v172_v0, 2  ;;  %v183_v3 = vrot.slane %v181_v1, 4 }
 0x115   :  { %v174_v4 = vadd.f32 %v173_v2, %v172_v0  ;;  %v184_v5 = vadd.f32 %v183_v3, %v181_v1 }
 0x117   :  { %v175_v6 = vrot.slane %v174_v4, 1  ;;  %v185_v7 = vrot.slane %v184_v5, 2 }
 0x119   :  { %v176_v8 = vadd.f32 %v175_v6, %v174_v4  ;;  %v186_v9 = vadd.f32 %v185_v7, %v184_v5 }
 0x11b   :  { %v177_v10 = vmul.f32 0.125, %v176_v8  ;;  %v187_v11 = vrot.slane %v186_v9, 1 }
 0x11d   :  { %v192_v12 = vadd.f32 1e-05, %v177_v10  ;;  %v188_v13 = vadd.f32 %v187_v11, %v186_v9 }
 0x11f   :  { %374 = vrsqrt.f32 %v192_v12  ;;  %v189_v14 = vmul.f32 0.125, %v188_v13 }
 0x121   :  { %v193_v15 = vadd.f32 1e-05, %v189_v14 }
 0x123   :  { %376 = vrsqrt.f32 %v193_v15 }
 0x129   :  { %v375_v16 = vpop.eup %374 }
 0x12a   :  { %v196_v18 = vmul.f32 %v375_v16, %v162_v56 }
 0x12c   :  { %v204_v20 = vmul.f32 %v316_v17, %v196_v18 }
 0x12d   :  { %v377_v21 = vpop.eup %376 }
 0x12e   :  { %v197_v22 = vmul.f32 %v377_v21, %v163_v61  ;;  %v212_v23 = vadd.f32 %v317_v19, %v204_v20 }
 0x130   :  { %v205_v24 = vmul.f32 %v316_v17, %v197_v22  ;;  %v214_v25 = vmax.f32 %v212_v23, 0.0 }
 0x132   :  { %v213_v26 = vadd.f32 %v317_v19, %v205_v24  ;;  %335 = vmatprep.mubr.msk.f32.mxu1 %vm136_vm1, %v214_v25 }
 0x134   :  { %v215_v27 = vmax.f32 %v213_v26, 0.0 }
 0x136   :  { %336 = vmatmul.mubr.msk.f32.vlgmr.msra.gmra.mrb[0].mxu1 %vm136_vm1, %v215_v27 }
 0x209   :  { %v337_v29 = vpop.f32.mrb[0].mxu1 }
 0x20a   :  { %v305_v30 = vadd.f32 %v337_v29, %v318_v28  ;;  %v299_v31 = vpop.f32.mrb[1].mxu1 }
 0x20b   :  { %v300_v32 = vadd.f32 %v318_v28, %v299_v31 }
 0x20c   :  { %309 = vst.msk [vmem:[%s523_s6 + $0x8] sm:$0xff] %vm136_vm1, %v305_v30 }
 0x20d   :  { %308 = vst.msk [vmem:[%s523_s6] sm:$0xff] %vm136_vm1, %v300_v32 }

// kernel: vitic_forward.13
= control target key start
LH: loop header
LB: loop body
LE: loop exit
PB: predicated region body
PF: predicated region fallthrough
CT: control target
= control target key end

     0   :  { %vm79_vm0 = vcmask 257024   ;;  %v1048_v7 = vmov 0.0|0.0   ;;  %vm1049_vm1 = vmmov 0   ;;  %v1050_v11 = vmov 0.0   ;;  %s1411_s0 = inlined_call_operand.vmem [shape: f32[4,32], index: 0, kind: input, shape index: {}]   ;;  %s1412_s3 = inlined_call_operand.vmem [shape: f32[32,32], index: 3, kind: input, shape index: {}]   ;;  %s1413_s1 = inlined_call_operand.vmem [shape: f32[1,32], index: 1, kind: input, shape index: {}]   ;;  %s1414_s2 = inlined_call_operand.vmem [shape: f32[1,32], index: 2, kind: input, shape index: {}]   ;;  %s1415_s7 = inlined_call_operand.vmem [shape: f32[32,32], index: 7, kind: input, shape index: {}]   ;;  %s1416_s4 = inlined_call_operand.vmem [shape: f32[1,32], index: 4, kind: input, shape index: {}]   ;;  %s1417_s5 = inlined_call_operand.vmem [shape: f32[1,32], index: 5, kind: input, shape index: {}]   ;;  %s1418_s6 = inlined_call_operand.vmem [shape: f32[1,32], index: 6, kind: input, shape index: {}]   ;;  %s1419_s13 = inlined_call_operand.vmem [shape: f32[32,32], index: 13, kind: input, shape index: {}]   ;;  %s1420_s11 = inlined_call_operand.vmem [shape: f32[32,16], index: 11, kind: input, shape index: {}]   ;;  %s1421_s8 = inlined_call_operand.vmem [shape: f32[1,32], index: 8, kind: input, shape index: {}]   ;;  %s1422_s14 = inlined_call_operand.vmem [shape: f32[1,32], index: 14, kind: input, shape index: {}]   ;;  %s1423_s9 = inlined_call_operand.vmem [shape: f32[1,32], index: 9, kind: input, shape index: {}]   ;;  %s1424_s10 = inlined_call_operand.vmem [shape: f32[1,32], index: 10, kind: input, shape index: {}]   ;;  %s1425_s17 = inlined_call_operand.vmem [shape: f32[32,32], index: 17, kind: input, shape index: {}]   ;;  %s1426_s15 = inlined_call_operand.vmem [shape: f32[1,32], index: 15, kind: input, shape index: {}]   ;;  %s1427_s16 = inlined_call_operand.vmem [shape: f32[1,32], index: 16, kind: input, shape index: {}]   ;;  %s1428_s21 = inlined_call_operand.vmem [shape: f32[32,10], index: 21, kind: input, shape index: {}]   ;;  %s1429_s12 = inlined_call_operand.vmem [shape: f32[1,16], index: 12, kind: input, shape index: {}]   ;;  %s1430_s23 = inlined_call_operand.vmem [shape: f32[4,16], index: 23, kind: output, shape index: {0}]   ;;  %s1431_s18 = inlined_call_operand.vmem [shape: f32[1,32], index: 18, kind: input, shape index: {}]   ;;  %s1432_s19 = inlined_call_operand.vmem [shape: f32[1,32], index: 19, kind: input, shape index: {}]   ;;  %s1433_s20 = inlined_call_operand.vmem [shape: f32[1,32], index: 20, kind: input, shape index: {}]   ;;  %s1434_s22 = inlined_call_operand.vmem [shape: f32[1,10], index: 22, kind: input, shape index: {}]   ;;  %s1435_s24 = inlined_call_operand.vmem [shape: f32[4,10], index: 24, kind: output, shape index: {1}]  }
   0x1   :  { %1439 = sst [smem:[#allocation2_spill]] %s1411_s0  ;;  %995 = vmatprep.subr.bf16.mxu0 %v1048_v7  ;;  %937 = vmatprep.mubr.msk.f32.mxu0 %vm1049_vm1, %v1050_v11  ;;  %vm119_vm2 = vcmask 261120   ;;  %v195_v30 = vlaneseq  ;;  %vm485_vm4 = vcmask 125952   ;;  %vm856_vm5 = vcmask 76800  }
   0x2   :  { %1440 = sst [smem:[#allocation3_spill]] %s1412_s3  ;;  %s1448_s27 = sld [smem:[#allocation2_spill]]  ;;  %1001 = vmatprep.subr.bf16.mxu1 %v1048_v7  ;;  %948 = vmatprep.mubr.msk.f32.mxu1 %vm1049_vm1, %v1050_v11 }
   0x3   :  { %1441 = sst [smem:[#allocation4_spill]] %s1413_s1  ;;  %s1449_s1 = sld [smem:[#allocation3_spill]]  ;;  %v1227_v31 = vshrl.u32 %v195_v30, 7  ;;  %v402_v30 = vld [vmem:[%s1420_s11 + $0x8] sm:$0xff] }
   0x4   :  { %1442 = sst [smem:[#allocation5_spill]] %s1414_s2  ;;  %s1450_s3 = sld [smem:[#allocation4_spill]] }
   0x5   :  { %1443 = sst [smem:[#allocation6_spill]] %s1415_s7  ;;  %vm197_vm3 = vcmp.lt.s32.totalorder %v1227_v31, 2  ;;  %v897_v31 = vld [vmem:[%s1434_s22] ss:$0 sm:$0xff] }
   0x6   :  { %1444 = sst [smem:[#allocation7_spill]] %s1416_s4 }
   0x7   :  { %1445 = sst [smem:[#allocation8_spill]] %s1417_s5 }
   0x8   :  { %1446 = sst [smem:[#allocation9_spill]] %s1418_s6  ;;  %v76_v0 = vld [vmem:[%s1448_s27] sm:$0xf]  ;;  %s1451_s27 = sld [smem:[#allocation5_spill]] }
   0x9   :  { %1447 = sst [smem:[#allocation10_spill]] %s1419_s13  ;;  %v80_v1 = vsel %vm79_vm0, %v76_v0, 0.0  ;;  %v108_v8 = vld [vmem:[%s1449_s1] sm:$0xff]  ;;  %v109_v9 = vld [vmem:[%s1449_s1 + $0x8] sm:$0xff]  ;;  %v110_v10 = vld [vmem:[%s1449_s1 + $0x10] sm:$0xff] }
   0xa   :  { %81 = vadd.xlane.f32.xlu0 %v80_v1  ;;  %v996_v12 = vpack.c.bf16 %v109_v9, %v108_v8  ;;  %v111_v13 = vld [vmem:[%s1449_s1 + $0x18] sm:$0xff]  ;;  %v877_v19 = vld [vmem:[%s1450_s3] ss:$0 sm:$0xff]  ;;  %s1452_s1 = sld [smem:[#allocation6_spill]]  ;;  %s1453_s3 = sld [smem:[#allocation7_spill]] }
   0xb   :  { %v999_v14 = vpack.c.bf16 %v111_v13, %v110_v10  ;;  %s1456_s6 = sld [smem:[#allocation10_spill]] }
   0xc   :  { %997 = vmatpush3.bf16.msra.mxu0 %v996_v12 }
   0xd   :  { %998 = vmatprep.subr.bf16.mxu0 %v1048_v7 }
   0xe   :  { %v878_v21 = vld [vmem:[%s1451_s27] ss:$0 sm:$0xff]  ;;  %s1454_s27 = sld [smem:[#allocation8_spill]] }
  0x10   :  { %1000 = vmatpush3.bf16.msra.mxu0 %v999_v14  ;;  %v257_v24 = vld [vmem:[%s1452_s1] sm:$0xff]  ;;  %v258_v25 = vld [vmem:[%s1452_s1 + $0x8] sm:$0xff]  ;;  %v259_v27 = vld [vmem:[%s1452_s1 + $0x10] sm:$0xff] }
  0x11   :  { %1007 = vmatprep.subr.bf16.mxu0 %v1048_v7  ;;  %v1002_v26 = vpack.c.bf16 %v258_v25, %v257_v24  ;;  %v260_v28 = vld [vmem:[%s1452_s1 + $0x18] sm:$0xff]  ;;  %v879_v32 = vld [vmem:[%s1453_s3] ss:$0 sm:$0xff]  ;;  %s1455_s1 = sld [smem:[#allocation9_spill]] }
  0x12   :  { %v1005_v29 = vpack.c.bf16 %v260_v28, %v259_v27  ;;  %v490_v27 = vld [vmem:[%s1456_s6 + $0x18] sm:$0xff] }
  0x13   :  { %1003 = vmatpush3.bf16.msra.mxu1 %v1002_v26  ;;  %v489_v26 = vld [vmem:[%s1456_s6 + $0x10] sm:$0xff] }
  0x14   :  { %1004 = vmatprep.subr.bf16.mxu1 %v1048_v7  ;;  %v1017_v28 = vpack.c.bf16 %v490_v27, %v489_v26 }
  0x17   :  { %1006 = vmatpush3.bf16.msra.mxu1 %v1005_v29  ;;  %v401_v29 = vld [vmem:[%s1420_s11] sm:$0xff] }
  0x18   :  { %1013 = vmatprep.subr.bf16.mxu1 %v1048_v7 }
  0x97   :  { %v82_v2 = vpop.xlane.xlu0 %81 }
  0x98   :  { %v84_v3 = vmul.f32 0.03125, %v82_v2 }
  0x9a   :  { %v85_v4 = vsub.f32 %v76_v0, %v84_v3 }
  0x9c   :  { %v86_v5 = vmul.f32 %v85_v4, %v85_v4 }
  0x9e   :  { %v87_v6 = vsel %vm79_vm0, %v86_v5, 0.0 }
  0x9f   :  { %88 = vadd.xlane.f32.xlu0 %v87_v6 }
 0x12c   :  { %v89_v15 = vpop.xlane.xlu0 %88 }
 0x12d   :  { %v90_v16 = vmul.f32 0.03125, %v89_v15 }
 0x12f   :  { %v91_v17 = vadd.f32 1e-06, %v90_v16  ;;  %v881_v16 = vld [vmem:[%s1454_s27] ss:$0 sm:$0xff] }
 0x131   :  { %1034 = vrsqrt.f32 %v91_v17 }
 0x13b   :  { %v1035_v18 = vpop.eup %1034 }
 0x13c   :  { %v93_v20 = vmul.f32 %v1035_v18, %v85_v4  ;;  %v882_v18 = vld [vmem:[%s1455_s1] ss:$0 sm:$0xff] }
 0x13e   :  { %v100_v22 = vmul.f32 %v877_v19, %v93_v20  ;;  %v487_v20 = vld [vmem:[%s1456_s6] sm:$0xff] }
 0x140   :  { %v1207_v23 = vadd.f32 %v878_v21, %v100_v22  ;;  %v488_v21 = vld [vmem:[%s1456_s6 + $0x8] sm:$0xff] }
 0x141   :  { %v1014_v24 = vpack.c.bf16 %v488_v21, %v487_v20 }
 0x142   :  { %938 = vmatmul.mubr.msk.f32.vlgmr.msra.gmra.mrb[0].mxu0 %vm119_vm2, %v1207_v23 }
 0x143   :  { %959 = vmatprep.mubr.msk.f32.mxu0 %vm1049_vm1, %v1050_v11 }
 0x215   :  { %v189_v33 = vpop.f32.mrb[0].mxu0 }
 0x216   :  { %v190_v34 = vadd.f32 %v879_v32, %v189_v33  ;;  %v939_v35 = vpop.f32.mrb[1].mxu0  ;;  %v1008_v32 = vpack.c.bf16 %v402_v30, %v401_v29  ;;  %v403_v33 = vld [vmem:[%s1420_s11 + $0x10] sm:$0xff] }
 0x217   :  { %v883_v35 = vld [vmem:[%s1421_s8] ss:$0 sm:$0xff] }
 0x218   :  { %v198_v36 = vsel %vm197_vm3, %v190_v34, 0.0  ;;  %v208_v37 = vsel %vm197_vm3, 0.0, %v190_v34  ;;  %1009 = vmatpush3.bf16.msra.mxu0 %v1008_v32 }
 0x219   :  { %v199_v38 = vsel %vm79_vm0, %v198_v36, 0.0  ;;  %v209_v39 = vsel %vm79_vm0, %v208_v37, 0.0  ;;  %1010 = vmatprep.subr.bf16.mxu0 %v1048_v7 }
 0x21a   :  { %v200_v40 = vrot.slane %v199_v38, 4  ;;  %v210_v41 = vrot.slane %v209_v39, 4 }
 0x21c   :  { %v201_v42 = vadd.f32 %v200_v40, %v199_v38  ;;  %v211_v43 = vadd.f32 %v210_v41, %v209_v39 }
 0x21e   :  { %v202_v44 = vrot.slane %v201_v42, 2  ;;  %v212_v45 = vrot.slane %v211_v43, 2 }
 0x220   :  { %v203_v46 = vadd.f32 %v202_v44, %v201_v42  ;;  %v213_v47 = vadd.f32 %v212_v45, %v211_v43  ;;  %v889_v45 = vld [vmem:[%s1422_s14] ss:$0 sm:$0xff] }
 0x222   :  { %v204_v48 = vrot.slane %v203_v46, 1  ;;  %v214_v49 = vrot.slane %v213_v47, 1 }
 0x224   :  { %v205_v50 = vadd.f32 %v204_v48, %v203_v46  ;;  %v215_v51 = vadd.f32 %v214_v49, %v213_v47 }
 0x226   :  { %v207_v52 = vmul.f32 0.5, %v205_v50  ;;  %v216_v53 = vmul.f32 0.5, %v215_v51 }
 0x228   :  { %v217_v54 = vsel %vm197_vm3, %v207_v52, %v216_v53 }
 0x229   :  { %v218_v55 = vsub.f32 %v190_v34, %v217_v54 }
 0x22b   :  { %v219_v56 = vmul.f32 %v218_v55, %v218_v55 }
 0x22d   :  { %v220_v57 = vsel %vm197_vm3, %v219_v56, 0.0  ;;  %v229_v58 = vsel %vm197_vm3, 0.0, %v219_v56 }
 0x22e   :  { %v221_v59 = vsel %vm79_vm0, %v220_v57, 0.0  ;;  %v230_v60 = vsel %vm79_vm0, %v229_v58, 0.0 }
 0x22f   :  { %v222_v61 = vrot.slane %v221_v59, 4  ;;  %v231_v62 = vrot.slane %v230_v60, 4 }
 0x231   :  { %v223_v63 = vadd.f32 %v222_v61, %v221_v59  ;;  %v232_v0 = vadd.f32 %v231_v62, %v230_v60 }
 0x233   :  { %v224_v1 = vrot.slane %v223_v63, 2  ;;  %v233_v2 = vrot.slane %v232_v0, 2 }
 0x235   :  { %v225_v3 = vadd.f32 %v224_v1, %v223_v63  ;;  %v234_v4 = vadd.f32 %v233_v2, %v232_v0 }
 0x237   :  { %v226_v5 = vrot.slane %v225_v3, 1  ;;  %v235_v6 = vrot.slane %v234_v4, 1 }
 0x239   :  { %v227_v8 = vadd.f32 %v226_v5, %v225_v3  ;;  %v236_v9 = vadd.f32 %v235_v6, %v234_v4 }
 0x23b   :  { %v228_v10 = vmul.f32 0.5, %v227_v8  ;;  %v237_v12 = vmul.f32 0.5, %v236_v9 }
 0x23d   :  { %v238_v13 = vsel %vm197_vm3, %v228_v10, %v237_v12 }
 0x23e   :  { %v239_v14 = vadd.f32 1e-05, %v238_v13 }
 0x240   :  { %1036 = vrsqrt.f32 %v239_v14 }
 0x24a   :  { %v1037_v15 = vpop.eup %1036 }
 0x24b   :  { %v241_v17 = vmul.f32 %v1037_v15, %v218_v55 }
 0x24d   :  { %v248_v19 = vmul.f32 %v881_v16, %v241_v17 }
 0x24f   :  { %v255_v22 = vadd.f32 %v882_v18, %v248_v19 }
 0x251   :  { %v256_v25 = vmax.f32 %v255_v22, 0.0 }
 0x253   :  { %949 = vmatmul.mubr.msk.f32.vlgmr.msra.gmra.mrb[0].mxu1 %vm119_vm2, %v256_v25 }
 0x254   :  { %1015 = vmatpush3.bf16.msra.mxu1 %v1014_v24  ;;  %970 = vmatprep.mubr.msk.f32.mxu1 %vm1049_vm1, %v1050_v11 }
 0x255   :  { %1016 = vmatprep.subr.bf16.mxu1 %v1048_v7 }
 0x258   :  { %1018 = vmatpush3.bf16.msra.mxu1 %v1017_v28 }
 0x259   :  { %1025 = vmatprep.subr.bf16.mxu1 %v1048_v7 }
 0x25b   :  { %971 = vmatmul.mubr.msk.f32.vlgmr.msra.gmra.mrb[2].mxu1 %vm119_vm2, %v1207_v23  ;;  %v404_v23 = vld [vmem:[%s1420_s11 + $0x18] sm:$0xff] }
 0x25c   :  { %992 = vmatprep.mubr.msk.f32.mxu1 %vm1049_vm1, %v1050_v11  ;;  %v1011_v34 = vpack.c.bf16 %v404_v23, %v403_v33 }
 0x25e   :  { %1012 = vmatpush3.bf16.msra.mxu0 %v1011_v34 }
 0x25f   :  { %1019 = vmatprep.subr.bf16.mxu0 %v1048_v7 }
 0x326   :  { %v337_v36 = vpop.f32.mrb[0].mxu1 }
 0x327   :  { %v338_v37 = vadd.f32 %v883_v35, %v337_v36  ;;  %v950_v38 = vpop.f32.mrb[1].mxu1 }
 0x329   :  { %v343_v39 = vsel %vm197_vm3, %v338_v37, 0.0  ;;  %v352_v40 = vsel %vm197_vm3, 0.0, %v338_v37 }
 0x32a   :  { %v344_v41 = vsel %vm79_vm0, %v343_v39, 0.0  ;;  %v353_v42 = vsel %vm79_vm0, %v352_v40, 0.0 }
 0x32b   :  { %v345_v43 = vrot.slane %v344_v41, 4  ;;  %v354_v44 = vrot.slane %v353_v42, 4 }
 0x32d   :  { %v346_v46 = vadd.f32 %v345_v43, %v344_v41  ;;  %v355_v47 = vadd.f32 %v354_v44, %v353_v42 }
 0x32e   :  { %v564_v48 = vpop.f32.mrb[2].mxu1 }
 0x32f   :  { %v347_v49 = vrot.slane %v346_v46, 2  ;;  %v356_v50 = vrot.slane %v355_v47, 2  ;;  %v565_v51 = vadd.f32 %v889_v45, %v564_v48  ;;  %v972_v52 = vpop.f32.mrb[3].mxu1 }
 0x331   :  { %v348_v53 = vadd.f32 %v347_v49, %v346_v46  ;;  %v357_v54 = vadd.f32 %v356_v50, %v355_v47  ;;  %v570_v55 = vsel %vm197_vm3, %v565_v51, 0.0  ;;  %v579_v56 = vsel %vm197_vm3, 0.0, %v565_v51 }
 0x332   :  { %v571_v57 = vsel %vm79_vm0, %v570_v55, 0.0  ;;  %v580_v58 = vsel %vm79_vm0, %v579_v56, 0.0 }
 0x333   :  { %v349_v59 = vrot.slane %v348_v53, 1  ;;  %v358_v60 = vrot.slane %v357_v54, 1  ;;  %v572_v61 = vrot.slane %v571_v57, 4  ;;  %v581_v62 = vrot.slane %v580_v58, 4 }
 0x335   :  { %v350_v63 = vadd.f32 %v349_v59, %v348_v53  ;;  %v359_v0 = vadd.f32 %v358_v60, %v357_v54  ;;  %v573_v1 = vadd.f32 %v572_v61, %v571_v57  ;;  %v582_v2 = vadd.f32 %v581_v62, %v580_v58 }
 0x337   :  { %v351_v3 = vmul.f32 0.5, %v350_v63  ;;  %v360_v4 = vmul.f32 0.5, %v359_v0  ;;  %v574_v5 = vrot.slane %v573_v1, 2  ;;  %v583_v6 = vrot.slane %v582_v2, 2 }
 0x339   :  { %v361_v8 = vsel %vm197_vm3, %v351_v3, %v360_v4  ;;  %v575_v9 = vadd.f32 %v574_v5, %v573_v1  ;;  %v584_v10 = vadd.f32 %v583_v6, %v582_v2  ;;  %v885_v1 = vld [vmem:[%s1423_s9] ss:$0 sm:$0xff]  ;;  %v629_v6 = vld [vmem:[%s1425_s17 + $0x8] sm:$0xff] }
 0x33a   :  { %v362_v12 = vsub.f32 %v338_v37, %v361_v8  ;;  %v886_v3 = vld [vmem:[%s1424_s10] ss:$0 sm:$0xff] }
 0x33b   :  { %v576_v13 = vrot.slane %v575_v9, 1  ;;  %v585_v14 = vrot.slane %v584_v10, 1  ;;  %v628_v5 = vld [vmem:[%s1425_s17] sm:$0xff] }
 0x33c   :  { %v363_v15 = vmul.f32 %v362_v12, %v362_v12 }
 0x33d   :  { %v577_v16 = vadd.f32 %v576_v13, %v575_v9  ;;  %v586_v17 = vadd.f32 %v585_v14, %v584_v10  ;;  %v1020_v9 = vpack.c.bf16 %v629_v6, %v628_v5  ;;  %v631_v13 = vld [vmem:[%s1425_s17 + $0x18] sm:$0xff] }
 0x33e   :  { %v364_v18 = vsel %vm197_vm3, %v363_v15, 0.0  ;;  %v373_v19 = vsel %vm197_vm3, 0.0, %v363_v15  ;;  %v891_v15 = vld [vmem:[%s1426_s15] ss:$0 sm:$0xff] }
 0x33f   :  { %v365_v20 = vsel %vm79_vm0, %v364_v18, 0.0  ;;  %v374_v21 = vsel %vm79_vm0, %v373_v19, 0.0  ;;  %v578_v22 = vmul.f32 0.5, %v577_v16  ;;  %v587_v24 = vmul.f32 0.5, %v586_v17  ;;  %v892_v17 = vld [vmem:[%s1427_s16] ss:$0 sm:$0xff] }
 0x340   :  { %v366_v25 = vrot.slane %v365_v20, 4  ;;  %v375_v26 = vrot.slane %v374_v21, 4 }
 0x341   :  { %v588_v27 = vsel %vm197_vm3, %v578_v22, %v587_v24  ;;  %v772_v22 = vld [vmem:[%s1428_s21] sm:$0xff]  ;;  %v773_v24 = vld [vmem:[%s1428_s21 + $0x8] sm:$0xff] }
 0x342   :  { %v367_v28 = vadd.f32 %v366_v25, %v365_v20  ;;  %v376_v29 = vadd.f32 %v375_v26, %v374_v21  ;;  %v589_v30 = vsub.f32 %v565_v51, %v588_v27  ;;  %v1026_v25 = vpack.c.bf16 %v773_v24, %v772_v22  ;;  %v775_v26 = vld [vmem:[%s1428_s21 + $0x18] sm:$0xff] }
 0x344   :  { %v368_v32 = vrot.slane %v367_v28, 2  ;;  %v377_v33 = vrot.slane %v376_v29, 2  ;;  %v590_v23 = vmul.f32 %v589_v30, %v589_v30  ;;  %1027 = vmatpush3.bf16.msra.mxu1 %v1026_v25 }
 0x345   :  { %1028 = vmatprep.subr.bf16.mxu1 %v1048_v7 }
 0x346   :  { %v369_v34 = vadd.f32 %v368_v32, %v367_v28  ;;  %v378_v35 = vadd.f32 %v377_v33, %v376_v29  ;;  %v591_v36 = vsel %vm197_vm3, %v590_v23, 0.0  ;;  %v600_v37 = vsel %vm197_vm3, 0.0, %v590_v23  ;;  %v887_v28 = vld [vmem:[%s1429_s12] ss:$0 sm:$0xff] }
 0x347   :  { %v592_v38 = vsel %vm79_vm0, %v591_v36, 0.0  ;;  %v601_v39 = vsel %vm79_vm0, %v600_v37, 0.0 }
 0x348   :  { %v370_v40 = vrot.slane %v369_v34, 1  ;;  %v379_v41 = vrot.slane %v378_v35, 1  ;;  %v593_v42 = vrot.slane %v592_v38, 4  ;;  %v602_v43 = vrot.slane %v601_v39, 4 }
 0x34a   :  { %v371_v44 = vadd.f32 %v370_v40, %v369_v34  ;;  %v380_v45 = vadd.f32 %v379_v41, %v378_v35  ;;  %v594_v46 = vadd.f32 %v593_v42, %v592_v38  ;;  %v603_v47 = vadd.f32 %v602_v43, %v601_v39 }
 0x34c   :  { %v372_v48 = vmul.f32 0.5, %v371_v44  ;;  %v381_v49 = vmul.f32 0.5, %v380_v45  ;;  %v595_v50 = vrot.slane %v594_v46, 2  ;;  %v604_v51 = vrot.slane %v603_v47, 2 }
 0x34e   :  { %v382_v52 = vsel %vm197_vm3, %v372_v48, %v381_v49  ;;  %v596_v53 = vadd.f32 %v595_v50, %v594_v46  ;;  %v605_v54 = vadd.f32 %v604_v51, %v603_v47 }
 0x34f   :  { %v383_v55 = vadd.f32 1e-05, %v382_v52 }
 0x350   :  { %v597_v56 = vrot.slane %v596_v53, 1  ;;  %v606_v57 = vrot.slane %v605_v54, 1 }
 0x351   :  { %1038 = vrsqrt.f32 %v383_v55 }
 0x352   :  { %v598_v58 = vadd.f32 %v597_v56, %v596_v53  ;;  %v607_v59 = vadd.f32 %v606_v57, %v605_v54 }
 0x354   :  { %v599_v60 = vmul.f32 0.5, %v598_v58  ;;  %v608_v61 = vmul.f32 0.5, %v607_v59 }
 0x356   :  { %v609_v62 = vsel %vm197_vm3, %v599_v60, %v608_v61 }
 0x357   :  { %v610_v63 = vadd.f32 1e-05, %v609_v62 }
 0x359   :  { %1040 = vrsqrt.f32 %v610_v63 }
 0x35b   :  { %v1039_v0 = vpop.eup %1038 }
 0x35c   :  { %v385_v2 = vmul.f32 %v1039_v0, %v362_v12  ;;  %v630_v12 = vld [vmem:[%s1425_s17 + $0x10] sm:$0xff] }
 0x35d   :  { %v1023_v18 = vpack.c.bf16 %v631_v13, %v630_v12 }
 0x35e   :  { %v392_v4 = vmul.f32 %v885_v1, %v385_v2 }
 0x360   :  { %v399_v8 = vadd.f32 %v886_v3, %v392_v4 }
 0x362   :  { %v400_v10 = vmax.f32 %v399_v8, 0.0 }
 0x363   :  { %v1041_v14 = vpop.eup %1040 }
 0x364   :  { %v612_v16 = vmul.f32 %v1041_v14, %v589_v30  ;;  %960 = vmatmul.mubr.msk.f32.vlgmr.msra.gmra.mrb[2].mxu0 %vm119_vm2, %v400_v10 }
 0x365   :  { %1021 = vmatpush3.bf16.msra.mxu0 %v1020_v9  ;;  %981 = vmatprep.mubr.msk.f32.mxu0 %vm1049_vm1, %v1050_v11  ;;  %v774_v11 = vld [vmem:[%s1428_s21 + $0x10] sm:$0xff] }
 0x366   :  { %v619_v19 = vmul.f32 %v891_v15, %v612_v16  ;;  %1022 = vmatprep.subr.bf16.mxu0 %v1048_v7  ;;  %v1029_v27 = vpack.c.bf16 %v775_v26, %v774_v11  ;;  %v893_v7 = vld [vmem:[%s1431_s18] ss:$0 sm:$0xff] }
 0x367   :  { %v895_v15 = vld [vmem:[%s1432_s19] ss:$0 sm:$0xff] }
 0x368   :  { %v626_v20 = vadd.f32 %v892_v17, %v619_v19  ;;  %1030 = vmatpush3.bf16.msra.mxu1 %v1029_v27  ;;  %v896_v17 = vld [vmem:[%s1433_s20] ss:$0 sm:$0xff] }
 0x369   :  { %1024 = vmatpush3.bf16.msra.mxu0 %v1023_v18 }
 0x36a   :  { %v627_v21 = vmax.f32 %v626_v20, 0.0 }
 0x36c   :  { %982 = vmatmul.mubr.msk.f32.vlgmr.msra.gmra.mrb[4].mxu0 %vm119_vm2, %v627_v21 }
 0x437   :  { %v481_v29 = vpop.f32.mrb[2].mxu0 }
 0x438   :  { %v482_v30 = vadd.f32 %v887_v28, %v481_v29  ;;  %v961_v32 = vpop.f32.mrb[3].mxu0 }
 0x43a   :  { %486 = vst.msk [vmem:[%s1430_s23] sm:$0xf] %vm485_vm4, %v482_v30 }
 0x43f   :  { %v708_v33 = vpop.f32.mrb[4].mxu0 }
 0x440   :  { %v709_v23 = vadd.f32 %v893_v7, %v708_v33  ;;  %v983_v34 = vpop.f32.mrb[5].mxu0 }
 0x442   :  { %v714_v35 = vsel %vm197_vm3, %v709_v23, 0.0  ;;  %v723_v36 = vsel %vm197_vm3, 0.0, %v709_v23 }
 0x443   :  { %v715_v37 = vsel %vm79_vm0, %v714_v35, 0.0  ;;  %v724_v38 = vsel %vm79_vm0, %v723_v36, 0.0 }
 0x444   :  { %v716_v39 = vrot.slane %v715_v37, 4  ;;  %v725_v40 = vrot.slane %v724_v38, 4 }
 0x446   :  { %v717_v41 = vadd.f32 %v716_v39, %v715_v37  ;;  %v726_v42 = vadd.f32 %v725_v40, %v724_v38 }
 0x448   :  { %v718_v43 = vrot.slane %v717_v41, 2  ;;  %v727_v44 = vrot.slane %v726_v42, 2 }
 0x44a   :  { %v719_v45 = vadd.f32 %v718_v43, %v717_v41  ;;  %v728_v46 = vadd.f32 %v727_v44, %v726_v42 }
 0x44c   :  { %v720_v47 = vrot.slane %v719_v45, 1  ;;  %v729_v48 = vrot.slane %v728_v46, 1 }
 0x44e   :  { %v721_v49 = vadd.f32 %v720_v47, %v719_v45  ;;  %v730_v50 = vadd.f32 %v729_v48, %v728_v46 }
 0x450   :  { %v722_v51 = vmul.f32 0.5, %v721_v49  ;;  %v731_v52 = vmul.f32 0.5, %v730_v50 }
 0x452   :  { %v732_v53 = vsel %vm197_vm3, %v722_v51, %v731_v52 }
 0x453   :  { %v733_v54 = vsub.f32 %v709_v23, %v732_v53 }
 0x455   :  { %v734_v55 = vmul.f32 %v733_v54, %v733_v54 }
 0x457   :  { %v735_v56 = vsel %vm197_vm3, %v734_v55, 0.0  ;;  %v744_v57 = vsel %vm197_vm3, 0.0, %v734_v55 }
 0x458   :  { %v736_v58 = vsel %vm79_vm0, %v735_v56, 0.0  ;;  %v745_v59 = vsel %vm79_vm0, %v744_v57, 0.0 }
 0x459   :  { %v737_v60 = vrot.slane %v736_v58, 4  ;;  %v746_v61 = vrot.slane %v745_v59, 4 }
 0x45b   :  { %v738_v62 = vadd.f32 %v737_v60, %v736_v58  ;;  %v747_v63 = vadd.f32 %v746_v61, %v745_v59 }
 0x45d   :  { %v739_v0 = vrot.slane %v738_v62, 2  ;;  %v748_v1 = vrot.slane %v747_v63, 2 }
 0x45f   :  { %v740_v2 = vadd.f32 %v739_v0, %v738_v62  ;;  %v749_v3 = vadd.f32 %v748_v1, %v747_v63 }
 0x461   :  { %v741_v4 = vrot.slane %v740_v2, 1  ;;  %v750_v5 = vrot.slane %v749_v3, 1 }
 0x463   :  { %v742_v6 = vadd.f32 %v741_v4, %v740_v2  ;;  %v751_v8 = vadd.f32 %v750_v5, %v749_v3 }
 0x465   :  { %v743_v9 = vmul.f32 0.5, %v742_v6  ;;  %v752_v10 = vmul.f32 0.5, %v751_v8 }
 0x467   :  { %v753_v12 = vsel %vm197_vm3, %v743_v9, %v752_v10 }
 0x468   :  { %v754_v13 = vadd.f32 1e-05, %v753_v12 }
 0x46a   :  { %1042 = vrsqrt.f32 %v754_v13 }
 0x474   :  { %v1043_v14 = vpop.eup %1042 }
 0x475   :  { %v756_v16 = vmul.f32 %v1043_v14, %v733_v54 }
 0x477   :  { %v763_v18 = vmul.f32 %v895_v15, %v756_v16 }
 0x479   :  { %v770_v19 = vadd.f32 %v896_v17, %v763_v18 }
 0x47b   :  { %v771_v20 = vmax.f32 %v770_v19, 0.0 }
 0x47d   :  { %993 = vmatmul.mubr.msk.f32.vlgmr.msra.gmra.mrb[4].mxu1 %vm119_vm2, %v771_v20 }
 0x550   :  { %v852_v21 = vpop.f32.mrb[4].mxu1 }
 0x551   :  { %v853_v22 = vadd.f32 %v897_v31, %v852_v21  ;;  %v994_v24 = vpop.f32.mrb[5].mxu1 }
 0x553   :  { %v857_v25 = vsel %vm856_vm5, %v853_v22, -inf }
 0x554   :  { %858 = vmax.xlane.f32.xlu1 %v857_v25 }
 0x5e1   :  { %v859_v11 = vpop.xlane.xlu1 %858 }
 0x5e2   :  { %v860_v26 = vsub.f32 %v853_v22, %v859_v11 }
 0x5e4   :  { %v861_v27 = vmul.f32 1.442695, %v860_v26 }
 0x5e6   :  { %1044 = vpow2.f32 %v861_v27 }
 0x5f0   :  { %v1045_v28 = vpop.eup %1044 }
 0x5f1   :  { %v863_v29 = vsel %vm856_vm5, %v1045_v28, 0.0 }
 0x5f2   :  { %864 = vadd.xlane.f32.xlu1 %v863_v29 }
 0x67f   :  { %v865_v30 = vpop.xlane.xlu1 %864 }
 0x680   :  { %1046 = vrcp.f32 %v865_v30 }
 0x68a   :  { %v1047_v32 = vpop.eup %1046 }
 0x68b   :  { %v867_v7 = vmul.f32 %v1047_v32, %v1045_v28 }
 0x68d   :  { %868 = vst.msk [vmem:[%s1435_s24] sm:$0xf] %vm856_vm5, %v867_v7 }

// kernel: vitic_forward.11
= control target key start
LH: loop header
LB: loop body
LE: loop exit
PB: predicated region body
PF: predicated region fallthrough
CT: control target
= control target key end

     0   :  { %s2201_s25 = smov 0   ;;  %s2446_s0 = inlined_call_operand.vmem [shape: f32[4,5,32], index: 0, kind: input, shape index: {}]   ;;  %s2447_s1 = inlined_call_operand.vmem [shape: f32[1,32], index: 1, kind: input, shape index: {}]   ;;  %s2448_s2 = inlined_call_operand.vmem [shape: f32[1,32], index: 2, kind: input, shape index: {}]   ;;  %s2449_s3 = inlined_call_operand.vmem [shape: f32[32,96], index: 3, kind: input, shape index: {}]   ;;  %s2450_s4 = inlined_call_operand.vmem [shape: f32[1,96], index: 4, kind: input, shape index: {}]   ;;  %s2451_s5 = inlined_call_operand.vmem [shape: f32[32,32], index: 5, kind: input, shape index: {}]   ;;  %s2452_s6 = inlined_call_operand.vmem [shape: f32[1,32], index: 6, kind: input, shape index: {}]   ;;  %s2453_s7 = inlined_call_operand.vmem [shape: f32[1,32], index: 7, kind: input, shape index: {}]   ;;  %s2454_s8 = inlined_call_operand.vmem [shape: f32[1,32], index: 8, kind: input, shape index: {}]   ;;  %s2455_s9 = inlined_call_operand.vmem [shape: f32[32,128], index: 9, kind: input, shape index: {}]   ;;  %s2456_s10 = inlined_call_operand.vmem [shape: f32[1,128], index: 10, kind: input, shape index: {}]   ;;  %s2457_s11 = inlined_call_operand.vmem [shape: f32[128,32], index: 11, kind: input, shape index: {}]   ;;  %s2458_s12 = inlined_call_operand.vmem [shape: f32[1,32], index: 12, kind: input, shape index: {}]   ;;  %s2459_s13 = inlined_call_operand.vmem [shape: f32[4,5,32], index: 13, kind: output, shape index: {}]  }
   0x1 LB: > { %s1820_s26 = sadd.s32 4294967295, %s2115_s25   ;;  %p1824_p0 = scmp.ge.s32.totalorder %s2115_s25, 1  ;;  %s2115_s25 = sphi %s2201_s25, %s23_s25  }
   0x2   : > { %p386_p1 = scmp.lt.s32.totalorder %s2115_s25, 5 }
   0x4   : > { %p387_p2 = pnand %p1824_p0, %p386_p1 }
   0x5   : > { %p428_p3 = scmp.lt.s32.totalorder (!%p387_p2), %s1820_s26, 3  ;;  %vm439_vm0 = vcmask (!%p387_p2), 258048   ;;  %v468_v7 = vld [vmem:[%s2449_s3] sm:$0xff] (!%p387_p2)  ;;  %v469_v8 = vld [vmem:[%s2449_s3 + $0x8] sm:$0xff] (!%p387_p2)  ;;  %v470_v9 = vld [vmem:[%s2449_s3 + $0x10] sm:$0xff] (!%p387_p2)  ;;  %v2117_v10 = vmov (!%p387_p2), 0.0|0.0  }
   0x6   : > { %390 = sbr.rel (%p387_p2) target bundleno = 4220 (0x107c), region = 72  ;;  %2027 = vmatprep.subr.bf16.mxu0 (!%p387_p2), %v2117_v10  ;;  %v2028_v11 = vpack.c.bf16 (!%p387_p2), %v469_v8, %v468_v7  ;;  %v471_v12 = vld [vmem:[%s2449_s3 + $0x18] sm:$0xff] (!%p387_p2)  ;;  %vm2118_vm1 = vmmov (!%p387_p2), 0   ;;  %v2119_v13 = vmov (!%p387_p2), 0.0   ;;  %v1827_v19 = vld [vmem:[%s2447_s1] ss:$0 sm:$0xff] (!%p387_p2) }
   0x7   : > { %1918 = vmatprep.mubr.msk.f32.mxu0 (!%p387_p2), %vm2118_vm1, %v2119_v13  ;;  %1946 = vmatprep.subr.mxu1 (!%p387_p2), %v2119_v13  ;;  %v2031_v14 = vpack.c.bf16 (!%p387_p2), %v471_v12, %v470_v9  ;;  %v1828_v21 = vld [vmem:[%s2448_s2] ss:$0 sm:$0xff] (!%p387_p2)  ;;  %vm479_vm2 = vcmask (!%p387_p2), 261120   ;;  %s2120_s14 = smov (!%p387_p2), 64   ;;  %s2121_s15 = smov (!%p387_p2), 96   ;;  %vm560_vm3 = vcmask (!%p387_p2), 64512  }
   0x8   : > { %1948 = vmatprep.mubr.msk.f32.mxu1 (!%p387_p2), %vm2118_vm1, %v2119_v13  ;;  %2029 = vmatpush3.bf16.msra.mxu0 (!%p387_p2), %v2028_v11  ;;  %v1829_v24 = vld [vmem:[%s2450_s4] ss:$0 sm:$0xff] (!%p387_p2)  ;;  %s2122_s16 = smov (!%p387_p2), 88   ;;  %vm654_vm4 = vcmask (!%p387_p2), 1044480   ;;  %vm636_vm5 = vcmask (!%p387_p2), 36864   ;;  %s2123_s17 = smov (!%p387_p2), 120  }
   0x9   : > { %2030 = vmatprep.subr.bf16.mxu0 (!%p387_p2), %v2117_v10  ;;  %vm650_vm6 = vcmask (!%p387_p2), 39936   ;;  %v553_v44 = vld [vmem:[%s2451_s5] sm:$0xff] (!%p387_p2)  ;;  %s2124_s20 = smov (!%p387_p2), 56   ;;  %s2125_s21 = smov (!%p387_p2), 80   ;;  %v554_v63 = vld [vmem:[%s2451_s5 + $0x8] sm:$0xff] (!%p387_p2) }
   0xa   : > { %1947 = vmatpush3.msra.mxu1 (!%p387_p2), %v553_v44  ;;  %s2126_s22 = smov (!%p387_p2), 112   ;;  %s2127_s23 = smov (!%p387_p2), 48  }
   0xb   : > { %1956 = vmatprep.subr.mxu1 (!%p387_p2), %v2119_v13  ;;  %s2128_s24 = smov (!%p387_p2), 72  }
   0xc   : > { %2032 = vmatpush3.bf16.msra.mxu0 (!%p387_p2), %v2031_v14 }
   0xd   : > { %s2461_s26 = smov (!%p428_p3, %s1820_s26), 3  ;;  %1921 = vmatprep.subr.mxu0 %v2119_v13 }
   0xe   : > { %s1825_s27 = sshll.u32 %s2461_s26, 3 }
   0xf   : > { %s431_s30 = scalar_lea.vmem %s2446_s0, %s1825_s27 }
  0x10   : > { %v2217_v0 = vld [vmem:[%s431_s30] sm:$0x1f]  ;;  %s2129_s30 = smov 104  }
  0x11   : > { %v440_v1 = vsel %vm439_vm0, %v2217_v0, 0.0 }
  0x12   : > { %441 = vadd.xlane.f32.xlu0 %v440_v1 }
  0x9f   : > { %v442_v2 = vpop.xlane.xlu0 %441 }
  0xa0   : > { %v444_v3 = vmul.f32 0.03125, %v442_v2 }
  0xa2   : > { %v445_v4 = vsub.f32 %v2217_v0, %v444_v3 }
  0xa4   : > { %v446_v5 = vmul.f32 %v445_v4, %v445_v4 }
  0xa6   : > { %v447_v6 = vsel %vm439_vm0, %v446_v5, 0.0 }
  0xa7   : > { %448 = vadd.xlane.f32.xlu0 %v447_v6 }
 0x134   : > { %v449_v15 = vpop.xlane.xlu0 %448 }
 0x135   : > { %v450_v16 = vmul.f32 0.03125, %v449_v15 }
 0x137   : > { %v451_v17 = vadd.f32 1e-06, %v450_v16 }
 0x139   : > { %2085 = vrsqrt.f32 %v451_v17 }
 0x143   : > { %v2086_v18 = vpop.eup %2085 }
 0x144   : > { %v453_v20 = vmul.f32 %v2086_v18, %v445_v4 }
 0x146   : > { %v460_v22 = vmul.f32 %v1827_v19, %v453_v20 }
 0x148   : > { %v467_v23 = vadd.f32 %v1828_v21, %v460_v22 }
 0x14a   : > { %1919 = vmatmul.mubr.msk.f32.vlgmr.msra.gmra.mrb[0].mxu0 %vm479_vm2, %v467_v23 }
 0x14b   : > { %1923 = vmatprep.mubr.msk.f32.mxu0 %vm2118_vm1, %v2119_v13 }
 0x21d   : > { %v549_v25 = vpop.f32.mrb[0].mxu0 }
 0x21e   : > { %v2255_v26 = vadd.f32 %v1829_v24, %v549_v25  ;;  %v1920_v27 = vpop.f32.mrb[1].mxu0  ;;  %v555_v24 = vld [vmem:[%s2451_s5 + $0x10] sm:$0xff] }
 0x220   : > { %648 = vrot.lane.b32.xlu0 %v2255_v26, %s2120_s14  ;;  %558 = vrot.lane.b32.xlu1 %v2255_v26, %s2121_s15  ;;  %s435_s15 = scalar_lea.vmem %s2459_s13, %s1825_s27 }
 0x224   : > { %729 = vrot.lane.b32.xlu0 %v2255_v26, %s2122_s16  ;;  %s2130_s16 = smov 40  }
 0x292   : > { %v559_v28 = vpop.permute.xlu1 %558  ;;  %v649_v29 = vpop.permute.xlu0 %648 }
 0x293   : > { %1922 = vmatpush3.xpose.msk.msra.mxu0 %vm560_vm3, %v559_v28 }
 0x294   : > { %1926 = vmatprep.subr.mxu0 %v2119_v13 }
 0x296   : > { %1924 = vmatmul.mubr.msk.f32.vlgmr.msra.gmra.mrb[2].mxu0 %vm560_vm3, %v2255_v26  ;;  %v730_v39 = vpop.permute.xlu0 %729 }
 0x297   : > { %1927 = vmatpush3.msk.msra.mxu0 %vm654_vm4, %v649_v29  ;;  %1928 = vmatprep.mubr.msk.f32.mxu0 %vm2118_vm1, %v2119_v13 }
 0x298   : > { %1931 = vmatprep.subr.mxu0 %v2119_v13 }
 0x369   : > { %v631_v30 = vpop.f32.mrb[2].mxu0 }
 0x36a   : > { %v635_v31 = vmul.f32 0.35355338, %v631_v30  ;;  %v1925_v32 = vpop.f32.mrb[3].mxu0 }
 0x36c   : > { %v637_v33 = vsel %vm636_vm5, %v635_v31, -inf }
 0x36d   : > { %638 = vmax.xlane.f32.xlu1 %v637_v33 }
 0x3fa   : > { %v639_v34 = vpop.xlane.xlu1 %638 }
 0x3fb   : > { %v640_v35 = vsub.f32 %v635_v31, %v639_v34 }
 0x3fd   : > { %v641_v36 = vmul.f32 1.442695, %v640_v35 }
 0x3ff   : > { %2087 = vpow2.f32 %v641_v36 }
 0x409   : > { %v2088_v37 = vpop.eup %2087 }
 0x40a   : > { %v643_v38 = vsel %vm636_vm5, %v2088_v37, 0.0 }
 0x40b   : > { %644 = vadd.xlane.f32.xlu0 %v643_v38  ;;  %v556_v38 = vld [vmem:[%s2451_s5 + $0x18] sm:$0xff] }
 0x421   : > { %727 = vrot.lane.b32.xlu0 %v2255_v26, %s2123_s17 }
 0x498   : > { %v645_v40 = vpop.xlane.xlu0 %644 }
 0x499   : > { %2089 = vrcp.f32 %v645_v40 }
 0x49c   : > { %v728_v43 = vpop.permute.xlu0 %727 }
 0x4a3   : > { %v2090_v41 = vpop.eup %2089 }
 0x4a4   : > { %v647_v42 = vmul.f32 %v2090_v41, %v2088_v37 }
 0x4a6   : > { %1929 = vmatmul.mubr.msk.f32.vlgmr.msra.gmra.mrb[4].mxu0 %vm650_vm6, %v647_v42 }
 0x4a7   : > { %1932 = vmatpush3.xpose.msk.msra.mxu0 %vm560_vm3, %v730_v39  ;;  %1933 = vmatprep.mubr.msk.f32.mxu0 %vm2118_vm1, %v2119_v13 }
 0x4a8   : > { %1936 = vmatprep.subr.mxu0 %v2119_v13 }
 0x4aa   : > { %1934 = vmatmul.mubr.msk.f32.vlgmr.msra.gmra.mrb[6].mxu0 %vm560_vm3, %v728_v43 }
 0x4ab   : > { %1938 = vmatprep.mubr.msk.f32.mxu0 %vm2118_vm1, %v2119_v13 }
 0x579   : > { %v723_v45 = vpop.f32.mrb[4].mxu0 }
 0x57a   : > { %v1930_v46 = vpop.f32.mrb[5].mxu0  ;;  %1949 = vmatmul.mubr.msk.f32.vlgmr.msra.gmra.mrb[0].mxu1 %vm560_vm3, %v723_v45 }
 0x57b   : > { %1958 = vmatprep.mubr.msk.f32.mxu1 %vm2118_vm1, %v2119_v13 }
 0x57d   : > { %v801_v47 = vpop.f32.mrb[6].mxu0 }
 0x57e   : > { %v805_v48 = vmul.f32 0.35355338, %v801_v47  ;;  %v1935_v49 = vpop.f32.mrb[7].mxu0 }
 0x57f   : > { %v1851_v49 = vld [vmem:[%s2452_s6] ss:$0 sm:$0xff] }
 0x580   : > { %v806_v50 = vsel %vm636_vm5, %v805_v48, -inf }
 0x581   : > { %807 = vmax.xlane.f32.xlu1 %v806_v50 }
 0x592   : > { %817 = vrot.lane.b32.xlu1 %v2255_v26, %s2124_s20 }
 0x596   : > { %1042 = vrot.lane.b32.xlu1 %v2255_v26, %s2125_s21 }
 0x59a   : > { %1040 = vrot.lane.b32.xlu1 %v2255_v26, %s2126_s22 }
 0x60e   : > { %v808_v51 = vpop.xlane.xlu1 %807 }
 0x60f   : > { %v809_v52 = vsub.f32 %v805_v48, %v808_v51 }
 0x611   : > { %v810_v53 = vmul.f32 1.442695, %v809_v52 }
 0x612   : > { %v818_v54 = vpop.permute.xlu1 %817 }
 0x613   : > { %2091 = vpow2.f32 %v810_v53  ;;  %1937 = vmatpush3.msk.msra.mxu0 %vm654_vm4, %v818_v54 }
 0x614   : > { %1941 = vmatprep.subr.mxu0 %v2119_v13 }
 0x616   : > { %v1043_v1 = vpop.permute.xlu1 %1042 }
 0x61a   : > { %v1041_v4 = vpop.permute.xlu1 %1040 }
 0x61d   : > { %v2092_v55 = vpop.eup %2091 }
 0x61e   : > { %v812_v56 = vsel %vm636_vm5, %v2092_v55, 0.0 }
 0x61f   : > { %813 = vadd.xlane.f32.xlu0 %v812_v56 }
 0x635   : > { %1130 = vrot.lane.b32.xlu0 %v2255_v26, %s2127_s23 }
 0x639   : > { %1283 = vrot.lane.b32.xlu0 %v2255_v26, %s2128_s24 }
 0x64d   : > { %v1036_v57 = vpop.f32.mrb[0].mxu1 }
 0x64e   : > { %v1950_v58 = vpop.f32.mrb[1].mxu1 }
 0x6ac   : > { %v814_v59 = vpop.xlane.xlu0 %813 }
 0x6ad   : > { %2093 = vrcp.f32 %v814_v59  ;;  %v1562_v59 = vld [vmem:[%s2455_s9 + $0x10] sm:$0xff] }
 0x6b0   : > { %v1131_v60 = vpop.permute.xlu0 %1130 }
 0x6b1   : > { %1957 = vmatpush3.msk.msra.mxu1 %vm654_vm4, %v1131_v60  ;;  %v1563_v60 = vld [vmem:[%s2455_s9 + $0x18] sm:$0xff] }
 0x6b2   : > { %1966 = vmatprep.subr.mxu1 %v2119_v13 }
 0x6b4   : > { %v1284_v19 = vpop.permute.xlu0 %1283 }
 0x6b7   : > { %v2094_v61 = vpop.eup %2093 }
 0x6b8   : > { %v816_v62 = vmul.f32 %v2094_v61, %v2092_v55  ;;  %v2037_v61 = vpack.c.bf16 %v1563_v60, %v1562_v59 }
 0x6ba   : > { %1939 = vmatmul.mubr.msk.f32.vlgmr.msra.gmra.mrb[8].mxu0 %vm650_vm6, %v816_v62 }
 0x6bb   : > { %1942 = vmatpush3.msra.mxu0 %v554_v63  ;;  %1943 = vmatprep.mubr.msk.f32.mxu0 %vm2118_vm1, %v2119_v13 }
 0x6bc   : > { %1951 = vmatprep.subr.mxu0 %v2119_v13 }
 0x78d   : > { %v890_v2 = vpop.f32.mrb[8].mxu0 }
 0x78e   : > { %v1940_v3 = vpop.f32.mrb[9].mxu0  ;;  %1944 = vmatmul.mubr.msk.f32.vlgmr.msra.gmra.mrb[10].mxu0 %vm560_vm3, %v890_v2 }
 0x78f   : > { %1952 = vmatpush3.xpose.msk.msra.mxu0 %vm560_vm3, %v1043_v1  ;;  %1953 = vmatprep.mubr.msk.f32.mxu0 %vm2118_vm1, %v2119_v13  ;;  %v1852_v3 = vld [vmem:[%s2453_s7] ss:$0 sm:$0xff] }
 0x790   : > { %1961 = vmatprep.subr.mxu0 %v2119_v13 }
 0x792   : > { %1954 = vmatmul.mubr.msk.f32.vlgmr.msra.gmra.mrb[12].mxu0 %vm560_vm3, %v1041_v4 }
 0x793   : > { %1963 = vmatprep.mubr.msk.f32.mxu0 %vm2118_vm1, %v2119_v13  ;;  %1962 = vmatpush3.msra.mxu0 %v555_v24 }
 0x794   : > { %1971 = vmatprep.subr.mxu0 %v2119_v13 }
 0x861   : > { %v963_v5 = vpop.f32.mrb[10].mxu0 }
 0x862   : > { %v1037_v6 = vadd.f32 %v1036_v57, %v963_v5  ;;  %v1945_v7 = vpop.f32.mrb[11].mxu0  ;;  %v1560_v57 = vld [vmem:[%s2455_s9] sm:$0xff] }
 0x863   : > { %v1853_v5 = vld [vmem:[%s2454_s8] ss:$0 sm:$0xff] }
 0x865   : > { %v1114_v8 = vpop.f32.mrb[12].mxu0 }
 0x866   : > { %v1118_v9 = vmul.f32 0.35355338, %v1114_v8  ;;  %v1955_v11 = vpop.f32.mrb[13].mxu0  ;;  %v1671_v8 = vld [vmem:[%s2457_s11] sm:$0xff] }
 0x868   : > { %v1119_v12 = vsel %vm636_vm5, %v1118_v9, -inf }
 0x869   : > { %1120 = vmax.xlane.f32.xlu1 %v1119_v12  ;;  %v1673_v12 = vld [vmem:[%s2457_s11 + $0x10] sm:$0xff] }
 0x8f6   : > { %v1121_v14 = vpop.xlane.xlu1 %1120 }
 0x8f7   : > { %v1122_v15 = vsub.f32 %v1118_v9, %v1121_v14  ;;  %v1672_v9 = vld [vmem:[%s2457_s11 + $0x8] sm:$0xff]  ;;  %v1674_v14 = vld [vmem:[%s2457_s11 + $0x18] sm:$0xff] }
 0x8f8   : > { %v2040_v11 = vpack.c.bf16 %v1672_v9, %v1671_v8 }
 0x8f9   : > { %v1123_v16 = vmul.f32 1.442695, %v1122_v15  ;;  %v2043_v15 = vpack.c.bf16 %v1674_v14, %v1673_v12 }
 0x8fb   : > { %2095 = vpow2.f32 %v1123_v16  ;;  %v1675_v16 = vld [vmem:[%s2457_s11 + $0x20] sm:$0xff] }
 0x905   : > { %v2096_v17 = vpop.eup %2095 }
 0x906   : > { %v1125_v18 = vsel %vm636_vm5, %v2096_v17, 0.0 }
 0x907   : > { %1126 = vadd.xlane.f32.xlu0 %v1125_v18 }
 0x91d   : > { %1281 = vrot.lane.b32.xlu0 %v2255_v26, %s2129_s30 }
 0x994   : > { %v1127_v20 = vpop.xlane.xlu0 %1126 }
 0x995   : > { %2097 = vrcp.f32 %v1127_v20  ;;  %v1678_v20 = vld [vmem:[%s2457_s11 + $0x38] sm:$0xff] }
 0x998   : > { %v1282_v23 = vpop.permute.xlu0 %1281 }
 0x99f   : > { %v2098_v21 = vpop.eup %2097 }
 0x9a0   : > { %v1129_v22 = vmul.f32 %v2098_v21, %v2096_v17  ;;  %v1676_v17 = vld [vmem:[%s2457_s11 + $0x28] sm:$0xff] }
 0x9a1   : > { %v2046_v18 = vpack.c.bf16 %v1676_v17, %v1675_v16 }
 0x9a2   : > { %1959 = vmatmul.mubr.msk.f32.vlgmr.msra.gmra.mrb[2].mxu1 %vm650_vm6, %v1129_v22  ;;  %v1679_v22 = vld [vmem:[%s2457_s11 + $0x40] sm:$0xff] }
 0x9a3   : > { %1967 = vmatpush3.xpose.msk.msra.mxu1 %vm560_vm3, %v1284_v19  ;;  %1968 = vmatprep.mubr.msk.f32.mxu1 %vm2118_vm1, %v2119_v13  ;;  %v1677_v19 = vld [vmem:[%s2457_s11 + $0x30] sm:$0xff] }
 0x9a4   : > { %1976 = vmatprep.subr.mxu1 %v2119_v13  ;;  %v2049_v21 = vpack.c.bf16 %v1678_v20, %v1677_v19 }
 0x9a6   : > { %1969 = vmatmul.mubr.msk.f32.vlgmr.msra.gmra.mrb[4].mxu1 %vm560_vm3, %v1282_v23  ;;  %v1680_v23 = vld [vmem:[%s2457_s11 + $0x48] sm:$0xff] }
 0x9a7   : > { %1978 = vmatprep.mubr.msk.f32.mxu1 %vm2118_vm1, %v2119_v13  ;;  %1977 = vmatpush3.msra.mxu1 %v556_v38  ;;  %v2052_v24 = vpack.c.bf16 %v1680_v23, %v1679_v22 }
 0x9a8   : > { %2039 = vmatprep.subr.bf16.mxu1 %v2117_v10 }
 0xa75   : > { %v1203_v25 = vpop.f32.mrb[2].mxu1 }
 0xa76   : > { %v1960_v27 = vpop.f32.mrb[3].mxu1  ;;  %1964 = vmatmul.mubr.msk.f32.vlgmr.msra.gmra.mrb[14].mxu0 %vm560_vm3, %v1203_v25  ;;  %v1681_v25 = vld [vmem:[%s2457_s11 + $0x50] sm:$0xff] }
 0xa77   : > { %1973 = vmatprep.mubr.msk.f32.mxu0 %vm2118_vm1, %v2119_v13  ;;  %v1682_v27 = vld [vmem:[%s2457_s11 + $0x58] sm:$0xff] }
 0xa79   : > { %v1355_v28 = vpop.f32.mrb[4].mxu1 }
 0xa7a   : > { %v1359_v29 = vmul.f32 0.35355338, %v1355_v28  ;;  %v1970_v30 = vpop.f32.mrb[5].mxu1  ;;  %v2055_v28 = vpack.c.bf16 %v1682_v27, %v1681_v25 }
 0xa7b   : > { %v1684_v30 = vld [vmem:[%s2457_s11 + $0x68] sm:$0xff] }
 0xa7c   : > { %v1360_v31 = vsel %vm636_vm5, %v1359_v29, -inf }
 0xa7d   : > { %1361 = vmax.xlane.f32.xlu1 %v1360_v31 }
 0xa8e   : > { %1371 = vrot.lane.b32.xlu1 %v2255_v26, %s2130_s16 }
 0xb0a   : > { %v1362_v32 = vpop.xlane.xlu1 %1361 }
 0xb0b   : > { %v1363_v33 = vsub.f32 %v1359_v29, %v1362_v32  ;;  %v1683_v29 = vld [vmem:[%s2457_s11 + $0x60] sm:$0xff]  ;;  %v1685_v32 = vld [vmem:[%s2457_s11 + $0x70] sm:$0xff] }
 0xb0c   : > { %v2058_v31 = vpack.c.bf16 %v1684_v30, %v1683_v29 }
 0xb0d   : > { %v1364_v34 = vmul.f32 1.442695, %v1363_v33  ;;  %v1686_v33 = vld [vmem:[%s2457_s11 + $0x78] sm:$0xff] }
 0xb0e   : > { %v1372_v35 = vpop.permute.xlu1 %1371 }
 0xb0f   : > { %2099 = vpow2.f32 %v1364_v34  ;;  %1972 = vmatpush3.msk.msra.mxu0 %vm654_vm4, %v1372_v35  ;;  %v2061_v34 = vpack.c.bf16 %v1686_v33, %v1685_v32  ;;  %v1854_v35 = vld [vmem:[%s2456_s10] ss:$0 sm:$0xff] }
 0xb10   : > { %2033 = vmatprep.subr.bf16.mxu0 %v2117_v10 }
 0xb19   : > { %v2100_v36 = vpop.eup %2099 }
 0xb1a   : > { %v1366_v37 = vsel %vm636_vm5, %v2100_v36, 0.0 }
 0xb1b   : > { %1367 = vadd.xlane.f32.xlu0 %v1366_v37 }
 0xb49   : > { %v1276_v26 = vpop.f32.mrb[14].mxu0 }
 0xb4a   : > { %v1280_v39 = vadd.f32 %v1276_v26, %v1037_v6  ;;  %v1965_v40 = vpop.f32.mrb[15].mxu0 }
 0xba8   : > { %v1368_v41 = vpop.xlane.xlu0 %1367 }
 0xba9   : > { %2101 = vrcp.f32 %v1368_v41 }
 0xbb3   : > { %v2102_v42 = vpop.eup %2101 }
 0xbb4   : > { %v1370_v43 = vmul.f32 %v2102_v42, %v2100_v36 }
 0xbb6   : > { %1974 = vmatmul.mubr.msk.f32.vlgmr.msra.gmra.mrb[16].mxu0 %vm650_vm6, %v1370_v43 }
 0xbb7   : > { %1989 = vmatprep.mubr.msk.f32.mxu0 %vm2118_vm1, %v2119_v13 }
 0xc89   : > { %v1444_v44 = vpop.f32.mrb[16].mxu0 }
 0xc8a   : > { %v1975_v45 = vpop.f32.mrb[17].mxu0  ;;  %1979 = vmatmul.mubr.msk.f32.vlgmr.msra.gmra.mrb[6].mxu1 %vm560_vm3, %v1444_v44 }
 0xc8b   : > { %2024 = vmatprep.mubr.msk.f32.mxu1 %vm2118_vm1, %v2119_v13  ;;  %2041 = vmatpush3.bf16.msra.mxu1 %v2040_v11 }
 0xc8c   : > { %2042 = vmatprep.subr.bf16.mxu1 %v2117_v10 }
 0xc8f   : > { %2044 = vmatpush3.bf16.msra.mxu1 %v2043_v15 }
 0xc90   : > { %2045 = vmatprep.subr.bf16.mxu1 %v2117_v10 }
 0xc93   : > { %2047 = vmatpush3.bf16.msra.mxu1 %v2046_v18 }
 0xc94   : > { %2048 = vmatprep.subr.bf16.mxu1 %v2117_v10 }
 0xc97   : > { %2050 = vmatpush3.bf16.msra.mxu1 %v2049_v21 }
 0xc98   : > { %2051 = vmatprep.subr.bf16.mxu1 %v2117_v10 }
 0xc9b   : > { %2053 = vmatpush3.bf16.msra.mxu1 %v2052_v24 }
 0xc9c   : > { %2054 = vmatprep.subr.bf16.mxu1 %v2117_v10 }
 0xc9f   : > { %2056 = vmatpush3.bf16.msra.mxu1 %v2055_v28 }
 0xca0   : > { %2057 = vmatprep.subr.bf16.mxu1 %v2117_v10 }
 0xca3   : > { %2059 = vmatpush3.bf16.msra.mxu1 %v2058_v31 }
 0xca4   : > { %2060 = vmatprep.subr.bf16.mxu1 %v2117_v10 }
 0xca7   : > { %2062 = vmatpush3.bf16.msra.mxu1 %v2061_v34 }
 0xd5d   : > { %v1517_v46 = vpop.f32.mrb[6].mxu1 }
 0xd5e   : > { %v1521_v47 = vadd.f32 %v1517_v46, %v1280_v39  ;;  %v1980_v48 = vpop.f32.mrb[7].mxu1 }
 0xd60   : > { %v1522_v50 = vadd.f32 %v1521_v47, %v2217_v0  ;;  %v1561_v0 = vld [vmem:[%s2455_s9 + $0x8] sm:$0xff] }
 0xd61   : > { %v2034_v58 = vpack.c.bf16 %v1561_v0, %v1560_v57 }
 0xd62   : > { %v2349_v51 = vadd.f32 %v1851_v49, %v1522_v50 }
 0xd63   : > { %2035 = vmatpush3.bf16.msra.mxu0 %v2034_v58 }
 0xd64   : > { %v1533_v52 = vsel %vm439_vm0, %v2349_v51, 0.0  ;;  %2036 = vmatprep.subr.bf16.mxu0 %v2117_v10 }
 0xd65   : > { %1534 = vadd.xlane.f32.xlu1 %v1533_v52 }
 0xd67   : > { %2038 = vmatpush3.bf16.msra.mxu0 %v2037_v61 }
 0xdf2   : > { %v1535_v53 = vpop.xlane.xlu1 %1534 }
 0xdf3   : > { %v1536_v54 = vmul.f32 0.03125, %v1535_v53 }
 0xdf5   : > { %v1537_v55 = vsub.f32 %v2349_v51, %v1536_v54 }
 0xdf7   : > { %v1538_v13 = vmul.f32 %v1537_v55, %v1537_v55 }
 0xdf9   : > { %v1539_v56 = vsel %vm439_vm0, %v1538_v13, 0.0 }
 0xdfa   : > { %1540 = vadd.xlane.f32.xlu0 %v1539_v56 }
 0xe87   : > { %v1541_v62 = vpop.xlane.xlu0 %1540 }
 0xe88   : > { %v1542_v63 = vmul.f32 0.03125, %v1541_v62  ;;  %v1856_v62 = vld [vmem:[%s2458_s12] ss:$0 sm:$0xff] }
 0xe8a   : > { %v1543_v1 = vadd.f32 1e-06, %v1542_v63 }
 0xe8c   : > { %2103 = vrsqrt.f32 %v1543_v1 }
 0xe96   : > { %v2104_v2 = vpop.eup %2103 }
 0xe97   : > { %v1545_v4 = vmul.f32 %v2104_v2, %v1537_v55 }
 0xe99   : > { %v1552_v6 = vmul.f32 %v1852_v3, %v1545_v4 }
 0xe9b   : > { %v1559_v7 = vadd.f32 %v1853_v5, %v1552_v6 }
 0xe9d   : > { %1990 = vmatmul.mubr.msk.f32.vlgmr.msra.gmra.mrb[18].mxu0 %vm479_vm2, %v1559_v7 }
 0xf70   : > { %v1640_v36 = vpop.f32.mrb[18].mxu0 }
 0xf71   : > { %v1641_v37 = vadd.f32 %v1854_v35, %v1640_v36  ;;  %v1991_v38 = vpop.f32.mrb[19].mxu0 }
 0xf73   : > { %v1645_v26 = vmul.f32 0.70710677, %v1641_v37  ;;  %v1644_v58 = vmul.f32 0.5, %v1641_v37 }
 0xf75   : > { %v1646_v39 = vand.u32 2147483647, %v1645_v26  ;;  %vm1666_vm7 = vcmp.ge.f32.partialorder %v1645_v26, 0.0 }
 0xf77   : > { %v1647_v10 = vmul.f32 0.3275911, %v1646_v39  ;;  %v1660_v41 = vsub.f32 0.0, %v1646_v39 }
 0xf79   : > { %v1648_v40 = vadd.f32 1.0, %v1647_v10  ;;  %v1661_v43 = vmul.f32 %v1660_v41, %v1646_v39 }
 0xf7b   : > { %2105 = vrcp.f32 %v1648_v40  ;;  %v1662_v46 = vmul.f32 1.442695, %v1661_v43 }
 0xf7d   : > { %2107 = vpow2.f32 %v1662_v46 }
 0xf85   : > { %v2106_v42 = vpop.eup %2105 }
 0xf86   : > { %v1651_v44 = vmul.f32 1.0614054, %v2106_v42 }
 0xf87   : > { %v2108_v55 = vpop.eup %2107 }
 0xf88   : > { %v1652_v45 = vadd.f32 -1.4531521, %v1651_v44 }
 0xf8a   : > { %v1653_v47 = vmul.f32 %v2106_v42, %v1652_v45 }
 0xf8c   : > { %v1654_v48 = vadd.f32 1.4214138, %v1653_v47 }
 0xf8e   : > { %v1655_v49 = vmul.f32 %v2106_v42, %v1654_v48 }
 0xf90   : > { %v1656_v50 = vadd.f32 -0.28449672, %v1655_v49 }
 0xf92   : > { %v1657_v52 = vmul.f32 %v2106_v42, %v1656_v50 }
 0xf94   : > { %v1658_v53 = vadd.f32 0.2548296, %v1657_v52 }
 0xf96   : > { %v1659_v54 = vmul.f32 %v2106_v42, %v1658_v53 }
 0xf98   : > { %v1664_v13 = vmul.f32 %v2108_v55, %v1659_v54 }
 0xf9a   : > { %v1665_v56 = vsub.f32 1.0, %v1664_v13 }
 0xf9c   : > { %v1667_v57 = vsub.f32 0.0, %v1665_v56 }
 0xf9e   : > { %v1668_v0 = vsel %vm1666_vm7, %v1665_v56, %v1667_v57 }
 0xf9f   : > { %v1669_v59 = vadd.f32 1.0, %v1668_v0 }
 0xfa1   : > { %v1670_v60 = vmul.f32 %v1669_v59, %v1644_v58 }
 0xfa3   : > { %2025 = vmatmul.mubr.f32.vlgmr.msra.gmra.mrb[8].mxu1 %v1670_v60 }
0x1076   : > { %v1753_v61 = vpop.f32.mrb[8].mxu1 }
0x1077   : > { %v1757_v63 = vadd.f32 %v1753_v61, %v2349_v51  ;;  %v2026_v1 = vpop.f32.mrb[9].mxu1 }
0x1079   : > { %v1765_v2 = vadd.f32 %v1856_v62, %v1757_v63 }
0x107b   : > { %1766 = vst.msk [vmem:[%s435_s15] sm:$0x1f] %vm439_vm0, %v1765_v2 }
0x107c PF: > { %s23_s25 = sadd.s32 1, %s2115_s25  }
0x107d   : > { %p20_p4 = scmp.ge.s32.totalorder %s23_s25, 6  }
0x107f   :  { %22 = sbr.rel (!%p20_p4) target bundleno = 1 (0x1), region = 102 }

</bundles_post_ra>
